<compile_context>
chip_gen: v6e
topology: v6e:2x2x1
jax: 0.10.0
libtpu: 0.0.40
codegen_flags: <defaults>
</compile_context>

<pallas_src>
import functools

import jax
import jax.numpy as jnp
from jax.experimental import pallas as pl
from jax.experimental.pallas import tpu as pltpu


def _round_up(x, m):
    return (x + m - 1) // m * m


# ---------------------------------------------------------------------------
# Pallas kernels
# ---------------------------------------------------------------------------
def _matmul_bias_kernel(a_ref, b_ref, bias_ref, o_ref, *, relu):
    """out tile = A_tile @ B_tile + bias, optional ReLU.  bf16 in, f32 acc."""
    acc = jnp.dot(a_ref[...], b_ref[...], preferred_element_type=jnp.float32)
    acc = acc + bias_ref[...]                 # (1, tn) broadcasts over rows
    if relu:
        acc = jnp.maximum(acc, 0.0)
    o_ref[...] = acc.astype(o_ref.dtype)


def matmul_bias(a, b, bias, *, relu, tm=256, tn=256, pad_n=False,
                out_dtype=jnp.float32):
    """a: (M, K), b: (K, N), bias: (N,) -> (M, N) in out_dtype.

    bf16 operands feed the MXU with f32 accumulation.  Grid is (N-tile outer,
    M-tile inner) so the (K, tn) weight slab stays VMEM-resident across the M
    sweep while A tiles stream; both axes are independent -> "parallel".
    """
    M, K = a.shape
    Kb, N = b.shape
    assert K == Kb

    # Optional output-column padding for lane-dense (unmasked) stores: useful
    # for the 62-wide fc2, wasteful for the 32/64-wide conv outputs.
    Np = _round_up(N, 128) if pad_n else N
    tn = min(tn, Np)
    if Np % tn:
        tn = Np
    Mp = _round_up(M, 8)
    tm = min(tm, Mp)
    Mp = _round_up(Mp, tm)

    a_p = a.astype(jnp.bfloat16)
    if Mp != M:
        a_p = jnp.pad(a_p, ((0, Mp - M), (0, 0)))
    b_p = b.astype(jnp.bfloat16)
    bias_p = bias.astype(jnp.float32)
    if Np != N:
        b_p = jnp.pad(b_p, ((0, 0), (0, Np - N)))
        bias_p = jnp.pad(bias_p, (0, Np - N))
    bias2 = bias_p.reshape(1, Np)

    out_isize = 2 if out_dtype == jnp.bfloat16 else 4
    cost = pl.CostEstimate(
        flops=2 * Mp * Np * K,
        transcendentals=0,
        bytes_accessed=int((Mp * K + K * Np) * 2 + Mp * Np * out_isize + Np * 4),
    )

    out = pl.pallas_call(
        functools.partial(_matmul_bias_kernel, relu=relu),
        out_shape=jax.ShapeDtypeStruct((Mp, Np), out_dtype),
        grid=(Np // tn, Mp // tm),            # N-tile outer, M-tile inner
        in_specs=[
            pl.BlockSpec((tm, K), lambda j, i: (i, 0)),   # A streams over M
            pl.BlockSpec((K, tn), lambda j, i: (0, j)),   # weights resident per N tile
            pl.BlockSpec((1, tn), lambda j, i: (0, j)),
        ],
        out_specs=pl.BlockSpec((tm, tn), lambda j, i: (i, j)),
        compiler_params=pltpu.CompilerParams(
            dimension_semantics=("parallel", "parallel"),
            vmem_limit_bytes=32 * 1024 * 1024),
        cost_estimate=cost,
    )(a_p, b_p, bias2)

    if Mp != M or Np != N:
        out = out[:M, :N]
    return out


def _maxpool_kernel(x_ref, o_ref, *, C):
    """x: (rt, 2, Wo, 2*C) -> (rt, Wo, C).

    Max over h-parity (leading axis of size 2) and over w-parity (the two
    C-wide halves of the lane axis).  No strided slicing, no transpose.
    """
    v = jnp.maximum(x_ref[:, 0], x_ref[:, 1])          # (rt, Wo, 2C)
    o_ref[...] = jnp.maximum(v[:, :, :C], v[:, :, C:])  # (rt, Wo, C)


def maxpool2x2(x, rt=512):
    """2x2 / stride-2 max pool on NHWC input (matches F.max_pool2d(x, 2))."""
    B, H, W, C = x.shape
    Ho, Wo = H // 2, W // 2
    rows = B * Ho
    # Pure reshape (no transpose): row = (b, ho), axis1 = h-parity,
    # last axis packs (w-parity, C) contiguously.
    xr = x.reshape(rows, 2, Wo, 2 * C)
    rt = min(rt, rows)
    rows_p = _round_up(rows, rt)
    if rows_p != rows:
        xr = jnp.pad(xr, ((0, rows_p - rows), (0, 0), (0, 0), (0, 0)))
    out = pl.pallas_call(
        functools.partial(_maxpool_kernel, C=C),
        out_shape=jax.ShapeDtypeStruct((rows_p, Wo, C), x.dtype),
        grid=(rows_p // rt,),
        in_specs=[pl.BlockSpec((rt, 2, Wo, 2 * C), lambda i: (i, 0, 0, 0))],
        out_specs=pl.BlockSpec((rt, Wo, C), lambda i: (i, 0, 0)),
        compiler_params=pltpu.CompilerParams(
            dimension_semantics=("parallel",),
            vmem_limit_bytes=32 * 1024 * 1024),
    )(xr)
    return out[:rows].reshape(B, Ho, Wo, C)


# ---------------------------------------------------------------------------
# JAX glue: im2col patch extraction (pad / stack / reshape only)
# ---------------------------------------------------------------------------
def im2col_same(x, k=5, pad=2, k_pad=None):
    """x: (N, H, W, C) -> (N*H*W, C*k*k), patch column = c*k*k + kh*k + kw
    (matches PyTorch conv weight.reshape(out_ch, in_ch*k*k) ordering).
    Optionally zero-pads the contraction dim to `k_pad` (sublane alignment)."""
    N, H, W, C = x.shape
    xp = jnp.pad(x, ((0, 0), (pad, pad), (pad, pad), (0, 0)))
    slices = [xp[:, dh:dh + H, dw:dw + W, :] for dh in range(k) for dw in range(k)]
    patches = jnp.stack(slices, axis=-1)               # (N, H, W, C, k*k)
    patches = patches.reshape(N * H * W, C * k * k)
    if k_pad is not None and k_pad > C * k * k:
        patches = jnp.pad(patches, ((0, 0), (0, k_pad - C * k * k)))
    return patches


# ---------------------------------------------------------------------------
# Parameters (deterministic, PyTorch-convention shapes), repacked for the MXU.
# ---------------------------------------------------------------------------
def init_params(key):
    ks = jax.random.split(key, 8)
    s = 0.05
    w1_t = s * jax.random.normal(ks[0], (32, 1, 5, 5), jnp.float32)
    b1 = 0.01 * jax.random.normal(ks[1], (32,), jnp.float32)
    w2_t = s * jax.random.normal(ks[2], (64, 32, 5, 5), jnp.float32)
    b2 = 0.01 * jax.random.normal(ks[3], (64,), jnp.float32)
    wf1_t = s * jax.random.normal(ks[4], (1024, 64 * 7 * 7), jnp.float32)
    bf1 = 0.01 * jax.random.normal(ks[5], (1024,), jnp.float32)
    wf2_t = s * jax.random.normal(ks[6], (62, 1024), jnp.float32)
    bf2 = 0.01 * jax.random.normal(ks[7], (62,), jnp.float32)

    # Repack for NHWC / im2col-matmul consumption (semantics identical to
    # PyTorch NCHW conv + NCHW-order flatten); weights stored in bf16 so the
    # MXU gets bf16 operands (f32 accumulation in-kernel), biases stay f32.
    w1 = w1_t.reshape(32, 25).T                                   # (25, 32)
    w1 = jnp.pad(w1, ((0, 7), (0, 0)))                            # K 25 -> 32
    w2 = w2_t.reshape(64, 32 * 25).T                              # (800, 64)
    # fc1 expects flatten order (C, H, W); our features flatten as (H, W, C).
    wf1 = (wf1_t.reshape(1024, 64, 7, 7)
                 .transpose(0, 2, 3, 1)
                 .reshape(1024, 64 * 7 * 7).T)                    # (3136, 1024)
    wf2 = wf2_t.T                                                 # (1024, 62)
    bf16 = jnp.bfloat16
    return dict(w1=w1.astype(bf16), b1=b1,
                w2=w2.astype(bf16), b2=b2,
                wf1=wf1.astype(bf16), bf1=bf1,
                wf2=wf2.astype(bf16), bf2=bf2)


# ---------------------------------------------------------------------------
# Forward pass (MnistConvLarge.forward)
# ---------------------------------------------------------------------------
def forward(params, x):
    # x = x.reshape(-1, 1, 28, 28)  (NCHW)  -> NHWC, bf16 activations
    x = x.reshape(-1, 1, 28, 28).transpose(0, 2, 3, 1).astype(jnp.bfloat16)
    B = x.shape[0]

    # conv1 (1->32, 5x5, pad 2) + ReLU   (im2col K padded 25->32)
    p1 = im2col_same(x, k_pad=32)                                 # (B*784, 32)
    h1 = matmul_bias(p1, params["w1"], params["b1"], relu=True,
                     tm=1024, out_dtype=jnp.bfloat16)
    h1 = maxpool2x2(h1.reshape(B, 28, 28, 32))                    # (B,14,14,32)

    # conv2 (32->64, 5x5, pad 2) + ReLU
    p2 = im2col_same(h1)                                          # (B*196, 800)
    h2 = matmul_bias(p2, params["w2"], params["b2"], relu=True,
                     tm=512, out_dtype=jnp.bfloat16)
    h2 = maxpool2x2(h2.reshape(B, 14, 14, 64))                    # (B,7,7,64)

    # flatten + fc1 (ReLU) + fc2 (output padded to 128 lanes, sliced to 62)
    flat = h2.reshape(B, 7 * 7 * 64)                              # (B, 3136)
    f1 = matmul_bias(flat, params["wf1"], params["bf1"], relu=True,
                     tm=256, tn=256, out_dtype=jnp.bfloat16)
    logits = matmul_bias(f1, params["wf2"], params["bf2"], relu=False,
                         tm=256, pad_n=True)
    return logits                                                 # (B, 62) f32


if __name__ == "__main__":
    key = jax.random.PRNGKey(0)
    pkey, xkey = jax.random.split(key)
    params = init_params(pkey)
    # Small batch; spatial must be 28x28 because fc1 hard-codes 64*7*7.
    x = jax.random.normal(xkey, (2, 784), jnp.float32)
    out = jax.jit(forward)(params, x)
    out = jax.block_until_ready(out)
    assert out.shape == (2, 62) and out.dtype == jnp.float32
    print("KERNEL_OK")
</pallas_src>

<mosaic_0001>
module attributes {stable_mosaic.version = 11 : i64} {
  func.func @_matmul_bias_kernel(%arg0: i32, %arg1: i32, %arg2: memref<1024x32xbf16, #tpu.memory_space<vmem>>, %arg3: memref<32x32xbf16, #tpu.memory_space<vmem>>, %arg4: memref<1x32xf32, #tpu.memory_space<vmem>>, %arg5: memref<1024x32xbf16, #tpu.memory_space<vmem>>) attributes {dimension_semantics = [#tpu.dimension_semantics<parallel>, #tpu.dimension_semantics<parallel>], iteration_bounds = array<i64: 1, 2>, scalar_prefetch = 0 : i64, scratch_operands = 0 : i64, tpu.core_type = #tpu.core_type<tc>, window_params = [{transform_indices = @transform_0, window_bounds = array<i64: 1024, 32>}, {transform_indices = @transform_1, window_bounds = array<i64: 32, 32>}, {transform_indices = @transform_2, window_bounds = array<i64: 1, 32>}, {transform_indices = @transform_3, window_bounds = array<i64: 1024, 32>}]} {
    %c0 = arith.constant 0 : index
    %c0_0 = arith.constant 0 : index
    %0 = vector.load %arg2[%c0, %c0_0] : memref<1024x32xbf16, #tpu.memory_space<vmem>>, vector<1024x32xbf16>
    %c0_1 = arith.constant 0 : index
    %c0_2 = arith.constant 0 : index
    %1 = vector.load %arg3[%c0_1, %c0_2] : memref<32x32xbf16, #tpu.memory_space<vmem>>, vector<32x32xbf16>
    %cst = arith.constant dense<0.000000e+00> : vector<1024x32xf32>
    %2 = tpu.matmul %0, %1, %cst {dimension_numbers = #tpu.dot_dimension_numbers<[1], [0], [0], [1], [0, 0, 1, 1], [], []>} : vector<1024x32xbf16>, vector<32x32xbf16>, vector<1024x32xf32> -> vector<1024x32xf32>
    %c0_3 = arith.constant 0 : index
    %c0_4 = arith.constant 0 : index
    %3 = vector.load %arg4[%c0_3, %c0_4] : memref<1x32xf32, #tpu.memory_space<vmem>>, vector<1x32xf32>
    %4 = vector.broadcast %3 : vector<1x32xf32> to vector<1024x32xf32>
    %5 = arith.addf %2, %4 : vector<1024x32xf32>
    %cst_5 = arith.constant 0.000000e+00 : f32
    %6 = vector.broadcast %cst_5 : f32 to vector<1024x32xf32>
    %7 = arith.maximumf %5, %6 : vector<1024x32xf32>
    %8 = arith.truncf %7 : vector<1024x32xf32> to vector<1024x32xbf16>
    %c0_6 = arith.constant 0 : index
    %c0_7 = arith.constant 0 : index
    %9 = vector.load %arg5[%c0_6, %c0_7] : memref<1024x32xbf16, #tpu.memory_space<vmem>>, vector<1024x32xbf16>
    tpu.vector_store %arg5[%c0_6, %c0_7], %8 {strides = array<i32>} : memref<1024x32xbf16, #tpu.memory_space<vmem>>, vector<1024x32xbf16>,
    return
  }
  func.func @transform_0(%arg0: i32, %arg1: i32) -> (i32, i32) {
    %c0_i32 = arith.constant 0 : i32
    %c0_i32_0 = arith.constant 0 : i32
    return %arg1, %c0_i32 : i32, i32
  }
  func.func @transform_1(%arg0: i32, %arg1: i32) -> (i32, i32) {
    %c0_i32 = arith.constant 0 : i32
    %c0_i32_0 = arith.constant 0 : i32
    return %c0_i32, %arg0 : i32, i32
  }
  func.func @transform_2(%arg0: i32, %arg1: i32) -> (i32, i32) {
    %c0_i32 = arith.constant 0 : i32
    %c0_i32_0 = arith.constant 0 : i32
    return %c0_i32, %arg0 : i32, i32
  }
  func.func @transform_3(%arg0: i32, %arg1: i32) -> (i32, i32) {
    %c0_i32 = arith.constant 0 : i32
    return %arg1, %arg0 : i32, i32
  }
}

module attributes {stable_mosaic.version = 11 : i64} {
  func.func @_maxpool_kernel(%arg0: i32, %arg1: memref<28x2x14x64xbf16, #tpu.memory_space<vmem>>, %arg2: memref<28x14x32xbf16, #tpu.memory_space<vmem>>) attributes {dimension_semantics = [#tpu.dimension_semantics<parallel>], iteration_bounds = array<i64: 1>, scalar_prefetch = 0 : i64, scratch_operands = 0 : i64, tpu.core_type = #tpu.core_type<tc>, window_params = [{transform_indices = @transform_0, window_bounds = array<i64: 28, 2, 14, 64>}, {transform_indices = @transform_1, window_bounds = array<i64: 28, 14, 32>}]} {
    %c0 = arith.constant 0 : index
    %c0_0 = arith.constant 0 : index
    %c0_1 = arith.constant 0 : index
    %c0_2 = arith.constant 0 : index
    %0 = vector.load %arg1[%c0, %c0_0, %c0_1, %c0_2] : memref<28x2x14x64xbf16, #tpu.memory_space<vmem>>, vector<28x1x14x64xbf16>
    %1 = vector.shape_cast %0 : vector<28x1x14x64xbf16> to vector<28x14x64xbf16>
    %c0_3 = arith.constant 0 : index
    %c1 = arith.constant 1 : index
    %c0_4 = arith.constant 0 : index
    %c0_5 = arith.constant 0 : index
    %2 = vector.load %arg1[%c0_3, %c1, %c0_4, %c0_5] : memref<28x2x14x64xbf16, #tpu.memory_space<vmem>>, vector<28x1x14x64xbf16>
    %3 = vector.shape_cast %2 : vector<28x1x14x64xbf16> to vector<28x14x64xbf16>
    %4 = arith.maximumf %1, %3 : vector<28x14x64xbf16>
    %5 = vector.extract_strided_slice %4 {offsets = [0, 0, 0], sizes = [28, 14, 32], strides = [1, 1, 1]} : vector<28x14x64xbf16> to vector<28x14x32xbf16>
    %6 = vector.extract_strided_slice %4 {offsets = [0, 0, 32], sizes = [28, 14, 32], strides = [1, 1, 1]} : vector<28x14x64xbf16> to vector<28x14x32xbf16>
    %7 = arith.maximumf %5, %6 : vector<28x14x32xbf16>
    %c0_6 = arith.constant 0 : index
    %c0_7 = arith.constant 0 : index
    %c0_8 = arith.constant 0 : index
    %8 = vector.load %arg2[%c0_6, %c0_7, %c0_8] : memref<28x14x32xbf16, #tpu.memory_space<vmem>>, vector<28x14x32xbf16>
    tpu.vector_store %arg2[%c0_6, %c0_7, %c0_8], %7 {strides = array<i32>} : memref<28x14x32xbf16, #tpu.memory_space<vmem>>, vector<28x14x32xbf16>,
    return
  }
  func.func @transform_0(%arg0: i32) -> (i32, i32, i32, i32) {
    %c0_i32 = arith.constant 0 : i32
    %c0_i32_0 = arith.constant 0 : i32
    %c0_i32_1 = arith.constant 0 : i32
    %c0_i32_2 = arith.constant 0 : i32
    return %arg0, %c0_i32, %c0_i32_0, %c0_i32_1 : i32, i32, i32, i32
  }
  func.func @transform_1(%arg0: i32) -> (i32, i32, i32) {
    %c0_i32 = arith.constant 0 : i32
    %c0_i32_0 = arith.constant 0 : i32
    %c0_i32_1 = arith.constant 0 : i32
    return %arg0, %c0_i32, %c0_i32_0 : i32, i32, i32
  }
}

module attributes {stable_mosaic.version = 11 : i64} {
  func.func @_matmul_bias_kernel(%arg0: i32, %arg1: i32, %arg2: memref<392x800xbf16, #tpu.memory_space<vmem>>, %arg3: memref<800x64xbf16, #tpu.memory_space<vmem>>, %arg4: memref<1x64xf32, #tpu.memory_space<vmem>>, %arg5: memref<392x64xbf16, #tpu.memory_space<vmem>>) attributes {dimension_semantics = [#tpu.dimension_semantics<parallel>, #tpu.dimension_semantics<parallel>], iteration_bounds = array<i64: 1, 1>, scalar_prefetch = 0 : i64, scratch_operands = 0 : i64, tpu.core_type = #tpu.core_type<tc>, window_params = [{transform_indices = @transform_0, window_bounds = array<i64: 392, 800>}, {transform_indices = @transform_1, window_bounds = array<i64: 800, 64>}, {transform_indices = @transform_2, window_bounds = array<i64: 1, 64>}, {transform_indices = @transform_3, window_bounds = array<i64: 392, 64>}]} {
    %c0 = arith.constant 0 : index
    %c0_0 = arith.constant 0 : index
    %0 = vector.load %arg2[%c0, %c0_0] : memref<392x800xbf16, #tpu.memory_space<vmem>>, vector<392x800xbf16>
    %c0_1 = arith.constant 0 : index
    %c0_2 = arith.constant 0 : index
    %1 = vector.load %arg3[%c0_1, %c0_2] : memref<800x64xbf16, #tpu.memory_space<vmem>>, vector<800x64xbf16>
    %cst = arith.constant dense<0.000000e+00> : vector<392x64xf32>
    %2 = tpu.matmul %0, %1, %cst {dimension_numbers = #tpu.dot_dimension_numbers<[1], [0], [0], [1], [0, 0, 1, 1], [], []>} : vector<392x800xbf16>, vector<800x64xbf16>, vector<392x64xf32> -> vector<392x64xf32>
    %c0_3 = arith.constant 0 : index
    %c0_4 = arith.constant 0 : index
    %3 = vector.load %arg4[%c0_3, %c0_4] : memref<1x64xf32, #tpu.memory_space<vmem>>, vector<1x64xf32>
    %4 = vector.broadcast %3 : vector<1x64xf32> to vector<392x64xf32>
    %5 = arith.addf %2, %4 : vector<392x64xf32>
    %cst_5 = arith.constant 0.000000e+00 : f32
    %6 = vector.broadcast %cst_5 : f32 to vector<392x64xf32>
    %7 = arith.maximumf %5, %6 : vector<392x64xf32>
    %8 = arith.truncf %7 : vector<392x64xf32> to vector<392x64xbf16>
    %c0_6 = arith.constant 0 : index
    %c0_7 = arith.constant 0 : index
    %9 = vector.load %arg5[%c0_6, %c0_7] : memref<392x64xbf16, #tpu.memory_space<vmem>>, vector<392x64xbf16>
    tpu.vector_store %arg5[%c0_6, %c0_7], %8 {strides = array<i32>} : memref<392x64xbf16, #tpu.memory_space<vmem>>, vector<392x64xbf16>,
    return
  }
  func.func @transform_0(%arg0: i32, %arg1: i32) -> (i32, i32) {
    %c0_i32 = arith.constant 0 : i32
    %c0_i32_0 = arith.constant 0 : i32
    return %arg1, %c0_i32 : i32, i32
  }
  func.func @transform_1(%arg0: i32, %arg1: i32) -> (i32, i32) {
    %c0_i32 = arith.constant 0 : i32
    %c0_i32_0 = arith.constant 0 : i32
    return %c0_i32, %arg0 : i32, i32
  }
  func.func @transform_2(%arg0: i32, %arg1: i32) -> (i32, i32) {
    %c0_i32 = arith.constant 0 : i32
    %c0_i32_0 = arith.constant 0 : i32
    return %c0_i32, %arg0 : i32, i32
  }
  func.func @transform_3(%arg0: i32, %arg1: i32) -> (i32, i32) {
    %c0_i32 = arith.constant 0 : i32
    return %arg1, %arg0 : i32, i32
  }
}

module attributes {stable_mosaic.version = 11 : i64} {
  func.func @_maxpool_kernel(%arg0: i32, %arg1: memref<14x2x7x128xbf16, #tpu.memory_space<vmem>>, %arg2: memref<14x7x64xbf16, #tpu.memory_space<vmem>>) attributes {dimension_semantics = [#tpu.dimension_semantics<parallel>], iteration_bounds = array<i64: 1>, scalar_prefetch = 0 : i64, scratch_operands = 0 : i64, tpu.core_type = #tpu.core_type<tc>, window_params = [{transform_indices = @transform_0, window_bounds = array<i64: 14, 2, 7, 128>}, {transform_indices = @transform_1, window_bounds = array<i64: 14, 7, 64>}]} {
    %c0 = arith.constant 0 : index
    %c0_0 = arith.constant 0 : index
    %c0_1 = arith.constant 0 : index
    %c0_2 = arith.constant 0 : index
    %0 = vector.load %arg1[%c0, %c0_0, %c0_1, %c0_2] : memref<14x2x7x128xbf16, #tpu.memory_space<vmem>>, vector<14x1x7x128xbf16>
    %1 = vector.shape_cast %0 : vector<14x1x7x128xbf16> to vector<14x7x128xbf16>
    %c0_3 = arith.constant 0 : index
    %c1 = arith.constant 1 : index
    %c0_4 = arith.constant 0 : index
    %c0_5 = arith.constant 0 : index
    %2 = vector.load %arg1[%c0_3, %c1, %c0_4, %c0_5] : memref<14x2x7x128xbf16, #tpu.memory_space<vmem>>, vector<14x1x7x128xbf16>
    %3 = vector.shape_cast %2 : vector<14x1x7x128xbf16> to vector<14x7x128xbf16>
    %4 = arith.maximumf %1, %3 : vector<14x7x128xbf16>
    %5 = vector.extract_strided_slice %4 {offsets = [0, 0, 0], sizes = [14, 7, 64], strides = [1, 1, 1]} : vector<14x7x128xbf16> to vector<14x7x64xbf16>
    %6 = vector.extract_strided_slice %4 {offsets = [0, 0, 64], sizes = [14, 7, 64], strides = [1, 1, 1]} : vector<14x7x128xbf16> to vector<14x7x64xbf16>
    %7 = arith.maximumf %5, %6 : vector<14x7x64xbf16>
    %c0_6 = arith.constant 0 : index
    %c0_7 = arith.constant 0 : index
    %c0_8 = arith.constant 0 : index
    %8 = vector.load %arg2[%c0_6, %c0_7, %c0_8] : memref<14x7x64xbf16, #tpu.memory_space<vmem>>, vector<14x7x64xbf16>
    tpu.vector_store %arg2[%c0_6, %c0_7, %c0_8], %7 {strides = array<i32>} : memref<14x7x64xbf16, #tpu.memory_space<vmem>>, vector<14x7x64xbf16>,
    return
  }
  func.func @transform_0(%arg0: i32) -> (i32, i32, i32, i32) {
    %c0_i32 = arith.constant 0 : i32
    %c0_i32_0 = arith.constant 0 : i32
    %c0_i32_1 = arith.constant 0 : i32
    %c0_i32_2 = arith.constant 0 : i32
    return %arg0, %c0_i32, %c0_i32_0, %c0_i32_1 : i32, i32, i32, i32
  }
  func.func @transform_1(%arg0: i32) -> (i32, i32, i32) {
    %c0_i32 = arith.constant 0 : i32
    %c0_i32_0 = arith.constant 0 : i32
    %c0_i32_1 = arith.constant 0 : i32
    return %arg0, %c0_i32, %c0_i32_0 : i32, i32, i32
  }
}

module attributes {stable_mosaic.version = 11 : i64} {
  func.func @_matmul_bias_kernel(%arg0: i32, %arg1: i32, %arg2: memref<8x3136xbf16, #tpu.memory_space<vmem>>, %arg3: memref<3136x256xbf16, #tpu.memory_space<vmem>>, %arg4: memref<1x256xf32, #tpu.memory_space<vmem>>, %arg5: memref<8x256xbf16, #tpu.memory_space<vmem>>) attributes {dimension_semantics = [#tpu.dimension_semantics<parallel>, #tpu.dimension_semantics<parallel>], iteration_bounds = array<i64: 4, 1>, scalar_prefetch = 0 : i64, scratch_operands = 0 : i64, tpu.core_type = #tpu.core_type<tc>, window_params = [{transform_indices = @transform_0, window_bounds = array<i64: 8, 3136>}, {transform_indices = @transform_1, window_bounds = array<i64: 3136, 256>}, {transform_indices = @transform_2, window_bounds = array<i64: 1, 256>}, {transform_indices = @transform_3, window_bounds = array<i64: 8, 256>}]} {
    %c0 = arith.constant 0 : index
    %c0_0 = arith.constant 0 : index
    %0 = vector.load %arg2[%c0, %c0_0] : memref<8x3136xbf16, #tpu.memory_space<vmem>>, vector<8x3136xbf16>
    %c0_1 = arith.constant 0 : index
    %c0_2 = arith.constant 0 : index
    %1 = vector.load %arg3[%c0_1, %c0_2] : memref<3136x256xbf16, #tpu.memory_space<vmem>>, vector<3136x256xbf16>
    %cst = arith.constant dense<0.000000e+00> : vector<8x256xf32>
    %2 = tpu.matmul %0, %1, %cst {dimension_numbers = #tpu.dot_dimension_numbers<[1], [0], [0], [1], [0, 0, 1, 1], [], []>} : vector<8x3136xbf16>, vector<3136x256xbf16>, vector<8x256xf32> -> vector<8x256xf32>
    %c0_3 = arith.constant 0 : index
    %c0_4 = arith.constant 0 : index
    %3 = vector.load %arg4[%c0_3, %c0_4] : memref<1x256xf32, #tpu.memory_space<vmem>>, vector<1x256xf32>
    %4 = vector.broadcast %3 : vector<1x256xf32> to vector<8x256xf32>
    %5 = arith.addf %2, %4 : vector<8x256xf32>
    %cst_5 = arith.constant 0.000000e+00 : f32
    %6 = vector.broadcast %cst_5 : f32 to vector<8x256xf32>
    %7 = arith.maximumf %5, %6 : vector<8x256xf32>
    %8 = arith.truncf %7 : vector<8x256xf32> to vector<8x256xbf16>
    %c0_6 = arith.constant 0 : index
    %c0_7 = arith.constant 0 : index
    %9 = vector.load %arg5[%c0_6, %c0_7] : memref<8x256xbf16, #tpu.memory_space<vmem>>, vector<8x256xbf16>
    tpu.vector_store %arg5[%c0_6, %c0_7], %8 {strides = array<i32>} : memref<8x256xbf16, #tpu.memory_space<vmem>>, vector<8x256xbf16>,
    return
  }
  func.func @transform_0(%arg0: i32, %arg1: i32) -> (i32, i32) {
    %c0_i32 = arith.constant 0 : i32
    %c0_i32_0 = arith.constant 0 : i32
    return %arg1, %c0_i32 : i32, i32
  }
  func.func @transform_1(%arg0: i32, %arg1: i32) -> (i32, i32) {
    %c0_i32 = arith.constant 0 : i32
    %c0_i32_0 = arith.constant 0 : i32
    return %c0_i32, %arg0 : i32, i32
  }
  func.func @transform_2(%arg0: i32, %arg1: i32) -> (i32, i32) {
    %c0_i32 = arith.constant 0 : i32
    %c0_i32_0 = arith.constant 0 : i32
    return %c0_i32, %arg0 : i32, i32
  }
  func.func @transform_3(%arg0: i32, %arg1: i32) -> (i32, i32) {
    %c0_i32 = arith.constant 0 : i32
    return %arg1, %arg0 : i32, i32
  }
}

module attributes {stable_mosaic.version = 11 : i64} {
  func.func @_matmul_bias_kernel(%arg0: i32, %arg1: i32, %arg2: memref<8x1024xbf16, #tpu.memory_space<vmem>>, %arg3: memref<1024x128xbf16, #tpu.memory_space<vmem>>, %arg4: memref<1x128xf32, #tpu.memory_space<vmem>>, %arg5: memref<8x128xf32, #tpu.memory_space<vmem>>) attributes {dimension_semantics = [#tpu.dimension_semantics<parallel>, #tpu.dimension_semantics<parallel>], iteration_bounds = array<i64: 1, 1>, scalar_prefetch = 0 : i64, scratch_operands = 0 : i64, tpu.core_type = #tpu.core_type<tc>, window_params = [{transform_indices = @transform_0, window_bounds = array<i64: 8, 1024>}, {transform_indices = @transform_1, window_bounds = array<i64: 1024, 128>}, {transform_indices = @transform_2, window_bounds = array<i64: 1, 128>}, {transform_indices = @transform_3, window_bounds = array<i64: 8, 128>}]} {
    %c0 = arith.constant 0 : index
    %c0_0 = arith.constant 0 : index
    %0 = vector.load %arg2[%c0, %c0_0] : memref<8x1024xbf16, #tpu.memory_space<vmem>>, vector<8x1024xbf16>
    %c0_1 = arith.constant 0 : index
    %c0_2 = arith.constant 0 : index
    %1 = vector.load %arg3[%c0_1, %c0_2] : memref<1024x128xbf16, #tpu.memory_space<vmem>>, vector<1024x128xbf16>
    %cst = arith.constant dense<0.000000e+00> : vector<8x128xf32>
    %2 = tpu.matmul %0, %1, %cst {dimension_numbers = #tpu.dot_dimension_numbers<[1], [0], [0], [1], [0, 0, 1, 1], [], []>} : vector<8x1024xbf16>, vector<1024x128xbf16>, vector<8x128xf32> -> vector<8x128xf32>
    %c0_3 = arith.constant 0 : index
    %c0_4 = arith.constant 0 : index
    %3 = vector.load %arg4[%c0_3, %c0_4] : memref<1x128xf32, #tpu.memory_space<vmem>>, vector<1x128xf32>
    %4 = vector.broadcast %3 : vector<1x128xf32> to vector<8x128xf32>
    %5 = arith.addf %2, %4 : vector<8x128xf32>
    %c0_5 = arith.constant 0 : index
    %c0_6 = arith.constant 0 : index
    %6 = vector.load %arg5[%c0_5, %c0_6] : memref<8x128xf32, #tpu.memory_space<vmem>>, vector<8x128xf32>
    tpu.vector_store %arg5[%c0_5, %c0_6], %5 {strides = array<i32>} : memref<8x128xf32, #tpu.memory_space<vmem>>, vector<8x128xf32>,
    return
  }
  func.func @transform_0(%arg0: i32, %arg1: i32) -> (i32, i32) {
    %c0_i32 = arith.constant 0 : i32
    %c0_i32_0 = arith.constant 0 : i32
    return %arg1, %c0_i32 : i32, i32
  }
  func.func @transform_1(%arg0: i32, %arg1: i32) -> (i32, i32) {
    %c0_i32 = arith.constant 0 : i32
    %c0_i32_0 = arith.constant 0 : i32
    return %c0_i32, %arg0 : i32, i32
  }
  func.func @transform_2(%arg0: i32, %arg1: i32) -> (i32, i32) {
    %c0_i32 = arith.constant 0 : i32
    %c0_i32_0 = arith.constant 0 : i32
    return %c0_i32, %arg0 : i32, i32
  }
  func.func @transform_3(%arg0: i32, %arg1: i32) -> (i32, i32) {
    %c0_i32 = arith.constant 0 : i32
    return %arg1, %arg0 : i32, i32
  }
}

</mosaic_0001>

<bundles_post_ra>
// kernel: forward.7
= control target key start
LH: loop header
LB: loop body
LE: loop exit
PB: predicated region body
PF: predicated region fallthrough
CT: control target
= control target key end

     0   :  { %s576_s22 = smov 96   ;;  %vm457_vm0 = vcmask 257024   ;;  %vm459_vm1 = vcmask 256000   ;;  %s1427_s0 = inlined_call_operand.vmem [shape: bf16[28,2,14,64], index: 0, kind: input, shape index: {}]   ;;  %s1428_s1 = inlined_call_operand.vmem [shape: bf16[28,14,32], index: 1, kind: output, shape index: {}]  }
   0x1   :  { %v10_v0 = vld [vmem:[%s1427_s0 + $0x10] sm:$0xf]  ;;  %v521_v1 = vld [vmem:[%s1427_s0 + $0x18] sm:$0xf]  ;;  %v8_v2 = vld [vmem:[%s1427_s0] sm:$0xf] }
   0x2   :  { %v596_v3 = vmax.bf16 %v521_v1, %v10_v0  ;;  %v519_v4 = vld [vmem:[%s1427_s0 + $0x8] sm:$0xf]  ;;  %v11_v5 = vld [vmem:[%s1427_s0 + $0x14] sm:$0x7]  ;;  %v522_v6 = vld [vmem:[%s1427_s0 + $0x1c] sm:$0x7] }
   0x3   :  { %v607_v7 = vmax.bf16 %v519_v4, %v8_v2  ;;  %v9_v8 = vld [vmem:[%s1427_s0 + $0x4] sm:$0x7]  ;;  %v520_v9 = vld [vmem:[%s1427_s0 + $0xc] sm:$0x7]  ;;  %v617_v10 = vmax.bf16 %v522_v6, %v11_v5  ;;  %v12_v14 = vld [vmem:[%s1427_s0 + $0x20] sm:$0xf] }
   0x4   :  { %237 = vrot.lane.b32.xlu1 %v596_v3, %s576_s22  ;;  %v621_v11 = vmax.bf16 %v520_v9, %v9_v8  ;;  %v13_v12 = vld [vmem:[%s1427_s0 + $0x24] sm:$0x7]  ;;  %v524_v13 = vld [vmem:[%s1427_s0 + $0x2c] sm:$0x7]  ;;  %v523_v15 = vld [vmem:[%s1427_s0 + $0x28] sm:$0xf] }
   0x5   :  { %233 = vrot.lane.b32.xlu0 %v607_v7, %s576_s22  ;;  %v637_v16 = vmax.bf16 %v524_v13, %v13_v12  ;;  %v641_v17 = vmax.bf16 %v523_v15, %v12_v14  ;;  %v15_v18 = vld [vmem:[%s1427_s0 + $0x34] sm:$0x7]  ;;  %v526_v19 = vld [vmem:[%s1427_s0 + $0x3c] sm:$0x7]  ;;  %v14_v20 = vld [vmem:[%s1427_s0 + $0x30] sm:$0xf] }
   0x6   :  { %v525_v21 = vld [vmem:[%s1427_s0 + $0x38] sm:$0xf]  ;;  %v657_v22 = vmax.bf16 %v526_v19, %v15_v18  ;;  %v17_v24 = vld [vmem:[%s1427_s0 + $0x44] sm:$0x7]  ;;  %v528_v25 = vld [vmem:[%s1427_s0 + $0x4c] sm:$0x7] }
   0x7   :  { %v661_v23 = vmax.bf16 %v525_v21, %v14_v20  ;;  %v16_v26 = vld [vmem:[%s1427_s0 + $0x40] sm:$0xf]  ;;  %v527_v27 = vld [vmem:[%s1427_s0 + $0x48] sm:$0xf]  ;;  %v677_v28 = vmax.bf16 %v528_v25, %v17_v24  ;;  %v19_v30 = vld [vmem:[%s1427_s0 + $0x54] sm:$0x7] }
   0x8   :  { %239 = vrot.lane.b32.xlu1 %v617_v10, %s576_s22  ;;  %v681_v29 = vmax.bf16 %v527_v27, %v16_v26  ;;  %v530_v31 = vld [vmem:[%s1427_s0 + $0x5c] sm:$0x7]  ;;  %v18_v32 = vld [vmem:[%s1427_s0 + $0x50] sm:$0xf]  ;;  %v529_v33 = vld [vmem:[%s1427_s0 + $0x58] sm:$0xf] }
   0x9   :  { %235 = vrot.lane.b32.xlu0 %v621_v11, %s576_s22  ;;  %v697_v34 = vmax.bf16 %v530_v31, %v19_v30  ;;  %v701_v35 = vmax.bf16 %v529_v33, %v18_v32  ;;  %v21_v36 = vld [vmem:[%s1427_s0 + $0x64] sm:$0x7]  ;;  %v532_v37 = vld [vmem:[%s1427_s0 + $0x6c] sm:$0x7]  ;;  %v20_v38 = vld [vmem:[%s1427_s0 + $0x60] sm:$0xf] }
   0xa   :  { %v531_v39 = vld [vmem:[%s1427_s0 + $0x68] sm:$0xf]  ;;  %v717_v40 = vmax.bf16 %v532_v37, %v21_v36  ;;  %v23_v42 = vld [vmem:[%s1427_s0 + $0x74] sm:$0x7]  ;;  %v534_v43 = vld [vmem:[%s1427_s0 + $0x7c] sm:$0x7] }
   0xb   :  { %v721_v41 = vmax.bf16 %v531_v39, %v20_v38  ;;  %v22_v44 = vld [vmem:[%s1427_s0 + $0x70] sm:$0xf]  ;;  %v533_v45 = vld [vmem:[%s1427_s0 + $0x78] sm:$0xf]  ;;  %v737_v46 = vmax.bf16 %v534_v43, %v23_v42  ;;  %v25_v48 = vld [vmem:[%s1427_s0 + $0x84] sm:$0x7] }
   0xc   :  { %243 = vrot.lane.b32.xlu1 %v637_v16, %s576_s22  ;;  %v741_v47 = vmax.bf16 %v533_v45, %v22_v44  ;;  %v536_v49 = vld [vmem:[%s1427_s0 + $0x8c] sm:$0x7]  ;;  %v24_v50 = vld [vmem:[%s1427_s0 + $0x80] sm:$0xf]  ;;  %v535_v51 = vld [vmem:[%s1427_s0 + $0x88] sm:$0xf] }
   0xd   :  { %241 = vrot.lane.b32.xlu0 %v641_v17, %s576_s22  ;;  %v757_v52 = vmax.bf16 %v536_v49, %v25_v48  ;;  %v761_v53 = vmax.bf16 %v535_v51, %v24_v50  ;;  %v27_v54 = vld [vmem:[%s1427_s0 + $0x94] sm:$0x7]  ;;  %v538_v55 = vld [vmem:[%s1427_s0 + $0x9c] sm:$0x7]  ;;  %v26_v56 = vld [vmem:[%s1427_s0 + $0x90] sm:$0xf] }
   0xe   :  { %v537_v57 = vld [vmem:[%s1427_s0 + $0x98] sm:$0xf]  ;;  %v777_v58 = vmax.bf16 %v538_v55, %v27_v54  ;;  %v29_v60 = vld [vmem:[%s1427_s0 + $0xa4] sm:$0x7]  ;;  %v540_v61 = vld [vmem:[%s1427_s0 + $0xac] sm:$0x7] }
   0xf   :  { %v781_v59 = vmax.bf16 %v537_v57, %v26_v56  ;;  %v28_v62 = vld [vmem:[%s1427_s0 + $0xa0] sm:$0xf]  ;;  %v539_v63 = vld [vmem:[%s1427_s0 + $0xa8] sm:$0xf]  ;;  %v797_v0 = vmax.bf16 %v540_v61, %v29_v60  ;;  %v31_v2 = vld [vmem:[%s1427_s0 + $0xb4] sm:$0x7] }
  0x10   :  { %247 = vrot.lane.b32.xlu1 %v657_v22, %s576_s22  ;;  %v801_v1 = vmax.bf16 %v539_v63, %v28_v62  ;;  %v542_v4 = vld [vmem:[%s1427_s0 + $0xbc] sm:$0x7]  ;;  %v30_v5 = vld [vmem:[%s1427_s0 + $0xb0] sm:$0xf]  ;;  %v541_v6 = vld [vmem:[%s1427_s0 + $0xb8] sm:$0xf] }
  0x11   :  { %245 = vrot.lane.b32.xlu0 %v661_v23, %s576_s22  ;;  %v817_v8 = vmax.bf16 %v542_v4, %v31_v2  ;;  %v821_v9 = vmax.bf16 %v541_v6, %v30_v5  ;;  %v33_v12 = vld [vmem:[%s1427_s0 + $0xc4] sm:$0x7]  ;;  %v544_v13 = vld [vmem:[%s1427_s0 + $0xcc] sm:$0x7]  ;;  %v32_v14 = vld [vmem:[%s1427_s0 + $0xc0] sm:$0xf] }
  0x12   :  { %v543_v15 = vld [vmem:[%s1427_s0 + $0xc8] sm:$0xf]  ;;  %v837_v18 = vmax.bf16 %v544_v13, %v33_v12  ;;  %v35_v20 = vld [vmem:[%s1427_s0 + $0xd4] sm:$0x7]  ;;  %v546_v21 = vld [vmem:[%s1427_s0 + $0xdc] sm:$0x7] }
  0x13   :  { %v841_v19 = vmax.bf16 %v543_v15, %v32_v14  ;;  %v34_v24 = vld [vmem:[%s1427_s0 + $0xd0] sm:$0xf]  ;;  %v545_v25 = vld [vmem:[%s1427_s0 + $0xd8] sm:$0xf]  ;;  %v857_v26 = vmax.bf16 %v546_v21, %v35_v20  ;;  %v37_v30 = vld [vmem:[%s1427_s0 + $0xe4] sm:$0x7] }
  0x14   :  { %251 = vrot.lane.b32.xlu1 %v677_v28, %s576_s22  ;;  %v861_v27 = vmax.bf16 %v545_v25, %v34_v24  ;;  %v548_v31 = vld [vmem:[%s1427_s0 + $0xec] sm:$0x7]  ;;  %v36_v32 = vld [vmem:[%s1427_s0 + $0xe0] sm:$0xf]  ;;  %v547_v33 = vld [vmem:[%s1427_s0 + $0xe8] sm:$0xf] }
  0x15   :  { %249 = vrot.lane.b32.xlu0 %v681_v29, %s576_s22  ;;  %v877_v36 = vmax.bf16 %v548_v31, %v37_v30  ;;  %v881_v37 = vmax.bf16 %v547_v33, %v36_v32  ;;  %v39_v38 = vld [vmem:[%s1427_s0 + $0xf4] sm:$0x7]  ;;  %v550_v39 = vld [vmem:[%s1427_s0 + $0xfc] sm:$0x7]  ;;  %v38_v42 = vld [vmem:[%s1427_s0 + $0xf0] sm:$0xf] }
  0x16   :  { %v549_v43 = vld [vmem:[%s1427_s0 + $0xf8] sm:$0xf]  ;;  %v897_v44 = vmax.bf16 %v550_v39, %v39_v38  ;;  %v41_v48 = vld [vmem:[%s1427_s0 + $0x104] sm:$0x7]  ;;  %v552_v49 = vld [vmem:[%s1427_s0 + $0x10c] sm:$0x7] }
  0x17   :  { %v901_v45 = vmax.bf16 %v549_v43, %v38_v42  ;;  %v40_v50 = vld [vmem:[%s1427_s0 + $0x100] sm:$0xf]  ;;  %v551_v51 = vld [vmem:[%s1427_s0 + $0x108] sm:$0xf]  ;;  %v917_v54 = vmax.bf16 %v552_v49, %v41_v48  ;;  %v43_v56 = vld [vmem:[%s1427_s0 + $0x114] sm:$0x7] }
  0x18   :  { %255 = vrot.lane.b32.xlu1 %v697_v34, %s576_s22  ;;  %v921_v55 = vmax.bf16 %v551_v51, %v40_v50  ;;  %v554_v57 = vld [vmem:[%s1427_s0 + $0x11c] sm:$0x7]  ;;  %v42_v60 = vld [vmem:[%s1427_s0 + $0x110] sm:$0xf]  ;;  %v553_v61 = vld [vmem:[%s1427_s0 + $0x118] sm:$0xf] }
  0x19   :  { %253 = vrot.lane.b32.xlu0 %v701_v35, %s576_s22  ;;  %v937_v62 = vmax.bf16 %v554_v57, %v43_v56  ;;  %v941_v63 = vmax.bf16 %v553_v61, %v42_v60  ;;  %v45_v2 = vld [vmem:[%s1427_s0 + $0x124] sm:$0x7]  ;;  %v556_v4 = vld [vmem:[%s1427_s0 + $0x12c] sm:$0x7]  ;;  %v44_v5 = vld [vmem:[%s1427_s0 + $0x120] sm:$0xf] }
  0x1a   :  { %v555_v6 = vld [vmem:[%s1427_s0 + $0x128] sm:$0xf]  ;;  %v957_v12 = vmax.bf16 %v556_v4, %v45_v2  ;;  %v47_v14 = vld [vmem:[%s1427_s0 + $0x134] sm:$0x7]  ;;  %v558_v15 = vld [vmem:[%s1427_s0 + $0x13c] sm:$0x7] }
  0x1b   :  { %v961_v13 = vmax.bf16 %v555_v6, %v44_v5  ;;  %v46_v20 = vld [vmem:[%s1427_s0 + $0x130] sm:$0xf]  ;;  %v557_v21 = vld [vmem:[%s1427_s0 + $0x138] sm:$0xf]  ;;  %v977_v24 = vmax.bf16 %v558_v15, %v47_v14  ;;  %v49_v30 = vld [vmem:[%s1427_s0 + $0x144] sm:$0x7] }
  0x1c   :  { %259 = vrot.lane.b32.xlu1 %v717_v40, %s576_s22  ;;  %v981_v25 = vmax.bf16 %v557_v21, %v46_v20  ;;  %v560_v31 = vld [vmem:[%s1427_s0 + $0x14c] sm:$0x7]  ;;  %v48_v32 = vld [vmem:[%s1427_s0 + $0x140] sm:$0xf]  ;;  %v559_v33 = vld [vmem:[%s1427_s0 + $0x148] sm:$0xf] }
  0x1d   :  { %257 = vrot.lane.b32.xlu0 %v721_v41, %s576_s22  ;;  %v997_v38 = vmax.bf16 %v560_v31, %v49_v30  ;;  %v1001_v39 = vmax.bf16 %v559_v33, %v48_v32  ;;  %v51_v42 = vld [vmem:[%s1427_s0 + $0x154] sm:$0x7]  ;;  %v562_v43 = vld [vmem:[%s1427_s0 + $0x15c] sm:$0x7]  ;;  %v50_v48 = vld [vmem:[%s1427_s0 + $0x150] sm:$0xf] }
  0x1e   :  { %v561_v49 = vld [vmem:[%s1427_s0 + $0x158] sm:$0xf]  ;;  %v1017_v50 = vmax.bf16 %v562_v43, %v51_v42  ;;  %v53_v56 = vld [vmem:[%s1427_s0 + $0x164] sm:$0x7]  ;;  %v564_v57 = vld [vmem:[%s1427_s0 + $0x16c] sm:$0x7] }
  0x1f   :  { %v1021_v51 = vmax.bf16 %v561_v49, %v50_v48  ;;  %v52_v60 = vld [vmem:[%s1427_s0 + $0x160] sm:$0xf]  ;;  %v563_v61 = vld [vmem:[%s1427_s0 + $0x168] sm:$0xf]  ;;  %v1037_v2 = vmax.bf16 %v564_v57, %v53_v56  ;;  %v55_v5 = vld [vmem:[%s1427_s0 + $0x174] sm:$0x7] }
  0x20   :  { %263 = vrot.lane.b32.xlu1 %v737_v46, %s576_s22  ;;  %v1041_v4 = vmax.bf16 %v563_v61, %v52_v60  ;;  %v566_v6 = vld [vmem:[%s1427_s0 + $0x17c] sm:$0x7]  ;;  %v54_v14 = vld [vmem:[%s1427_s0 + $0x170] sm:$0xf]  ;;  %v565_v15 = vld [vmem:[%s1427_s0 + $0x178] sm:$0xf] }
  0x21   :  { %261 = vrot.lane.b32.xlu0 %v741_v47, %s576_s22  ;;  %v1057_v20 = vmax.bf16 %v566_v6, %v55_v5  ;;  %v1061_v21 = vmax.bf16 %v565_v15, %v54_v14  ;;  %v57_v30 = vld [vmem:[%s1427_s0 + $0x184] sm:$0x7]  ;;  %v568_v31 = vld [vmem:[%s1427_s0 + $0x18c] sm:$0x7]  ;;  %v56_v32 = vld [vmem:[%s1427_s0 + $0x180] sm:$0xf] }
  0x22   :  { %v567_v33 = vld [vmem:[%s1427_s0 + $0x188] sm:$0xf]  ;;  %v1077_v42 = vmax.bf16 %v568_v31, %v57_v30  ;;  %v59_v48 = vld [vmem:[%s1427_s0 + $0x194] sm:$0x7]  ;;  %v570_v49 = vld [vmem:[%s1427_s0 + $0x19c] sm:$0x7] }
  0x23   :  { %v1081_v43 = vmax.bf16 %v567_v33, %v56_v32  ;;  %v58_v56 = vld [vmem:[%s1427_s0 + $0x190] sm:$0xf]  ;;  %v569_v57 = vld [vmem:[%s1427_s0 + $0x198] sm:$0xf]  ;;  %v1097_v60 = vmax.bf16 %v570_v49, %v59_v48  ;;  %v61_v5 = vld [vmem:[%s1427_s0 + $0x1a4] sm:$0x7] }
  0x24   :  { %267 = vrot.lane.b32.xlu1 %v757_v52, %s576_s22  ;;  %v1101_v61 = vmax.bf16 %v569_v57, %v58_v56  ;;  %v572_v6 = vld [vmem:[%s1427_s0 + $0x1ac] sm:$0x7]  ;;  %v60_v14 = vld [vmem:[%s1427_s0 + $0x1a0] sm:$0xf]  ;;  %v571_v15 = vld [vmem:[%s1427_s0 + $0x1a8] sm:$0xf] }
  0x25   :  { %265 = vrot.lane.b32.xlu0 %v761_v53, %s576_s22  ;;  %v1117_v30 = vmax.bf16 %v572_v6, %v61_v5  ;;  %v1121_v31 = vmax.bf16 %v571_v15, %v60_v14  ;;  %v63_v32 = vld [vmem:[%s1427_s0 + $0x1b4] sm:$0x7]  ;;  %v574_v33 = vld [vmem:[%s1427_s0 + $0x1bc] sm:$0x7]  ;;  %v62_v48 = vld [vmem:[%s1427_s0 + $0x1b0] sm:$0xf] }
  0x26   :  { %v573_v49 = vld [vmem:[%s1427_s0 + $0x1b8] sm:$0xf]  ;;  %v1137_v56 = vmax.bf16 %v574_v33, %v63_v32 }
  0x27   :  { %v1141_v57 = vmax.bf16 %v573_v49, %v62_v48 }
  0x28   :  { %271 = vrot.lane.b32.xlu1 %v777_v58, %s576_s22 }
  0x29   :  { %269 = vrot.lane.b32.xlu0 %v781_v59, %s576_s22 }
  0x2c   :  { %275 = vrot.lane.b32.xlu1 %v797_v0, %s576_s22 }
  0x2d   :  { %273 = vrot.lane.b32.xlu0 %v801_v1, %s576_s22 }
  0x30   :  { %279 = vrot.lane.b32.xlu1 %v817_v8, %s576_s22 }
  0x31   :  { %277 = vrot.lane.b32.xlu0 %v821_v9, %s576_s22 }
  0x34   :  { %283 = vrot.lane.b32.xlu1 %v837_v18, %s576_s22 }
  0x35   :  { %281 = vrot.lane.b32.xlu0 %v841_v19, %s576_s22 }
  0x38   :  { %287 = vrot.lane.b32.xlu1 %v857_v26, %s576_s22 }
  0x39   :  { %285 = vrot.lane.b32.xlu0 %v861_v27, %s576_s22 }
  0x3c   :  { %291 = vrot.lane.b32.xlu1 %v877_v36, %s576_s22 }
  0x3d   :  { %289 = vrot.lane.b32.xlu0 %v881_v37, %s576_s22 }
  0x40   :  { %295 = vrot.lane.b32.xlu1 %v897_v44, %s576_s22 }
  0x41   :  { %293 = vrot.lane.b32.xlu0 %v901_v45, %s576_s22 }
  0x44   :  { %299 = vrot.lane.b32.xlu1 %v917_v54, %s576_s22 }
  0x45   :  { %297 = vrot.lane.b32.xlu0 %v921_v55, %s576_s22 }
  0x48   :  { %303 = vrot.lane.b32.xlu1 %v937_v62, %s576_s22 }
  0x49   :  { %301 = vrot.lane.b32.xlu0 %v941_v63, %s576_s22 }
  0x4c   :  { %307 = vrot.lane.b32.xlu1 %v957_v12, %s576_s22 }
  0x4d   :  { %305 = vrot.lane.b32.xlu0 %v961_v13, %s576_s22 }
  0x50   :  { %311 = vrot.lane.b32.xlu1 %v977_v24, %s576_s22 }
  0x51   :  { %309 = vrot.lane.b32.xlu0 %v981_v25, %s576_s22 }
  0x54   :  { %315 = vrot.lane.b32.xlu1 %v997_v38, %s576_s22 }
  0x55   :  { %313 = vrot.lane.b32.xlu0 %v1001_v39, %s576_s22 }
  0x58   :  { %319 = vrot.lane.b32.xlu1 %v1017_v50, %s576_s22 }
  0x59   :  { %317 = vrot.lane.b32.xlu0 %v1021_v51, %s576_s22 }
  0x5c   :  { %323 = vrot.lane.b32.xlu1 %v1037_v2, %s576_s22 }
  0x5d   :  { %321 = vrot.lane.b32.xlu0 %v1041_v4, %s576_s22 }
  0x60   :  { %327 = vrot.lane.b32.xlu1 %v1057_v20, %s576_s22 }
  0x61   :  { %325 = vrot.lane.b32.xlu0 %v1061_v21, %s576_s22 }
  0x64   :  { %331 = vrot.lane.b32.xlu1 %v1077_v42, %s576_s22 }
  0x65   :  { %329 = vrot.lane.b32.xlu0 %v1081_v43, %s576_s22 }
  0x68   :  { %335 = vrot.lane.b32.xlu1 %v1097_v60, %s576_s22 }
  0x69   :  { %333 = vrot.lane.b32.xlu0 %v1101_v61, %s576_s22 }
  0x6c   :  { %339 = vrot.lane.b32.xlu1 %v1117_v30, %s576_s22 }
  0x6d   :  { %337 = vrot.lane.b32.xlu0 %v1121_v31, %s576_s22 }
  0x70   :  { %343 = vrot.lane.b32.xlu1 %v1137_v56, %s576_s22 }
  0x71   :  { %341 = vrot.lane.b32.xlu0 %v1141_v57, %s576_s22 }
  0x76   :  { %v238_v5 = vpop.permute.xlu1 %237 }
  0x77   :  { %v403_v6 = vmax.bf16 %v238_v5, %v596_v3  ;;  %v234_v14 = vpop.permute.xlu0 %233 }
  0x78   :  { %v401_v15 = vmax.bf16 %v234_v14, %v607_v7 }
  0x79   :  { %461 = vst.msk [vmem:[%s1428_s1 + $0x8] sm:$0xf] %vm457_vm0, %v403_v6 }
  0x7a   :  { %458 = vst.msk [vmem:[%s1428_s1] sm:$0xf] %vm457_vm0, %v401_v15  ;;  %v240_v32 = vpop.permute.xlu1 %239 }
  0x7b   :  { %v404_v33 = vmax.bf16 %v240_v32, %v617_v10  ;;  %v236_v48 = vpop.permute.xlu0 %235 }
  0x7c   :  { %v402_v3 = vmax.bf16 %v236_v48, %v621_v11 }
  0x7d   :  { %462 = vst.msk [vmem:[%s1428_s1 + $0xc] sm:$0x7] %vm459_vm1, %v404_v33 }
  0x7e   :  { %460 = vst.msk [vmem:[%s1428_s1 + $0x4] sm:$0x7] %vm459_vm1, %v402_v3  ;;  %v244_v7 = vpop.permute.xlu1 %243 }
  0x7f   :  { %v406_v49 = vmax.bf16 %v244_v7, %v637_v16  ;;  %v242_v5 = vpop.permute.xlu0 %241 }
  0x80   :  { %v405_v6 = vmax.bf16 %v242_v5, %v641_v17 }
  0x81   :  { %464 = vst.msk [vmem:[%s1428_s1 + $0x14] sm:$0x7] %vm459_vm1, %v406_v49 }
  0x82   :  { %463 = vst.msk [vmem:[%s1428_s1 + $0x10] sm:$0xf] %vm457_vm0, %v405_v6  ;;  %v248_v10 = vpop.permute.xlu1 %247 }
  0x83   :  { %v408_v11 = vmax.bf16 %v248_v10, %v657_v22  ;;  %v246_v14 = vpop.permute.xlu0 %245 }
  0x84   :  { %v407_v15 = vmax.bf16 %v246_v14, %v661_v23 }
  0x85   :  { %466 = vst.msk [vmem:[%s1428_s1 + $0x1c] sm:$0x7] %vm459_vm1, %v408_v11 }
  0x86   :  { %465 = vst.msk [vmem:[%s1428_s1 + $0x18] sm:$0xf] %vm457_vm0, %v407_v15  ;;  %v252_v16 = vpop.permute.xlu1 %251 }
  0x87   :  { %v410_v17 = vmax.bf16 %v252_v16, %v677_v28  ;;  %v250_v32 = vpop.permute.xlu0 %249 }
  0x88   :  { %v409_v33 = vmax.bf16 %v250_v32, %v681_v29 }
  0x89   :  { %468 = vst.msk [vmem:[%s1428_s1 + $0x24] sm:$0x7] %vm459_vm1, %v410_v17 }
  0x8a   :  { %467 = vst.msk [vmem:[%s1428_s1 + $0x20] sm:$0xf] %vm457_vm0, %v409_v33  ;;  %v256_v22 = vpop.permute.xlu1 %255 }
  0x8b   :  { %v412_v23 = vmax.bf16 %v256_v22, %v697_v34  ;;  %v254_v48 = vpop.permute.xlu0 %253 }
  0x8c   :  { %v411_v3 = vmax.bf16 %v254_v48, %v701_v35 }
  0x8d   :  { %470 = vst.msk [vmem:[%s1428_s1 + $0x2c] sm:$0x7] %vm459_vm1, %v412_v23 }
  0x8e   :  { %469 = vst.msk [vmem:[%s1428_s1 + $0x28] sm:$0xf] %vm457_vm0, %v411_v3  ;;  %v260_v28 = vpop.permute.xlu1 %259 }
  0x8f   :  { %v414_v29 = vmax.bf16 %v260_v28, %v717_v40  ;;  %v258_v7 = vpop.permute.xlu0 %257 }
  0x90   :  { %v413_v49 = vmax.bf16 %v258_v7, %v721_v41 }
  0x91   :  { %472 = vst.msk [vmem:[%s1428_s1 + $0x34] sm:$0x7] %vm459_vm1, %v414_v29 }
  0x92   :  { %471 = vst.msk [vmem:[%s1428_s1 + $0x30] sm:$0xf] %vm457_vm0, %v413_v49  ;;  %v264_v34 = vpop.permute.xlu1 %263 }
  0x93   :  { %v416_v35 = vmax.bf16 %v264_v34, %v737_v46  ;;  %v262_v5 = vpop.permute.xlu0 %261 }
  0x94   :  { %v415_v6 = vmax.bf16 %v262_v5, %v741_v47 }
  0x95   :  { %474 = vst.msk [vmem:[%s1428_s1 + $0x3c] sm:$0x7] %vm459_vm1, %v416_v35 }
  0x96   :  { %473 = vst.msk [vmem:[%s1428_s1 + $0x38] sm:$0xf] %vm457_vm0, %v415_v6  ;;  %v268_v40 = vpop.permute.xlu1 %267 }
  0x97   :  { %v418_v41 = vmax.bf16 %v268_v40, %v757_v52  ;;  %v266_v10 = vpop.permute.xlu0 %265 }
  0x98   :  { %v417_v11 = vmax.bf16 %v266_v10, %v761_v53 }
  0x99   :  { %476 = vst.msk [vmem:[%s1428_s1 + $0x44] sm:$0x7] %vm459_vm1, %v418_v41 }
  0x9a   :  { %475 = vst.msk [vmem:[%s1428_s1 + $0x40] sm:$0xf] %vm457_vm0, %v417_v11  ;;  %v272_v46 = vpop.permute.xlu1 %271 }
  0x9b   :  { %v420_v47 = vmax.bf16 %v272_v46, %v777_v58  ;;  %v270_v14 = vpop.permute.xlu0 %269 }
  0x9c   :  { %v419_v15 = vmax.bf16 %v270_v14, %v781_v59 }
  0x9d   :  { %478 = vst.msk [vmem:[%s1428_s1 + $0x4c] sm:$0x7] %vm459_vm1, %v420_v47 }
  0x9e   :  { %477 = vst.msk [vmem:[%s1428_s1 + $0x48] sm:$0xf] %vm457_vm0, %v419_v15  ;;  %v276_v52 = vpop.permute.xlu1 %275 }
  0x9f   :  { %v422_v53 = vmax.bf16 %v276_v52, %v797_v0  ;;  %v274_v16 = vpop.permute.xlu0 %273 }
  0xa0   :  { %v421_v17 = vmax.bf16 %v274_v16, %v801_v1 }
  0xa1   :  { %480 = vst.msk [vmem:[%s1428_s1 + $0x54] sm:$0x7] %vm459_vm1, %v422_v53 }
  0xa2   :  { %479 = vst.msk [vmem:[%s1428_s1 + $0x50] sm:$0xf] %vm457_vm0, %v421_v17  ;;  %v280_v58 = vpop.permute.xlu1 %279 }
  0xa3   :  { %v424_v59 = vmax.bf16 %v280_v58, %v817_v8  ;;  %v278_v32 = vpop.permute.xlu0 %277 }
  0xa4   :  { %v423_v33 = vmax.bf16 %v278_v32, %v821_v9 }
  0xa5   :  { %482 = vst.msk [vmem:[%s1428_s1 + $0x5c] sm:$0x7] %vm459_vm1, %v424_v59 }
  0xa6   :  { %481 = vst.msk [vmem:[%s1428_s1 + $0x58] sm:$0xf] %vm457_vm0, %v423_v33  ;;  %v284_v0 = vpop.permute.xlu1 %283 }
  0xa7   :  { %v426_v1 = vmax.bf16 %v284_v0, %v837_v18  ;;  %v282_v22 = vpop.permute.xlu0 %281 }
  0xa8   :  { %v425_v23 = vmax.bf16 %v282_v22, %v841_v19 }
  0xa9   :  { %484 = vst.msk [vmem:[%s1428_s1 + $0x64] sm:$0x7] %vm459_vm1, %v426_v1 }
  0xaa   :  { %483 = vst.msk [vmem:[%s1428_s1 + $0x60] sm:$0xf] %vm457_vm0, %v425_v23  ;;  %v288_v8 = vpop.permute.xlu1 %287 }
  0xab   :  { %v428_v9 = vmax.bf16 %v288_v8, %v857_v26  ;;  %v286_v48 = vpop.permute.xlu0 %285 }
  0xac   :  { %v427_v3 = vmax.bf16 %v286_v48, %v861_v27 }
  0xad   :  { %486 = vst.msk [vmem:[%s1428_s1 + $0x6c] sm:$0x7] %vm459_vm1, %v428_v9 }
  0xae   :  { %485 = vst.msk [vmem:[%s1428_s1 + $0x68] sm:$0xf] %vm457_vm0, %v427_v3  ;;  %v292_v18 = vpop.permute.xlu1 %291 }
  0xaf   :  { %v430_v19 = vmax.bf16 %v292_v18, %v877_v36  ;;  %v290_v28 = vpop.permute.xlu0 %289 }
  0xb0   :  { %v429_v29 = vmax.bf16 %v290_v28, %v881_v37 }
  0xb1   :  { %488 = vst.msk [vmem:[%s1428_s1 + $0x74] sm:$0x7] %vm459_vm1, %v430_v19 }
  0xb2   :  { %487 = vst.msk [vmem:[%s1428_s1 + $0x70] sm:$0xf] %vm457_vm0, %v429_v29  ;;  %v296_v26 = vpop.permute.xlu1 %295 }
  0xb3   :  { %v432_v27 = vmax.bf16 %v296_v26, %v897_v44  ;;  %v294_v7 = vpop.permute.xlu0 %293 }
  0xb4   :  { %v431_v49 = vmax.bf16 %v294_v7, %v901_v45 }
  0xb5   :  { %490 = vst.msk [vmem:[%s1428_s1 + $0x7c] sm:$0x7] %vm459_vm1, %v432_v27 }
  0xb6   :  { %489 = vst.msk [vmem:[%s1428_s1 + $0x78] sm:$0xf] %vm457_vm0, %v431_v49  ;;  %v300_v36 = vpop.permute.xlu1 %299 }
  0xb7   :  { %v434_v37 = vmax.bf16 %v300_v36, %v917_v54  ;;  %v298_v34 = vpop.permute.xlu0 %297 }
  0xb8   :  { %v433_v35 = vmax.bf16 %v298_v34, %v921_v55 }
  0xb9   :  { %492 = vst.msk [vmem:[%s1428_s1 + $0x84] sm:$0x7] %vm459_vm1, %v434_v37 }
  0xba   :  { %491 = vst.msk [vmem:[%s1428_s1 + $0x80] sm:$0xf] %vm457_vm0, %v433_v35  ;;  %v304_v44 = vpop.permute.xlu1 %303 }
  0xbb   :  { %v436_v45 = vmax.bf16 %v304_v44, %v937_v62  ;;  %v302_v5 = vpop.permute.xlu0 %301 }
  0xbc   :  { %v435_v6 = vmax.bf16 %v302_v5, %v941_v63 }
  0xbd   :  { %494 = vst.msk [vmem:[%s1428_s1 + $0x8c] sm:$0x7] %vm459_vm1, %v436_v45 }
  0xbe   :  { %493 = vst.msk [vmem:[%s1428_s1 + $0x88] sm:$0xf] %vm457_vm0, %v435_v6  ;;  %v308_v54 = vpop.permute.xlu1 %307 }
  0xbf   :  { %v438_v55 = vmax.bf16 %v308_v54, %v957_v12  ;;  %v306_v40 = vpop.permute.xlu0 %305 }
  0xc0   :  { %v437_v41 = vmax.bf16 %v306_v40, %v961_v13 }
  0xc1   :  { %496 = vst.msk [vmem:[%s1428_s1 + $0x94] sm:$0x7] %vm459_vm1, %v438_v55 }
  0xc2   :  { %495 = vst.msk [vmem:[%s1428_s1 + $0x90] sm:$0xf] %vm457_vm0, %v437_v41  ;;  %v312_v62 = vpop.permute.xlu1 %311 }
  0xc3   :  { %v440_v63 = vmax.bf16 %v312_v62, %v977_v24  ;;  %v310_v10 = vpop.permute.xlu0 %309 }
  0xc4   :  { %v439_v11 = vmax.bf16 %v310_v10, %v981_v25 }
  0xc5   :  { %498 = vst.msk [vmem:[%s1428_s1 + $0x9c] sm:$0x7] %vm459_vm1, %v440_v63 }
  0xc6   :  { %497 = vst.msk [vmem:[%s1428_s1 + $0x98] sm:$0xf] %vm457_vm0, %v439_v11  ;;  %v316_v12 = vpop.permute.xlu1 %315 }
  0xc7   :  { %v442_v13 = vmax.bf16 %v316_v12, %v997_v38  ;;  %v314_v46 = vpop.permute.xlu0 %313 }
  0xc8   :  { %v441_v47 = vmax.bf16 %v314_v46, %v1001_v39 }
  0xc9   :  { %500 = vst.msk [vmem:[%s1428_s1 + $0xa4] sm:$0x7] %vm459_vm1, %v442_v13 }
  0xca   :  { %499 = vst.msk [vmem:[%s1428_s1 + $0xa0] sm:$0xf] %vm457_vm0, %v441_v47  ;;  %v320_v24 = vpop.permute.xlu1 %319 }
  0xcb   :  { %v444_v25 = vmax.bf16 %v320_v24, %v1017_v50  ;;  %v318_v14 = vpop.permute.xlu0 %317 }
  0xcc   :  { %v443_v15 = vmax.bf16 %v318_v14, %v1021_v51 }
  0xcd   :  { %502 = vst.msk [vmem:[%s1428_s1 + $0xac] sm:$0x7] %vm459_vm1, %v444_v25 }
  0xce   :  { %501 = vst.msk [vmem:[%s1428_s1 + $0xa8] sm:$0xf] %vm457_vm0, %v443_v15  ;;  %v324_v38 = vpop.permute.xlu1 %323 }
  0xcf   :  { %v446_v39 = vmax.bf16 %v324_v38, %v1037_v2  ;;  %v322_v52 = vpop.permute.xlu0 %321 }
  0xd0   :  { %v445_v53 = vmax.bf16 %v322_v52, %v1041_v4 }
  0xd1   :  { %504 = vst.msk [vmem:[%s1428_s1 + $0xb4] sm:$0x7] %vm459_vm1, %v446_v39 }
  0xd2   :  { %503 = vst.msk [vmem:[%s1428_s1 + $0xb0] sm:$0xf] %vm457_vm0, %v445_v53  ;;  %v328_v50 = vpop.permute.xlu1 %327 }
  0xd3   :  { %v448_v51 = vmax.bf16 %v328_v50, %v1057_v20  ;;  %v326_v16 = vpop.permute.xlu0 %325 }
  0xd4   :  { %v447_v17 = vmax.bf16 %v326_v16, %v1061_v21 }
  0xd5   :  { %506 = vst.msk [vmem:[%s1428_s1 + $0xbc] sm:$0x7] %vm459_vm1, %v448_v51 }
  0xd6   :  { %505 = vst.msk [vmem:[%s1428_s1 + $0xb8] sm:$0xf] %vm457_vm0, %v447_v17  ;;  %v332_v2 = vpop.permute.xlu1 %331 }
  0xd7   :  { %v450_v4 = vmax.bf16 %v332_v2, %v1077_v42  ;;  %v330_v58 = vpop.permute.xlu0 %329 }
  0xd8   :  { %v449_v59 = vmax.bf16 %v330_v58, %v1081_v43 }
  0xd9   :  { %508 = vst.msk [vmem:[%s1428_s1 + $0xc4] sm:$0x7] %vm459_vm1, %v450_v4 }
  0xda   :  { %507 = vst.msk [vmem:[%s1428_s1 + $0xc0] sm:$0xf] %vm457_vm0, %v449_v59  ;;  %v336_v20 = vpop.permute.xlu1 %335 }
  0xdb   :  { %v452_v21 = vmax.bf16 %v336_v20, %v1097_v60  ;;  %v334_v32 = vpop.permute.xlu0 %333 }
  0xdc   :  { %v451_v33 = vmax.bf16 %v334_v32, %v1101_v61 }
  0xdd   :  { %510 = vst.msk [vmem:[%s1428_s1 + $0xcc] sm:$0x7] %vm459_vm1, %v452_v21 }
  0xde   :  { %509 = vst.msk [vmem:[%s1428_s1 + $0xc8] sm:$0xf] %vm457_vm0, %v451_v33  ;;  %v340_v42 = vpop.permute.xlu1 %339 }
  0xdf   :  { %v454_v43 = vmax.bf16 %v340_v42, %v1117_v30  ;;  %v338_v0 = vpop.permute.xlu0 %337 }
  0xe0   :  { %v453_v1 = vmax.bf16 %v338_v0, %v1121_v31 }
  0xe1   :  { %512 = vst.msk [vmem:[%s1428_s1 + $0xd4] sm:$0x7] %vm459_vm1, %v454_v43 }
  0xe2   :  { %511 = vst.msk [vmem:[%s1428_s1 + $0xd0] sm:$0xf] %vm457_vm0, %v453_v1  ;;  %v344_v60 = vpop.permute.xlu1 %343 }
  0xe3   :  { %v456_v61 = vmax.bf16 %v344_v60, %v1137_v56  ;;  %v342_v22 = vpop.permute.xlu0 %341 }
  0xe4   :  { %v455_v23 = vmax.bf16 %v342_v22, %v1141_v57 }
  0xe5   :  { %514 = vst.msk [vmem:[%s1428_s1 + $0xdc] sm:$0x7] %vm459_vm1, %v456_v61 }
  0xe6   :  { %513 = vst.msk [vmem:[%s1428_s1 + $0xd8] sm:$0xf] %vm457_vm0, %v455_v23 }

// kernel: forward.6
= control target key start
LH: loop header
LB: loop body
LE: loop exit
PB: predicated region body
PF: predicated region fallthrough
CT: control target
= control target key end

     0   :  { %s3043_s12 = smov 0   ;;  %s3045_s13 = smov 0   ;;  %s3615_s0 = inlined_call_operand.vmem [shape: bf16[2048,32], index: 0, kind: input, shape index: {}]   ;;  %s3616_s1 = inlined_call_operand.vmem [shape: bf16[32,32], index: 1, kind: input, shape index: {}]   ;;  %s3617_s2 = inlined_call_operand.vmem [shape: f32[1,32], index: 2, kind: input, shape index: {}]   ;;  %s3618_s3 = inlined_call_operand.vmem [shape: bf16[2048,32], index: 3, kind: output, shape index: {}]  }
   0x1   :  { %s3047_s14 = smov 0  }
   0x2 LB: > { %s22_s15 = sadd.s32 1, %s3017_s13  ;;  %p2312_p0 = scmp.ge.s32.totalorder %s3021_s14, 1  ;;  %s3021_s14 = sphi %s3047_s14, %s13_s14   ;;  %s3017_s13 = sphi %s3045_s13, %s3620_s13   ;;  %s3013_s12 = sphi %s3043_s12, %s3619_s12  }
   0x3   : > { %p23_p1 = scmp.ge.s32.totalorder %s22_s15, 2  ;;  %p169_p2 = scmp.lt.s32.totalorder %s3021_s14, 3 }
   0x5   : > { %s3622_s15 = smov (%p23_p1, %s22_s15), 0  ;;  %p170_p3 = pnand %p2312_p0, %p169_p2 }
   0x6   : > { %s2313_s18 = sshll.u32 (!%p170_p3), %s3013_s12, 7 }
   0x7   : > { %173 = sbr.rel (%p170_p3) target bundleno = 347 (0x15b), region = 32  ;;  %p204_p4 = scmp.lt.s32.totalorder (!%p170_p3), %s2313_s18, 255 }
   0xc   : > { %v2932_v0 = vld [vmem:[%s3616_s1 + $0x8] sm:$0xff]   ;;  %v2933_v1 = vld [vmem:[%s3616_s1] sm:$0xff]   ;;  %s3624_s18 = smov (!%p204_p4, %s2313_s18), 255  ;;  %vm697_vm0 = vcmask 261120   ;;  %vm2075_vm1 = vcmask 257024  }
   0xd   : > { %2772 = vmatprep.subr.bf16.mxu0 %v2932_v0  ;;  %2904 = vmatprep.subr.bf16.mxu1 %v2932_v0  ;;  %s2314_s21 = sshll.u32 %s3624_s18, 2 }
   0xe   : > { %2773 = vmatpush3.bf16.msra.mxu0 %v2932_v0  ;;  %2906 = vmatpush3.bf16.msra.mxu1 %v2932_v0  ;;  %s3075_s24 = scalar_lea.vmem %s3615_s0, %s2314_s21  ;;  %s3218_s29 = scalar_lea.vmem %s3618_s3, %s2314_s21 }
   0xf   : > { %2774 = vmatprep.subr.bf16.mxu0 %v2933_v1  ;;  %2905 = vmatprep.subr.bf16.mxu1 %v2933_v1  ;;  %v2934_v2 = vld [vmem:[%s3075_s24] sm:$0xff]   ;;  %v2936_v4 = vld [vmem:[%s3075_s24 + $0x8] sm:$0xff]   ;;  %v2938_v6 = vld [vmem:[%s3075_s24 + $0x10] sm:$0xff]  }
  0x10   : > { %v2935_v3 = vld [vmem:[%s3075_s24 + $0x100] sm:$0xff]   ;;  %2776 = vmatprep.mubr.msk.bf16.mxu0 %vm697_vm0, %v2934_v2  ;;  %v2937_v5 = vld [vmem:[%s3075_s24 + $0x108] sm:$0xff]   ;;  %v2939_v7 = vld [vmem:[%s3075_s24 + $0x110] sm:$0xff]  }
  0x11   : > { %2840 = vmatprep.mubr.msk.bf16.mxu1 %vm697_vm0, %v2935_v3  ;;  %v2940_v8 = vld [vmem:[%s3075_s24 + $0x18] sm:$0xff]   ;;  %v2942_v10 = vld [vmem:[%s3075_s24 + $0x20] sm:$0xff]   ;;  %v2944_v12 = vld [vmem:[%s3075_s24 + $0x28] sm:$0xff]  }
  0x12   : > { %2775 = vmatpush3.bf16.msra.mxu0 %v2933_v1  ;;  %2907 = vmatpush3.bf16.msra.mxu1 %v2933_v1  ;;  %v2941_v9 = vld [vmem:[%s3075_s24 + $0x118] sm:$0xff]   ;;  %v2943_v11 = vld [vmem:[%s3075_s24 + $0x120] sm:$0xff]   ;;  %v2945_v13 = vld [vmem:[%s3075_s24 + $0x128] sm:$0xff]  }
  0x13   : > { %v2946_v14 = vld [vmem:[%s3075_s24 + $0x30] sm:$0xff]   ;;  %v2948_v16 = vld [vmem:[%s3075_s24 + $0x38] sm:$0xff]   ;;  %v2950_v18 = vld [vmem:[%s3075_s24 + $0x40] sm:$0xff]  }
  0x14   : > { %v2947_v15 = vld [vmem:[%s3075_s24 + $0x130] sm:$0xff]   ;;  %v2949_v17 = vld [vmem:[%s3075_s24 + $0x138] sm:$0xff]   ;;  %v2951_v19 = vld [vmem:[%s3075_s24 + $0x140] sm:$0xff]  }
  0x15   : > { %2777 = vmatmul.mubr.msk.bf16.vlgmr.msra.gmra.mxu0 %vm697_vm0, %v2936_v4  ;;  %2841 = vmatmul.mubr.msk.bf16.vlgmr.msra.gmra.mxu1 %vm697_vm0, %v2937_v5  ;;  %v2952_v20 = vld [vmem:[%s3075_s24 + $0x48] sm:$0xff]   ;;  %v2954_v22 = vld [vmem:[%s3075_s24 + $0x50] sm:$0xff]   ;;  %v2956_v24 = vld [vmem:[%s3075_s24 + $0x58] sm:$0xff]  }
  0x16   : > { %2780 = vmatprep.mubr.msk.bf16.mxu0 %vm697_vm0, %v2938_v6  ;;  %2844 = vmatprep.mubr.msk.bf16.mxu1 %vm697_vm0, %v2939_v7  ;;  %v2953_v21 = vld [vmem:[%s3075_s24 + $0x148] sm:$0xff]   ;;  %v2955_v23 = vld [vmem:[%s3075_s24 + $0x150] sm:$0xff]   ;;  %v2957_v25 = vld [vmem:[%s3075_s24 + $0x158] sm:$0xff]  }
  0x17   : > { %v2958_v26 = vld [vmem:[%s3075_s24 + $0x60] sm:$0xff]   ;;  %v2960_v28 = vld [vmem:[%s3075_s24 + $0x68] sm:$0xff]   ;;  %v2962_v30 = vld [vmem:[%s3075_s24 + $0x70] sm:$0xff]  }
  0x18   : > { %v2959_v27 = vld [vmem:[%s3075_s24 + $0x160] sm:$0xff]   ;;  %v2961_v29 = vld [vmem:[%s3075_s24 + $0x168] sm:$0xff]   ;;  %v2963_v31 = vld [vmem:[%s3075_s24 + $0x170] sm:$0xff]  }
  0x19   : > { %v2964_v32 = vld [vmem:[%s3075_s24 + $0x78] sm:$0xff]   ;;  %v2966_v34 = vld [vmem:[%s3075_s24 + $0x80] sm:$0xff]   ;;  %v2968_v36 = vld [vmem:[%s3075_s24 + $0x88] sm:$0xff]  }
  0x1a   : > { %v2965_v33 = vld [vmem:[%s3075_s24 + $0x178] sm:$0xff]   ;;  %v2967_v35 = vld [vmem:[%s3075_s24 + $0x180] sm:$0xff]   ;;  %v2969_v37 = vld [vmem:[%s3075_s24 + $0x188] sm:$0xff]  }
  0x1b   : > { %v2970_v38 = vld [vmem:[%s3075_s24 + $0x90] sm:$0xff]   ;;  %v2972_v40 = vld [vmem:[%s3075_s24 + $0x98] sm:$0xff]   ;;  %v2974_v42 = vld [vmem:[%s3075_s24 + $0xa0] sm:$0xff]  }
  0x1c   : > { %v2971_v39 = vld [vmem:[%s3075_s24 + $0x190] sm:$0xff]   ;;  %v2973_v41 = vld [vmem:[%s3075_s24 + $0x198] sm:$0xff]   ;;  %v2975_v43 = vld [vmem:[%s3075_s24 + $0x1a0] sm:$0xff]  }
  0x1d   : > { %2781 = vmatmul.mubr.msk.bf16.gmra.mxu0 %vm697_vm0, %v2940_v8  ;;  %2845 = vmatmul.mubr.msk.bf16.gmra.mxu1 %vm697_vm0, %v2941_v9  ;;  %v2976_v44 = vld [vmem:[%s3075_s24 + $0xa8] sm:$0xff]   ;;  %v2978_v46 = vld [vmem:[%s3075_s24 + $0xb0] sm:$0xff]   ;;  %v2980_v48 = vld [vmem:[%s3075_s24 + $0xb8] sm:$0xff]  }
  0x1e   : > { %2784 = vmatprep.mubr.msk.bf16.mxu0 %vm697_vm0, %v2942_v10  ;;  %2848 = vmatprep.mubr.msk.bf16.mxu1 %vm697_vm0, %v2943_v11  ;;  %v2977_v45 = vld [vmem:[%s3075_s24 + $0x1a8] sm:$0xff]   ;;  %v2979_v47 = vld [vmem:[%s3075_s24 + $0x1b0] sm:$0xff]   ;;  %v2981_v49 = vld [vmem:[%s3075_s24 + $0x1b8] sm:$0xff]  }
  0x1f   : > { %v2982_v50 = vld [vmem:[%s3075_s24 + $0xc0] sm:$0xff]   ;;  %v2984_v52 = vld [vmem:[%s3075_s24 + $0xc8] sm:$0xff]   ;;  %v2986_v54 = vld [vmem:[%s3075_s24 + $0xd0] sm:$0xff]  }
  0x20   : > { %v2983_v51 = vld [vmem:[%s3075_s24 + $0x1c0] sm:$0xff]   ;;  %v2985_v53 = vld [vmem:[%s3075_s24 + $0x1c8] sm:$0xff]   ;;  %v2987_v55 = vld [vmem:[%s3075_s24 + $0x1d0] sm:$0xff]  }
  0x21   : > { %v2988_v56 = vld [vmem:[%s3075_s24 + $0xd8] sm:$0xff]   ;;  %v2990_v58 = vld [vmem:[%s3075_s24 + $0xe0] sm:$0xff]   ;;  %v2992_v60 = vld [vmem:[%s3075_s24 + $0xe8] sm:$0xff]  }
  0x22   : > { %v2989_v57 = vld [vmem:[%s3075_s24 + $0x1d8] sm:$0xff]   ;;  %v2991_v59 = vld [vmem:[%s3075_s24 + $0x1e0] sm:$0xff]   ;;  %v2993_v61 = vld [vmem:[%s3075_s24 + $0x1e8] sm:$0xff]  }
  0x23   : > { %v2994_v62 = vld [vmem:[%s3075_s24 + $0xf0] sm:$0xff]   ;;  %v2996_v0 = vld [vmem:[%s3075_s24 + $0xf8] sm:$0xff]   ;;  %v3208_v2 = vld [vmem:[%s3617_s2] ss:$0 sm:$0xff] }
  0x24   : > { %v2995_v63 = vld [vmem:[%s3075_s24 + $0x1f0] sm:$0xff]   ;;  %v2997_v1 = vld [vmem:[%s3075_s24 + $0x1f8] sm:$0xff]  }
  0x25   : > { %2785 = vmatmul.mubr.msk.bf16.gmra.mxu0 %vm697_vm0, %v2944_v12  ;;  %2849 = vmatmul.mubr.msk.bf16.gmra.mxu1 %vm697_vm0, %v2945_v13 }
  0x26   : > { %2788 = vmatprep.mubr.msk.bf16.mxu0 %vm697_vm0, %v2946_v14  ;;  %2852 = vmatprep.mubr.msk.bf16.mxu1 %vm697_vm0, %v2947_v15 }
  0x2d   : > { %2789 = vmatmul.mubr.msk.bf16.gmra.mxu0 %vm697_vm0, %v2948_v16  ;;  %2853 = vmatmul.mubr.msk.bf16.gmra.mxu1 %vm697_vm0, %v2949_v17 }
  0x2e   : > { %2792 = vmatprep.mubr.msk.bf16.mxu0 %vm697_vm0, %v2950_v18  ;;  %2856 = vmatprep.mubr.msk.bf16.mxu1 %vm697_vm0, %v2951_v19 }
  0x35   : > { %2793 = vmatmul.mubr.msk.bf16.gmra.mxu0 %vm697_vm0, %v2952_v20  ;;  %2857 = vmatmul.mubr.msk.bf16.gmra.mxu1 %vm697_vm0, %v2953_v21 }
  0x36   : > { %2796 = vmatprep.mubr.msk.bf16.mxu0 %vm697_vm0, %v2954_v22  ;;  %2860 = vmatprep.mubr.msk.bf16.mxu1 %vm697_vm0, %v2955_v23 }
  0x3d   : > { %2797 = vmatmul.mubr.msk.bf16.gmra.mxu0 %vm697_vm0, %v2956_v24  ;;  %2861 = vmatmul.mubr.msk.bf16.gmra.mxu1 %vm697_vm0, %v2957_v25 }
  0x3e   : > { %2800 = vmatprep.mubr.msk.bf16.mxu0 %vm697_vm0, %v2958_v26  ;;  %2864 = vmatprep.mubr.msk.bf16.mxu1 %vm697_vm0, %v2959_v27 }
  0x45   : > { %2801 = vmatmul.mubr.msk.bf16.gmra.mxu0 %vm697_vm0, %v2960_v28  ;;  %2865 = vmatmul.mubr.msk.bf16.gmra.mxu1 %vm697_vm0, %v2961_v29 }
  0x46   : > { %2804 = vmatprep.mubr.msk.bf16.mxu0 %vm697_vm0, %v2962_v30  ;;  %2868 = vmatprep.mubr.msk.bf16.mxu1 %vm697_vm0, %v2963_v31 }
  0x4d   : > { %2805 = vmatmul.mubr.msk.bf16.gmra.mxu0 %vm697_vm0, %v2964_v32  ;;  %2869 = vmatmul.mubr.msk.bf16.gmra.mxu1 %vm697_vm0, %v2965_v33 }
  0x4e   : > { %2808 = vmatprep.mubr.msk.bf16.mxu0 %vm697_vm0, %v2966_v34  ;;  %2872 = vmatprep.mubr.msk.bf16.mxu1 %vm697_vm0, %v2967_v35 }
  0x55   : > { %2809 = vmatmul.mubr.msk.bf16.gmra.mxu0 %vm697_vm0, %v2968_v36  ;;  %2873 = vmatmul.mubr.msk.bf16.gmra.mxu1 %vm697_vm0, %v2969_v37 }
  0x56   : > { %2812 = vmatprep.mubr.msk.bf16.mxu0 %vm697_vm0, %v2970_v38  ;;  %2876 = vmatprep.mubr.msk.bf16.mxu1 %vm697_vm0, %v2971_v39 }
  0x5d   : > { %2813 = vmatmul.mubr.msk.bf16.gmra.mxu0 %vm697_vm0, %v2972_v40  ;;  %2877 = vmatmul.mubr.msk.bf16.gmra.mxu1 %vm697_vm0, %v2973_v41 }
  0x5e   : > { %2816 = vmatprep.mubr.msk.bf16.mxu0 %vm697_vm0, %v2974_v42  ;;  %2880 = vmatprep.mubr.msk.bf16.mxu1 %vm697_vm0, %v2975_v43 }
  0x65   : > { %2817 = vmatmul.mubr.msk.bf16.gmra.mxu0 %vm697_vm0, %v2976_v44  ;;  %2881 = vmatmul.mubr.msk.bf16.gmra.mxu1 %vm697_vm0, %v2977_v45 }
  0x66   : > { %2820 = vmatprep.mubr.msk.bf16.mxu0 %vm697_vm0, %v2978_v46  ;;  %2884 = vmatprep.mubr.msk.bf16.mxu1 %vm697_vm0, %v2979_v47 }
  0x6d   : > { %2821 = vmatmul.mubr.msk.bf16.gmra.mxu0 %vm697_vm0, %v2980_v48  ;;  %2885 = vmatmul.mubr.msk.bf16.gmra.mxu1 %vm697_vm0, %v2981_v49 }
  0x6e   : > { %2824 = vmatprep.mubr.msk.bf16.mxu0 %vm697_vm0, %v2982_v50  ;;  %2888 = vmatprep.mubr.msk.bf16.mxu1 %vm697_vm0, %v2983_v51 }
  0x75   : > { %2825 = vmatmul.mubr.msk.bf16.gmra.mxu0 %vm697_vm0, %v2984_v52  ;;  %2889 = vmatmul.mubr.msk.bf16.gmra.mxu1 %vm697_vm0, %v2985_v53 }
  0x76   : > { %2828 = vmatprep.mubr.msk.bf16.mxu0 %vm697_vm0, %v2986_v54  ;;  %2892 = vmatprep.mubr.msk.bf16.mxu1 %vm697_vm0, %v2987_v55 }
  0x7d   : > { %2829 = vmatmul.mubr.msk.bf16.gmra.mxu0 %vm697_vm0, %v2988_v56  ;;  %2893 = vmatmul.mubr.msk.bf16.gmra.mxu1 %vm697_vm0, %v2989_v57 }
  0x7e   : > { %2832 = vmatprep.mubr.msk.bf16.mxu0 %vm697_vm0, %v2990_v58  ;;  %2896 = vmatprep.mubr.msk.bf16.mxu1 %vm697_vm0, %v2991_v59 }
  0x85   : > { %2833 = vmatmul.mubr.msk.bf16.gmra.mxu0 %vm697_vm0, %v2992_v60  ;;  %2897 = vmatmul.mubr.msk.bf16.gmra.mxu1 %vm697_vm0, %v2993_v61 }
  0x86   : > { %2836 = vmatprep.mubr.msk.bf16.mxu0 %vm697_vm0, %v2994_v62  ;;  %2900 = vmatprep.mubr.msk.bf16.mxu1 %vm697_vm0, %v2995_v63 }
  0x8d   : > { %2837 = vmatmul.mubr.msk.bf16.gmra.mxu0 %vm697_vm0, %v2996_v0  ;;  %2901 = vmatmul.mubr.msk.bf16.gmra.mxu1 %vm697_vm0, %v2997_v1 }
  0xd5   : > { %v2778_v3 = vpop.f32.mrf.mxu0  ;;  %v2842_v5 = vpop.f32.mrf.mxu1 }
  0xd6   : > { %v933_v4 = vadd.f32 %v2778_v3, %v3208_v2  ;;  %v1189_v6 = vadd.f32 %v2842_v5, %v3208_v2 }
  0xd7   : > { %v924_v7 = vpop.f32.mrf.mxu0  ;;  %v1180_v10 = vpop.f32.mrf.mxu1 }
  0xd8   : > { %v1437_v8 = vmax.f32 %v933_v4, 0.0  ;;  %v925_v9 = vadd.f32 %v3208_v2, %v924_v7  ;;  %v1501_v11 = vmax.f32 %v1189_v6, 0.0  ;;  %v1181_v12 = vadd.f32 %v3208_v2, %v1180_v10 }
  0xd9   : > { %v2779_v13 = vpop.f32.mrf.mxu0  ;;  %v2843_v17 = vpop.f32.mrf.mxu1 }
  0xda   : > { %v2580_v14 = vpack.c.bf16 %v1437_v8, %v1437_v8  ;;  %v1435_v15 = vmax.f32 %v925_v9, 0.0  ;;  %v936_v16 = vadd.f32 %v2779_v13, %v3208_v2  ;;  %v2644_v18 = vpack.c.bf16 %v1501_v11, %v1501_v11 }
  0xdb   : > { %v1499_v19 = vmax.f32 %v1181_v12, 0.0  ;;  %v1192_v20 = vadd.f32 %v2843_v17, %v3208_v2  ;;  %v927_v21 = vpop.f32.mrf.mxu0  ;;  %v1183_v25 = vpop.f32.mrf.mxu1 }
  0xdc   : > { %2078 = vst.msk [vmem:[%s3218_s29 + $0x8] sm:$0xf] %vm2075_vm1, %v2580_v14  ;;  %v2578_v22 = vpack.c.bf16 %v1435_v15, %v1435_v15  ;;  %v1438_v23 = vmax.f32 %v936_v16, 0.0  ;;  %v928_v24 = vadd.f32 %v3208_v2, %v927_v21  ;;  %2142 = vst.msk [vmem:[%s3218_s29 + $0x108] sm:$0xf] %vm2075_vm1, %v2644_v18  ;;  %v1184_v28 = vadd.f32 %v3208_v2, %v1183_v25 }
  0xdd   : > { %v2642_v26 = vpack.c.bf16 %v1499_v19, %v1499_v19  ;;  %v1502_v27 = vmax.f32 %v1192_v20, 0.0  ;;  %v2782_v29 = vpop.f32.mrf.mxu0  ;;  %v2846_v33 = vpop.f32.mrf.mxu1 }
  0xde   : > { %2076 = vst.msk [vmem:[%s3218_s29] sm:$0xf] %vm2075_vm1, %v2578_v22  ;;  %v2581_v30 = vpack.c.bf16 %v1438_v23, %v1438_v23  ;;  %v1436_v31 = vmax.f32 %v928_v24, 0.0  ;;  %v949_v32 = vadd.f32 %v2782_v29, %v3208_v2  ;;  %v1500_v35 = vmax.f32 %v1184_v28, 0.0 }
  0xdf   : > { %2140 = vst.msk [vmem:[%s3218_s29 + $0x100] sm:$0xf] %vm2075_vm1, %v2642_v26  ;;  %v2645_v34 = vpack.c.bf16 %v1502_v27, %v1502_v27  ;;  %v1205_v36 = vadd.f32 %v2846_v33, %v3208_v2  ;;  %v940_v37 = vpop.f32.mrf.mxu0  ;;  %v1196_v41 = vpop.f32.mrf.mxu1 }
  0xe0   : > { %2079 = vst.msk [vmem:[%s3218_s29 + $0xc] sm:$0xf] %vm2075_vm1, %v2581_v30  ;;  %v2579_v38 = vpack.c.bf16 %v1436_v31, %v1436_v31  ;;  %v1441_v39 = vmax.f32 %v949_v32, 0.0  ;;  %v941_v40 = vadd.f32 %v3208_v2, %v940_v37  ;;  %v2643_v42 = vpack.c.bf16 %v1500_v35, %v1500_v35 }
  0xe1   : > { %2143 = vst.msk [vmem:[%s3218_s29 + $0x10c] sm:$0xf] %vm2075_vm1, %v2645_v34  ;;  %v1505_v43 = vmax.f32 %v1205_v36, 0.0  ;;  %v1197_v44 = vadd.f32 %v3208_v2, %v1196_v41  ;;  %v2783_v45 = vpop.f32.mrf.mxu0  ;;  %v2847_v49 = vpop.f32.mrf.mxu1 }
  0xe2   : > { %2077 = vst.msk [vmem:[%s3218_s29 + $0x4] sm:$0xf] %vm2075_vm1, %v2579_v38  ;;  %v2584_v46 = vpack.c.bf16 %v1441_v39, %v1441_v39  ;;  %v1439_v47 = vmax.f32 %v941_v40, 0.0  ;;  %v952_v48 = vadd.f32 %v2783_v45, %v3208_v2  ;;  %2141 = vst.msk [vmem:[%s3218_s29 + $0x104] sm:$0xf] %vm2075_vm1, %v2643_v42  ;;  %v1208_v52 = vadd.f32 %v2847_v49, %v3208_v2 }
  0xe3   : > { %v2648_v50 = vpack.c.bf16 %v1505_v43, %v1505_v43  ;;  %v1503_v51 = vmax.f32 %v1197_v44, 0.0  ;;  %v943_v53 = vpop.f32.mrf.mxu0  ;;  %v1199_v57 = vpop.f32.mrf.mxu1 }
  0xe4   : > { %2082 = vst.msk [vmem:[%s3218_s29 + $0x18] sm:$0xf] %vm2075_vm1, %v2584_v46  ;;  %v2582_v54 = vpack.c.bf16 %v1439_v47, %v1439_v47  ;;  %v1442_v55 = vmax.f32 %v952_v48, 0.0  ;;  %v944_v56 = vadd.f32 %v3208_v2, %v943_v53  ;;  %v1506_v59 = vmax.f32 %v1208_v52, 0.0 }
  0xe5   : > { %2146 = vst.msk [vmem:[%s3218_s29 + $0x118] sm:$0xf] %vm2075_vm1, %v2648_v50  ;;  %v2646_v58 = vpack.c.bf16 %v1503_v51, %v1503_v51  ;;  %v1200_v60 = vadd.f32 %v3208_v2, %v1199_v57  ;;  %v2786_v61 = vpop.f32.mrf.mxu0  ;;  %v2850_v1 = vpop.f32.mrf.mxu1 }
  0xe6   : > { %2080 = vst.msk [vmem:[%s3218_s29 + $0x10] sm:$0xf] %vm2075_vm1, %v2582_v54  ;;  %v2585_v62 = vpack.c.bf16 %v1442_v55, %v1442_v55  ;;  %v1440_v63 = vmax.f32 %v944_v56, 0.0  ;;  %v965_v0 = vadd.f32 %v2786_v61, %v3208_v2  ;;  %v2649_v3 = vpack.c.bf16 %v1506_v59, %v1506_v59 }
  0xe7   : > { %2144 = vst.msk [vmem:[%s3218_s29 + $0x110] sm:$0xf] %vm2075_vm1, %v2646_v58  ;;  %v1504_v4 = vmax.f32 %v1200_v60, 0.0  ;;  %v1221_v5 = vadd.f32 %v2850_v1, %v3208_v2  ;;  %v956_v6 = vpop.f32.mrf.mxu0  ;;  %v1212_v10 = vpop.f32.mrf.mxu1 }
  0xe8   : > { %2083 = vst.msk [vmem:[%s3218_s29 + $0x1c] sm:$0xf] %vm2075_vm1, %v2585_v62  ;;  %v2583_v7 = vpack.c.bf16 %v1440_v63, %v1440_v63  ;;  %v1445_v8 = vmax.f32 %v965_v0, 0.0  ;;  %v957_v9 = vadd.f32 %v3208_v2, %v956_v6  ;;  %2147 = vst.msk [vmem:[%s3218_s29 + $0x11c] sm:$0xf] %vm2075_vm1, %v2649_v3  ;;  %v1213_v13 = vadd.f32 %v3208_v2, %v1212_v10 }
  0xe9   : > { %v2647_v11 = vpack.c.bf16 %v1504_v4, %v1504_v4  ;;  %v1509_v12 = vmax.f32 %v1221_v5, 0.0  ;;  %v2787_v14 = vpop.f32.mrf.mxu0  ;;  %v2851_v18 = vpop.f32.mrf.mxu1 }
  0xea   : > { %2081 = vst.msk [vmem:[%s3218_s29 + $0x14] sm:$0xf] %vm2075_vm1, %v2583_v7  ;;  %v2588_v15 = vpack.c.bf16 %v1445_v8, %v1445_v8  ;;  %v1443_v16 = vmax.f32 %v957_v9, 0.0  ;;  %v968_v17 = vadd.f32 %v2787_v14, %v3208_v2  ;;  %v1507_v20 = vmax.f32 %v1213_v13, 0.0 }
  0xeb   : > { %2145 = vst.msk [vmem:[%s3218_s29 + $0x114] sm:$0xf] %vm2075_vm1, %v2647_v11  ;;  %v2652_v19 = vpack.c.bf16 %v1509_v12, %v1509_v12  ;;  %v1224_v21 = vadd.f32 %v2851_v18, %v3208_v2  ;;  %v959_v22 = vpop.f32.mrf.mxu0  ;;  %v1215_v26 = vpop.f32.mrf.mxu1 }
  0xec   : > { %2086 = vst.msk [vmem:[%s3218_s29 + $0x28] sm:$0xf] %vm2075_vm1, %v2588_v15  ;;  %v2586_v23 = vpack.c.bf16 %v1443_v16, %v1443_v16  ;;  %v1446_v24 = vmax.f32 %v968_v17, 0.0  ;;  %v960_v25 = vadd.f32 %v3208_v2, %v959_v22  ;;  %v2650_v27 = vpack.c.bf16 %v1507_v20, %v1507_v20 }
  0xed   : > { %2150 = vst.msk [vmem:[%s3218_s29 + $0x128] sm:$0xf] %vm2075_vm1, %v2652_v19  ;;  %v1510_v28 = vmax.f32 %v1224_v21, 0.0  ;;  %v1216_v29 = vadd.f32 %v3208_v2, %v1215_v26  ;;  %v2790_v30 = vpop.f32.mrf.mxu0  ;;  %v2854_v34 = vpop.f32.mrf.mxu1 }
  0xee   : > { %2084 = vst.msk [vmem:[%s3218_s29 + $0x20] sm:$0xf] %vm2075_vm1, %v2586_v23  ;;  %v2589_v31 = vpack.c.bf16 %v1446_v24, %v1446_v24  ;;  %v1444_v32 = vmax.f32 %v960_v25, 0.0  ;;  %v981_v33 = vadd.f32 %v2790_v30, %v3208_v2  ;;  %2148 = vst.msk [vmem:[%s3218_s29 + $0x120] sm:$0xf] %vm2075_vm1, %v2650_v27  ;;  %v1237_v37 = vadd.f32 %v2854_v34, %v3208_v2 }
  0xef   : > { %v2653_v35 = vpack.c.bf16 %v1510_v28, %v1510_v28  ;;  %v1508_v36 = vmax.f32 %v1216_v29, 0.0  ;;  %v972_v38 = vpop.f32.mrf.mxu0  ;;  %v1228_v42 = vpop.f32.mrf.mxu1 }
  0xf0   : > { %2087 = vst.msk [vmem:[%s3218_s29 + $0x2c] sm:$0xf] %vm2075_vm1, %v2589_v31  ;;  %v2587_v39 = vpack.c.bf16 %v1444_v32, %v1444_v32  ;;  %v1449_v40 = vmax.f32 %v981_v33, 0.0  ;;  %v973_v41 = vadd.f32 %v3208_v2, %v972_v38  ;;  %v1513_v44 = vmax.f32 %v1237_v37, 0.0 }
  0xf1   : > { %2151 = vst.msk [vmem:[%s3218_s29 + $0x12c] sm:$0xf] %vm2075_vm1, %v2653_v35  ;;  %v2651_v43 = vpack.c.bf16 %v1508_v36, %v1508_v36  ;;  %v1229_v45 = vadd.f32 %v3208_v2, %v1228_v42  ;;  %v2791_v46 = vpop.f32.mrf.mxu0  ;;  %v2855_v50 = vpop.f32.mrf.mxu1 }
  0xf2   : > { %2085 = vst.msk [vmem:[%s3218_s29 + $0x24] sm:$0xf] %vm2075_vm1, %v2587_v39  ;;  %v2592_v47 = vpack.c.bf16 %v1449_v40, %v1449_v40  ;;  %v1447_v48 = vmax.f32 %v973_v41, 0.0  ;;  %v984_v49 = vadd.f32 %v2791_v46, %v3208_v2  ;;  %v2656_v51 = vpack.c.bf16 %v1513_v44, %v1513_v44 }
  0xf3   : > { %2149 = vst.msk [vmem:[%s3218_s29 + $0x124] sm:$0xf] %vm2075_vm1, %v2651_v43  ;;  %v1511_v52 = vmax.f32 %v1229_v45, 0.0  ;;  %v1240_v53 = vadd.f32 %v2855_v50, %v3208_v2  ;;  %v975_v54 = vpop.f32.mrf.mxu0  ;;  %v1231_v58 = vpop.f32.mrf.mxu1 }
  0xf4   : > { %2090 = vst.msk [vmem:[%s3218_s29 + $0x38] sm:$0xf] %vm2075_vm1, %v2592_v47  ;;  %v2590_v55 = vpack.c.bf16 %v1447_v48, %v1447_v48  ;;  %v1450_v56 = vmax.f32 %v984_v49, 0.0  ;;  %v976_v57 = vadd.f32 %v3208_v2, %v975_v54  ;;  %2154 = vst.msk [vmem:[%s3218_s29 + $0x138] sm:$0xf] %vm2075_vm1, %v2656_v51  ;;  %v1232_v61 = vadd.f32 %v3208_v2, %v1231_v58 }
  0xf5   : > { %v2654_v59 = vpack.c.bf16 %v1511_v52, %v1511_v52  ;;  %v1514_v60 = vmax.f32 %v1240_v53, 0.0  ;;  %v2794_v62 = vpop.f32.mrf.mxu0  ;;  %v2858_v3 = vpop.f32.mrf.mxu1 }
  0xf6   : > { %2088 = vst.msk [vmem:[%s3218_s29 + $0x30] sm:$0xf] %vm2075_vm1, %v2590_v55  ;;  %v2593_v63 = vpack.c.bf16 %v1450_v56, %v1450_v56  ;;  %v1448_v0 = vmax.f32 %v976_v57, 0.0  ;;  %v997_v1 = vadd.f32 %v2794_v62, %v3208_v2  ;;  %v1512_v5 = vmax.f32 %v1232_v61, 0.0 }
  0xf7   : > { %2152 = vst.msk [vmem:[%s3218_s29 + $0x130] sm:$0xf] %vm2075_vm1, %v2654_v59  ;;  %v2657_v4 = vpack.c.bf16 %v1514_v60, %v1514_v60  ;;  %v1253_v6 = vadd.f32 %v2858_v3, %v3208_v2  ;;  %v988_v7 = vpop.f32.mrf.mxu0  ;;  %v1244_v11 = vpop.f32.mrf.mxu1 }
  0xf8   : > { %2091 = vst.msk [vmem:[%s3218_s29 + $0x3c] sm:$0xf] %vm2075_vm1, %v2593_v63  ;;  %v2591_v8 = vpack.c.bf16 %v1448_v0, %v1448_v0  ;;  %v1453_v9 = vmax.f32 %v997_v1, 0.0  ;;  %v989_v10 = vadd.f32 %v3208_v2, %v988_v7  ;;  %v2655_v12 = vpack.c.bf16 %v1512_v5, %v1512_v5 }
  0xf9   : > { %2155 = vst.msk [vmem:[%s3218_s29 + $0x13c] sm:$0xf] %vm2075_vm1, %v2657_v4  ;;  %v1517_v13 = vmax.f32 %v1253_v6, 0.0  ;;  %v1245_v14 = vadd.f32 %v3208_v2, %v1244_v11  ;;  %v2795_v15 = vpop.f32.mrf.mxu0  ;;  %v2859_v19 = vpop.f32.mrf.mxu1 }
  0xfa   : > { %2089 = vst.msk [vmem:[%s3218_s29 + $0x34] sm:$0xf] %vm2075_vm1, %v2591_v8  ;;  %v2596_v16 = vpack.c.bf16 %v1453_v9, %v1453_v9  ;;  %v1451_v17 = vmax.f32 %v989_v10, 0.0  ;;  %v1000_v18 = vadd.f32 %v2795_v15, %v3208_v2  ;;  %2153 = vst.msk [vmem:[%s3218_s29 + $0x134] sm:$0xf] %vm2075_vm1, %v2655_v12  ;;  %v1256_v22 = vadd.f32 %v2859_v19, %v3208_v2 }
  0xfb   : > { %v2660_v20 = vpack.c.bf16 %v1517_v13, %v1517_v13  ;;  %v1515_v21 = vmax.f32 %v1245_v14, 0.0  ;;  %v991_v23 = vpop.f32.mrf.mxu0  ;;  %v1247_v27 = vpop.f32.mrf.mxu1 }
  0xfc   : > { %2094 = vst.msk [vmem:[%s3218_s29 + $0x48] sm:$0xf] %vm2075_vm1, %v2596_v16  ;;  %v2594_v24 = vpack.c.bf16 %v1451_v17, %v1451_v17  ;;  %v1454_v25 = vmax.f32 %v1000_v18, 0.0  ;;  %v992_v26 = vadd.f32 %v3208_v2, %v991_v23  ;;  %v1518_v29 = vmax.f32 %v1256_v22, 0.0 }
  0xfd   : > { %2158 = vst.msk [vmem:[%s3218_s29 + $0x148] sm:$0xf] %vm2075_vm1, %v2660_v20  ;;  %v2658_v28 = vpack.c.bf16 %v1515_v21, %v1515_v21  ;;  %v1248_v30 = vadd.f32 %v3208_v2, %v1247_v27  ;;  %v2798_v31 = vpop.f32.mrf.mxu0  ;;  %v2862_v35 = vpop.f32.mrf.mxu1 }
  0xfe   : > { %2092 = vst.msk [vmem:[%s3218_s29 + $0x40] sm:$0xf] %vm2075_vm1, %v2594_v24  ;;  %v2597_v32 = vpack.c.bf16 %v1454_v25, %v1454_v25  ;;  %v1452_v33 = vmax.f32 %v992_v26, 0.0  ;;  %v1013_v34 = vadd.f32 %v2798_v31, %v3208_v2  ;;  %v2661_v36 = vpack.c.bf16 %v1518_v29, %v1518_v29 }
  0xff   : > { %2156 = vst.msk [vmem:[%s3218_s29 + $0x140] sm:$0xf] %vm2075_vm1, %v2658_v28  ;;  %v1516_v37 = vmax.f32 %v1248_v30, 0.0  ;;  %v1269_v38 = vadd.f32 %v2862_v35, %v3208_v2  ;;  %v1004_v39 = vpop.f32.mrf.mxu0  ;;  %v1260_v43 = vpop.f32.mrf.mxu1 }
 0x100   : > { %2095 = vst.msk [vmem:[%s3218_s29 + $0x4c] sm:$0xf] %vm2075_vm1, %v2597_v32  ;;  %v2595_v40 = vpack.c.bf16 %v1452_v33, %v1452_v33  ;;  %v1457_v41 = vmax.f32 %v1013_v34, 0.0  ;;  %v1005_v42 = vadd.f32 %v3208_v2, %v1004_v39  ;;  %2159 = vst.msk [vmem:[%s3218_s29 + $0x14c] sm:$0xf] %vm2075_vm1, %v2661_v36  ;;  %v1261_v46 = vadd.f32 %v3208_v2, %v1260_v43 }
 0x101   : > { %v2659_v44 = vpack.c.bf16 %v1516_v37, %v1516_v37  ;;  %v1521_v45 = vmax.f32 %v1269_v38, 0.0  ;;  %v2799_v47 = vpop.f32.mrf.mxu0  ;;  %v2863_v51 = vpop.f32.mrf.mxu1 }
 0x102   : > { %2093 = vst.msk [vmem:[%s3218_s29 + $0x44] sm:$0xf] %vm2075_vm1, %v2595_v40  ;;  %v2600_v48 = vpack.c.bf16 %v1457_v41, %v1457_v41  ;;  %v1455_v49 = vmax.f32 %v1005_v42, 0.0  ;;  %v1016_v50 = vadd.f32 %v2799_v47, %v3208_v2  ;;  %v1519_v53 = vmax.f32 %v1261_v46, 0.0 }
 0x103   : > { %2157 = vst.msk [vmem:[%s3218_s29 + $0x144] sm:$0xf] %vm2075_vm1, %v2659_v44  ;;  %v2664_v52 = vpack.c.bf16 %v1521_v45, %v1521_v45  ;;  %v1272_v54 = vadd.f32 %v2863_v51, %v3208_v2  ;;  %v1007_v55 = vpop.f32.mrf.mxu0  ;;  %v1263_v59 = vpop.f32.mrf.mxu1 }
 0x104   : > { %2098 = vst.msk [vmem:[%s3218_s29 + $0x58] sm:$0xf] %vm2075_vm1, %v2600_v48  ;;  %v2598_v56 = vpack.c.bf16 %v1455_v49, %v1455_v49  ;;  %v1458_v57 = vmax.f32 %v1016_v50, 0.0  ;;  %v1008_v58 = vadd.f32 %v3208_v2, %v1007_v55  ;;  %v2662_v60 = vpack.c.bf16 %v1519_v53, %v1519_v53 }
 0x105   : > { %2162 = vst.msk [vmem:[%s3218_s29 + $0x158] sm:$0xf] %vm2075_vm1, %v2664_v52  ;;  %v1522_v61 = vmax.f32 %v1272_v54, 0.0  ;;  %v1264_v62 = vadd.f32 %v3208_v2, %v1263_v59  ;;  %v2802_v63 = vpop.f32.mrf.mxu0  ;;  %v2866_v4 = vpop.f32.mrf.mxu1 }
 0x106   : > { %2096 = vst.msk [vmem:[%s3218_s29 + $0x50] sm:$0xf] %vm2075_vm1, %v2598_v56  ;;  %v2601_v0 = vpack.c.bf16 %v1458_v57, %v1458_v57  ;;  %v1456_v1 = vmax.f32 %v1008_v58, 0.0  ;;  %v1029_v3 = vadd.f32 %v2802_v63, %v3208_v2  ;;  %2160 = vst.msk [vmem:[%s3218_s29 + $0x150] sm:$0xf] %vm2075_vm1, %v2662_v60  ;;  %v1285_v7 = vadd.f32 %v2866_v4, %v3208_v2 }
 0x107   : > { %v2665_v5 = vpack.c.bf16 %v1522_v61, %v1522_v61  ;;  %v1520_v6 = vmax.f32 %v1264_v62, 0.0  ;;  %v1020_v8 = vpop.f32.mrf.mxu0  ;;  %v1276_v12 = vpop.f32.mrf.mxu1 }
 0x108   : > { %2099 = vst.msk [vmem:[%s3218_s29 + $0x5c] sm:$0xf] %vm2075_vm1, %v2601_v0  ;;  %v2599_v9 = vpack.c.bf16 %v1456_v1, %v1456_v1  ;;  %v1461_v10 = vmax.f32 %v1029_v3, 0.0  ;;  %v1021_v11 = vadd.f32 %v3208_v2, %v1020_v8  ;;  %v1525_v14 = vmax.f32 %v1285_v7, 0.0 }
 0x109   : > { %2163 = vst.msk [vmem:[%s3218_s29 + $0x15c] sm:$0xf] %vm2075_vm1, %v2665_v5  ;;  %v2663_v13 = vpack.c.bf16 %v1520_v6, %v1520_v6  ;;  %v1277_v15 = vadd.f32 %v3208_v2, %v1276_v12  ;;  %v2803_v16 = vpop.f32.mrf.mxu0  ;;  %v2867_v20 = vpop.f32.mrf.mxu1 }
 0x10a   : > { %2097 = vst.msk [vmem:[%s3218_s29 + $0x54] sm:$0xf] %vm2075_vm1, %v2599_v9  ;;  %v2604_v17 = vpack.c.bf16 %v1461_v10, %v1461_v10  ;;  %v1459_v18 = vmax.f32 %v1021_v11, 0.0  ;;  %v1032_v19 = vadd.f32 %v2803_v16, %v3208_v2  ;;  %v2668_v21 = vpack.c.bf16 %v1525_v14, %v1525_v14 }
 0x10b   : > { %2161 = vst.msk [vmem:[%s3218_s29 + $0x154] sm:$0xf] %vm2075_vm1, %v2663_v13  ;;  %v1523_v22 = vmax.f32 %v1277_v15, 0.0  ;;  %v1288_v23 = vadd.f32 %v2867_v20, %v3208_v2  ;;  %v1023_v24 = vpop.f32.mrf.mxu0  ;;  %v1279_v28 = vpop.f32.mrf.mxu1 }
 0x10c   : > { %2102 = vst.msk [vmem:[%s3218_s29 + $0x68] sm:$0xf] %vm2075_vm1, %v2604_v17  ;;  %v2602_v25 = vpack.c.bf16 %v1459_v18, %v1459_v18  ;;  %v1462_v26 = vmax.f32 %v1032_v19, 0.0  ;;  %v1024_v27 = vadd.f32 %v3208_v2, %v1023_v24  ;;  %2166 = vst.msk [vmem:[%s3218_s29 + $0x168] sm:$0xf] %vm2075_vm1, %v2668_v21  ;;  %v1280_v31 = vadd.f32 %v3208_v2, %v1279_v28 }
 0x10d   : > { %v2666_v29 = vpack.c.bf16 %v1523_v22, %v1523_v22  ;;  %v1526_v30 = vmax.f32 %v1288_v23, 0.0  ;;  %v2806_v32 = vpop.f32.mrf.mxu0  ;;  %v2870_v36 = vpop.f32.mrf.mxu1 }
 0x10e   : > { %2100 = vst.msk [vmem:[%s3218_s29 + $0x60] sm:$0xf] %vm2075_vm1, %v2602_v25  ;;  %v2605_v33 = vpack.c.bf16 %v1462_v26, %v1462_v26  ;;  %v1460_v34 = vmax.f32 %v1024_v27, 0.0  ;;  %v1045_v35 = vadd.f32 %v2806_v32, %v3208_v2  ;;  %v1524_v38 = vmax.f32 %v1280_v31, 0.0 }
 0x10f   : > { %2164 = vst.msk [vmem:[%s3218_s29 + $0x160] sm:$0xf] %vm2075_vm1, %v2666_v29  ;;  %v2669_v37 = vpack.c.bf16 %v1526_v30, %v1526_v30  ;;  %v1301_v39 = vadd.f32 %v2870_v36, %v3208_v2  ;;  %v1036_v40 = vpop.f32.mrf.mxu0  ;;  %v1292_v44 = vpop.f32.mrf.mxu1 }
 0x110   : > { %2103 = vst.msk [vmem:[%s3218_s29 + $0x6c] sm:$0xf] %vm2075_vm1, %v2605_v33  ;;  %v2603_v41 = vpack.c.bf16 %v1460_v34, %v1460_v34  ;;  %v1465_v42 = vmax.f32 %v1045_v35, 0.0  ;;  %v1037_v43 = vadd.f32 %v3208_v2, %v1036_v40  ;;  %v2667_v45 = vpack.c.bf16 %v1524_v38, %v1524_v38 }
 0x111   : > { %2167 = vst.msk [vmem:[%s3218_s29 + $0x16c] sm:$0xf] %vm2075_vm1, %v2669_v37  ;;  %v1529_v46 = vmax.f32 %v1301_v39, 0.0  ;;  %v1293_v47 = vadd.f32 %v3208_v2, %v1292_v44  ;;  %v2807_v48 = vpop.f32.mrf.mxu0  ;;  %v2871_v52 = vpop.f32.mrf.mxu1 }
 0x112   : > { %2101 = vst.msk [vmem:[%s3218_s29 + $0x64] sm:$0xf] %vm2075_vm1, %v2603_v41  ;;  %v2608_v49 = vpack.c.bf16 %v1465_v42, %v1465_v42  ;;  %v1463_v50 = vmax.f32 %v1037_v43, 0.0  ;;  %v1048_v51 = vadd.f32 %v2807_v48, %v3208_v2  ;;  %2165 = vst.msk [vmem:[%s3218_s29 + $0x164] sm:$0xf] %vm2075_vm1, %v2667_v45  ;;  %v1304_v55 = vadd.f32 %v2871_v52, %v3208_v2 }
 0x113   : > { %v2672_v53 = vpack.c.bf16 %v1529_v46, %v1529_v46  ;;  %v1527_v54 = vmax.f32 %v1293_v47, 0.0  ;;  %v1039_v56 = vpop.f32.mrf.mxu0  ;;  %v1295_v60 = vpop.f32.mrf.mxu1 }
 0x114   : > { %2106 = vst.msk [vmem:[%s3218_s29 + $0x78] sm:$0xf] %vm2075_vm1, %v2608_v49  ;;  %v2606_v57 = vpack.c.bf16 %v1463_v50, %v1463_v50  ;;  %v1466_v58 = vmax.f32 %v1048_v51, 0.0  ;;  %v1040_v59 = vadd.f32 %v3208_v2, %v1039_v56  ;;  %v1530_v62 = vmax.f32 %v1304_v55, 0.0 }
 0x115   : > { %2170 = vst.msk [vmem:[%s3218_s29 + $0x178] sm:$0xf] %vm2075_vm1, %v2672_v53  ;;  %v2670_v61 = vpack.c.bf16 %v1527_v54, %v1527_v54  ;;  %v1296_v63 = vadd.f32 %v3208_v2, %v1295_v60  ;;  %v2810_v0 = vpop.f32.mrf.mxu0  ;;  %v2874_v5 = vpop.f32.mrf.mxu1 }
 0x116   : > { %2104 = vst.msk [vmem:[%s3218_s29 + $0x70] sm:$0xf] %vm2075_vm1, %v2606_v57  ;;  %v2609_v1 = vpack.c.bf16 %v1466_v58, %v1466_v58  ;;  %v1464_v3 = vmax.f32 %v1040_v59, 0.0  ;;  %v1061_v4 = vadd.f32 %v2810_v0, %v3208_v2  ;;  %v2673_v6 = vpack.c.bf16 %v1530_v62, %v1530_v62 }
 0x117   : > { %2168 = vst.msk [vmem:[%s3218_s29 + $0x170] sm:$0xf] %vm2075_vm1, %v2670_v61  ;;  %v1528_v7 = vmax.f32 %v1296_v63, 0.0  ;;  %v1317_v8 = vadd.f32 %v2874_v5, %v3208_v2  ;;  %v1052_v9 = vpop.f32.mrf.mxu0  ;;  %v1308_v13 = vpop.f32.mrf.mxu1 }
 0x118   : > { %2107 = vst.msk [vmem:[%s3218_s29 + $0x7c] sm:$0xf] %vm2075_vm1, %v2609_v1  ;;  %v2607_v10 = vpack.c.bf16 %v1464_v3, %v1464_v3  ;;  %v1469_v11 = vmax.f32 %v1061_v4, 0.0  ;;  %v1053_v12 = vadd.f32 %v3208_v2, %v1052_v9  ;;  %2171 = vst.msk [vmem:[%s3218_s29 + $0x17c] sm:$0xf] %vm2075_vm1, %v2673_v6  ;;  %v1309_v16 = vadd.f32 %v3208_v2, %v1308_v13 }
 0x119   : > { %v2671_v14 = vpack.c.bf16 %v1528_v7, %v1528_v7  ;;  %v1533_v15 = vmax.f32 %v1317_v8, 0.0  ;;  %v2811_v17 = vpop.f32.mrf.mxu0  ;;  %v2875_v21 = vpop.f32.mrf.mxu1 }
 0x11a   : > { %2105 = vst.msk [vmem:[%s3218_s29 + $0x74] sm:$0xf] %vm2075_vm1, %v2607_v10  ;;  %v2612_v18 = vpack.c.bf16 %v1469_v11, %v1469_v11  ;;  %v1467_v19 = vmax.f32 %v1053_v12, 0.0  ;;  %v1064_v20 = vadd.f32 %v2811_v17, %v3208_v2  ;;  %v1531_v23 = vmax.f32 %v1309_v16, 0.0 }
 0x11b   : > { %2169 = vst.msk [vmem:[%s3218_s29 + $0x174] sm:$0xf] %vm2075_vm1, %v2671_v14  ;;  %v2676_v22 = vpack.c.bf16 %v1533_v15, %v1533_v15  ;;  %v1320_v24 = vadd.f32 %v2875_v21, %v3208_v2  ;;  %v1055_v25 = vpop.f32.mrf.mxu0  ;;  %v1311_v29 = vpop.f32.mrf.mxu1 }
 0x11c   : > { %2110 = vst.msk [vmem:[%s3218_s29 + $0x88] sm:$0xf] %vm2075_vm1, %v2612_v18  ;;  %v2610_v26 = vpack.c.bf16 %v1467_v19, %v1467_v19  ;;  %v1470_v27 = vmax.f32 %v1064_v20, 0.0  ;;  %v1056_v28 = vadd.f32 %v3208_v2, %v1055_v25  ;;  %v2674_v30 = vpack.c.bf16 %v1531_v23, %v1531_v23 }
 0x11d   : > { %2174 = vst.msk [vmem:[%s3218_s29 + $0x188] sm:$0xf] %vm2075_vm1, %v2676_v22  ;;  %v1534_v31 = vmax.f32 %v1320_v24, 0.0  ;;  %v1312_v32 = vadd.f32 %v3208_v2, %v1311_v29  ;;  %v2814_v33 = vpop.f32.mrf.mxu0  ;;  %v2878_v37 = vpop.f32.mrf.mxu1 }
 0x11e   : > { %2108 = vst.msk [vmem:[%s3218_s29 + $0x80] sm:$0xf] %vm2075_vm1, %v2610_v26  ;;  %v2613_v34 = vpack.c.bf16 %v1470_v27, %v1470_v27  ;;  %v1468_v35 = vmax.f32 %v1056_v28, 0.0  ;;  %v1077_v36 = vadd.f32 %v2814_v33, %v3208_v2  ;;  %2172 = vst.msk [vmem:[%s3218_s29 + $0x180] sm:$0xf] %vm2075_vm1, %v2674_v30  ;;  %v1333_v40 = vadd.f32 %v2878_v37, %v3208_v2 }
 0x11f   : > { %v2677_v38 = vpack.c.bf16 %v1534_v31, %v1534_v31  ;;  %v1532_v39 = vmax.f32 %v1312_v32, 0.0  ;;  %v1068_v41 = vpop.f32.mrf.mxu0  ;;  %v1324_v45 = vpop.f32.mrf.mxu1 }
 0x120   : > { %2111 = vst.msk [vmem:[%s3218_s29 + $0x8c] sm:$0xf] %vm2075_vm1, %v2613_v34  ;;  %v2611_v42 = vpack.c.bf16 %v1468_v35, %v1468_v35  ;;  %v1473_v43 = vmax.f32 %v1077_v36, 0.0  ;;  %v1069_v44 = vadd.f32 %v3208_v2, %v1068_v41  ;;  %v1537_v47 = vmax.f32 %v1333_v40, 0.0 }
 0x121   : > { %2175 = vst.msk [vmem:[%s3218_s29 + $0x18c] sm:$0xf] %vm2075_vm1, %v2677_v38  ;;  %v2675_v46 = vpack.c.bf16 %v1532_v39, %v1532_v39  ;;  %v1325_v48 = vadd.f32 %v3208_v2, %v1324_v45  ;;  %v2815_v49 = vpop.f32.mrf.mxu0  ;;  %v2879_v53 = vpop.f32.mrf.mxu1 }
 0x122   : > { %2109 = vst.msk [vmem:[%s3218_s29 + $0x84] sm:$0xf] %vm2075_vm1, %v2611_v42  ;;  %v2616_v50 = vpack.c.bf16 %v1473_v43, %v1473_v43  ;;  %v1471_v51 = vmax.f32 %v1069_v44, 0.0  ;;  %v1080_v52 = vadd.f32 %v2815_v49, %v3208_v2  ;;  %v2680_v54 = vpack.c.bf16 %v1537_v47, %v1537_v47 }
 0x123   : > { %2173 = vst.msk [vmem:[%s3218_s29 + $0x184] sm:$0xf] %vm2075_vm1, %v2675_v46  ;;  %v1535_v55 = vmax.f32 %v1325_v48, 0.0  ;;  %v1336_v56 = vadd.f32 %v2879_v53, %v3208_v2  ;;  %v1071_v57 = vpop.f32.mrf.mxu0  ;;  %v1327_v61 = vpop.f32.mrf.mxu1 }
 0x124   : > { %2114 = vst.msk [vmem:[%s3218_s29 + $0x98] sm:$0xf] %vm2075_vm1, %v2616_v50  ;;  %v2614_v58 = vpack.c.bf16 %v1471_v51, %v1471_v51  ;;  %v1474_v59 = vmax.f32 %v1080_v52, 0.0  ;;  %v1072_v60 = vadd.f32 %v3208_v2, %v1071_v57  ;;  %2178 = vst.msk [vmem:[%s3218_s29 + $0x198] sm:$0xf] %vm2075_vm1, %v2680_v54  ;;  %v1328_v0 = vadd.f32 %v3208_v2, %v1327_v61 }
 0x125   : > { %v2678_v62 = vpack.c.bf16 %v1535_v55, %v1535_v55  ;;  %v1538_v63 = vmax.f32 %v1336_v56, 0.0  ;;  %v2818_v1 = vpop.f32.mrf.mxu0  ;;  %v2882_v6 = vpop.f32.mrf.mxu1 }
 0x126   : > { %2112 = vst.msk [vmem:[%s3218_s29 + $0x90] sm:$0xf] %vm2075_vm1, %v2614_v58  ;;  %v2617_v3 = vpack.c.bf16 %v1474_v59, %v1474_v59  ;;  %v1472_v4 = vmax.f32 %v1072_v60, 0.0  ;;  %v1093_v5 = vadd.f32 %v2818_v1, %v3208_v2  ;;  %v1536_v8 = vmax.f32 %v1328_v0, 0.0 }
 0x127   : > { %2176 = vst.msk [vmem:[%s3218_s29 + $0x190] sm:$0xf] %vm2075_vm1, %v2678_v62  ;;  %v2681_v7 = vpack.c.bf16 %v1538_v63, %v1538_v63  ;;  %v1349_v9 = vadd.f32 %v2882_v6, %v3208_v2  ;;  %v1084_v10 = vpop.f32.mrf.mxu0  ;;  %v1340_v14 = vpop.f32.mrf.mxu1 }
 0x128   : > { %2115 = vst.msk [vmem:[%s3218_s29 + $0x9c] sm:$0xf] %vm2075_vm1, %v2617_v3  ;;  %v2615_v11 = vpack.c.bf16 %v1472_v4, %v1472_v4  ;;  %v1477_v12 = vmax.f32 %v1093_v5, 0.0  ;;  %v1085_v13 = vadd.f32 %v3208_v2, %v1084_v10  ;;  %v2679_v15 = vpack.c.bf16 %v1536_v8, %v1536_v8 }
 0x129   : > { %2179 = vst.msk [vmem:[%s3218_s29 + $0x19c] sm:$0xf] %vm2075_vm1, %v2681_v7  ;;  %v1541_v16 = vmax.f32 %v1349_v9, 0.0  ;;  %v1341_v17 = vadd.f32 %v3208_v2, %v1340_v14  ;;  %v2819_v18 = vpop.f32.mrf.mxu0  ;;  %v2883_v22 = vpop.f32.mrf.mxu1 }
 0x12a   : > { %2113 = vst.msk [vmem:[%s3218_s29 + $0x94] sm:$0xf] %vm2075_vm1, %v2615_v11  ;;  %v2620_v19 = vpack.c.bf16 %v1477_v12, %v1477_v12  ;;  %v1475_v20 = vmax.f32 %v1085_v13, 0.0  ;;  %v1096_v21 = vadd.f32 %v2819_v18, %v3208_v2  ;;  %2177 = vst.msk [vmem:[%s3218_s29 + $0x194] sm:$0xf] %vm2075_vm1, %v2679_v15  ;;  %v1352_v25 = vadd.f32 %v2883_v22, %v3208_v2 }
 0x12b   : > { %v2684_v23 = vpack.c.bf16 %v1541_v16, %v1541_v16  ;;  %v1539_v24 = vmax.f32 %v1341_v17, 0.0  ;;  %v1087_v26 = vpop.f32.mrf.mxu0  ;;  %v1343_v30 = vpop.f32.mrf.mxu1 }
 0x12c   : > { %2118 = vst.msk [vmem:[%s3218_s29 + $0xa8] sm:$0xf] %vm2075_vm1, %v2620_v19  ;;  %v2618_v27 = vpack.c.bf16 %v1475_v20, %v1475_v20  ;;  %v1478_v28 = vmax.f32 %v1096_v21, 0.0  ;;  %v1088_v29 = vadd.f32 %v3208_v2, %v1087_v26  ;;  %v1542_v32 = vmax.f32 %v1352_v25, 0.0 }
 0x12d   : > { %2182 = vst.msk [vmem:[%s3218_s29 + $0x1a8] sm:$0xf] %vm2075_vm1, %v2684_v23  ;;  %v2682_v31 = vpack.c.bf16 %v1539_v24, %v1539_v24  ;;  %v1344_v33 = vadd.f32 %v3208_v2, %v1343_v30  ;;  %v2822_v34 = vpop.f32.mrf.mxu0  ;;  %v2886_v38 = vpop.f32.mrf.mxu1 }
 0x12e   : > { %2116 = vst.msk [vmem:[%s3218_s29 + $0xa0] sm:$0xf] %vm2075_vm1, %v2618_v27  ;;  %v2621_v35 = vpack.c.bf16 %v1478_v28, %v1478_v28  ;;  %v1476_v36 = vmax.f32 %v1088_v29, 0.0  ;;  %v1109_v37 = vadd.f32 %v2822_v34, %v3208_v2  ;;  %v2685_v39 = vpack.c.bf16 %v1542_v32, %v1542_v32 }
 0x12f   : > { %2180 = vst.msk [vmem:[%s3218_s29 + $0x1a0] sm:$0xf] %vm2075_vm1, %v2682_v31  ;;  %v1540_v40 = vmax.f32 %v1344_v33, 0.0  ;;  %v1365_v41 = vadd.f32 %v2886_v38, %v3208_v2  ;;  %v1100_v42 = vpop.f32.mrf.mxu0  ;;  %v1356_v46 = vpop.f32.mrf.mxu1  ;;  %v3522_v38 = vld [vmem:[%s3617_s2] ss:$0 sm:$0xff] }
 0x130   : > { %2119 = vst.msk [vmem:[%s3218_s29 + $0xac] sm:$0xf] %vm2075_vm1, %v2621_v35  ;;  %v2619_v43 = vpack.c.bf16 %v1476_v36, %v1476_v36  ;;  %v1481_v44 = vmax.f32 %v1109_v37, 0.0  ;;  %v1101_v45 = vadd.f32 %v3208_v2, %v1100_v42  ;;  %2183 = vst.msk [vmem:[%s3218_s29 + $0x1ac] sm:$0xf] %vm2075_vm1, %v2685_v39  ;;  %v1357_v49 = vadd.f32 %v3208_v2, %v1356_v46 }
 0x131   : > { %v2683_v47 = vpack.c.bf16 %v1540_v40, %v1540_v40  ;;  %v1545_v48 = vmax.f32 %v1365_v41, 0.0  ;;  %v2823_v50 = vpop.f32.mrf.mxu0  ;;  %v2887_v54 = vpop.f32.mrf.mxu1 }
 0x132   : > { %2117 = vst.msk [vmem:[%s3218_s29 + $0xa4] sm:$0xf] %vm2075_vm1, %v2619_v43  ;;  %v2624_v51 = vpack.c.bf16 %v1481_v44, %v1481_v44  ;;  %v1479_v52 = vmax.f32 %v1101_v45, 0.0  ;;  %v1112_v53 = vadd.f32 %v2823_v50, %v3208_v2  ;;  %v1543_v56 = vmax.f32 %v1357_v49, 0.0 }
 0x133   : > { %2181 = vst.msk [vmem:[%s3218_s29 + $0x1a4] sm:$0xf] %vm2075_vm1, %v2683_v47  ;;  %v2688_v55 = vpack.c.bf16 %v1545_v48, %v1545_v48  ;;  %v1368_v57 = vadd.f32 %v2887_v54, %v3208_v2  ;;  %v1103_v58 = vpop.f32.mrf.mxu0  ;;  %v1359_v62 = vpop.f32.mrf.mxu1 }
 0x134   : > { %2122 = vst.msk [vmem:[%s3218_s29 + $0xb8] sm:$0xf] %vm2075_vm1, %v2624_v51  ;;  %v2622_v59 = vpack.c.bf16 %v1479_v52, %v1479_v52  ;;  %v1482_v60 = vmax.f32 %v1112_v53, 0.0  ;;  %v1104_v61 = vadd.f32 %v3208_v2, %v1103_v58  ;;  %v2686_v63 = vpack.c.bf16 %v1543_v56, %v1543_v56 }
 0x135   : > { %2186 = vst.msk [vmem:[%s3218_s29 + $0x1b8] sm:$0xf] %vm2075_vm1, %v2688_v55  ;;  %v1546_v0 = vmax.f32 %v1368_v57, 0.0  ;;  %v1360_v1 = vadd.f32 %v3208_v2, %v1359_v62  ;;  %v2826_v3 = vpop.f32.mrf.mxu0  ;;  %v2890_v7 = vpop.f32.mrf.mxu1 }
 0x136   : > { %2120 = vst.msk [vmem:[%s3218_s29 + $0xb0] sm:$0xf] %vm2075_vm1, %v2622_v59  ;;  %v2625_v4 = vpack.c.bf16 %v1482_v60, %v1482_v60  ;;  %v1480_v5 = vmax.f32 %v1104_v61, 0.0  ;;  %v1125_v6 = vadd.f32 %v2826_v3, %v3208_v2  ;;  %2184 = vst.msk [vmem:[%s3218_s29 + $0x1b0] sm:$0xf] %vm2075_vm1, %v2686_v63  ;;  %v1381_v10 = vadd.f32 %v2890_v7, %v3208_v2 }
 0x137   : > { %v2689_v8 = vpack.c.bf16 %v1546_v0, %v1546_v0  ;;  %v1544_v9 = vmax.f32 %v1360_v1, 0.0  ;;  %v1116_v11 = vpop.f32.mrf.mxu0  ;;  %v1372_v15 = vpop.f32.mrf.mxu1 }
 0x138   : > { %2123 = vst.msk [vmem:[%s3218_s29 + $0xbc] sm:$0xf] %vm2075_vm1, %v2625_v4  ;;  %v2623_v12 = vpack.c.bf16 %v1480_v5, %v1480_v5  ;;  %v1485_v13 = vmax.f32 %v1125_v6, 0.0  ;;  %v1117_v14 = vadd.f32 %v3208_v2, %v1116_v11  ;;  %v1549_v17 = vmax.f32 %v1381_v10, 0.0 }
 0x139   : > { %2187 = vst.msk [vmem:[%s3218_s29 + $0x1bc] sm:$0xf] %vm2075_vm1, %v2689_v8  ;;  %v2687_v16 = vpack.c.bf16 %v1544_v9, %v1544_v9  ;;  %v1373_v18 = vadd.f32 %v3208_v2, %v1372_v15  ;;  %v2827_v19 = vpop.f32.mrf.mxu0  ;;  %v2891_v23 = vpop.f32.mrf.mxu1 }
 0x13a   : > { %2121 = vst.msk [vmem:[%s3218_s29 + $0xb4] sm:$0xf] %vm2075_vm1, %v2623_v12  ;;  %v2628_v20 = vpack.c.bf16 %v1485_v13, %v1485_v13  ;;  %v1483_v21 = vmax.f32 %v1117_v14, 0.0  ;;  %v1128_v22 = vadd.f32 %v2827_v19, %v3208_v2  ;;  %v2692_v24 = vpack.c.bf16 %v1549_v17, %v1549_v17 }
 0x13b   : > { %2185 = vst.msk [vmem:[%s3218_s29 + $0x1b4] sm:$0xf] %vm2075_vm1, %v2687_v16  ;;  %v1547_v25 = vmax.f32 %v1373_v18, 0.0  ;;  %v1384_v26 = vadd.f32 %v2891_v23, %v3208_v2  ;;  %v1119_v27 = vpop.f32.mrf.mxu0  ;;  %v1375_v31 = vpop.f32.mrf.mxu1 }
 0x13c   : > { %2126 = vst.msk [vmem:[%s3218_s29 + $0xc8] sm:$0xf] %vm2075_vm1, %v2628_v20  ;;  %v2626_v28 = vpack.c.bf16 %v1483_v21, %v1483_v21  ;;  %v1486_v29 = vmax.f32 %v1128_v22, 0.0  ;;  %v1120_v30 = vadd.f32 %v3208_v2, %v1119_v27  ;;  %2190 = vst.msk [vmem:[%s3218_s29 + $0x1c8] sm:$0xf] %vm2075_vm1, %v2692_v24  ;;  %v1376_v34 = vadd.f32 %v3208_v2, %v1375_v31 }
 0x13d   : > { %v2690_v32 = vpack.c.bf16 %v1547_v25, %v1547_v25  ;;  %v1550_v33 = vmax.f32 %v1384_v26, 0.0  ;;  %v2830_v35 = vpop.f32.mrf.mxu0  ;;  %v2894_v40 = vpop.f32.mrf.mxu1 }
 0x13e   : > { %2124 = vst.msk [vmem:[%s3218_s29 + $0xc0] sm:$0xf] %vm2075_vm1, %v2626_v28  ;;  %v2629_v36 = vpack.c.bf16 %v1486_v29, %v1486_v29  ;;  %v1484_v37 = vmax.f32 %v1120_v30, 0.0  ;;  %v1141_v39 = vadd.f32 %v3522_v38, %v2830_v35  ;;  %v1548_v42 = vmax.f32 %v1376_v34, 0.0 }
 0x13f   : > { %2188 = vst.msk [vmem:[%s3218_s29 + $0x1c0] sm:$0xf] %vm2075_vm1, %v2690_v32  ;;  %v2693_v41 = vpack.c.bf16 %v1550_v33, %v1550_v33  ;;  %v1397_v2 = vadd.f32 %v3522_v38, %v2894_v40  ;;  %v1132_v43 = vpop.f32.mrf.mxu0  ;;  %v1388_v47 = vpop.f32.mrf.mxu1 }
 0x140   : > { %2127 = vst.msk [vmem:[%s3218_s29 + $0xcc] sm:$0xf] %vm2075_vm1, %v2629_v36  ;;  %v2627_v44 = vpack.c.bf16 %v1484_v37, %v1484_v37  ;;  %v1489_v45 = vmax.f32 %v1141_v39, 0.0  ;;  %v1133_v46 = vadd.f32 %v3522_v38, %v1132_v43  ;;  %v2691_v48 = vpack.c.bf16 %v1548_v42, %v1548_v42 }
 0x141   : > { %2191 = vst.msk [vmem:[%s3218_s29 + $0x1cc] sm:$0xf] %vm2075_vm1, %v2693_v41  ;;  %v1553_v49 = vmax.f32 %v1397_v2, 0.0  ;;  %v1389_v50 = vadd.f32 %v3522_v38, %v1388_v47  ;;  %v2831_v51 = vpop.f32.mrf.mxu0  ;;  %v2895_v55 = vpop.f32.mrf.mxu1 }
 0x142   : > { %2125 = vst.msk [vmem:[%s3218_s29 + $0xc4] sm:$0xf] %vm2075_vm1, %v2627_v44  ;;  %v2632_v52 = vpack.c.bf16 %v1489_v45, %v1489_v45  ;;  %v1487_v53 = vmax.f32 %v1133_v46, 0.0  ;;  %v1144_v54 = vadd.f32 %v3522_v38, %v2831_v51  ;;  %2189 = vst.msk [vmem:[%s3218_s29 + $0x1c4] sm:$0xf] %vm2075_vm1, %v2691_v48  ;;  %v1400_v58 = vadd.f32 %v3522_v38, %v2895_v55 }
 0x143   : > { %v2696_v56 = vpack.c.bf16 %v1553_v49, %v1553_v49  ;;  %v1551_v57 = vmax.f32 %v1389_v50, 0.0  ;;  %v1135_v59 = vpop.f32.mrf.mxu0  ;;  %v1391_v63 = vpop.f32.mrf.mxu1 }
 0x144   : > { %2130 = vst.msk [vmem:[%s3218_s29 + $0xd8] sm:$0xf] %vm2075_vm1, %v2632_v52  ;;  %v2630_v60 = vpack.c.bf16 %v1487_v53, %v1487_v53  ;;  %v1490_v61 = vmax.f32 %v1144_v54, 0.0  ;;  %v1136_v62 = vadd.f32 %v3522_v38, %v1135_v59  ;;  %v1554_v1 = vmax.f32 %v1400_v58, 0.0 }
 0x145   : > { %2194 = vst.msk [vmem:[%s3218_s29 + $0x1d8] sm:$0xf] %vm2075_vm1, %v2696_v56  ;;  %v2694_v0 = vpack.c.bf16 %v1551_v57, %v1551_v57  ;;  %v1392_v3 = vadd.f32 %v3522_v38, %v1391_v63  ;;  %v2834_v4 = vpop.f32.mrf.mxu0  ;;  %v2898_v8 = vpop.f32.mrf.mxu1 }
 0x146   : > { %2128 = vst.msk [vmem:[%s3218_s29 + $0xd0] sm:$0xf] %vm2075_vm1, %v2630_v60  ;;  %v2633_v5 = vpack.c.bf16 %v1490_v61, %v1490_v61  ;;  %v1488_v6 = vmax.f32 %v1136_v62, 0.0  ;;  %v1157_v7 = vadd.f32 %v3522_v38, %v2834_v4  ;;  %v2697_v9 = vpack.c.bf16 %v1554_v1, %v1554_v1 }
 0x147   : > { %2192 = vst.msk [vmem:[%s3218_s29 + $0x1d0] sm:$0xf] %vm2075_vm1, %v2694_v0  ;;  %v1552_v10 = vmax.f32 %v1392_v3, 0.0  ;;  %v1413_v11 = vadd.f32 %v3522_v38, %v2898_v8  ;;  %v1148_v12 = vpop.f32.mrf.mxu0  ;;  %v1404_v16 = vpop.f32.mrf.mxu1 }
 0x148   : > { %2131 = vst.msk [vmem:[%s3218_s29 + $0xdc] sm:$0xf] %vm2075_vm1, %v2633_v5  ;;  %v2631_v13 = vpack.c.bf16 %v1488_v6, %v1488_v6  ;;  %v1493_v14 = vmax.f32 %v1157_v7, 0.0  ;;  %v1149_v15 = vadd.f32 %v3522_v38, %v1148_v12  ;;  %2195 = vst.msk [vmem:[%s3218_s29 + $0x1dc] sm:$0xf] %vm2075_vm1, %v2697_v9  ;;  %v1405_v19 = vadd.f32 %v3522_v38, %v1404_v16 }
 0x149   : > { %v2695_v17 = vpack.c.bf16 %v1552_v10, %v1552_v10  ;;  %v1557_v18 = vmax.f32 %v1413_v11, 0.0  ;;  %v2835_v20 = vpop.f32.mrf.mxu0  ;;  %v2899_v24 = vpop.f32.mrf.mxu1 }
 0x14a   : > { %2129 = vst.msk [vmem:[%s3218_s29 + $0xd4] sm:$0xf] %vm2075_vm1, %v2631_v13  ;;  %v2636_v21 = vpack.c.bf16 %v1493_v14, %v1493_v14  ;;  %v1491_v22 = vmax.f32 %v1149_v15, 0.0  ;;  %v1160_v23 = vadd.f32 %v3522_v38, %v2835_v20  ;;  %v1555_v26 = vmax.f32 %v1405_v19, 0.0 }
 0x14b   : > { %2193 = vst.msk [vmem:[%s3218_s29 + $0x1d4] sm:$0xf] %vm2075_vm1, %v2695_v17  ;;  %v2700_v25 = vpack.c.bf16 %v1557_v18, %v1557_v18  ;;  %v1416_v27 = vadd.f32 %v3522_v38, %v2899_v24  ;;  %v1151_v28 = vpop.f32.mrf.mxu0  ;;  %v1407_v32 = vpop.f32.mrf.mxu1 }
 0x14c   : > { %2134 = vst.msk [vmem:[%s3218_s29 + $0xe8] sm:$0xf] %vm2075_vm1, %v2636_v21  ;;  %v2634_v29 = vpack.c.bf16 %v1491_v22, %v1491_v22  ;;  %v1494_v30 = vmax.f32 %v1160_v23, 0.0  ;;  %v1152_v31 = vadd.f32 %v3522_v38, %v1151_v28  ;;  %v2698_v33 = vpack.c.bf16 %v1555_v26, %v1555_v26 }
 0x14d   : > { %2198 = vst.msk [vmem:[%s3218_s29 + $0x1e8] sm:$0xf] %vm2075_vm1, %v2700_v25  ;;  %v1558_v34 = vmax.f32 %v1416_v27, 0.0  ;;  %v1408_v35 = vadd.f32 %v3522_v38, %v1407_v32  ;;  %v2838_v36 = vpop.f32.mrf.mxu0  ;;  %v2902_v41 = vpop.f32.mrf.mxu1 }
 0x14e   : > { %2132 = vst.msk [vmem:[%s3218_s29 + $0xe0] sm:$0xf] %vm2075_vm1, %v2634_v29  ;;  %v2637_v37 = vpack.c.bf16 %v1494_v30, %v1494_v30  ;;  %v1492_v39 = vmax.f32 %v1152_v31, 0.0  ;;  %v1173_v40 = vadd.f32 %v3522_v38, %v2838_v36  ;;  %2196 = vst.msk [vmem:[%s3218_s29 + $0x1e0] sm:$0xf] %vm2075_vm1, %v2698_v33  ;;  %v1429_v43 = vadd.f32 %v3522_v38, %v2902_v41 }
 0x14f   : > { %v2701_v42 = vpack.c.bf16 %v1558_v34, %v1558_v34  ;;  %v1556_v2 = vmax.f32 %v1408_v35, 0.0  ;;  %v1164_v44 = vpop.f32.mrf.mxu0  ;;  %v1420_v48 = vpop.f32.mrf.mxu1 }
 0x150   : > { %2135 = vst.msk [vmem:[%s3218_s29 + $0xec] sm:$0xf] %vm2075_vm1, %v2637_v37  ;;  %v2635_v45 = vpack.c.bf16 %v1492_v39, %v1492_v39  ;;  %v1497_v46 = vmax.f32 %v1173_v40, 0.0  ;;  %v1165_v47 = vadd.f32 %v3522_v38, %v1164_v44  ;;  %v1561_v50 = vmax.f32 %v1429_v43, 0.0 }
 0x151   : > { %2199 = vst.msk [vmem:[%s3218_s29 + $0x1ec] sm:$0xf] %vm2075_vm1, %v2701_v42  ;;  %v2699_v49 = vpack.c.bf16 %v1556_v2, %v1556_v2  ;;  %v1421_v51 = vadd.f32 %v3522_v38, %v1420_v48  ;;  %v2839_v52 = vpop.f32.mrf.mxu0  ;;  %v2903_v56 = vpop.f32.mrf.mxu1 }
 0x152   : > { %2133 = vst.msk [vmem:[%s3218_s29 + $0xe4] sm:$0xf] %vm2075_vm1, %v2635_v45  ;;  %v2640_v53 = vpack.c.bf16 %v1497_v46, %v1497_v46  ;;  %v1495_v54 = vmax.f32 %v1165_v47, 0.0  ;;  %v1176_v55 = vadd.f32 %v3522_v38, %v2839_v52  ;;  %v2704_v57 = vpack.c.bf16 %v1561_v50, %v1561_v50 }
 0x153   : > { %2197 = vst.msk [vmem:[%s3218_s29 + $0x1e4] sm:$0xf] %vm2075_vm1, %v2699_v49  ;;  %v1559_v58 = vmax.f32 %v1421_v51, 0.0  ;;  %v1432_v59 = vadd.f32 %v3522_v38, %v2903_v56  ;;  %v1167_v60 = vpop.f32.mrf.mxu0  ;;  %v1423_v0 = vpop.f32.mrf.mxu1 }
 0x154   : > { %2138 = vst.msk [vmem:[%s3218_s29 + $0xf8] sm:$0xf] %vm2075_vm1, %v2640_v53  ;;  %v2638_v61 = vpack.c.bf16 %v1495_v54, %v1495_v54  ;;  %v1498_v62 = vmax.f32 %v1176_v55, 0.0  ;;  %v1168_v63 = vadd.f32 %v3522_v38, %v1167_v60  ;;  %2202 = vst.msk [vmem:[%s3218_s29 + $0x1f8] sm:$0xf] %vm2075_vm1, %v2704_v57  ;;  %v1424_v4 = vadd.f32 %v3522_v38, %v1423_v0 }
 0x155   : > { %v2702_v1 = vpack.c.bf16 %v1559_v58, %v1559_v58  ;;  %v1562_v3 = vmax.f32 %v1432_v59, 0.0 }
 0x156   : > { %2136 = vst.msk [vmem:[%s3218_s29 + $0xf0] sm:$0xf] %vm2075_vm1, %v2638_v61  ;;  %v2641_v5 = vpack.c.bf16 %v1498_v62, %v1498_v62  ;;  %v1496_v6 = vmax.f32 %v1168_v63, 0.0  ;;  %v1560_v8 = vmax.f32 %v1424_v4, 0.0 }
 0x157   : > { %2200 = vst.msk [vmem:[%s3218_s29 + $0x1f0] sm:$0xf] %vm2075_vm1, %v2702_v1  ;;  %v2705_v7 = vpack.c.bf16 %v1562_v3, %v1562_v3 }
 0x158   : > { %2139 = vst.msk [vmem:[%s3218_s29 + $0xfc] sm:$0xf] %vm2075_vm1, %v2641_v5  ;;  %v2639_v9 = vpack.c.bf16 %v1496_v6, %v1496_v6  ;;  %v2703_v10 = vpack.c.bf16 %v1560_v8, %v1560_v8 }
 0x159   : > { %2203 = vst.msk [vmem:[%s3218_s29 + $0x1fc] sm:$0xf] %vm2075_vm1, %v2705_v7 }
 0x15a   : > { %2137 = vst.msk [vmem:[%s3218_s29 + $0xf4] sm:$0xf] %vm2075_vm1, %v2639_v9  ;;  %2201 = vst.msk [vmem:[%s3218_s29 + $0x1f4] sm:$0xf] %vm2075_vm1, %v2703_v10 }
 0x15b PF: > { %s13_s14 = sadd.s32 1, %s3021_s14   ;;  %s3619_s12 = smov %s3017_s13 }
 0x15c   : > { %p10_p5 = scmp.ge.s32.totalorder %s13_s14, 4   ;;  %s3620_s13 = smov %s3622_s15 }
 0x15e   :  { %12 = sbr.rel (!%p10_p5) target bundleno = 2 (0x2), region = 68 }

// kernel: forward.9
= control target key start
LH: loop header
LB: loop body
LE: loop exit
PB: predicated region body
PF: predicated region fallthrough
CT: control target
= control target key end

     0   :  { %s185_s22 = smov 64   ;;  %vm121_vm0 = vcmask 519168   ;;  %vm122_vm1 = vsmask.f32 3328  ;;  %s466_s0 = inlined_call_operand.vmem [shape: bf16[14,2,7,128], index: 0, kind: input, shape index: {}]   ;;  %s467_s1 = inlined_call_operand.vmem [shape: bf16[14,7,64], index: 1, kind: output, shape index: {}]  }
   0x1   :  { %v10_v0 = vld [vmem:[%s466_s0 + $0x10] sm:$0xf]  ;;  %v172_v1 = vld [vmem:[%s466_s0 + $0x14] sm:$0xf]  ;;  %v8_v2 = vld [vmem:[%s466_s0] sm:$0xf] }
   0x2   :  { %v205_v3 = vmax.bf16 %v172_v1, %v10_v0  ;;  %v170_v4 = vld [vmem:[%s466_s0 + $0x4] sm:$0xf]  ;;  %v11_v5 = vld [vmem:[%s466_s0 + $0x18] sm:$0xf]  ;;  %v173_v6 = vld [vmem:[%s466_s0 + $0x1c] sm:$0xf] }
   0x3   :  { %v216_v7 = vmax.bf16 %v170_v4, %v8_v2  ;;  %v9_v8 = vld [vmem:[%s466_s0 + $0x8] sm:$0xf]  ;;  %v171_v9 = vld [vmem:[%s466_s0 + $0xc] sm:$0xf]  ;;  %v226_v10 = vmax.bf16 %v173_v6, %v11_v5  ;;  %v12_v14 = vld [vmem:[%s466_s0 + $0x20] sm:$0xf] }
   0x4   :  { %69 = vrot.lane.b32.xlu1 %v205_v3, %s185_s22  ;;  %v230_v11 = vmax.bf16 %v171_v9, %v9_v8  ;;  %v13_v12 = vld [vmem:[%s466_s0 + $0x28] sm:$0xf]  ;;  %v175_v13 = vld [vmem:[%s466_s0 + $0x2c] sm:$0xf]  ;;  %v174_v15 = vld [vmem:[%s466_s0 + $0x24] sm:$0xf] }
   0x5   :  { %65 = vrot.lane.b32.xlu0 %v216_v7, %s185_s22  ;;  %v246_v16 = vmax.bf16 %v175_v13, %v13_v12  ;;  %v250_v17 = vmax.bf16 %v174_v15, %v12_v14  ;;  %v15_v18 = vld [vmem:[%s466_s0 + $0x38] sm:$0xf]  ;;  %v177_v19 = vld [vmem:[%s466_s0 + $0x3c] sm:$0xf]  ;;  %v14_v20 = vld [vmem:[%s466_s0 + $0x30] sm:$0xf] }
   0x6   :  { %v176_v21 = vld [vmem:[%s466_s0 + $0x34] sm:$0xf]  ;;  %v266_v22 = vmax.bf16 %v177_v19, %v15_v18  ;;  %v17_v24 = vld [vmem:[%s466_s0 + $0x48] sm:$0xf]  ;;  %v179_v25 = vld [vmem:[%s466_s0 + $0x4c] sm:$0xf] }
   0x7   :  { %v270_v23 = vmax.bf16 %v176_v21, %v14_v20  ;;  %v16_v26 = vld [vmem:[%s466_s0 + $0x40] sm:$0xf]  ;;  %v178_v27 = vld [vmem:[%s466_s0 + $0x44] sm:$0xf]  ;;  %v286_v28 = vmax.bf16 %v179_v25, %v17_v24  ;;  %v19_v30 = vld [vmem:[%s466_s0 + $0x58] sm:$0xf] }
   0x8   :  { %71 = vrot.lane.b32.xlu1 %v226_v10, %s185_s22  ;;  %v290_v29 = vmax.bf16 %v178_v27, %v16_v26  ;;  %v181_v31 = vld [vmem:[%s466_s0 + $0x5c] sm:$0xf]  ;;  %v18_v32 = vld [vmem:[%s466_s0 + $0x50] sm:$0xf]  ;;  %v180_v33 = vld [vmem:[%s466_s0 + $0x54] sm:$0xf] }
   0x9   :  { %67 = vrot.lane.b32.xlu0 %v230_v11, %s185_s22  ;;  %v306_v34 = vmax.bf16 %v181_v31, %v19_v30  ;;  %v310_v35 = vmax.bf16 %v180_v33, %v18_v32  ;;  %v21_v36 = vld [vmem:[%s466_s0 + $0x68] sm:$0xf]  ;;  %v183_v37 = vld [vmem:[%s466_s0 + $0x6c] sm:$0xf]  ;;  %v20_v38 = vld [vmem:[%s466_s0 + $0x60] sm:$0xf] }
   0xa   :  { %v182_v39 = vld [vmem:[%s466_s0 + $0x64] sm:$0xf]  ;;  %v326_v40 = vmax.bf16 %v183_v37, %v21_v36  ;;  %vm336_vm2 = vmand %vm121_vm0, %vm122_vm1  ;;  %v130_v43 = vld [vmem:[%s467_s1 + $0x8] sm:$0xf] }
   0xb   :  { %v330_v41 = vmax.bf16 %v182_v39, %v20_v38  ;;  %v124_v46 = vld [vmem:[%s467_s1] sm:$0xf]  ;;  %v133_v51 = vld [vmem:[%s467_s1 + $0xc] sm:$0xf]  ;;  %v127_v54 = vld [vmem:[%s467_s1 + $0x4] sm:$0xf] }
   0xc   :  { %75 = vrot.lane.b32.xlu1 %v246_v16, %s185_s22  ;;  %v139_v59 = vld [vmem:[%s467_s1 + $0x14] sm:$0xf]  ;;  %v136_v62 = vld [vmem:[%s467_s1 + $0x10] sm:$0xf]  ;;  %v142_v6 = vld [vmem:[%s467_s1 + $0x18] sm:$0xf] }
   0xd   :  { %73 = vrot.lane.b32.xlu0 %v250_v17, %s185_s22  ;;  %v148_v14 = vld [vmem:[%s467_s1 + $0x20] sm:$0xf]  ;;  %v157_v19 = vld [vmem:[%s467_s1 + $0x2c] sm:$0xf]  ;;  %v163_v27 = vld [vmem:[%s467_s1 + $0x34] sm:$0xf] }
   0xe   :  { %v160_v30 = vld [vmem:[%s467_s1 + $0x30] sm:$0xf] }
  0x10   :  { %79 = vrot.lane.b32.xlu1 %v266_v22, %s185_s22 }
  0x11   :  { %77 = vrot.lane.b32.xlu0 %v270_v23, %s185_s22 }
  0x14   :  { %83 = vrot.lane.b32.xlu1 %v286_v28, %s185_s22 }
  0x15   :  { %81 = vrot.lane.b32.xlu0 %v290_v29, %s185_s22 }
  0x18   :  { %87 = vrot.lane.b32.xlu1 %v306_v34, %s185_s22 }
  0x19   :  { %85 = vrot.lane.b32.xlu0 %v310_v35, %s185_s22 }
  0x1c   :  { %91 = vrot.lane.b32.xlu1 %v326_v40, %s185_s22 }
  0x1d   :  { %89 = vrot.lane.b32.xlu0 %v330_v41, %s185_s22 }
  0x76   :  { %v70_v44 = vpop.permute.xlu1 %69 }
  0x77   :  { %v109_v45 = vmax.bf16 %v70_v44, %v205_v3  ;;  %v66_v47 = vpop.permute.xlu0 %65  ;;  %v145_v3 = vld [vmem:[%s467_s1 + $0x1c] sm:$0xf] }
  0x78   :  { %v107_v48 = vmax.bf16 %v66_v47, %v216_v7 }
  0x79   :  { %v131_v49 = vsel %vm336_vm2, %v109_v45, %v130_v43 }
  0x7a   :  { %132 = vst [vmem:[%s467_s1 + $0x8] sm:$0xf] %v131_v49  ;;  %v125_v50 = vsel %vm336_vm2, %v107_v48, %v124_v46  ;;  %v72_v52 = vpop.permute.xlu1 %71 }
  0x7b   :  { %126 = vst [vmem:[%s467_s1] sm:$0xf] %v125_v50  ;;  %v110_v53 = vmax.bf16 %v72_v52, %v226_v10  ;;  %v68_v55 = vpop.permute.xlu0 %67 }
  0x7c   :  { %v108_v56 = vmax.bf16 %v68_v55, %v230_v11  ;;  %v151_v11 = vld [vmem:[%s467_s1 + $0x24] sm:$0xf] }
  0x7d   :  { %v134_v57 = vsel %vm336_vm2, %v110_v53, %v133_v51 }
  0x7e   :  { %135 = vst [vmem:[%s467_s1 + $0xc] sm:$0xf] %v134_v57  ;;  %v128_v58 = vsel %vm336_vm2, %v108_v56, %v127_v54  ;;  %v76_v60 = vpop.permute.xlu1 %75 }
  0x7f   :  { %129 = vst [vmem:[%s467_s1 + $0x4] sm:$0xf] %v128_v58  ;;  %v112_v61 = vmax.bf16 %v76_v60, %v246_v16  ;;  %v74_v63 = vpop.permute.xlu0 %73 }
  0x80   :  { %v111_v0 = vmax.bf16 %v74_v63, %v250_v17 }
  0x81   :  { %v140_v1 = vsel %vm336_vm2, %v112_v61, %v139_v59 }
  0x82   :  { %141 = vst [vmem:[%s467_s1 + $0x14] sm:$0xf] %v140_v1  ;;  %v137_v2 = vsel %vm336_vm2, %v111_v0, %v136_v62  ;;  %v80_v4 = vpop.permute.xlu1 %79 }
  0x83   :  { %138 = vst [vmem:[%s467_s1 + $0x10] sm:$0xf] %v137_v2  ;;  %v114_v5 = vmax.bf16 %v80_v4, %v266_v22  ;;  %v78_v7 = vpop.permute.xlu0 %77  ;;  %v154_v22 = vld [vmem:[%s467_s1 + $0x28] sm:$0xf] }
  0x84   :  { %v113_v8 = vmax.bf16 %v78_v7, %v270_v23 }
  0x85   :  { %v146_v9 = vsel %vm336_vm2, %v114_v5, %v145_v3 }
  0x86   :  { %147 = vst [vmem:[%s467_s1 + $0x1c] sm:$0xf] %v146_v9  ;;  %v143_v10 = vsel %vm336_vm2, %v113_v8, %v142_v6  ;;  %v84_v12 = vpop.permute.xlu1 %83 }
  0x87   :  { %144 = vst [vmem:[%s467_s1 + $0x18] sm:$0xf] %v143_v10  ;;  %v116_v13 = vmax.bf16 %v84_v12, %v286_v28  ;;  %v82_v15 = vpop.permute.xlu0 %81 }
  0x88   :  { %v115_v16 = vmax.bf16 %v82_v15, %v290_v29 }
  0x89   :  { %v152_v17 = vsel %vm336_vm2, %v116_v13, %v151_v11 }
  0x8a   :  { %153 = vst [vmem:[%s467_s1 + $0x24] sm:$0xf] %v152_v17  ;;  %v149_v18 = vsel %vm336_vm2, %v115_v16, %v148_v14  ;;  %v88_v20 = vpop.permute.xlu1 %87 }
  0x8b   :  { %150 = vst [vmem:[%s467_s1 + $0x20] sm:$0xf] %v149_v18  ;;  %v118_v21 = vmax.bf16 %v88_v20, %v306_v34  ;;  %v86_v23 = vpop.permute.xlu0 %85 }
  0x8c   :  { %v117_v24 = vmax.bf16 %v86_v23, %v310_v35 }
  0x8d   :  { %v158_v25 = vsel %vm336_vm2, %v118_v21, %v157_v19 }
  0x8e   :  { %159 = vst [vmem:[%s467_s1 + $0x2c] sm:$0xf] %v158_v25  ;;  %v155_v26 = vsel %vm336_vm2, %v117_v24, %v154_v22  ;;  %v92_v28 = vpop.permute.xlu1 %91 }
  0x8f   :  { %156 = vst [vmem:[%s467_s1 + $0x28] sm:$0xf] %v155_v26  ;;  %v120_v29 = vmax.bf16 %v92_v28, %v326_v40  ;;  %v90_v31 = vpop.permute.xlu0 %89 }
  0x90   :  { %v119_v32 = vmax.bf16 %v90_v31, %v330_v41 }
  0x91   :  { %v164_v33 = vsel %vm336_vm2, %v120_v29, %v163_v27 }
  0x92   :  { %165 = vst [vmem:[%s467_s1 + $0x34] sm:$0xf] %v164_v33  ;;  %v161_v34 = vsel %vm336_vm2, %v119_v32, %v160_v30 }
  0x93   :  { %162 = vst [vmem:[%s467_s1 + $0x30] sm:$0xf] %v161_v34 }

// kernel: forward.8
= control target key start
LH: loop header
LB: loop body
LE: loop exit
PB: predicated region body
PF: predicated region fallthrough
CT: control target
= control target key end

     0   :  { %v3566_v0 = vmov 0   ;;  %v3567_v40 = vmov 0.0   ;;  %vm3568_vm0 = vmmov 0   ;;  %vm1482_vm1 = vcmask 261120   ;;  %s4777_s1 = inlined_call_operand.vmem [shape: bf16[800,64], index: 1, kind: input, shape index: {}]   ;;  %s4778_s0 = inlined_call_operand.vmem [shape: bf16[392,800], index: 0, kind: input, shape index: {}]   ;;  %s4779_s2 = inlined_call_operand.vmem [shape: f32[1,64], index: 2, kind: input, shape index: {}]   ;;  %s4780_s3 = inlined_call_operand.vmem [shape: bf16[392,64], index: 3, kind: output, shape index: {}]  }
   0x1   :  { %1558 = vmatprep.subr.bf16.mxu0 %v3566_v0  ;;  %1790 = vmatprep.subr.bf16.mxu1 %v3566_v0  ;;  %v3269_v1 = vld [vmem:[%s4777_s1 + $0x38] sm:$0xff]   ;;  %v3271_v3 = vld [vmem:[%s4777_s1 + $0x30] sm:$0xff]   ;;  %v3273_v5 = vld [vmem:[%s4777_s1 + $0x28] sm:$0xff]   ;;  %vm2732_vm2 = vcmask 519168  }
   0x2   :  { %v3270_v2 = vld [vmem:[%s4777_s1 + $0xb8] sm:$0xff]   ;;  %1559 = vmatpush1.bf16.msra.mxu0 %v3269_v1  ;;  %v3272_v4 = vld [vmem:[%s4777_s1 + $0xb0] sm:$0xff]   ;;  %v3274_v6 = vld [vmem:[%s4777_s1 + $0xa8] sm:$0xff]  }
   0x3   :  { %1791 = vmatpush1.bf16.msra.mxu1 %v3270_v2  ;;  %1560 = vmatprep.subr.bf16.mxu0 %v3566_v0  ;;  %v3275_v7 = vld [vmem:[%s4777_s1 + $0x20] sm:$0xff]   ;;  %v3277_v9 = vld [vmem:[%s4777_s1 + $0x18] sm:$0xff]   ;;  %v3279_v11 = vld [vmem:[%s4777_s1 + $0x10] sm:$0xff]  }
   0x4   :  { %1792 = vmatprep.subr.bf16.mxu1 %v3566_v0  ;;  %v3276_v8 = vld [vmem:[%s4777_s1 + $0xa0] sm:$0xff]   ;;  %v3278_v10 = vld [vmem:[%s4777_s1 + $0x98] sm:$0xff]   ;;  %v3280_v12 = vld [vmem:[%s4777_s1 + $0x90] sm:$0xff]  }
   0x5   :  { %v3281_v13 = vld [vmem:[%s4777_s1 + $0x8] sm:$0xff]   ;;  %v3283_v15 = vld [vmem:[%s4777_s1] sm:$0xff]   ;;  %v3285_v17 = vld [vmem:[%s4777_s1 + $0x78] sm:$0xff]  }
   0x6   :  { %1561 = vmatpush1.bf16.msra.mxu0 %v3271_v3  ;;  %v3282_v14 = vld [vmem:[%s4777_s1 + $0x88] sm:$0xff]   ;;  %v3284_v16 = vld [vmem:[%s4777_s1 + $0x80] sm:$0xff]   ;;  %v3286_v18 = vld [vmem:[%s4777_s1 + $0xf8] sm:$0xff]  }
   0x7   :  { %1793 = vmatpush1.bf16.msra.mxu1 %v3272_v4  ;;  %1562 = vmatprep.subr.bf16.mxu0 %v3566_v0  ;;  %v3303_v19 = vld [vmem:[%s4778_s0 + $0x4] ss:$28 sps:$4 sm:$0xff]   ;;  %v3287_v20 = vld [vmem:[%s4777_s1 + $0x70] sm:$0xff]   ;;  %v3306_v21 = vld [vmem:[%s4778_s0 + $0xc] ss:$28 sps:$4 sm:$0xff]  }
   0x8   :  { %1794 = vmatprep.subr.bf16.mxu1 %v3566_v0  ;;  %v3288_v22 = vld [vmem:[%s4777_s1 + $0xf0] sm:$0xff]   ;;  %1590 = vmatprep.mubr.bf16.mxu0 %v3303_v19  ;;  %v3289_v23 = vld [vmem:[%s4777_s1 + $0x68] sm:$0xff]   ;;  %v3291_v25 = vld [vmem:[%s4777_s1 + $0x60] sm:$0xff]  }
   0x9   :  { %1822 = vmatprep.mubr.bf16.mxu1 %v3306_v21  ;;  %v3290_v24 = vld [vmem:[%s4777_s1 + $0xe8] sm:$0xff]   ;;  %v3292_v26 = vld [vmem:[%s4777_s1 + $0xe0] sm:$0xff]   ;;  %v3293_v27 = vld [vmem:[%s4777_s1 + $0x58] sm:$0xff]  }
   0xa   :  { %1563 = vmatpush1.bf16.msra.mxu0 %v3273_v5  ;;  %v3294_v28 = vld [vmem:[%s4777_s1 + $0xd8] sm:$0xff]   ;;  %v3295_v29 = vld [vmem:[%s4777_s1 + $0x50] sm:$0xff]   ;;  %v3297_v31 = vld [vmem:[%s4777_s1 + $0x48] sm:$0xff]  }
   0xb   :  { %1795 = vmatpush1.bf16.msra.mxu1 %v3274_v6  ;;  %1564 = vmatprep.subr.bf16.mxu0 %v3566_v0  ;;  %v3296_v30 = vld [vmem:[%s4777_s1 + $0xd0] sm:$0xff]   ;;  %v3298_v32 = vld [vmem:[%s4777_s1 + $0xc8] sm:$0xff]   ;;  %v3299_v33 = vld [vmem:[%s4777_s1 + $0x40] sm:$0xff]  }
   0xc   :  { %1796 = vmatprep.subr.bf16.mxu1 %v3566_v0  ;;  %v3300_v34 = vld [vmem:[%s4777_s1 + $0xc0] sm:$0xff]   ;;  %v3307_v37 = vld [vmem:[%s4777_s1 + $0x138] sm:$0xff]   ;;  %v3308_v38 = vld [vmem:[%s4777_s1 + $0x188] sm:$0xff]  }
   0xd   :  { %v3301_v35 = vld [vmem:[%s4778_s0] ss:$28 sps:$4 sm:$0xff]   ;;  %v3304_v36 = vld [vmem:[%s4778_s0 + $0x8] ss:$28 sps:$4 sm:$0xff]   ;;  %v3315_v42 = vld [vmem:[%s4777_s1 + $0x130] sm:$0xff]  }
   0xe   :  { %1565 = vmatpush1.bf16.msra.mxu0 %v3275_v7  ;;  %v3309_v39 = vld [vmem:[%s4778_s0 + $0x3c] ss:$28 sps:$4 sm:$0xff]   ;;  %v3311_v41 = vld [vmem:[%s4778_s0 + $0x44] ss:$28 sps:$4 sm:$0xff]   ;;  %v3316_v45 = vld [vmem:[%s4778_s0 + $0x74] ss:$28 sps:$4 sm:$0xff]  }
   0xf   :  { %1797 = vmatpush1.bf16.msra.mxu1 %v3276_v8  ;;  %1566 = vmatprep.subr.bf16.mxu0 %v3566_v0  ;;  %v3313_v43 = vld [vmem:[%s4778_s0 + $0x38] ss:$28 sps:$4 sm:$0xff]   ;;  %v3314_v44 = vld [vmem:[%s4778_s0 + $0x40] ss:$28 sps:$4 sm:$0xff]   ;;  %v3328_v47 = vld [vmem:[%s4777_s1 + $0x128] sm:$0xff]  }
  0x10   :  { %1798 = vmatprep.subr.bf16.mxu1 %v3566_v0  ;;  %v3318_v46 = vld [vmem:[%s4778_s0 + $0x7c] ss:$28 sps:$4 sm:$0xff]   ;;  %v3320_v48 = vld [vmem:[%s4778_s0 + $0x70] ss:$28 sps:$4 sm:$0xff]   ;;  %v3339_v49 = vld [vmem:[%s4777_s1 + $0x120] sm:$0xff]  }
  0x11   :  { %v3321_v50 = vld [vmem:[%s4778_s0 + $0x78] ss:$28 sps:$4 sm:$0xff]   ;;  %v3322_v51 = vld [vmem:[%s4778_s0 + $0xac] ss:$28 sps:$4 sm:$0xff]   ;;  %v3393_v54 = vld [vmem:[%s4777_s1 + $0x180] sm:$0xff]  }
  0x12   :  { %1567 = vmatpush1.bf16.msra.mxu0 %v3277_v9  ;;  %v3324_v52 = vld [vmem:[%s4778_s0 + $0xb4] ss:$28 sps:$4 sm:$0xff]   ;;  %v3348_v53 = vld [vmem:[%s4777_s1 + $0x118] sm:$0xff]   ;;  %v3326_v56 = vld [vmem:[%s4778_s0 + $0xa8] ss:$28 sps:$4 sm:$0xff]  }
  0x13   :  { %1799 = vmatpush1.bf16.msra.mxu1 %v3278_v10  ;;  %1568 = vmatprep.subr.bf16.mxu0 %v3566_v0  ;;  %v3361_v55 = vld [vmem:[%s4777_s1 + $0x110] sm:$0xff]   ;;  %v3329_v58 = vld [vmem:[%s4778_s0 + $0xe4] ss:$28 sps:$4 sm:$0xff]   ;;  %v3331_v59 = vld [vmem:[%s4778_s0 + $0xec] ss:$28 sps:$4 sm:$0xff]  }
  0x14   :  { %1800 = vmatprep.subr.bf16.mxu1 %v3566_v0  ;;  %v3327_v57 = vld [vmem:[%s4778_s0 + $0xb0] ss:$28 sps:$4 sm:$0xff]   ;;  %v3381_v61 = vld [vmem:[%s4777_s1 + $0x100] sm:$0xff]   ;;  %v3335_v1 = vld [vmem:[%s4778_s0 + $0x11c] ss:$28 sps:$4 sm:$0xff]  }
  0x15   :  { %v3368_v60 = vld [vmem:[%s4777_s1 + $0x108] sm:$0xff]   ;;  %v3333_v62 = vld [vmem:[%s4778_s0 + $0xe0] ss:$28 sps:$4 sm:$0xff]   ;;  %v3402_v4 = vld [vmem:[%s4777_s1 + $0x170] sm:$0xff]  }
  0x16   :  { %1569 = vmatpush1.bf16.msra.mxu0 %v3279_v11  ;;  %v3334_v63 = vld [vmem:[%s4778_s0 + $0xe8] ss:$28 sps:$4 sm:$0xff]   ;;  %v3388_v3 = vld [vmem:[%s4777_s1 + $0x178] sm:$0xff]   ;;  %v3342_v7 = vld [vmem:[%s4778_s0 + $0x154] ss:$28 sps:$4 sm:$0xff]  }
  0x17   :  { %1801 = vmatpush1.bf16.msra.mxu1 %v3280_v12  ;;  %1570 = vmatprep.subr.bf16.mxu0 %v3566_v0  ;;  %v3337_v2 = vld [vmem:[%s4778_s0 + $0x124] ss:$28 sps:$4 sm:$0xff]   ;;  %v3340_v5 = vld [vmem:[%s4778_s0 + $0x118] ss:$28 sps:$4 sm:$0xff]   ;;  %v3409_v9 = vld [vmem:[%s4777_s1 + $0x168] sm:$0xff]  }
  0x18   :  { %1802 = vmatprep.subr.bf16.mxu1 %v3566_v0  ;;  %v3341_v6 = vld [vmem:[%s4778_s0 + $0x120] ss:$28 sps:$4 sm:$0xff]   ;;  %v3346_v10 = vld [vmem:[%s4778_s0 + $0x150] ss:$28 sps:$4 sm:$0xff]   ;;  %v3347_v12 = vld [vmem:[%s4778_s0 + $0x158] ss:$28 sps:$4 sm:$0xff]  }
  0x19   :  { %v3344_v8 = vld [vmem:[%s4778_s0 + $0x15c] ss:$28 sps:$4 sm:$0xff]   ;;  %v3422_v11 = vld [vmem:[%s4777_s1 + $0x160] sm:$0xff]   ;;  %v3455_v21 = vld [vmem:[%s4777_s1 + $0x148] sm:$0xff]  }
  0x1a   :  { %1571 = vmatpush1.bf16.msra.mxu0 %v3281_v13  ;;  %v3349_v13 = vld [vmem:[%s4778_s0 + $0x18c] ss:$28 sps:$4 sm:$0xff]   ;;  %v3355_v19 = vld [vmem:[%s4778_s0 + $0x1c4] ss:$28 sps:$4 sm:$0xff]  }
  0x1b   :  { %1803 = vmatpush1.bf16.msra.mxu1 %v3282_v14  ;;  %1572 = vmatprep.subr.bf16.mxu0 %v3566_v0  ;;  %v3351_v14 = vld [vmem:[%s4778_s0 + $0x194] ss:$28 sps:$4 sm:$0xff]  }
  0x1c   :  { %1804 = vmatprep.subr.bf16.mxu1 %v3566_v0 }
  0x1e   :  { %1573 = vmatpush1.bf16.msra.mxu0 %v3283_v15  ;;  %v3433_v15 = vld [vmem:[%s4777_s1 + $0x158] sm:$0xff]  }
  0x1f   :  { %1805 = vmatpush1.bf16.msra.mxu1 %v3284_v16  ;;  %1574 = vmatprep.subr.bf16.mxu0 %v3566_v0  ;;  %v3353_v16 = vld [vmem:[%s4778_s0 + $0x188] ss:$28 sps:$4 sm:$0xff]  }
  0x20   :  { %1806 = vmatprep.subr.bf16.mxu1 %v3566_v0 }
  0x22   :  { %1575 = vmatpush2.bf16.msra.mxu0 %v3285_v17  ;;  %v3442_v17 = vld [vmem:[%s4777_s1 + $0x150] sm:$0xff]  }
  0x23   :  { %1807 = vmatpush2.bf16.msra.mxu1 %v3286_v18  ;;  %1576 = vmatprep.subr.bf16.mxu0 %v3566_v0  ;;  %v3354_v18 = vld [vmem:[%s4778_s0 + $0x190] ss:$28 sps:$4 sm:$0xff]  }
  0x24   :  { %1808 = vmatprep.subr.bf16.mxu1 %v3566_v0 }
  0x26   :  { %1577 = vmatpush2.bf16.msra.mxu0 %v3287_v20  ;;  %v3357_v20 = vld [vmem:[%s4778_s0 + $0x1cc] ss:$28 sps:$4 sm:$0xff]  }
  0x27   :  { %1809 = vmatpush2.bf16.msra.mxu1 %v3288_v22  ;;  %1578 = vmatprep.subr.bf16.mxu0 %v3566_v0  ;;  %v3462_v22 = vld [vmem:[%s4777_s1 + $0x140] sm:$0xff]  }
  0x28   :  { %1810 = vmatprep.subr.bf16.mxu1 %v3566_v0 }
  0x2a   :  { %1579 = vmatpush2.bf16.msra.mxu0 %v3289_v23  ;;  %v3359_v23 = vld [vmem:[%s4778_s0 + $0x1c0] ss:$28 sps:$4 sm:$0xff]  }
  0x2b   :  { %1811 = vmatpush2.bf16.msra.mxu1 %v3290_v24  ;;  %1580 = vmatprep.subr.bf16.mxu0 %v3566_v0  ;;  %v3360_v24 = vld [vmem:[%s4778_s0 + $0x1c8] ss:$28 sps:$4 sm:$0xff]  }
  0x2c   :  { %1812 = vmatprep.subr.bf16.mxu1 %v3566_v0 }
  0x2e   :  { %1581 = vmatpush2.bf16.msra.mxu0 %v3291_v25  ;;  %v3362_v25 = vld [vmem:[%s4778_s0 + $0x1fc] ss:$28 sps:$4 sm:$0xff]  }
  0x2f   :  { %1813 = vmatpush2.bf16.msra.mxu1 %v3292_v26  ;;  %1582 = vmatprep.subr.bf16.mxu0 %v3566_v0  ;;  %v3364_v26 = vld [vmem:[%s4778_s0 + $0x204] ss:$28 sps:$4 sm:$0xff]  }
  0x30   :  { %1814 = vmatprep.subr.bf16.mxu1 %v3566_v0 }
  0x32   :  { %1583 = vmatpush2.bf16.msra.mxu0 %v3293_v27  ;;  %v3366_v27 = vld [vmem:[%s4778_s0 + $0x1f8] ss:$28 sps:$4 sm:$0xff]  }
  0x33   :  { %1815 = vmatpush2.bf16.msra.mxu1 %v3294_v28  ;;  %1584 = vmatprep.subr.bf16.mxu0 %v3566_v0  ;;  %v3367_v28 = vld [vmem:[%s4778_s0 + $0x200] ss:$28 sps:$4 sm:$0xff]  }
  0x34   :  { %1816 = vmatprep.subr.bf16.mxu1 %v3566_v0 }
  0x36   :  { %1585 = vmatpush2.bf16.msra.mxu0 %v3295_v29  ;;  %v3371_v29 = vld [vmem:[%s4778_s0 + $0x23c] ss:$28 sps:$4 sm:$0xff]  }
  0x37   :  { %1817 = vmatpush2.bf16.msra.mxu1 %v3296_v30  ;;  %1586 = vmatprep.subr.bf16.mxu0 %v3566_v0  ;;  %v3373_v30 = vld [vmem:[%s4778_s0 + $0x230] ss:$28 sps:$4 sm:$0xff]  }
  0x38   :  { %1818 = vmatprep.subr.bf16.mxu1 %v3566_v0 }
  0x3a   :  { %1587 = vmatpush2.bf16.msra.mxu0 %v3297_v31  ;;  %v3374_v31 = vld [vmem:[%s4778_s0 + $0x238] ss:$28 sps:$4 sm:$0xff]  }
  0x3b   :  { %1819 = vmatpush2.bf16.msra.mxu1 %v3298_v32  ;;  %1588 = vmatprep.subr.bf16.mxu0 %v3566_v0  ;;  %v3375_v32 = vld [vmem:[%s4778_s0 + $0x26c] ss:$28 sps:$4 sm:$0xff]  }
  0x3c   :  { %1820 = vmatprep.subr.bf16.mxu1 %v3566_v0 }
  0x3e   :  { %1589 = vmatpush2.bf16.msra.mxu0 %v3299_v33  ;;  %v3377_v33 = vld [vmem:[%s4778_s0 + $0x274] ss:$28 sps:$4 sm:$0xff]  }
  0x3f   :  { %1821 = vmatpush2.bf16.msra.mxu1 %v3300_v34  ;;  %2022 = vmatprep.subr.bf16.mxu0 %v3566_v0  ;;  %v3379_v34 = vld [vmem:[%s4778_s0 + $0x268] ss:$28 sps:$4 sm:$0xff]  }
  0x40   :  { %3162 = vmatprep.subr.bf16.mxu1 %v3567_v40 }
  0x41   :  { %1591 = vmatmul.mubr.bf16.vlgmr.msra.gmra.mxu0 %v3301_v35  ;;  %v3380_v35 = vld [vmem:[%s4778_s0 + $0x270] ss:$28 sps:$4 sm:$0xff]  }
  0x42   :  { %1823 = vmatmul.mubr.bf16.vlgmr.msra.gmra.mxu1 %v3304_v36  ;;  %2023 = vmatpush1.bf16.msra.mxu0 %v3307_v37  ;;  %v3382_v36 = vld [vmem:[%s4778_s0 + $0x2a4] ss:$28 sps:$4 sm:$0xff]   ;;  %v3384_v37 = vld [vmem:[%s4778_s0 + $0x2ac] ss:$28 sps:$4 sm:$0xff]  }
  0x43   :  { %3163 = vmatpush3.bf16.msra.mxu1 %v3308_v38  ;;  %1598 = vmatprep.mubr.bf16.mxu0 %v3309_v39  ;;  %v3386_v38 = vld [vmem:[%s4778_s0 + $0x2a0] ss:$28 sps:$4 sm:$0xff]   ;;  %v3387_v39 = vld [vmem:[%s4778_s0 + $0x2a8] ss:$28 sps:$4 sm:$0xff]  }
  0x44   :  { %1830 = vmatprep.mubr.bf16.mxu1 %v3311_v41  ;;  %2024 = vmatprep.subr.bf16.mxu0 %v3566_v0  ;;  %v3389_v41 = vld [vmem:[%s4778_s0 + $0x2dc] ss:$28 sps:$4 sm:$0xff]  }
  0x45   :  { %3164 = vmatprep.subr.bf16.mxu1 %v3567_v40 }
  0x46   :  { %2025 = vmatpush1.bf16.msra.mxu0 %v3315_v42  ;;  %v3391_v42 = vld [vmem:[%s4778_s0 + $0x2e4] ss:$28 sps:$4 sm:$0xff]  }
  0x47   :  { %2026 = vmatprep.subr.bf16.mxu0 %v3566_v0  ;;  %3165 = vmatpush3.bf16.msra.mxu1 %v3393_v54  ;;  %v3412_v54 = vld [vmem:[%s4778_s0 + $0x38c] ss:$28 sps:$4 sm:$0xff]  }
  0x49   :  { %1599 = vmatmul.mubr.bf16.gmra.mxu0 %v3313_v43  ;;  %v3394_v43 = vld [vmem:[%s4778_s0 + $0x2d8] ss:$28 sps:$4 sm:$0xff]  }
  0x4a   :  { %1831 = vmatmul.mubr.bf16.gmra.mxu1 %v3314_v44  ;;  %1606 = vmatprep.mubr.bf16.mxu0 %v3316_v45  ;;  %v3395_v44 = vld [vmem:[%s4778_s0 + $0x2e0] ss:$28 sps:$4 sm:$0xff]   ;;  %v3396_v45 = vld [vmem:[%s4778_s0 + $0x314] ss:$28 sps:$4 sm:$0xff]  }
  0x4b   :  { %1838 = vmatprep.mubr.bf16.mxu1 %v3318_v46  ;;  %2027 = vmatpush1.bf16.msra.mxu0 %v3328_v47  ;;  %v3398_v46 = vld [vmem:[%s4778_s0 + $0x31c] ss:$28 sps:$4 sm:$0xff]   ;;  %v3400_v47 = vld [vmem:[%s4778_s0 + $0x310] ss:$28 sps:$4 sm:$0xff]  }
  0x4c   :  { %2028 = vmatprep.subr.bf16.mxu0 %v3566_v0 }
  0x4f   :  { %2029 = vmatpush1.bf16.msra.mxu0 %v3339_v49  ;;  %v3403_v49 = vld [vmem:[%s4778_s0 + $0x34c] ss:$28 sps:$4 sm:$0xff]  }
  0x50   :  { %2030 = vmatprep.subr.bf16.mxu0 %v3566_v0 }
  0x51   :  { %1607 = vmatmul.mubr.bf16.gmra.mxu0 %v3320_v48  ;;  %v3401_v48 = vld [vmem:[%s4778_s0 + $0x318] ss:$28 sps:$4 sm:$0xff]  }
  0x52   :  { %1839 = vmatmul.mubr.bf16.gmra.mxu1 %v3321_v50  ;;  %1614 = vmatprep.mubr.bf16.mxu0 %v3322_v51  ;;  %v3405_v50 = vld [vmem:[%s4778_s0 + $0x354] ss:$28 sps:$4 sm:$0xff]   ;;  %v3407_v51 = vld [vmem:[%s4778_s0 + $0x348] ss:$28 sps:$4 sm:$0xff]  }
  0x53   :  { %1846 = vmatprep.mubr.bf16.mxu1 %v3324_v52  ;;  %2031 = vmatpush1.bf16.msra.mxu0 %v3348_v53  ;;  %v3408_v52 = vld [vmem:[%s4778_s0 + $0x350] ss:$28 sps:$4 sm:$0xff]   ;;  %v3410_v53 = vld [vmem:[%s4778_s0 + $0x384] ss:$28 sps:$4 sm:$0xff]  }
  0x54   :  { %2032 = vmatprep.subr.bf16.mxu0 %v3566_v0 }
  0x57   :  { %2033 = vmatpush1.bf16.msra.mxu0 %v3361_v55  ;;  %v3414_v55 = vld [vmem:[%s4778_s0 + $0x380] ss:$28 sps:$4 sm:$0xff]  }
  0x58   :  { %2034 = vmatprep.subr.bf16.mxu0 %v3566_v0 }
  0x59   :  { %1615 = vmatmul.mubr.bf16.gmra.mxu0 %v3326_v56  ;;  %v3415_v56 = vld [vmem:[%s4778_s0 + $0x388] ss:$28 sps:$4 sm:$0xff]  }
  0x5a   :  { %1847 = vmatmul.mubr.bf16.gmra.mxu1 %v3327_v57  ;;  %1622 = vmatprep.mubr.bf16.mxu0 %v3329_v58  ;;  %v3416_v57 = vld [vmem:[%s4778_s0 + $0x3bc] ss:$28 sps:$4 sm:$0xff]   ;;  %v3418_v58 = vld [vmem:[%s4778_s0 + $0x3c4] ss:$28 sps:$4 sm:$0xff]  }
  0x5b   :  { %1854 = vmatprep.mubr.bf16.mxu1 %v3331_v59  ;;  %2035 = vmatpush1.bf16.msra.mxu0 %v3368_v60  ;;  %v3420_v59 = vld [vmem:[%s4778_s0 + $0x3b8] ss:$28 sps:$4 sm:$0xff]   ;;  %v3421_v60 = vld [vmem:[%s4778_s0 + $0x3c0] ss:$28 sps:$4 sm:$0xff]  }
  0x5c   :  { %2036 = vmatprep.subr.bf16.mxu0 %v3566_v0 }
  0x5f   :  { %2037 = vmatpush1.bf16.msra.mxu0 %v3381_v61  ;;  %v3423_v61 = vld [vmem:[%s4778_s0 + $0x3f4] ss:$28 sps:$4 sm:$0xff]  }
  0x60   :  { %2038 = vmatprep.subr.bf16.mxu0 %v3566_v0 }
  0x61   :  { %1623 = vmatmul.mubr.bf16.gmra.mxu0 %v3333_v62  ;;  %v3425_v62 = vld [vmem:[%s4778_s0 + $0x3fc] ss:$28 sps:$4 sm:$0xff]  }
  0x62   :  { %1855 = vmatmul.mubr.bf16.gmra.mxu1 %v3334_v63  ;;  %1630 = vmatprep.mubr.bf16.mxu0 %v3335_v1  ;;  %v3427_v63 = vld [vmem:[%s4778_s0 + $0x3f0] ss:$28 sps:$4 sm:$0xff]   ;;  %v3428_v1 = vld [vmem:[%s4778_s0 + $0x3f8] ss:$28 sps:$4 sm:$0xff]  }
  0x63   :  { %1862 = vmatprep.mubr.bf16.mxu1 %v3337_v2  ;;  %2039 = vmatpush2.bf16.msra.mxu0 %v3388_v3  ;;  %v3429_v2 = vld [vmem:[%s4778_s0 + $0x42c] ss:$28 sps:$4 sm:$0xff]   ;;  %v3431_v3 = vld [vmem:[%s4778_s0 + $0x434] ss:$28 sps:$4 sm:$0xff]  }
  0x64   :  { %2040 = vmatprep.subr.bf16.mxu0 %v3566_v0 }
  0x67   :  { %2041 = vmatpush2.bf16.msra.mxu0 %v3402_v4  ;;  %v3434_v4 = vld [vmem:[%s4778_s0 + $0x428] ss:$28 sps:$4 sm:$0xff]  }
  0x68   :  { %2042 = vmatprep.subr.bf16.mxu0 %v3566_v0 }
  0x69   :  { %1631 = vmatmul.mubr.bf16.gmra.mxu0 %v3340_v5  ;;  %v3435_v5 = vld [vmem:[%s4778_s0 + $0x430] ss:$28 sps:$4 sm:$0xff]  }
  0x6a   :  { %1863 = vmatmul.mubr.bf16.gmra.mxu1 %v3341_v6  ;;  %1638 = vmatprep.mubr.bf16.mxu0 %v3342_v7  ;;  %v3436_v6 = vld [vmem:[%s4778_s0 + $0x464] ss:$28 sps:$4 sm:$0xff]   ;;  %v3438_v7 = vld [vmem:[%s4778_s0 + $0x46c] ss:$28 sps:$4 sm:$0xff]  }
  0x6b   :  { %1870 = vmatprep.mubr.bf16.mxu1 %v3344_v8  ;;  %2043 = vmatpush2.bf16.msra.mxu0 %v3409_v9  ;;  %v3440_v8 = vld [vmem:[%s4778_s0 + $0x460] ss:$28 sps:$4 sm:$0xff]   ;;  %v3441_v9 = vld [vmem:[%s4778_s0 + $0x468] ss:$28 sps:$4 sm:$0xff]  }
  0x6c   :  { %2044 = vmatprep.subr.bf16.mxu0 %v3566_v0 }
  0x6f   :  { %2045 = vmatpush2.bf16.msra.mxu0 %v3422_v11  ;;  %v3445_v11 = vld [vmem:[%s4778_s0 + $0x4a4] ss:$28 sps:$4 sm:$0xff]  }
  0x70   :  { %2046 = vmatprep.subr.bf16.mxu0 %v3566_v0 }
  0x71   :  { %1639 = vmatmul.mubr.bf16.gmra.mxu0 %v3346_v10  ;;  %v3443_v10 = vld [vmem:[%s4778_s0 + $0x49c] ss:$28 sps:$4 sm:$0xff]  }
  0x72   :  { %1871 = vmatmul.mubr.bf16.gmra.mxu1 %v3347_v12  ;;  %1646 = vmatprep.mubr.bf16.mxu0 %v3349_v13  ;;  %v3447_v12 = vld [vmem:[%s4778_s0 + $0x498] ss:$28 sps:$4 sm:$0xff]   ;;  %v3448_v13 = vld [vmem:[%s4778_s0 + $0x4a0] ss:$28 sps:$4 sm:$0xff]  }
  0x73   :  { %1878 = vmatprep.mubr.bf16.mxu1 %v3351_v14  ;;  %2047 = vmatpush2.bf16.msra.mxu0 %v3433_v15  ;;  %v3449_v14 = vld [vmem:[%s4778_s0 + $0x4d4] ss:$28 sps:$4 sm:$0xff]   ;;  %v3451_v15 = vld [vmem:[%s4778_s0 + $0x4dc] ss:$28 sps:$4 sm:$0xff]  }
  0x74   :  { %2048 = vmatprep.subr.bf16.mxu0 %v3566_v0 }
  0x77   :  { %2049 = vmatpush2.bf16.msra.mxu0 %v3442_v17  ;;  %v3454_v17 = vld [vmem:[%s4778_s0 + $0x4d8] ss:$28 sps:$4 sm:$0xff]  }
  0x78   :  { %2050 = vmatprep.subr.bf16.mxu0 %v3566_v0 }
  0x79   :  { %1647 = vmatmul.mubr.bf16.gmra.mxu0 %v3353_v16  ;;  %v3453_v16 = vld [vmem:[%s4778_s0 + $0x4d0] ss:$28 sps:$4 sm:$0xff]  }
  0x7a   :  { %1879 = vmatmul.mubr.bf16.gmra.mxu1 %v3354_v18  ;;  %1654 = vmatprep.mubr.bf16.mxu0 %v3355_v19  ;;  %v3456_v18 = vld [vmem:[%s4778_s0 + $0x50c] ss:$28 sps:$4 sm:$0xff]   ;;  %v3458_v19 = vld [vmem:[%s4778_s0 + $0x514] ss:$28 sps:$4 sm:$0xff]  }
  0x7b   :  { %1886 = vmatprep.mubr.bf16.mxu1 %v3357_v20  ;;  %2051 = vmatpush2.bf16.msra.mxu0 %v3455_v21  ;;  %v207_v20 = vld [vmem:[%s4778_s0 + $0x540] sm:$0xff]  ;;  %v208_v21 = vld [vmem:[%s4778_s0 + $0x548] sm:$0xff] }
  0x7c   :  { %2052 = vmatprep.subr.bf16.mxu0 %v3566_v0  ;;  %v3369_v0 = vld [vmem:[%s4778_s0 + $0x234] ss:$28 sps:$4 sm:$0xff]  }
  0x7f   :  { %2053 = vmatpush2.bf16.msra.mxu0 %v3462_v22  ;;  %v3460_v22 = vld [vmem:[%s4778_s0 + $0x508] ss:$28 sps:$4 sm:$0xff]  }
  0x81   :  { %1655 = vmatmul.mubr.bf16.gmra.mxu0 %v3359_v23  ;;  %v3461_v23 = vld [vmem:[%s4778_s0 + $0x510] ss:$28 sps:$4 sm:$0xff]  }
  0x82   :  { %1887 = vmatmul.mubr.bf16.gmra.mxu1 %v3360_v24  ;;  %1662 = vmatprep.mubr.bf16.mxu0 %v3362_v25  ;;  %v2956_v24 = vcombine.high %v207_v20, %v207_v20  ;;  %v2958_v25 = vcombine.high %v208_v21, %v208_v21 }
  0x83   :  { %1894 = vmatprep.mubr.bf16.mxu1 %v3364_v26  ;;  %v2955_v26 = vcombine.low %v207_v20, %v207_v20 }
  0x89   :  { %1663 = vmatmul.mubr.bf16.gmra.mxu0 %v3366_v27  ;;  %v2957_v27 = vcombine.low %v208_v21, %v208_v21 }
  0x8a   :  { %1895 = vmatmul.mubr.bf16.gmra.mxu1 %v3367_v28  ;;  %1670 = vmatprep.mubr.bf16.mxu0 %v3369_v0  ;;  %v3469_v28 = vld [vmem:[%s4778_s0 + $0x14] ss:$28 sps:$4 sm:$0xff]   ;;  %v4089_v0 = vld [vmem:[%s4779_s2] ss:$0 sm:$0xff] }
  0x8b   :  { %1902 = vmatprep.mubr.bf16.mxu1 %v3371_v29 }
  0x91   :  { %1671 = vmatmul.mubr.bf16.gmra.mxu0 %v3373_v30 }
  0x92   :  { %1903 = vmatmul.mubr.bf16.gmra.mxu1 %v3374_v31  ;;  %1678 = vmatprep.mubr.bf16.mxu0 %v3375_v32 }
  0x93   :  { %1910 = vmatprep.mubr.bf16.mxu1 %v3377_v33 }
  0x99   :  { %1679 = vmatmul.mubr.bf16.gmra.mxu0 %v3379_v34 }
  0x9a   :  { %1911 = vmatmul.mubr.bf16.gmra.mxu1 %v3380_v35  ;;  %1686 = vmatprep.mubr.bf16.mxu0 %v3382_v36  ;;  %v3467_v36 = vld [vmem:[%s4778_s0 + $0x10] ss:$28 sps:$4 sm:$0xff]  }
  0x9b   :  { %1918 = vmatprep.mubr.bf16.mxu1 %v3384_v37 }
  0xa1   :  { %1687 = vmatmul.mubr.bf16.gmra.mxu0 %v3386_v38 }
  0xa2   :  { %1919 = vmatmul.mubr.bf16.gmra.mxu1 %v3387_v39  ;;  %1694 = vmatprep.mubr.bf16.mxu0 %v3389_v41  ;;  %v3470_v39 = vld [vmem:[%s4778_s0 + $0x18] ss:$28 sps:$4 sm:$0xff]   ;;  %v3471_v41 = vld [vmem:[%s4778_s0 + $0x4c] ss:$28 sps:$4 sm:$0xff]  }
  0xa3   :  { %1926 = vmatprep.mubr.bf16.mxu1 %v3391_v42 }
  0xa9   :  { %1695 = vmatmul.mubr.bf16.gmra.mxu0 %v3394_v43 }
  0xaa   :  { %1927 = vmatmul.mubr.bf16.gmra.mxu1 %v3395_v44  ;;  %1702 = vmatprep.mubr.bf16.mxu0 %v3396_v45 }
  0xab   :  { %1934 = vmatprep.mubr.bf16.mxu1 %v3398_v46 }
  0xb1   :  { %1703 = vmatmul.mubr.bf16.gmra.mxu0 %v3400_v47 }
  0xb2   :  { %1935 = vmatmul.mubr.bf16.gmra.mxu1 %v3401_v48  ;;  %1710 = vmatprep.mubr.bf16.mxu0 %v3403_v49 }
  0xb3   :  { %1942 = vmatprep.mubr.bf16.mxu1 %v3405_v50 }
  0xb9   :  { %1711 = vmatmul.mubr.bf16.gmra.mxu0 %v3407_v51 }
  0xba   :  { %1943 = vmatmul.mubr.bf16.gmra.mxu1 %v3408_v52  ;;  %1718 = vmatprep.mubr.bf16.mxu0 %v3410_v53  ;;  %v3473_v52 = vld [vmem:[%s4778_s0 + $0x48] ss:$28 sps:$4 sm:$0xff]  }
  0xbb   :  { %1950 = vmatprep.mubr.bf16.mxu1 %v3412_v54 }
  0xc1   :  { %1719 = vmatmul.mubr.bf16.gmra.mxu0 %v3414_v55  ;;  %v3474_v55 = vld [vmem:[%s4778_s0 + $0x50] ss:$28 sps:$4 sm:$0xff]  }
  0xc2   :  { %1951 = vmatmul.mubr.bf16.gmra.mxu1 %v3415_v56  ;;  %1726 = vmatprep.mubr.bf16.mxu0 %v3416_v57  ;;  %v3475_v56 = vld [vmem:[%s4778_s0 + $0x84] ss:$28 sps:$4 sm:$0xff]  }
  0xc3   :  { %1958 = vmatprep.mubr.bf16.mxu1 %v3418_v58 }
  0xc9   :  { %1727 = vmatmul.mubr.bf16.gmra.mxu0 %v3420_v59 }
  0xca   :  { %1959 = vmatmul.mubr.bf16.gmra.mxu1 %v3421_v60  ;;  %1734 = vmatprep.mubr.bf16.mxu0 %v3423_v61 }
  0xcb   :  { %1966 = vmatprep.mubr.bf16.mxu1 %v3425_v62 }
  0xd1   :  { %1735 = vmatmul.mubr.bf16.gmra.mxu0 %v3427_v63 }
  0xd2   :  { %1967 = vmatmul.mubr.bf16.gmra.mxu1 %v3428_v1  ;;  %1742 = vmatprep.mubr.bf16.mxu0 %v3429_v2 }
  0xd3   :  { %1974 = vmatprep.mubr.bf16.mxu1 %v3431_v3 }
  0xd9   :  { %1743 = vmatmul.mubr.bf16.gmra.mxu0 %v3434_v4  ;;  %v3477_v4 = vld [vmem:[%s4778_s0 + $0x80] ss:$28 sps:$4 sm:$0xff]  }
  0xda   :  { %1975 = vmatmul.mubr.bf16.gmra.mxu1 %v3435_v5  ;;  %1750 = vmatprep.mubr.bf16.mxu0 %v3436_v6 }
  0xdb   :  { %1982 = vmatprep.mubr.bf16.mxu1 %v3438_v7  ;;  %v3478_v7 = vld [vmem:[%s4778_s0 + $0x88] ss:$28 sps:$4 sm:$0xff]  }
  0xe1   :  { %1751 = vmatmul.mubr.bf16.gmra.mxu0 %v3440_v8  ;;  %v3481_v8 = vld [vmem:[%s4778_s0 + $0xbc] ss:$28 sps:$4 sm:$0xff]  }
  0xe2   :  { %1983 = vmatmul.mubr.bf16.gmra.mxu1 %v3441_v9  ;;  %1758 = vmatprep.mubr.bf16.mxu0 %v3443_v10 }
  0xe3   :  { %1990 = vmatprep.mubr.bf16.mxu1 %v3445_v11 }
  0xe9   :  { %1759 = vmatmul.mubr.bf16.gmra.mxu0 %v3447_v12 }
  0xea   :  { %1991 = vmatmul.mubr.bf16.gmra.mxu1 %v3448_v13  ;;  %1766 = vmatprep.mubr.bf16.mxu0 %v3449_v14 }
  0xeb   :  { %1998 = vmatprep.mubr.bf16.mxu1 %v3451_v15 }
  0xf1   :  { %1767 = vmatmul.mubr.bf16.gmra.mxu0 %v3453_v16 }
  0xf2   :  { %1999 = vmatmul.mubr.bf16.gmra.mxu1 %v3454_v17  ;;  %1774 = vmatprep.mubr.bf16.mxu0 %v3456_v18 }
  0xf3   :  { %2006 = vmatprep.mubr.bf16.mxu1 %v3458_v19  ;;  %v3479_v19 = vld [vmem:[%s4778_s0 + $0xb8] ss:$28 sps:$4 sm:$0xff]  }
  0xf9   :  { %1775 = vmatmul.mubr.bf16.gmra.mxu0 %v3460_v22  ;;  %v3482_v22 = vld [vmem:[%s4778_s0 + $0xc0] ss:$28 sps:$4 sm:$0xff]  }
  0xfa   :  { %2007 = vmatmul.mubr.bf16.gmra.mxu1 %v3461_v23  ;;  %1782 = vmatprep.mubr.bf16.mxu0 %v2956_v24  ;;  %v3485_v23 = vld [vmem:[%s4778_s0 + $0xf4] ss:$28 sps:$4 sm:$0xff]  }
  0xfb   :  { %2014 = vmatprep.mubr.bf16.mxu1 %v2958_v25 }
 0x101   :  { %v1592_v29 = vpop.f32.mrf.mxu0  ;;  %1783 = vmatmul.mubr.bf16.gmra.mxu0 %v2955_v26 }
 0x102   :  { %v1593_v30 = vadd.f32 %v4089_v0, %v1592_v29  ;;  %v1824_v31 = vpop.f32.mrf.mxu1  ;;  %2015 = vmatmul.mubr.bf16.gmra.mxu1 %v2957_v27  ;;  %2054 = vmatprep.mubr.bf16.mxu0 %v3469_v28 }
 0x103   :  { %v1594_v32 = vpop.f32.mrf.mxu0  ;;  %3166 = vmatprep.mubr.msk.bf16.mxu1 %vm3568_vm0, %v3567_v40 }
 0x104   :  { %v4094_v33 = vadd.f32 %v1824_v31, %v1593_v30  ;;  %v1826_v34 = vpop.f32.mrf.mxu1 }
 0x105   :  { %v1595_v35 = vpop.f32.mrf.mxu0 }
 0x106   :  { %v1596_v37 = vadd.f32 %v4089_v0, %v1595_v35  ;;  %v1827_v38 = vpop.f32.mrf.mxu1  ;;  %v3483_v35 = vld [vmem:[%s4778_s0 + $0xf0] ss:$28 sps:$4 sm:$0xff]  }
 0x107   :  { %v1597_v42 = vpop.f32.mrf.mxu0 }
 0x108   :  { %v4106_v43 = vadd.f32 %v1827_v38, %v1596_v37  ;;  %v1829_v44 = vpop.f32.mrf.mxu1  ;;  %v3486_v38 = vld [vmem:[%s4778_s0 + $0xf8] ss:$28 sps:$4 sm:$0xff]  }
 0x109   :  { %v1600_v45 = vpop.f32.mrf.mxu0  ;;  %2055 = vmatmul.mubr.bf16.vlgmr.msra.gmra.mxu0 %v3467_v36 }
 0x10a   :  { %v1601_v46 = vadd.f32 %v4089_v0, %v1600_v45  ;;  %v1832_v47 = vpop.f32.mrf.mxu1  ;;  %3167 = vmatmul.mubr.msk.bf16.vlgmr.msra.gmra.mxu1 %vm1482_vm1, %v3470_v39  ;;  %2062 = vmatprep.mubr.bf16.mxu0 %v3471_v41  ;;  %v3489_v39 = vld [vmem:[%s4778_s0 + $0x12c] ss:$28 sps:$4 sm:$0xff]  }
 0x10b   :  { %v1602_v48 = vpop.f32.mrf.mxu0  ;;  %3170 = vmatprep.mubr.msk.bf16.mxu1 %vm3568_vm0, %v3567_v40 }
 0x10c   :  { %v4112_v49 = vadd.f32 %v1832_v47, %v1601_v46  ;;  %v1834_v50 = vpop.f32.mrf.mxu1 }
 0x10d   :  { %v1603_v51 = vpop.f32.mrf.mxu0 }
 0x10e   :  { %v1604_v53 = vadd.f32 %v4089_v0, %v1603_v51  ;;  %v1835_v54 = vpop.f32.mrf.mxu1 }
 0x10f   :  { %v1605_v57 = vpop.f32.mrf.mxu0 }
 0x110   :  { %v4124_v58 = vadd.f32 %v1835_v54, %v1604_v53  ;;  %v1837_v59 = vpop.f32.mrf.mxu1  ;;  %v3487_v53 = vld [vmem:[%s4778_s0 + $0x128] ss:$28 sps:$4 sm:$0xff]  }
 0x111   :  { %v1608_v60 = vpop.f32.mrf.mxu0  ;;  %2063 = vmatmul.mubr.bf16.gmra.mxu0 %v3473_v52  ;;  %v3493_v57 = vld [vmem:[%s4778_s0 + $0x164] ss:$28 sps:$4 sm:$0xff]  }
 0x112   :  { %v1609_v61 = vadd.f32 %v4089_v0, %v1608_v60  ;;  %v1840_v62 = vpop.f32.mrf.mxu1  ;;  %3171 = vmatmul.mubr.msk.bf16.gmra.mxu1 %vm1482_vm1, %v3474_v55  ;;  %2070 = vmatprep.mubr.bf16.mxu0 %v3475_v56  ;;  %v3490_v56 = vld [vmem:[%s4778_s0 + $0x130] ss:$28 sps:$4 sm:$0xff]  }
 0x113   :  { %v1610_v63 = vpop.f32.mrf.mxu0  ;;  %3174 = vmatprep.mubr.msk.bf16.mxu1 %vm3568_vm0, %v3567_v40 }
 0x114   :  { %v4130_v1 = vadd.f32 %v1840_v62, %v1609_v61  ;;  %v1842_v2 = vpop.f32.mrf.mxu1 }
 0x115   :  { %v1611_v3 = vpop.f32.mrf.mxu0 }
 0x116   :  { %v1612_v5 = vadd.f32 %v4089_v0, %v1611_v3  ;;  %v1843_v6 = vpop.f32.mrf.mxu1 }
 0x117   :  { %v1613_v9 = vpop.f32.mrf.mxu0 }
 0x118   :  { %v4142_v10 = vadd.f32 %v1843_v6, %v1612_v5  ;;  %v1845_v11 = vpop.f32.mrf.mxu1 }
 0x119   :  { %v1616_v12 = vpop.f32.mrf.mxu0  ;;  %2071 = vmatmul.mubr.bf16.gmra.mxu0 %v3477_v4  ;;  %v3494_v11 = vld [vmem:[%s4778_s0 + $0x168] ss:$28 sps:$4 sm:$0xff]  }
 0x11a   :  { %v1617_v13 = vadd.f32 %v4089_v0, %v1616_v12  ;;  %v1848_v14 = vpop.f32.mrf.mxu1  ;;  %3175 = vmatmul.mubr.msk.bf16.gmra.mxu1 %vm1482_vm1, %v3478_v7  ;;  %2078 = vmatprep.mubr.bf16.mxu0 %v3481_v8  ;;  %v3491_v7 = vld [vmem:[%s4778_s0 + $0x160] ss:$28 sps:$4 sm:$0xff]  }
 0x11b   :  { %v1618_v15 = vpop.f32.mrf.mxu0  ;;  %3178 = vmatprep.mubr.msk.bf16.mxu1 %vm3568_vm0, %v3567_v40  ;;  %v3497_v12 = vld [vmem:[%s4778_s0 + $0x19c] ss:$28 sps:$4 sm:$0xff]  }
 0x11c   :  { %v4148_v16 = vadd.f32 %v1848_v14, %v1617_v13  ;;  %v1850_v17 = vpop.f32.mrf.mxu1 }
 0x11d   :  { %v1619_v18 = vpop.f32.mrf.mxu0 }
 0x11e   :  { %v1620_v20 = vadd.f32 %v4089_v0, %v1619_v18  ;;  %v1851_v21 = vpop.f32.mrf.mxu1 }
 0x11f   :  { %v1621_v24 = vpop.f32.mrf.mxu0 }
 0x120   :  { %v4160_v25 = vadd.f32 %v1851_v21, %v1620_v20  ;;  %v1853_v26 = vpop.f32.mrf.mxu1  ;;  %v3495_v24 = vld [vmem:[%s4778_s0 + $0x198] ss:$28 sps:$4 sm:$0xff]  }
 0x121   :  { %v1624_v27 = vpop.f32.mrf.mxu0  ;;  %2079 = vmatmul.mubr.bf16.gmra.mxu0 %v3479_v19 }
 0x122   :  { %v1625_v28 = vadd.f32 %v4089_v0, %v1624_v27  ;;  %v1856_v29 = vpop.f32.mrf.mxu1  ;;  %3179 = vmatmul.mubr.msk.bf16.gmra.mxu1 %vm1482_vm1, %v3482_v22  ;;  %2086 = vmatprep.mubr.bf16.mxu0 %v3485_v23 }
 0x123   :  { %v1626_v30 = vpop.f32.mrf.mxu0  ;;  %3182 = vmatprep.mubr.msk.bf16.mxu1 %vm3568_vm0, %v3567_v40 }
 0x124   :  { %v4166_v31 = vadd.f32 %v1856_v29, %v1625_v28  ;;  %v1858_v32 = vpop.f32.mrf.mxu1  ;;  %v3498_v28 = vld [vmem:[%s4778_s0 + $0x1a0] ss:$28 sps:$4 sm:$0xff]   ;;  %v3501_v29 = vld [vmem:[%s4778_s0 + $0x1d4] ss:$28 sps:$4 sm:$0xff]  }
 0x125   :  { %v1627_v34 = vpop.f32.mrf.mxu0 }
 0x126   :  { %v1628_v36 = vadd.f32 %v4089_v0, %v1627_v34  ;;  %v1859_v37 = vpop.f32.mrf.mxu1 }
 0x127   :  { %v1629_v41 = vpop.f32.mrf.mxu0 }
 0x128   :  { %v4178_v42 = vadd.f32 %v1859_v37, %v1628_v36  ;;  %v1861_v44 = vpop.f32.mrf.mxu1 }
 0x129   :  { %v1632_v45 = vpop.f32.mrf.mxu0  ;;  %2087 = vmatmul.mubr.bf16.gmra.mxu0 %v3483_v35 }
 0x12a   :  { %v1633_v46 = vadd.f32 %v4089_v0, %v1632_v45  ;;  %v1864_v47 = vpop.f32.mrf.mxu1  ;;  %3183 = vmatmul.mubr.msk.bf16.gmra.mxu1 %vm1482_vm1, %v3486_v38  ;;  %2094 = vmatprep.mubr.bf16.mxu0 %v3489_v39  ;;  %v3499_v45 = vld [vmem:[%s4778_s0 + $0x1d0] ss:$28 sps:$4 sm:$0xff]  }
 0x12b   :  { %v1634_v48 = vpop.f32.mrf.mxu0  ;;  %3186 = vmatprep.mubr.msk.bf16.mxu1 %vm3568_vm0, %v3567_v40 }
 0x12c   :  { %v4184_v50 = vadd.f32 %v1864_v47, %v1633_v46  ;;  %v1866_v51 = vpop.f32.mrf.mxu1  ;;  %v3502_v48 = vld [vmem:[%s4778_s0 + $0x1d8] ss:$28 sps:$4 sm:$0xff]  }
 0x12d   :  { %v1635_v52 = vpop.f32.mrf.mxu0  ;;  %v3505_v51 = vld [vmem:[%s4778_s0 + $0x20c] ss:$28 sps:$4 sm:$0xff]  }
 0x12e   :  { %v1636_v54 = vadd.f32 %v4089_v0, %v1635_v52  ;;  %v1867_v55 = vpop.f32.mrf.mxu1 }
 0x12f   :  { %v1637_v59 = vpop.f32.mrf.mxu0 }
 0x130   :  { %v4196_v60 = vadd.f32 %v1867_v55, %v1636_v54  ;;  %v1869_v61 = vpop.f32.mrf.mxu1 }
 0x131   :  { %v1640_v62 = vpop.f32.mrf.mxu0  ;;  %2095 = vmatmul.mubr.bf16.gmra.mxu0 %v3487_v53 }
 0x132   :  { %v1641_v63 = vadd.f32 %v4089_v0, %v1640_v62  ;;  %v1872_v2 = vpop.f32.mrf.mxu1  ;;  %3187 = vmatmul.mubr.msk.bf16.gmra.mxu1 %vm1482_vm1, %v3490_v56  ;;  %2102 = vmatprep.mubr.bf16.mxu0 %v3493_v57 }
 0x133   :  { %v1642_v3 = vpop.f32.mrf.mxu0  ;;  %3190 = vmatprep.mubr.msk.bf16.mxu1 %vm3568_vm0, %v3567_v40 }
 0x134   :  { %v4202_v4 = vadd.f32 %v1872_v2, %v1641_v63  ;;  %v1874_v5 = vpop.f32.mrf.mxu1  ;;  %v3503_v2 = vld [vmem:[%s4778_s0 + $0x208] ss:$28 sps:$4 sm:$0xff]  }
 0x135   :  { %v1643_v6 = vpop.f32.mrf.mxu0 }
 0x136   :  { %v1644_v8 = vadd.f32 %v4089_v0, %v1643_v6  ;;  %v1875_v9 = vpop.f32.mrf.mxu1  ;;  %v3506_v6 = vld [vmem:[%s4778_s0 + $0x210] ss:$28 sps:$4 sm:$0xff]  }
 0x137   :  { %v1645_v13 = vpop.f32.mrf.mxu0 }
 0x138   :  { %v4214_v14 = vadd.f32 %v1875_v9, %v1644_v8  ;;  %v1877_v15 = vpop.f32.mrf.mxu1 }
 0x139   :  { %v1648_v17 = vpop.f32.mrf.mxu0  ;;  %2103 = vmatmul.mubr.bf16.gmra.mxu0 %v3491_v7  ;;  %v3509_v7 = vld [vmem:[%s4778_s0 + $0x244] ss:$28 sps:$4 sm:$0xff]  }
 0x13a   :  { %v1649_v18 = vadd.f32 %v4089_v0, %v1648_v17  ;;  %v1880_v19 = vpop.f32.mrf.mxu1  ;;  %3191 = vmatmul.mubr.msk.bf16.gmra.mxu1 %vm1482_vm1, %v3494_v11  ;;  %2110 = vmatprep.mubr.bf16.mxu0 %v3497_v12 }
 0x13b   :  { %v1650_v20 = vpop.f32.mrf.mxu0  ;;  %3194 = vmatprep.mubr.msk.bf16.mxu1 %vm3568_vm0, %v3567_v40 }
 0x13c   :  { %v4220_v21 = vadd.f32 %v1880_v19, %v1649_v18  ;;  %v1882_v22 = vpop.f32.mrf.mxu1 }
 0x13d   :  { %v1651_v23 = vpop.f32.mrf.mxu0  ;;  %v3507_v22 = vld [vmem:[%s4778_s0 + $0x240] ss:$28 sps:$4 sm:$0xff]  }
 0x13e   :  { %v1652_v26 = vadd.f32 %v4089_v0, %v1651_v23  ;;  %v1883_v27 = vpop.f32.mrf.mxu1 }
 0x13f   :  { %v1653_v30 = vpop.f32.mrf.mxu0 }
 0x140   :  { %v4232_v32 = vadd.f32 %v1883_v27, %v1652_v26  ;;  %v1885_v34 = vpop.f32.mrf.mxu1  ;;  %v3510_v26 = vld [vmem:[%s4778_s0 + $0x248] ss:$28 sps:$4 sm:$0xff]   ;;  %v3513_v27 = vld [vmem:[%s4778_s0 + $0x27c] ss:$28 sps:$4 sm:$0xff]  }
 0x141   :  { %v1656_v35 = vpop.f32.mrf.mxu0  ;;  %2111 = vmatmul.mubr.bf16.gmra.mxu0 %v3495_v24 }
 0x142   :  { %v1657_v36 = vadd.f32 %v4089_v0, %v1656_v35  ;;  %v1888_v37 = vpop.f32.mrf.mxu1  ;;  %3195 = vmatmul.mubr.msk.bf16.gmra.mxu1 %vm1482_vm1, %v3498_v28  ;;  %2118 = vmatprep.mubr.bf16.mxu0 %v3501_v29 }
 0x143   :  { %v1658_v38 = vpop.f32.mrf.mxu0  ;;  %3198 = vmatprep.mubr.msk.bf16.mxu1 %vm3568_vm0, %v3567_v40 }
 0x144   :  { %v4238_v39 = vadd.f32 %v1888_v37, %v1657_v36  ;;  %v1890_v41 = vpop.f32.mrf.mxu1 }
 0x145   :  { %v1659_v44 = vpop.f32.mrf.mxu0 }
 0x146   :  { %v1660_v46 = vadd.f32 %v4089_v0, %v1659_v44  ;;  %v1891_v47 = vpop.f32.mrf.mxu1 }
 0x147   :  { %v1661_v52 = vpop.f32.mrf.mxu0 }
 0x148   :  { %v4250_v53 = vadd.f32 %v1891_v47, %v1660_v46  ;;  %v1893_v54 = vpop.f32.mrf.mxu1 }
 0x149   :  { %v1664_v55 = vpop.f32.mrf.mxu0  ;;  %2119 = vmatmul.mubr.bf16.gmra.mxu0 %v3499_v45  ;;  %v3511_v45 = vld [vmem:[%s4778_s0 + $0x278] ss:$28 sps:$4 sm:$0xff]  }
 0x14a   :  { %v1665_v56 = vadd.f32 %v4089_v0, %v1664_v55  ;;  %v1896_v57 = vpop.f32.mrf.mxu1  ;;  %3199 = vmatmul.mubr.msk.bf16.gmra.mxu1 %vm1482_vm1, %v3502_v48  ;;  %2126 = vmatprep.mubr.bf16.mxu0 %v3505_v51  ;;  %v3514_v48 = vld [vmem:[%s4778_s0 + $0x280] ss:$28 sps:$4 sm:$0xff]   ;;  %v3517_v51 = vld [vmem:[%s4778_s0 + $0x2b4] ss:$28 sps:$4 sm:$0xff]  }
 0x14b   :  { %v1666_v59 = vpop.f32.mrf.mxu0  ;;  %3202 = vmatprep.mubr.msk.bf16.mxu1 %vm3568_vm0, %v3567_v40 }
 0x14c   :  { %v4256_v61 = vadd.f32 %v1896_v57, %v1665_v56  ;;  %v1898_v62 = vpop.f32.mrf.mxu1 }
 0x14d   :  { %v1667_v63 = vpop.f32.mrf.mxu0 }
 0x14e   :  { %v1668_v3 = vadd.f32 %v4089_v0, %v1667_v63  ;;  %v1899_v5 = vpop.f32.mrf.mxu1 }
 0x14f   :  { %v1669_v8 = vpop.f32.mrf.mxu0 }
 0x150   :  { %v4268_v9 = vadd.f32 %v1899_v5, %v1668_v3  ;;  %v1901_v11 = vpop.f32.mrf.mxu1  ;;  %v3515_v5 = vld [vmem:[%s4778_s0 + $0x2b0] ss:$28 sps:$4 sm:$0xff]   ;;  %v3518_v8 = vld [vmem:[%s4778_s0 + $0x2b8] ss:$28 sps:$4 sm:$0xff]  }
 0x151   :  { %v1672_v12 = vpop.f32.mrf.mxu0  ;;  %2127 = vmatmul.mubr.bf16.gmra.mxu0 %v3503_v2  ;;  %v3521_v11 = vld [vmem:[%s4778_s0 + $0x2ec] ss:$28 sps:$4 sm:$0xff]  }
 0x152   :  { %v1673_v13 = vadd.f32 %v4089_v0, %v1672_v12  ;;  %v1904_v15 = vpop.f32.mrf.mxu1  ;;  %3203 = vmatmul.mubr.msk.bf16.gmra.mxu1 %vm1482_vm1, %v3506_v6  ;;  %2134 = vmatprep.mubr.bf16.mxu0 %v3509_v7 }
 0x153   :  { %v1674_v17 = vpop.f32.mrf.mxu0  ;;  %3206 = vmatprep.mubr.msk.bf16.mxu1 %vm3568_vm0, %v3567_v40 }
 0x154   :  { %v4274_v18 = vadd.f32 %v1904_v15, %v1673_v13  ;;  %v1906_v19 = vpop.f32.mrf.mxu1 }
 0x155   :  { %v1675_v20 = vpop.f32.mrf.mxu0 }
 0x156   :  { %v1676_v23 = vadd.f32 %v4089_v0, %v1675_v20  ;;  %v1907_v24 = vpop.f32.mrf.mxu1 }
 0x157   :  { %v1677_v28 = vpop.f32.mrf.mxu0 }
 0x158   :  { %v4286_v29 = vadd.f32 %v1907_v24, %v1676_v23  ;;  %v1909_v30 = vpop.f32.mrf.mxu1 }
 0x159   :  { %v1680_v34 = vpop.f32.mrf.mxu0  ;;  %2135 = vmatmul.mubr.bf16.gmra.mxu0 %v3507_v22 }
 0x15a   :  { %v1681_v35 = vadd.f32 %v4089_v0, %v1680_v34  ;;  %v1912_v36 = vpop.f32.mrf.mxu1  ;;  %3207 = vmatmul.mubr.msk.bf16.gmra.mxu1 %vm1482_vm1, %v3510_v26  ;;  %2142 = vmatprep.mubr.bf16.mxu0 %v3513_v27  ;;  %v3519_v27 = vld [vmem:[%s4778_s0 + $0x2e8] ss:$28 sps:$4 sm:$0xff]   ;;  %v3522_v34 = vld [vmem:[%s4778_s0 + $0x2f0] ss:$28 sps:$4 sm:$0xff]  }
 0x15b   :  { %v1682_v37 = vpop.f32.mrf.mxu0  ;;  %3210 = vmatprep.mubr.msk.bf16.mxu1 %vm3568_vm0, %v3567_v40 }
 0x15c   :  { %v4292_v38 = vadd.f32 %v1912_v36, %v1681_v35  ;;  %v1914_v41 = vpop.f32.mrf.mxu1  ;;  %v3525_v35 = vld [vmem:[%s4778_s0 + $0x324] ss:$28 sps:$4 sm:$0xff]  }
 0x15d   :  { %v1683_v44 = vpop.f32.mrf.mxu0 }
 0x15e   :  { %v1684_v46 = vadd.f32 %v4089_v0, %v1683_v44  ;;  %v1915_v47 = vpop.f32.mrf.mxu1 }
 0x15f   :  { %v1685_v52 = vpop.f32.mrf.mxu0 }
 0x160   :  { %v4304_v54 = vadd.f32 %v1915_v47, %v1684_v46  ;;  %v1917_v55 = vpop.f32.mrf.mxu1 }
 0x161   :  { %v1688_v56 = vpop.f32.mrf.mxu0  ;;  %2143 = vmatmul.mubr.bf16.gmra.mxu0 %v3511_v45  ;;  %v3523_v55 = vld [vmem:[%s4778_s0 + $0x320] ss:$28 sps:$4 sm:$0xff]  }
 0x162   :  { %v1689_v57 = vadd.f32 %v4089_v0, %v1688_v56  ;;  %v1920_v59 = vpop.f32.mrf.mxu1  ;;  %3211 = vmatmul.mubr.msk.bf16.gmra.mxu1 %vm1482_vm1, %v3514_v48  ;;  %2150 = vmatprep.mubr.bf16.mxu0 %v3517_v51 }
 0x163   :  { %v1690_v62 = vpop.f32.mrf.mxu0  ;;  %3214 = vmatprep.mubr.msk.bf16.mxu1 %vm3568_vm0, %v3567_v40 }
 0x164   :  { %v4310_v63 = vadd.f32 %v1920_v59, %v1689_v57  ;;  %v1922_v2 = vpop.f32.mrf.mxu1  ;;  %v3526_v59 = vld [vmem:[%s4778_s0 + $0x328] ss:$28 sps:$4 sm:$0xff]   ;;  %v3529_v62 = vld [vmem:[%s4778_s0 + $0x35c] ss:$28 sps:$4 sm:$0xff]  }
 0x165   :  { %v1691_v3 = vpop.f32.mrf.mxu0 }
 0x166   :  { %v1692_v6 = vadd.f32 %v4089_v0, %v1691_v3  ;;  %v1923_v7 = vpop.f32.mrf.mxu1 }
 0x167   :  { %v1693_v12 = vpop.f32.mrf.mxu0 }
 0x168   :  { %v4322_v13 = vadd.f32 %v1923_v7, %v1692_v6  ;;  %v1925_v15 = vpop.f32.mrf.mxu1 }
 0x169   :  { %v1696_v17 = vpop.f32.mrf.mxu0  ;;  %2151 = vmatmul.mubr.bf16.gmra.mxu0 %v3515_v5 }
 0x16a   :  { %v1697_v19 = vadd.f32 %v4089_v0, %v1696_v17  ;;  %v1928_v20 = vpop.f32.mrf.mxu1  ;;  %3215 = vmatmul.mubr.msk.bf16.gmra.mxu1 %vm1482_vm1, %v3518_v8  ;;  %2158 = vmatprep.mubr.bf16.mxu0 %v3521_v11 }
 0x16b   :  { %v1698_v22 = vpop.f32.mrf.mxu0  ;;  %3218 = vmatprep.mubr.msk.bf16.mxu1 %vm3568_vm0, %v3567_v40 }
 0x16c   :  { %v4328_v23 = vadd.f32 %v1928_v20, %v1697_v19  ;;  %v1930_v24 = vpop.f32.mrf.mxu1  ;;  %v3527_v19 = vld [vmem:[%s4778_s0 + $0x358] ss:$28 sps:$4 sm:$0xff]  }
 0x16d   :  { %v1699_v26 = vpop.f32.mrf.mxu0  ;;  %v3530_v24 = vld [vmem:[%s4778_s0 + $0x360] ss:$28 sps:$4 sm:$0xff]  }
 0x16e   :  { %v1700_v28 = vadd.f32 %v4089_v0, %v1699_v26  ;;  %v1931_v30 = vpop.f32.mrf.mxu1  ;;  %v3533_v26 = vld [vmem:[%s4778_s0 + $0x394] ss:$28 sps:$4 sm:$0xff]  }
 0x16f   :  { %v1701_v36 = vpop.f32.mrf.mxu0 }
 0x170   :  { %v4340_v37 = vadd.f32 %v1931_v30, %v1700_v28  ;;  %v1933_v41 = vpop.f32.mrf.mxu1 }
 0x171   :  { %v1704_v44 = vpop.f32.mrf.mxu0  ;;  %2159 = vmatmul.mubr.bf16.gmra.mxu0 %v3519_v27 }
 0x172   :  { %v1705_v45 = vadd.f32 %v4089_v0, %v1704_v44  ;;  %v1936_v46 = vpop.f32.mrf.mxu1  ;;  %3219 = vmatmul.mubr.msk.bf16.gmra.mxu1 %vm1482_vm1, %v3522_v34  ;;  %2166 = vmatprep.mubr.bf16.mxu0 %v3525_v35 }
 0x173   :  { %v1706_v47 = vpop.f32.mrf.mxu0  ;;  %3222 = vmatprep.mubr.msk.bf16.mxu1 %vm3568_vm0, %v3567_v40 }
 0x174   :  { %v4346_v48 = vadd.f32 %v1936_v46, %v1705_v45  ;;  %v1938_v51 = vpop.f32.mrf.mxu1  ;;  %v3531_v47 = vld [vmem:[%s4778_s0 + $0x390] ss:$28 sps:$4 sm:$0xff]  }
 0x175   :  { %v1707_v52 = vpop.f32.mrf.mxu0 }
 0x176   :  { %v1708_v56 = vadd.f32 %v4089_v0, %v1707_v52  ;;  %v1939_v57 = vpop.f32.mrf.mxu1 }
 0x177   :  { %v1709_v2 = vpop.f32.mrf.mxu0 }
 0x178   :  { %v4358_v3 = vadd.f32 %v1939_v57, %v1708_v56  ;;  %v1941_v5 = vpop.f32.mrf.mxu1  ;;  %v3537_v56 = vld [vmem:[%s4778_s0 + $0x3cc] ss:$28 sps:$4 sm:$0xff]  }
 0x179   :  { %v1712_v6 = vpop.f32.mrf.mxu0  ;;  %2167 = vmatmul.mubr.bf16.gmra.mxu0 %v3523_v55  ;;  %v3534_v55 = vld [vmem:[%s4778_s0 + $0x398] ss:$28 sps:$4 sm:$0xff]  }
 0x17a   :  { %v1713_v7 = vadd.f32 %v4089_v0, %v1712_v6  ;;  %v1944_v8 = vpop.f32.mrf.mxu1  ;;  %3223 = vmatmul.mubr.msk.bf16.gmra.mxu1 %vm1482_vm1, %v3526_v59  ;;  %2174 = vmatprep.mubr.bf16.mxu0 %v3529_v62 }
 0x17b   :  { %v1714_v11 = vpop.f32.mrf.mxu0  ;;  %3226 = vmatprep.mubr.msk.bf16.mxu1 %vm3568_vm0, %v3567_v40 }
 0x17c   :  { %v4364_v12 = vadd.f32 %v1944_v8, %v1713_v7  ;;  %v1946_v15 = vpop.f32.mrf.mxu1 }
 0x17d   :  { %v1715_v17 = vpop.f32.mrf.mxu0 }
 0x17e   :  { %v1716_v20 = vadd.f32 %v4089_v0, %v1715_v17  ;;  %v1947_v22 = vpop.f32.mrf.mxu1  ;;  %v3535_v17 = vld [vmem:[%s4778_s0 + $0x3c8] ss:$28 sps:$4 sm:$0xff]  }
 0x17f   :  { %v1717_v27 = vpop.f32.mrf.mxu0 }
 0x180   :  { %v4376_v28 = vadd.f32 %v1947_v22, %v1716_v20  ;;  %v1949_v30 = vpop.f32.mrf.mxu1  ;;  %v3538_v22 = vld [vmem:[%s4778_s0 + $0x3d0] ss:$28 sps:$4 sm:$0xff]  }
 0x181   :  { %v1720_v34 = vpop.f32.mrf.mxu0  ;;  %2175 = vmatmul.mubr.bf16.gmra.mxu0 %v3527_v19 }
 0x182   :  { %v1721_v35 = vadd.f32 %v4089_v0, %v1720_v34  ;;  %v1952_v36 = vpop.f32.mrf.mxu1  ;;  %3227 = vmatmul.mubr.msk.bf16.gmra.mxu1 %vm1482_vm1, %v3530_v24  ;;  %2182 = vmatprep.mubr.bf16.mxu0 %v3533_v26  ;;  %v3541_v24 = vld [vmem:[%s4778_s0 + $0x404] ss:$28 sps:$4 sm:$0xff]  }
 0x183   :  { %v1722_v41 = vpop.f32.mrf.mxu0  ;;  %3230 = vmatprep.mubr.msk.bf16.mxu1 %vm3568_vm0, %v3567_v40 }
 0x184   :  { %v4382_v44 = vadd.f32 %v1952_v36, %v1721_v35  ;;  %v1954_v45 = vpop.f32.mrf.mxu1 }
 0x185   :  { %v1723_v46 = vpop.f32.mrf.mxu0 }
 0x186   :  { %v1724_v51 = vadd.f32 %v4089_v0, %v1723_v46  ;;  %v1955_v52 = vpop.f32.mrf.mxu1 }
 0x187   :  { %v1725_v57 = vpop.f32.mrf.mxu0 }
 0x188   :  { %v4394_v59 = vadd.f32 %v1955_v52, %v1724_v51  ;;  %v1957_v62 = vpop.f32.mrf.mxu1  ;;  %v3539_v51 = vld [vmem:[%s4778_s0 + $0x400] ss:$28 sps:$4 sm:$0xff]  }
 0x189   :  { %v1728_v2 = vpop.f32.mrf.mxu0  ;;  %2183 = vmatmul.mubr.bf16.gmra.mxu0 %v3531_v47  ;;  %v3545_v57 = vld [vmem:[%s4778_s0 + $0x43c] ss:$28 sps:$4 sm:$0xff]  }
 0x18a   :  { %v1729_v5 = vadd.f32 %v4089_v0, %v1728_v2  ;;  %v1960_v6 = vpop.f32.mrf.mxu1  ;;  %3231 = vmatmul.mubr.msk.bf16.gmra.mxu1 %vm1482_vm1, %v3534_v55  ;;  %2190 = vmatprep.mubr.bf16.mxu0 %v3537_v56  ;;  %v3542_v56 = vld [vmem:[%s4778_s0 + $0x408] ss:$28 sps:$4 sm:$0xff]  }
 0x18b   :  { %v1730_v7 = vpop.f32.mrf.mxu0  ;;  %3234 = vmatprep.mubr.msk.bf16.mxu1 %vm3568_vm0, %v3567_v40 }
 0x18c   :  { %v4400_v8 = vadd.f32 %v1960_v6, %v1729_v5  ;;  %v1962_v11 = vpop.f32.mrf.mxu1 }
 0x18d   :  { %v1731_v15 = vpop.f32.mrf.mxu0 }
 0x18e   :  { %v1732_v19 = vadd.f32 %v4089_v0, %v1731_v15  ;;  %v1963_v20 = vpop.f32.mrf.mxu1 }
 0x18f   :  { %v1733_v26 = vpop.f32.mrf.mxu0 }
 0x190   :  { %v4412_v27 = vadd.f32 %v1963_v20, %v1732_v19  ;;  %v1965_v30 = vpop.f32.mrf.mxu1 }
 0x191   :  { %v1736_v34 = vpop.f32.mrf.mxu0  ;;  %2191 = vmatmul.mubr.bf16.gmra.mxu0 %v3535_v17  ;;  %v3546_v30 = vld [vmem:[%s4778_s0 + $0x440] ss:$28 sps:$4 sm:$0xff]  }
 0x192   :  { %v1737_v35 = vadd.f32 %v4089_v0, %v1736_v34  ;;  %v1968_v36 = vpop.f32.mrf.mxu1  ;;  %3235 = vmatmul.mubr.msk.bf16.gmra.mxu1 %vm1482_vm1, %v3538_v22  ;;  %2198 = vmatprep.mubr.bf16.mxu0 %v3541_v24  ;;  %v3543_v22 = vld [vmem:[%s4778_s0 + $0x438] ss:$28 sps:$4 sm:$0xff]  }
 0x193   :  { %v1738_v41 = vpop.f32.mrf.mxu0  ;;  %3238 = vmatprep.mubr.msk.bf16.mxu1 %vm3568_vm0, %v3567_v40  ;;  %v3549_v34 = vld [vmem:[%s4778_s0 + $0x474] ss:$28 sps:$4 sm:$0xff]  }
 0x194   :  { %v4418_v45 = vadd.f32 %v1968_v36, %v1737_v35  ;;  %v1970_v46 = vpop.f32.mrf.mxu1 }
 0x195   :  { %v1739_v47 = vpop.f32.mrf.mxu0 }
 0x196   :  { %v1740_v52 = vadd.f32 %v4089_v0, %v1739_v47  ;;  %v1971_v55 = vpop.f32.mrf.mxu1 }
 0x197   :  { %v1741_v62 = vpop.f32.mrf.mxu0 }
 0x198   :  { %v4430_v2 = vadd.f32 %v1971_v55, %v1740_v52  ;;  %v1973_v5 = vpop.f32.mrf.mxu1  ;;  %v3547_v62 = vld [vmem:[%s4778_s0 + $0x470] ss:$28 sps:$4 sm:$0xff]  }
 0x199   :  { %v1744_v6 = vpop.f32.mrf.mxu0  ;;  %2199 = vmatmul.mubr.bf16.gmra.mxu0 %v3539_v51 }
 0x19a   :  { %v1745_v7 = vadd.f32 %v4089_v0, %v1744_v6  ;;  %v1976_v11 = vpop.f32.mrf.mxu1  ;;  %3239 = vmatmul.mubr.msk.bf16.gmra.mxu1 %vm1482_vm1, %v3542_v56  ;;  %2206 = vmatprep.mubr.bf16.mxu0 %v3545_v57 }
 0x19b   :  { %v1746_v15 = vpop.f32.mrf.mxu0  ;;  %3242 = vmatprep.mubr.msk.bf16.mxu1 %vm3568_vm0, %v3567_v40 }
 0x19c   :  { %v4436_v17 = vadd.f32 %v1976_v11, %v1745_v7  ;;  %v1978_v19 = vpop.f32.mrf.mxu1  ;;  %v3550_v7 = vld [vmem:[%s4778_s0 + $0x478] ss:$28 sps:$4 sm:$0xff]   ;;  %v3553_v11 = vld [vmem:[%s4778_s0 + $0x4ac] ss:$28 sps:$4 sm:$0xff]  }
 0x19d   :  { %v1747_v20 = vpop.f32.mrf.mxu0 }
 0x19e   :  { %v1748_v24 = vadd.f32 %v4089_v0, %v1747_v20  ;;  %v1979_v26 = vpop.f32.mrf.mxu1 }
 0x19f   :  { %v1749_v35 = vpop.f32.mrf.mxu0 }
 0x1a0   :  { %v4448_v36 = vadd.f32 %v1979_v26, %v1748_v24  ;;  %v1981_v41 = vpop.f32.mrf.mxu1 }
 0x1a1   :  { %v1752_v46 = vpop.f32.mrf.mxu0  ;;  %2207 = vmatmul.mubr.bf16.gmra.mxu0 %v3543_v22 }
 0x1a2   :  { %v1753_v47 = vadd.f32 %v4089_v0, %v1752_v46  ;;  %v1984_v51 = vpop.f32.mrf.mxu1  ;;  %3243 = vmatmul.mubr.msk.bf16.gmra.mxu1 %vm1482_vm1, %v3546_v30  ;;  %2214 = vmatprep.mubr.bf16.mxu0 %v3549_v34  ;;  %v3551_v46 = vld [vmem:[%s4778_s0 + $0x4a8] ss:$28 sps:$4 sm:$0xff]  }
 0x1a3   :  { %v1754_v52 = vpop.f32.mrf.mxu0  ;;  %3246 = vmatprep.mubr.msk.bf16.mxu1 %vm3568_vm0, %v3567_v40 }
 0x1a4   :  { %v4454_v55 = vadd.f32 %v1984_v51, %v1753_v47  ;;  %v1986_v56 = vpop.f32.mrf.mxu1  ;;  %v3554_v52 = vld [vmem:[%s4778_s0 + $0x4b0] ss:$28 sps:$4 sm:$0xff]  }
 0x1a5   :  { %v1755_v57 = vpop.f32.mrf.mxu0  ;;  %v3557_v56 = vld [vmem:[%s4778_s0 + $0x4e4] ss:$28 sps:$4 sm:$0xff]  }
 0x1a6   :  { %v1756_v5 = vadd.f32 %v4089_v0, %v1755_v57  ;;  %v1987_v6 = vpop.f32.mrf.mxu1 }
 0x1a7   :  { %v1757_v15 = vpop.f32.mrf.mxu0 }
 0x1a8   :  { %v4466_v19 = vadd.f32 %v1987_v6, %v1756_v5  ;;  %v1989_v20 = vpop.f32.mrf.mxu1 }
 0x1a9   :  { %v1760_v22 = vpop.f32.mrf.mxu0  ;;  %2215 = vmatmul.mubr.bf16.gmra.mxu0 %v3547_v62 }
 0x1aa   :  { %v1761_v24 = vadd.f32 %v4089_v0, %v1760_v22  ;;  %v1992_v26 = vpop.f32.mrf.mxu1  ;;  %3247 = vmatmul.mubr.msk.bf16.gmra.mxu1 %vm1482_vm1, %v3550_v7  ;;  %2222 = vmatprep.mubr.bf16.mxu0 %v3553_v11 }
 0x1ab   :  { %v1762_v30 = vpop.f32.mrf.mxu0  ;;  %3250 = vmatprep.mubr.msk.bf16.mxu1 %vm3568_vm0, %v3567_v40 }
 0x1ac   :  { %v4472_v34 = vadd.f32 %v1992_v26, %v1761_v24  ;;  %v1994_v35 = vpop.f32.mrf.mxu1  ;;  %v3555_v26 = vld [vmem:[%s4778_s0 + $0x4e0] ss:$28 sps:$4 sm:$0xff]  }
 0x1ad   :  { %v1763_v41 = vpop.f32.mrf.mxu0 }
 0x1ae   :  { %v1764_v47 = vadd.f32 %v4089_v0, %v1763_v41  ;;  %v1995_v51 = vpop.f32.mrf.mxu1  ;;  %v3558_v41 = vld [vmem:[%s4778_s0 + $0x4e8] ss:$28 sps:$4 sm:$0xff]  }
 0x1af   :  { %v1765_v57 = vpop.f32.mrf.mxu0 }
 0x1b0   :  { %v4484_v62 = vadd.f32 %v1995_v51, %v1764_v47  ;;  %v1997_v5 = vpop.f32.mrf.mxu1 }
 0x1b1   :  { %v1768_v6 = vpop.f32.mrf.mxu0  ;;  %2223 = vmatmul.mubr.bf16.gmra.mxu0 %v3551_v46  ;;  %v3561_v46 = vld [vmem:[%s4778_s0 + $0x51c] ss:$28 sps:$4 sm:$0xff]  }
 0x1b2   :  { %v1769_v7 = vadd.f32 %v4089_v0, %v1768_v6  ;;  %v2000_v11 = vpop.f32.mrf.mxu1  ;;  %3251 = vmatmul.mubr.msk.bf16.gmra.mxu1 %vm1482_vm1, %v3554_v52  ;;  %2230 = vmatprep.mubr.bf16.mxu0 %v3557_v56 }
 0x1b3   :  { %v1770_v15 = vpop.f32.mrf.mxu0  ;;  %3254 = vmatprep.mubr.msk.bf16.mxu1 %vm3568_vm0, %v3567_v40 }
 0x1b4   :  { %v4490_v20 = vadd.f32 %v2000_v11, %v1769_v7  ;;  %v2002_v22 = vpop.f32.mrf.mxu1  ;;  %v209_v7 = vld [vmem:[%s4778_s0 + $0x550] sm:$0xff] }
 0x1b5   :  { %v1771_v24 = vpop.f32.mrf.mxu0 }
 0x1b6   :  { %v1772_v30 = vadd.f32 %v4089_v0, %v1771_v24  ;;  %v2003_v35 = vpop.f32.mrf.mxu1  ;;  %v3559_v24 = vld [vmem:[%s4778_s0 + $0x518] ss:$28 sps:$4 sm:$0xff]  }
 0x1b7   :  { %v1773_v47 = vpop.f32.mrf.mxu0 }
 0x1b8   :  { %v4502_v51 = vadd.f32 %v2003_v35, %v1772_v30  ;;  %v2005_v52 = vpop.f32.mrf.mxu1  ;;  %v3562_v35 = vld [vmem:[%s4778_s0 + $0x520] ss:$28 sps:$4 sm:$0xff]  }
 0x1b9   :  { %v1776_v56 = vpop.f32.mrf.mxu0  ;;  %2231 = vmatmul.mubr.bf16.gmra.mxu0 %v3555_v26 }
 0x1ba   :  { %v1777_v57 = vadd.f32 %v4089_v0, %v1776_v56  ;;  %v2008_v5 = vpop.f32.mrf.mxu1  ;;  %3255 = vmatmul.mubr.msk.bf16.gmra.mxu1 %vm1482_vm1, %v3558_v41  ;;  %2238 = vmatprep.mubr.bf16.mxu0 %v3561_v46  ;;  %v2960_v41 = vcombine.high %v209_v7, %v209_v7 }
 0x1bb   :  { %v1778_v6 = vpop.f32.mrf.mxu0  ;;  %3258 = vmatprep.mubr.msk.bf16.mxu1 %vm3568_vm0, %v3567_v40 }
 0x1bc   :  { %v4511_v11 = vadd.f32 %v2008_v5, %v1777_v57  ;;  %v2010_v15 = vpop.f32.mrf.mxu1 }
 0x1bd   :  { %v1779_v22 = vpop.f32.mrf.mxu0 }
 0x1be   :  { %4781 = vst [vmem:[#allocation2_spill] sm:$0xff] %v4511_v11  ;;  %v1780_v26 = vadd.f32 %v4089_v0, %v1779_v22  ;;  %v2011_v30 = vpop.f32.mrf.mxu1 }
 0x1bf   :  { %v1781_v46 = vpop.f32.mrf.mxu0 }
 0x1c0   :  { %v4520_v47 = vadd.f32 %v2011_v30, %v1780_v26  ;;  %v2013_v52 = vpop.f32.mrf.mxu1  ;;  %v2959_v46 = vcombine.low %v209_v7, %v209_v7 }
 0x1c1   :  { %v1784_v56 = vpop.f32.mrf.mxu0  ;;  %2239 = vmatmul.mubr.bf16.gmra.mxu0 %v3559_v24  ;;  %v3565_v24 = vld [vmem:[%s4778_s0 + $0x558] ss:$0 sps:$4 sm:$0xff]  }
 0x1c2   :  { %v1785_v57 = vadd.f32 %v4089_v0, %v1784_v56  ;;  %v2016_v5 = vpop.f32.mrf.mxu1  ;;  %3259 = vmatmul.mubr.msk.bf16.gmra.mxu1 %vm1482_vm1, %v3562_v35  ;;  %2246 = vmatprep.mubr.bf16.mxu0 %v2960_v41 }
 0x1c3   :  { %v1786_v6 = vpop.f32.mrf.mxu0  ;;  %3262 = vmatprep.mubr.msk.bf16.mxu1 %vm3568_vm0, %v3567_v40 }
 0x1c4   :  { %v4526_v15 = vadd.f32 %v2016_v5, %v1785_v57  ;;  %v2018_v22 = vpop.f32.mrf.mxu1 }
 0x1c5   :  { %v1787_v11 = vpop.f32.mrf.mxu0 }
 0x1c6   :  { %4782 = vst [vmem:[#allocation3_spill] sm:$0xff] %v4526_v15  ;;  %v2019_v26 = vpop.f32.mrf.mxu1 }
 0x1c7   :  { %v1788_v30 = vpop.f32.mrf.mxu0 }
 0x1c8   :  { %v2020_v0 = vpop.f32.mrf.mxu1 }
 0x1c9   :  { %v2056_v52 = vpop.f32.mrf.mxu0  ;;  %2247 = vmatmul.mubr.bf16.gmra.mxu0 %v2959_v46 }
 0x1ca   :  { %v2057_v35 = vadd.f32 %v2056_v52, %v4094_v33  ;;  %v2288_v41 = vpop.f32.mrf.mxu1  ;;  %3263 = vmatmul.mubr.msk.bf16.gmra.mxu1 %vm1482_vm1, %v3565_v24 }
 0x1cb   :  { %v2058_v40 = vpop.f32.mrf.mxu0 }
 0x1cc   :  { %v2289_v56 = vadd.f32 %v2288_v41, %v2057_v35  ;;  %v3168_v57 = vpop.f32.mrf.mxu1 }
 0x1cd   :  { %v2059_v5 = vpop.f32.mrf.mxu0 }
 0x1ce   :  { %v2486_v11 = vmax.f32 %v2289_v56, 0.0  ;;  %v2060_v7 = vadd.f32 %v2059_v5, %v4106_v43  ;;  %v2291_v6 = vpop.f32.mrf.mxu1 }
 0x1cf   :  { %v2061_v22 = vpop.f32.mrf.mxu0 }
 0x1d0   :  { %v3086_v26 = vpack.c.bf16 %v2486_v11, %v2486_v11  ;;  %v2292_v30 = vadd.f32 %v2291_v6, %v2060_v7  ;;  %v3169_v0 = vpop.f32.mrf.mxu1 }
 0x1d1   :  { %v2064_v15 = vpop.f32.mrf.mxu0 }
 0x1d2   :  { %2733 = vst.msk [vmem:[%s4780_s3] sm:$0xf] %vm2732_vm2, %v3086_v26  ;;  %v2487_v33 = vmax.f32 %v2292_v30, 0.0  ;;  %v2065_v46 = vadd.f32 %v2064_v15, %v4112_v49  ;;  %v2296_v24 = vpop.f32.mrf.mxu1 }
 0x1d3   :  { %v2066_v52 = vpop.f32.mrf.mxu0 }
 0x1d4   :  { %v3087_v35 = vpack.c.bf16 %v2487_v33, %v2487_v33  ;;  %v2297_v41 = vadd.f32 %v2296_v24, %v2065_v46  ;;  %v3172_v43 = vpop.f32.mrf.mxu1 }
 0x1d5   :  { %v2067_v40 = vpop.f32.mrf.mxu0 }
 0x1d6   :  { %2734 = vst.msk [vmem:[%s4780_s3 + $0x4] sm:$0xf] %vm2732_vm2, %v3087_v35  ;;  %v2488_v56 = vmax.f32 %v2297_v41, 0.0  ;;  %v2068_v57 = vadd.f32 %v2067_v40, %v4124_v58  ;;  %v2299_v5 = vpop.f32.mrf.mxu1 }
 0x1d7   :  { %v2069_v11 = vpop.f32.mrf.mxu0 }
 0x1d8   :  { %v3088_v7 = vpack.c.bf16 %v2488_v56, %v2488_v56  ;;  %v2300_v6 = vadd.f32 %v2299_v5, %v2068_v57  ;;  %v3173_v22 = vpop.f32.mrf.mxu1 }
 0x1d9   :  { %v2072_v49 = vpop.f32.mrf.mxu0 }
 0x1da   :  { %2735 = vst.msk [vmem:[%s4780_s3 + $0x8] sm:$0xf] %vm2732_vm2, %v3088_v7  ;;  %v2489_v15 = vmax.f32 %v2300_v6, 0.0  ;;  %v2073_v26 = vadd.f32 %v2072_v49, %v4130_v1  ;;  %v2304_v30 = vpop.f32.mrf.mxu1 }
 0x1db   :  { %v2074_v0 = vpop.f32.mrf.mxu0 }
 0x1dc   :  { %v3089_v33 = vpack.c.bf16 %v2489_v15, %v2489_v15  ;;  %v2305_v46 = vadd.f32 %v2304_v30, %v2073_v26  ;;  %v3176_v24 = vpop.f32.mrf.mxu1 }
 0x1dd   :  { %v2075_v58 = vpop.f32.mrf.mxu0 }
 0x1de   :  { %2736 = vst.msk [vmem:[%s4780_s3 + $0xc] sm:$0xf] %vm2732_vm2, %v3089_v33  ;;  %v2490_v52 = vmax.f32 %v2305_v46, 0.0  ;;  %v2076_v35 = vadd.f32 %v2075_v58, %v4142_v10  ;;  %v2307_v41 = vpop.f32.mrf.mxu1 }
 0x1df   :  { %v2077_v43 = vpop.f32.mrf.mxu0 }
 0x1e0   :  { %v3090_v40 = vpack.c.bf16 %v2490_v52, %v2490_v52  ;;  %v2308_v56 = vadd.f32 %v2307_v41, %v2076_v35  ;;  %v3177_v57 = vpop.f32.mrf.mxu1 }
 0x1e1   :  { %v2080_v1 = vpop.f32.mrf.mxu0 }
 0x1e2   :  { %2737 = vst.msk [vmem:[%s4780_s3 + $0x10] sm:$0xf] %vm2732_vm2, %v3090_v40  ;;  %v2491_v5 = vmax.f32 %v2308_v56, 0.0  ;;  %v2081_v11 = vadd.f32 %v2080_v1, %v4148_v16  ;;  %v2312_v7 = vpop.f32.mrf.mxu1 }
 0x1e3   :  { %v2082_v6 = vpop.f32.mrf.mxu0 }
 0x1e4   :  { %v3091_v22 = vpack.c.bf16 %v2491_v5, %v2491_v5  ;;  %v2313_v49 = vadd.f32 %v2312_v7, %v2081_v11  ;;  %v3180_v15 = vpop.f32.mrf.mxu1 }
 0x1e5   :  { %v2083_v10 = vpop.f32.mrf.mxu0 }
 0x1e6   :  { %2738 = vst.msk [vmem:[%s4780_s3 + $0x14] sm:$0xf] %vm2732_vm2, %v3091_v22  ;;  %v2492_v26 = vmax.f32 %v2313_v49, 0.0  ;;  %v2084_v30 = vadd.f32 %v2083_v10, %v4160_v25  ;;  %v2315_v0 = vpop.f32.mrf.mxu1 }
 0x1e7   :  { %v2085_v33 = vpop.f32.mrf.mxu0 }
 0x1e8   :  { %v3092_v46 = vpack.c.bf16 %v2492_v26, %v2492_v26  ;;  %v2316_v24 = vadd.f32 %v2315_v0, %v2084_v30  ;;  %v3181_v58 = vpop.f32.mrf.mxu1 }
 0x1e9   :  { %v2088_v16 = vpop.f32.mrf.mxu0 }
 0x1ea   :  { %2739 = vst.msk [vmem:[%s4780_s3 + $0x18] sm:$0xf] %vm2732_vm2, %v3092_v46  ;;  %v2493_v52 = vmax.f32 %v2316_v24, 0.0  ;;  %v2089_v35 = vadd.f32 %v2088_v16, %v4166_v31  ;;  %v2320_v41 = vpop.f32.mrf.mxu1 }
 0x1eb   :  { %v2090_v43 = vpop.f32.mrf.mxu0 }
 0x1ec   :  { %v3093_v40 = vpack.c.bf16 %v2493_v52, %v2493_v52  ;;  %v2321_v56 = vadd.f32 %v2320_v41, %v2089_v35  ;;  %v3184_v57 = vpop.f32.mrf.mxu1 }
 0x1ed   :  { %v2091_v25 = vpop.f32.mrf.mxu0 }
 0x1ee   :  { %2740 = vst.msk [vmem:[%s4780_s3 + $0x1c] sm:$0xf] %vm2732_vm2, %v3093_v40  ;;  %v2494_v1 = vmax.f32 %v2321_v56, 0.0  ;;  %v2092_v5 = vadd.f32 %v2091_v25, %v4178_v42  ;;  %v2323_v11 = vpop.f32.mrf.mxu1 }
 0x1ef   :  { %v2093_v7 = vpop.f32.mrf.mxu0 }
 0x1f0   :  { %v3094_v6 = vpack.c.bf16 %v2494_v1, %v2494_v1  ;;  %v2324_v22 = vadd.f32 %v2323_v11, %v2092_v5  ;;  %v3185_v49 = vpop.f32.mrf.mxu1 }
 0x1f1   :  { %v2096_v31 = vpop.f32.mrf.mxu0 }
 0x1f2   :  { %2741 = vst.msk [vmem:[%s4780_s3 + $0x20] sm:$0xf] %vm2732_vm2, %v3094_v6  ;;  %v2495_v15 = vmax.f32 %v2324_v22, 0.0  ;;  %v2097_v10 = vadd.f32 %v2096_v31, %v4184_v50  ;;  %v2328_v26 = vpop.f32.mrf.mxu1 }
 0x1f3   :  { %v2098_v30 = vpop.f32.mrf.mxu0 }
 0x1f4   :  { %v3095_v0 = vpack.c.bf16 %v2495_v15, %v2495_v15  ;;  %v2329_v33 = vadd.f32 %v2328_v26, %v2097_v10  ;;  %v3188_v46 = vpop.f32.mrf.mxu1 }
 0x1f5   :  { %v2099_v42 = vpop.f32.mrf.mxu0 }
 0x1f6   :  { %2742 = vst.msk [vmem:[%s4780_s3 + $0x24] sm:$0xf] %vm2732_vm2, %v3095_v0  ;;  %v2496_v24 = vmax.f32 %v2329_v33, 0.0  ;;  %v2100_v58 = vadd.f32 %v2099_v42, %v4196_v60  ;;  %v2331_v16 = vpop.f32.mrf.mxu1 }
 0x1f7   :  { %v2101_v52 = vpop.f32.mrf.mxu0 }
 0x1f8   :  { %v3096_v35 = vpack.c.bf16 %v2496_v24, %v2496_v24  ;;  %v2332_v41 = vadd.f32 %v2331_v16, %v2100_v58  ;;  %v3189_v43 = vpop.f32.mrf.mxu1 }
 0x1f9   :  { %v2104_v50 = vpop.f32.mrf.mxu0 }
 0x1fa   :  { %2743 = vst.msk [vmem:[%s4780_s3 + $0x28] sm:$0xf] %vm2732_vm2, %v3096_v35  ;;  %v2497_v40 = vmax.f32 %v2332_v41, 0.0  ;;  %v2105_v56 = vadd.f32 %v2104_v50, %v4202_v4  ;;  %v2336_v57 = vpop.f32.mrf.mxu1 }
 0x1fb   :  { %v2106_v25 = vpop.f32.mrf.mxu0 }
 0x1fc   :  { %v3097_v1 = vpack.c.bf16 %v2497_v40, %v2497_v40  ;;  %v2337_v5 = vadd.f32 %v2336_v57, %v2105_v56  ;;  %v3192_v11 = vpop.f32.mrf.mxu1 }
 0x1fd   :  { %v2107_v60 = vpop.f32.mrf.mxu0 }
 0x1fe   :  { %2744 = vst.msk [vmem:[%s4780_s3 + $0x2c] sm:$0xf] %vm2732_vm2, %v3097_v1  ;;  %v2498_v7 = vmax.f32 %v2337_v5, 0.0  ;;  %v2108_v6 = vadd.f32 %v2107_v60, %v4214_v14  ;;  %v2339_v22 = vpop.f32.mrf.mxu1 }
 0x1ff   :  { %v2109_v49 = vpop.f32.mrf.mxu0 }
 0x200   :  { %v3098_v31 = vpack.c.bf16 %v2498_v7, %v2498_v7  ;;  %v2340_v15 = vadd.f32 %v2339_v22, %v2108_v6  ;;  %v3193_v10 = vpop.f32.mrf.mxu1 }
 0x201   :  { %v2112_v4 = vpop.f32.mrf.mxu0 }
 0x202   :  { %2745 = vst.msk [vmem:[%s4780_s3 + $0x30] sm:$0xf] %vm2732_vm2, %v3098_v31  ;;  %v2499_v26 = vmax.f32 %v2340_v15, 0.0  ;;  %v2113_v30 = vadd.f32 %v2112_v4, %v4220_v21  ;;  %v2344_v0 = vpop.f32.mrf.mxu1 }
 0x203   :  { %v2114_v33 = vpop.f32.mrf.mxu0 }
 0x204   :  { %v3099_v46 = vpack.c.bf16 %v2499_v26, %v2499_v26  ;;  %v2345_v42 = vadd.f32 %v2344_v0, %v2113_v30  ;;  %v3196_v24 = vpop.f32.mrf.mxu1 }
 0x205   :  { %v2115_v14 = vpop.f32.mrf.mxu0 }
 0x206   :  { %2746 = vst.msk [vmem:[%s4780_s3 + $0x34] sm:$0xf] %vm2732_vm2, %v3099_v46  ;;  %v2500_v58 = vmax.f32 %v2345_v42, 0.0  ;;  %v2116_v16 = vadd.f32 %v2115_v14, %v4232_v32  ;;  %v2347_v52 = vpop.f32.mrf.mxu1 }
 0x207   :  { %v2117_v35 = vpop.f32.mrf.mxu0 }
 0x208   :  { %v3100_v41 = vpack.c.bf16 %v2500_v58, %v2500_v58  ;;  %v2348_v43 = vadd.f32 %v2347_v52, %v2116_v16  ;;  %v3197_v50 = vpop.f32.mrf.mxu1 }
 0x209   :  { %v2120_v21 = vpop.f32.mrf.mxu0 }
 0x20a   :  { %2747 = vst.msk [vmem:[%s4780_s3 + $0x38] sm:$0xf] %vm2732_vm2, %v3100_v41  ;;  %v2501_v40 = vmax.f32 %v2348_v43, 0.0  ;;  %v2121_v56 = vadd.f32 %v2120_v21, %v4238_v39  ;;  %v2352_v57 = vpop.f32.mrf.mxu1 }
 0x20b   :  { %v2122_v25 = vpop.f32.mrf.mxu0 }
 0x20c   :  { %v3101_v1 = vpack.c.bf16 %v2501_v40, %v2501_v40  ;;  %v2353_v5 = vadd.f32 %v2352_v57, %v2121_v56  ;;  %v3200_v11 = vpop.f32.mrf.mxu1 }
 0x20d   :  { %v2123_v32 = vpop.f32.mrf.mxu0 }
 0x20e   :  { %2748 = vst.msk [vmem:[%s4780_s3 + $0x3c] sm:$0xf] %vm2732_vm2, %v3101_v1  ;;  %v2502_v60 = vmax.f32 %v2353_v5, 0.0  ;;  %v2124_v7 = vadd.f32 %v2123_v32, %v4250_v53  ;;  %v2355_v6 = vpop.f32.mrf.mxu1 }
 0x20f   :  { %v2125_v22 = vpop.f32.mrf.mxu0 }
 0x210   :  { %v3102_v49 = vpack.c.bf16 %v2502_v60, %v2502_v60  ;;  %v2356_v31 = vadd.f32 %v2355_v6, %v2124_v7  ;;  %v3201_v15 = vpop.f32.mrf.mxu1 }
 0x211   :  { %v2128_v39 = vpop.f32.mrf.mxu0 }
 0x212   :  { %2749 = vst.msk [vmem:[%s4780_s3 + $0x40] sm:$0xf] %vm2732_vm2, %v3102_v49  ;;  %v2503_v10 = vmax.f32 %v2356_v31, 0.0  ;;  %v2129_v4 = vadd.f32 %v2128_v39, %v4256_v61  ;;  %v2360_v26 = vpop.f32.mrf.mxu1 }
 0x213   :  { %v2130_v30 = vpop.f32.mrf.mxu0 }
 0x214   :  { %v3103_v0 = vpack.c.bf16 %v2503_v10, %v2503_v10  ;;  %v2361_v33 = vadd.f32 %v2360_v26, %v2129_v4  ;;  %v3204_v46 = vpop.f32.mrf.mxu1 }
 0x215   :  { %v2131_v53 = vpop.f32.mrf.mxu0 }
 0x216   :  { %2750 = vst.msk [vmem:[%s4780_s3 + $0x44] sm:$0xf] %vm2732_vm2, %v3103_v0  ;;  %v2504_v42 = vmax.f32 %v2361_v33, 0.0  ;;  %v2132_v24 = vadd.f32 %v2131_v53, %v4268_v9  ;;  %v2363_v14 = vpop.f32.mrf.mxu1 }
 0x217   :  { %v2133_v58 = vpop.f32.mrf.mxu0 }
 0x218   :  { %v3104_v16 = vpack.c.bf16 %v2504_v42, %v2504_v42  ;;  %v2364_v52 = vadd.f32 %v2363_v14, %v2132_v24  ;;  %v3205_v35 = vpop.f32.mrf.mxu1 }
 0x219   :  { %v2136_v61 = vpop.f32.mrf.mxu0 }
 0x21a   :  { %2751 = vst.msk [vmem:[%s4780_s3 + $0x48] sm:$0xf] %vm2732_vm2, %v3104_v16  ;;  %v2505_v41 = vmax.f32 %v2364_v52, 0.0  ;;  %v2137_v43 = vadd.f32 %v2136_v61, %v4274_v18  ;;  %v2368_v50 = vpop.f32.mrf.mxu1 }
 0x21b   :  { %v2138_v21 = vpop.f32.mrf.mxu0 }
 0x21c   :  { %v3105_v40 = vpack.c.bf16 %v2505_v41, %v2505_v41  ;;  %v2369_v56 = vadd.f32 %v2368_v50, %v2137_v43  ;;  %v3208_v57 = vpop.f32.mrf.mxu1 }
 0x21d   :  { %v2139_v9 = vpop.f32.mrf.mxu0 }
 0x21e   :  { %2752 = vst.msk [vmem:[%s4780_s3 + $0x4c] sm:$0xf] %vm2732_vm2, %v3105_v40  ;;  %v2506_v25 = vmax.f32 %v2369_v56, 0.0  ;;  %v2140_v1 = vadd.f32 %v2139_v9, %v4286_v29  ;;  %v2371_v5 = vpop.f32.mrf.mxu1 }
 0x21f   :  { %v2141_v11 = vpop.f32.mrf.mxu0 }
 0x220   :  { %v3106_v32 = vpack.c.bf16 %v2506_v25, %v2506_v25  ;;  %v2372_v60 = vadd.f32 %v2371_v5, %v2140_v1  ;;  %v3209_v7 = vpop.f32.mrf.mxu1 }
 0x221   :  { %v2144_v18 = vpop.f32.mrf.mxu0 }
 0x222   :  { %2753 = vst.msk [vmem:[%s4780_s3 + $0x50] sm:$0xf] %vm2732_vm2, %v3106_v32  ;;  %v2507_v6 = vmax.f32 %v2372_v60, 0.0  ;;  %v2145_v22 = vadd.f32 %v2144_v18, %v4292_v38  ;;  %v2376_v49 = vpop.f32.mrf.mxu1 }
 0x223   :  { %v2146_v31 = vpop.f32.mrf.mxu0 }
 0x224   :  { %v3107_v15 = vpack.c.bf16 %v2507_v6, %v2507_v6  ;;  %v2377_v39 = vadd.f32 %v2376_v49, %v2145_v22  ;;  %v3212_v10 = vpop.f32.mrf.mxu1 }
 0x225   :  { %v2147_v29 = vpop.f32.mrf.mxu0 }
 0x226   :  { %2754 = vst.msk [vmem:[%s4780_s3 + $0x54] sm:$0xf] %vm2732_vm2, %v3107_v15  ;;  %v2508_v4 = vmax.f32 %v2377_v39, 0.0  ;;  %v2148_v26 = vadd.f32 %v2147_v29, %v4304_v54  ;;  %v2379_v30 = vpop.f32.mrf.mxu1 }
 0x227   :  { %v2149_v0 = vpop.f32.mrf.mxu0 }
 0x228   :  { %v3108_v33 = vpack.c.bf16 %v2508_v4, %v2508_v4  ;;  %v2380_v46 = vadd.f32 %v2379_v30, %v2148_v26  ;;  %v3213_v53 = vpop.f32.mrf.mxu1 }
 0x229   :  { %v2152_v38 = vpop.f32.mrf.mxu0 }
 0x22a   :  { %2755 = vst.msk [vmem:[%s4780_s3 + $0x58] sm:$0xf] %vm2732_vm2, %v3108_v33  ;;  %v2509_v42 = vmax.f32 %v2380_v46, 0.0  ;;  %v2153_v24 = vadd.f32 %v2152_v38, %v4310_v63  ;;  %v2384_v14 = vpop.f32.mrf.mxu1 }
 0x22b   :  { %v2154_v58 = vpop.f32.mrf.mxu0 }
 0x22c   :  { %v3109_v16 = vpack.c.bf16 %v2509_v42, %v2509_v42  ;;  %v2385_v52 = vadd.f32 %v2384_v14, %v2153_v24  ;;  %v3216_v35 = vpop.f32.mrf.mxu1 }
 0x22d   :  { %v2155_v54 = vpop.f32.mrf.mxu0 }
 0x22e   :  { %2756 = vst.msk [vmem:[%s4780_s3 + $0x5c] sm:$0xf] %vm2732_vm2, %v3109_v16  ;;  %v2510_v61 = vmax.f32 %v2385_v52, 0.0  ;;  %v2156_v41 = vadd.f32 %v2155_v54, %v4322_v13  ;;  %v2387_v43 = vpop.f32.mrf.mxu1 }
 0x22f   :  { %v2157_v50 = vpop.f32.mrf.mxu0 }
 0x230   :  { %v3110_v21 = vpack.c.bf16 %v2510_v61, %v2510_v61  ;;  %v2388_v40 = vadd.f32 %v2387_v43, %v2156_v41  ;;  %v3217_v56 = vpop.f32.mrf.mxu1 }
 0x231   :  { %v2160_v63 = vpop.f32.mrf.mxu0 }
 0x232   :  { %2757 = vst.msk [vmem:[%s4780_s3 + $0x60] sm:$0xf] %vm2732_vm2, %v3110_v21  ;;  %v2511_v57 = vmax.f32 %v2388_v40, 0.0  ;;  %v2161_v9 = vadd.f32 %v2160_v63, %v4328_v23  ;;  %v2392_v25 = vpop.f32.mrf.mxu1 }
 0x233   :  { %v2162_v1 = vpop.f32.mrf.mxu0 }
 0x234   :  { %v3111_v5 = vpack.c.bf16 %v2511_v57, %v2511_v57  ;;  %v2393_v11 = vadd.f32 %v2392_v25, %v2161_v9  ;;  %v3220_v32 = vpop.f32.mrf.mxu1 }
 0x235   :  { %v2163_v13 = vpop.f32.mrf.mxu0 }
 0x236   :  { %2758 = vst.msk [vmem:[%s4780_s3 + $0x64] sm:$0xf] %vm2732_vm2, %v3111_v5  ;;  %v2512_v60 = vmax.f32 %v2393_v11, 0.0  ;;  %v2164_v7 = vadd.f32 %v2163_v13, %v4340_v37  ;;  %v2395_v18 = vpop.f32.mrf.mxu1 }
 0x237   :  { %v2165_v6 = vpop.f32.mrf.mxu0 }
 0x238   :  { %v3112_v22 = vpack.c.bf16 %v2512_v60, %v2512_v60  ;;  %v2396_v49 = vadd.f32 %v2395_v18, %v2164_v7  ;;  %v3221_v31 = vpop.f32.mrf.mxu1 }
 0x239   :  { %v2168_v23 = vpop.f32.mrf.mxu0 }
 0x23a   :  { %2759 = vst.msk [vmem:[%s4780_s3 + $0x68] sm:$0xf] %vm2732_vm2, %v3112_v22  ;;  %v2513_v15 = vmax.f32 %v2396_v49, 0.0  ;;  %v2169_v39 = vadd.f32 %v2168_v23, %v4346_v48  ;;  %v2400_v10 = vpop.f32.mrf.mxu1 }
 0x23b   :  { %v2170_v29 = vpop.f32.mrf.mxu0 }
 0x23c   :  { %v3113_v4 = vpack.c.bf16 %v2513_v15, %v2513_v15  ;;  %v2401_v26 = vadd.f32 %v2400_v10, %v2169_v39  ;;  %v3224_v30 = vpop.f32.mrf.mxu1 }
 0x23d   :  { %v2171_v37 = vpop.f32.mrf.mxu0 }
 0x23e   :  { %2760 = vst.msk [vmem:[%s4780_s3 + $0x6c] sm:$0xf] %vm2732_vm2, %v3113_v4  ;;  %v2514_v0 = vmax.f32 %v2401_v26, 0.0  ;;  %v2172_v33 = vadd.f32 %v2171_v37, %v4358_v3  ;;  %v2403_v46 = vpop.f32.mrf.mxu1 }
 0x23f   :  { %v2173_v53 = vpop.f32.mrf.mxu0 }
 0x240   :  { %v3114_v38 = vpack.c.bf16 %v2514_v0, %v2514_v0  ;;  %v2404_v42 = vadd.f32 %v2403_v46, %v2172_v33  ;;  %v3225_v24 = vpop.f32.mrf.mxu1 }
 0x241   :  { %v2176_v48 = vpop.f32.mrf.mxu0 }
 0x242   :  { %2761 = vst.msk [vmem:[%s4780_s3 + $0x70] sm:$0xf] %vm2732_vm2, %v3114_v38  ;;  %v2515_v14 = vmax.f32 %v2404_v42, 0.0  ;;  %v2177_v58 = vadd.f32 %v2176_v48, %v4364_v12  ;;  %v2408_v16 = vpop.f32.mrf.mxu1 }
 0x243   :  { %v2178_v52 = vpop.f32.mrf.mxu0 }
 0x244   :  { %v3115_v35 = vpack.c.bf16 %v2515_v14, %v2515_v14  ;;  %v2409_v54 = vadd.f32 %v2408_v16, %v2177_v58  ;;  %v3228_v61 = vpop.f32.mrf.mxu1 }
 0x245   :  { %v2179_v3 = vpop.f32.mrf.mxu0 }
 0x246   :  { %2762 = vst.msk [vmem:[%s4780_s3 + $0x74] sm:$0xf] %vm2732_vm2, %v3115_v35  ;;  %v2516_v41 = vmax.f32 %v2409_v54, 0.0  ;;  %v2180_v43 = vadd.f32 %v2179_v3, %v4376_v28  ;;  %v2411_v50 = vpop.f32.mrf.mxu1 }
 0x247   :  { %v2181_v21 = vpop.f32.mrf.mxu0 }
 0x248   :  { %v3116_v40 = vpack.c.bf16 %v2516_v41, %v2516_v41  ;;  %v2412_v56 = vadd.f32 %v2411_v50, %v2180_v43  ;;  %v3229_v63 = vpop.f32.mrf.mxu1 }
 0x249   :  { %v2184_v12 = vpop.f32.mrf.mxu0 }
 0x24a   :  { %2763 = vst.msk [vmem:[%s4780_s3 + $0x78] sm:$0xf] %vm2732_vm2, %v3116_v40  ;;  %v2517_v57 = vmax.f32 %v2412_v56, 0.0  ;;  %v2185_v9 = vadd.f32 %v2184_v12, %v4382_v44  ;;  %v2416_v25 = vpop.f32.mrf.mxu1 }
 0x24b   :  { %v2186_v1 = vpop.f32.mrf.mxu0 }
 0x24c   :  { %v3117_v5 = vpack.c.bf16 %v2517_v57, %v2517_v57  ;;  %v2417_v11 = vadd.f32 %v2416_v25, %v2185_v9  ;;  %v3232_v32 = vpop.f32.mrf.mxu1 }
 0x24d   :  { %v2187_v28 = vpop.f32.mrf.mxu0 }
 0x24e   :  { %2764 = vst.msk [vmem:[%s4780_s3 + $0x7c] sm:$0xf] %vm2732_vm2, %v3117_v5  ;;  %v2518_v13 = vmax.f32 %v2417_v11, 0.0  ;;  %v2188_v60 = vadd.f32 %v2187_v28, %v4394_v59  ;;  %v2419_v7 = vpop.f32.mrf.mxu1 }
 0x24f   :  { %v2189_v18 = vpop.f32.mrf.mxu0 }
 0x250   :  { %v3118_v6 = vpack.c.bf16 %v2518_v13, %v2518_v13  ;;  %v2420_v22 = vadd.f32 %v2419_v7, %v2188_v60  ;;  %v3233_v49 = vpop.f32.mrf.mxu1 }
 0x251   :  { %v2192_v44 = vpop.f32.mrf.mxu0 }
 0x252   :  { %2765 = vst.msk [vmem:[%s4780_s3 + $0x80] sm:$0xf] %vm2732_vm2, %v3118_v6  ;;  %v2519_v31 = vmax.f32 %v2420_v22, 0.0  ;;  %v2193_v23 = vadd.f32 %v2192_v44, %v4400_v8  ;;  %v2424_v15 = vpop.f32.mrf.mxu1 }
 0x253   :  { %v2194_v39 = vpop.f32.mrf.mxu0 }
 0x254   :  { %v3119_v10 = vpack.c.bf16 %v2519_v31, %v2519_v31  ;;  %v2425_v29 = vadd.f32 %v2424_v15, %v2193_v23  ;;  %v3236_v4 = vpop.f32.mrf.mxu1 }
 0x255   :  { %v2195_v59 = vpop.f32.mrf.mxu0 }
 0x256   :  { %2766 = vst.msk [vmem:[%s4780_s3 + $0x84] sm:$0xf] %vm2732_vm2, %v3119_v10  ;;  %v2520_v26 = vmax.f32 %v2425_v29, 0.0  ;;  %v2196_v30 = vadd.f32 %v2195_v59, %v4412_v27  ;;  %v2427_v37 = vpop.f32.mrf.mxu1 }
 0x257   :  { %v2197_v0 = vpop.f32.mrf.mxu0 }
 0x258   :  { %v3120_v33 = vpack.c.bf16 %v2520_v26, %v2520_v26  ;;  %v2428_v46 = vadd.f32 %v2427_v37, %v2196_v30  ;;  %v3237_v53 = vpop.f32.mrf.mxu1 }
 0x259   :  { %v2200_v8 = vpop.f32.mrf.mxu0 }
 0x25a   :  { %2767 = vst.msk [vmem:[%s4780_s3 + $0x88] sm:$0xf] %vm2732_vm2, %v3120_v33  ;;  %v2521_v38 = vmax.f32 %v2428_v46, 0.0  ;;  %v2201_v42 = vadd.f32 %v2200_v8, %v4418_v45  ;;  %v2432_v24 = vpop.f32.mrf.mxu1 }
 0x25b   :  { %v2202_v48 = vpop.f32.mrf.mxu0 }
 0x25c   :  { %v3121_v14 = vpack.c.bf16 %v2521_v38, %v2521_v38  ;;  %v2433_v58 = vadd.f32 %v2432_v24, %v2201_v42  ;;  %v3240_v16 = vpop.f32.mrf.mxu1 }
 0x25d   :  { %v2203_v27 = vpop.f32.mrf.mxu0 }
 0x25e   :  { %2768 = vst.msk [vmem:[%s4780_s3 + $0x8c] sm:$0xf] %vm2732_vm2, %v3121_v14  ;;  %v2522_v52 = vmax.f32 %v2433_v58, 0.0  ;;  %v2204_v35 = vadd.f32 %v2203_v27, %v4430_v2  ;;  %v2435_v54 = vpop.f32.mrf.mxu1 }
 0x25f   :  { %v2205_v61 = vpop.f32.mrf.mxu0 }
 0x260   :  { %v3122_v3 = vpack.c.bf16 %v2522_v52, %v2522_v52  ;;  %v2436_v41 = vadd.f32 %v2435_v54, %v2204_v35  ;;  %v3241_v43 = vpop.f32.mrf.mxu1 }
 0x261   :  { %v2208_v45 = vpop.f32.mrf.mxu0 }
 0x262   :  { %2769 = vst.msk [vmem:[%s4780_s3 + $0x90] sm:$0xf] %vm2732_vm2, %v3122_v3  ;;  %v2523_v50 = vmax.f32 %v2436_v41, 0.0  ;;  %v2209_v21 = vadd.f32 %v2208_v45, %v4436_v17  ;;  %v2440_v40 = vpop.f32.mrf.mxu1 }
 0x263   :  { %v2210_v56 = vpop.f32.mrf.mxu0 }
 0x264   :  { %v3123_v63 = vpack.c.bf16 %v2523_v50, %v2523_v50  ;;  %v2441_v12 = vadd.f32 %v2440_v40, %v2209_v21  ;;  %v3244_v57 = vpop.f32.mrf.mxu1  ;;  %v4783_v56 = vld [vmem:[#allocation2_spill] sm:$0xff] }
 0x265   :  { %v2211_v2 = vpop.f32.mrf.mxu0 }
 0x266   :  { %2770 = vst.msk [vmem:[%s4780_s3 + $0x94] sm:$0xf] %vm2732_vm2, %v3123_v63  ;;  %v2524_v9 = vmax.f32 %v2441_v12, 0.0  ;;  %v2212_v25 = vadd.f32 %v2211_v2, %v4448_v36  ;;  %v2443_v1 = vpop.f32.mrf.mxu1 }
 0x267   :  { %v2213_v5 = vpop.f32.mrf.mxu0 }
 0x268   :  { %v3124_v11 = vpack.c.bf16 %v2524_v9, %v2524_v9  ;;  %v2444_v32 = vadd.f32 %v2443_v1, %v2212_v25  ;;  %v3245_v28 = vpop.f32.mrf.mxu1 }
 0x269   :  { %v2216_v17 = vpop.f32.mrf.mxu0 }
 0x26a   :  { %2771 = vst.msk [vmem:[%s4780_s3 + $0x98] sm:$0xf] %vm2732_vm2, %v3124_v11  ;;  %v2525_v13 = vmax.f32 %v2444_v32, 0.0  ;;  %v2217_v60 = vadd.f32 %v2216_v17, %v4454_v55  ;;  %v2448_v7 = vpop.f32.mrf.mxu1 }
 0x26b   :  { %v2218_v18 = vpop.f32.mrf.mxu0 }
 0x26c   :  { %v3125_v6 = vpack.c.bf16 %v2525_v13, %v2525_v13  ;;  %v2449_v22 = vadd.f32 %v2448_v7, %v2217_v60  ;;  %v3248_v49 = vpop.f32.mrf.mxu1  ;;  %v4784_v18 = vld [vmem:[#allocation3_spill] sm:$0xff] }
 0x26d   :  { %v2219_v36 = vpop.f32.mrf.mxu0 }
 0x26e   :  { %2772 = vst.msk [vmem:[%s4780_s3 + $0x9c] sm:$0xf] %vm2732_vm2, %v3125_v6  ;;  %v2526_v44 = vmax.f32 %v2449_v22, 0.0  ;;  %v2220_v31 = vadd.f32 %v2219_v36, %v4466_v19  ;;  %v2451_v23 = vpop.f32.mrf.mxu1 }
 0x26f   :  { %v2221_v15 = vpop.f32.mrf.mxu0 }
 0x270   :  { %v3126_v39 = vpack.c.bf16 %v2526_v44, %v2526_v44  ;;  %v2452_v10 = vadd.f32 %v2451_v23, %v2220_v31  ;;  %v3249_v29 = vpop.f32.mrf.mxu1 }
 0x271   :  { %v2224_v55 = vpop.f32.mrf.mxu0 }
 0x272   :  { %2773 = vst.msk [vmem:[%s4780_s3 + $0xa0] sm:$0xf] %vm2732_vm2, %v3126_v39  ;;  %v2527_v4 = vmax.f32 %v2452_v10, 0.0  ;;  %v2225_v59 = vadd.f32 %v2224_v55, %v4472_v34  ;;  %v2456_v26 = vpop.f32.mrf.mxu1 }
 0x273   :  { %v2226_v30 = vpop.f32.mrf.mxu0 }
 0x274   :  { %v3127_v37 = vpack.c.bf16 %v2527_v4, %v2527_v4  ;;  %v2457_v0 = vadd.f32 %v2456_v26, %v2225_v59  ;;  %v3252_v33 = vpop.f32.mrf.mxu1 }
 0x275   :  { %v2227_v19 = vpop.f32.mrf.mxu0 }
 0x276   :  { %2774 = vst.msk [vmem:[%s4780_s3 + $0xa4] sm:$0xf] %vm2732_vm2, %v3127_v37  ;;  %v2528_v46 = vmax.f32 %v2457_v0, 0.0  ;;  %v2228_v53 = vadd.f32 %v2227_v19, %v4484_v62  ;;  %v2459_v8 = vpop.f32.mrf.mxu1 }
 0x277   :  { %v2229_v38 = vpop.f32.mrf.mxu0 }
 0x278   :  { %v3128_v42 = vpack.c.bf16 %v2528_v46, %v2528_v46  ;;  %v2460_v24 = vadd.f32 %v2459_v8, %v2228_v53  ;;  %v3253_v48 = vpop.f32.mrf.mxu1 }
 0x279   :  { %v2232_v34 = vpop.f32.mrf.mxu0 }
 0x27a   :  { %2775 = vst.msk [vmem:[%s4780_s3 + $0xa8] sm:$0xf] %vm2732_vm2, %v3128_v42  ;;  %v2529_v14 = vmax.f32 %v2460_v24, 0.0  ;;  %v2233_v58 = vadd.f32 %v2232_v34, %v4490_v20  ;;  %v2464_v16 = vpop.f32.mrf.mxu1 }
 0x27b   :  { %v2234_v27 = vpop.f32.mrf.mxu0 }
 0x27c   :  { %v3129_v52 = vpack.c.bf16 %v2529_v14, %v2529_v14  ;;  %v2465_v35 = vadd.f32 %v2464_v16, %v2233_v58  ;;  %v3256_v54 = vpop.f32.mrf.mxu1 }
 0x27d   :  { %v2235_v62 = vpop.f32.mrf.mxu0 }
 0x27e   :  { %2776 = vst.msk [vmem:[%s4780_s3 + $0xac] sm:$0xf] %vm2732_vm2, %v3129_v52  ;;  %v2530_v61 = vmax.f32 %v2465_v35, 0.0  ;;  %v2236_v3 = vadd.f32 %v2235_v62, %v4502_v51  ;;  %v2467_v41 = vpop.f32.mrf.mxu1 }
 0x27f   :  { %v2237_v43 = vpop.f32.mrf.mxu0 }
 0x280   :  { %v3130_v45 = vpack.c.bf16 %v2530_v61, %v2530_v61  ;;  %v2468_v50 = vadd.f32 %v2467_v41, %v2236_v3  ;;  %v3257_v21 = vpop.f32.mrf.mxu1 }
 0x281   :  { %v2240_v20 = vpop.f32.mrf.mxu0 }
 0x282   :  { %2777 = vst.msk [vmem:[%s4780_s3 + $0xb0] sm:$0xf] %vm2732_vm2, %v3130_v45  ;;  %v2531_v40 = vmax.f32 %v2468_v50, 0.0  ;;  %v2241_v63 = vadd.f32 %v2240_v20, %v4783_v56  ;;  %v2472_v12 = vpop.f32.mrf.mxu1 }
 0x283   :  { %v2242_v57 = vpop.f32.mrf.mxu0 }
 0x284   :  { %v3131_v2 = vpack.c.bf16 %v2531_v40, %v2531_v40  ;;  %v2473_v9 = vadd.f32 %v2472_v12, %v2241_v63  ;;  %v3260_v25 = vpop.f32.mrf.mxu1 }
 0x285   :  { %v2243_v51 = vpop.f32.mrf.mxu0 }
 0x286   :  { %2778 = vst.msk [vmem:[%s4780_s3 + $0xb4] sm:$0xf] %vm2732_vm2, %v3131_v2  ;;  %v2532_v1 = vmax.f32 %v2473_v9, 0.0  ;;  %v2244_v5 = vadd.f32 %v2243_v51, %v4520_v47  ;;  %v2475_v11 = vpop.f32.mrf.mxu1 }
 0x287   :  { %v2245_v32 = vpop.f32.mrf.mxu0 }
 0x288   :  { %v3132_v28 = vpack.c.bf16 %v2532_v1, %v2532_v1  ;;  %v2476_v17 = vadd.f32 %v2475_v11, %v2244_v5  ;;  %v3261_v13 = vpop.f32.mrf.mxu1 }
 0x289   :  { %v2248_v60 = vpop.f32.mrf.mxu0 }
 0x28a   :  { %2779 = vst.msk [vmem:[%s4780_s3 + $0xb8] sm:$0xf] %vm2732_vm2, %v3132_v28  ;;  %v2533_v7 = vmax.f32 %v2476_v17, 0.0  ;;  %v2249_v6 = vadd.f32 %v2248_v60, %v4784_v18  ;;  %v2480_v22 = vpop.f32.mrf.mxu1 }
 0x28b   :  { %v2250_v49 = vpop.f32.mrf.mxu0 }
 0x28c   :  { %v3133_v36 = vpack.c.bf16 %v2533_v7, %v2533_v7  ;;  %v2481_v44 = vadd.f32 %v2480_v22, %v2249_v6  ;;  %v3264_v31 = vpop.f32.mrf.mxu1 }
 0x28d   :  { %v2251_v47 = vpop.f32.mrf.mxu0 }
 0x28e   :  { %2780 = vst.msk [vmem:[%s4780_s3 + $0xbc] sm:$0xf] %vm2732_vm2, %v3133_v36  ;;  %v2534_v23 = vmax.f32 %v2481_v44, 0.0  ;;  %v2483_v15 = vpop.f32.mrf.mxu1 }
 0x28f   :  { %v2252_v39 = vpop.f32.mrf.mxu0 }
 0x290   :  { %v3134_v10 = vpack.c.bf16 %v2534_v23, %v2534_v23  ;;  %v3265_v29 = vpop.f32.mrf.mxu1 }
 0x292   :  { %2781 = vst.msk [vmem:[%s4780_s3 + $0xc0] sm:$0xf] %vm2732_vm2, %v3134_v10 }

// kernel: forward.10
= control target key start
LH: loop header
LB: loop body
LE: loop exit
PB: predicated region body
PF: predicated region fallthrough
CT: control target
= control target key end

     0   :  { %s6109_s12 = smov 0   ;;  %s6111_s13 = smov 0   ;;  %s7486_s0 = inlined_call_operand.vmem [shape: bf16[8,3136], index: 0, kind: input, shape index: {}]   ;;  %s7487_s1 = inlined_call_operand.vmem [shape: bf16[3136,1024], index: 1, kind: input, shape index: {}]   ;;  %s7488_s2 = inlined_call_operand.vmem [shape: f32[1,1024], index: 2, kind: input, shape index: {}]   ;;  %s7489_s3 = inlined_call_operand.vmem [shape: bf16[8,1024], index: 3, kind: output, shape index: {}]  }
   0x1   :  { %s6113_s14 = smov 0   ;;  %s6115_s15 = smov 0  }
   0x2   :  { %s6117_s16 = smov 0  }
   0x3 LB: > { %s25_s17 = sadd.s32 1, %s6082_s15  ;;  %p65_p1 = scmp.ne.s32.totalorder %s6074_s13, %s6070_s12  ;;  %s6086_s16 = sphi %s6117_s16, %s13_s16   ;;  %s6082_s15 = sphi %s6115_s15, %s7493_s15   ;;  %s6078_s14 = sphi %s6113_s14, %s7492_s14   ;;  %s6074_s13 = sphi %s6111_s13, %s7491_s13   ;;  %s6070_s12 = sphi %s6109_s12, %s7490_s12  }
   0x4   : > { %p27_p0 = scmp.ge.s32.totalorder %s25_s17, 4  ;;  %p66_p2 = scmp.eq.s32.totalorder %s6086_s16, 0 }
   0x5   : > { %s58_s19 = sadd.s32 1, %s6074_s13  ;;  %p4962_p5 = scmp.ge.s32.totalorder %s6086_s16, 4 }
   0x6   : > { %s7495_s17 = smov (%p27_p0, %s25_s17), 0  ;;  %p67_p3 = por %p66_p2, %p65_p1 }
   0x7   : > { %s55_s18 = ssub.s32 %s6082_s15, %s7495_s17  ;;  %153 = sbr.rel (%p4962_p5) target bundleno = 408 (0x198), region = 20 }
   0x8   : > { %p56_p4 = scmp.eq.s32.totalorder %s55_s18, 0 }
   0xa   : > { %s6144_s20 = scalar_select %p56_p4, %s6074_s13, %s58_s19  }
   0xc   : > { %156 = sbr.rel (!%p67_p3) target bundleno = 408 (0x198), region = 24  ;;  %s158_s21 = sand.u32 (%p67_p3), 1, %s6074_s13  }
   0xd   : > { %s5390_s22 = sshll.u32 (%p67_p3), %s6082_s15, 3  ;;  %s5392_s23 = smul.u32 (%p67_p3), 3136, %s158_s21 }
   0xe   : > { %s6152_s26 = scalar_lea.vmem (%p67_p3), %s7487_s1, %s5390_s22 }
   0xf   : > { %v974_v0 = vld [vmem:[%s6152_s26] sm:$0xff] (%p67_p3)  ;;  %s6160_s27 = scalar_lea.vmem (%p67_p3), [#allocation2], %s5392_s23 }
  0x10   : > { %v976_v1 = vld [vmem:[%s6152_s26 + $0x20] sm:$0xff] (%p67_p3)  ;;  %975 = vst [vmem:[%s6160_s27] sm:$0xff] (%p67_p3), %v974_v0 }
  0x11   : > { %v978_v2 = vld [vmem:[%s6152_s26 + $0x40] sm:$0xff]  ;;  %977 = vst [vmem:[%s6160_s27 + $0x8] sm:$0xff] %v976_v1 }
  0x12   : > { %v980_v3 = vld [vmem:[%s6152_s26 + $0x60] sm:$0xff]  ;;  %979 = vst [vmem:[%s6160_s27 + $0x10] sm:$0xff] %v978_v2 }
  0x13   : > { %v982_v4 = vld [vmem:[%s6152_s26 + $0x80] sm:$0xff]  ;;  %981 = vst [vmem:[%s6160_s27 + $0x18] sm:$0xff] %v980_v3 }
  0x14   : > { %v984_v5 = vld [vmem:[%s6152_s26 + $0xa0] sm:$0xff]  ;;  %983 = vst [vmem:[%s6160_s27 + $0x20] sm:$0xff] %v982_v4 }
  0x15   : > { %985 = vst [vmem:[%s6160_s27 + $0x28] sm:$0xff] %v984_v5  ;;  %v986_v6 = vld [vmem:[%s6152_s26 + $0xc0] sm:$0xff] }
  0x16   : > { %v988_v7 = vld [vmem:[%s6152_s26 + $0xe0] sm:$0xff]  ;;  %987 = vst [vmem:[%s6160_s27 + $0x30] sm:$0xff] %v986_v6 }
  0x17   : > { %v990_v8 = vld [vmem:[%s6152_s26 + $0x100] sm:$0xff]  ;;  %989 = vst [vmem:[%s6160_s27 + $0x38] sm:$0xff] %v988_v7 }
  0x18   : > { %991 = vst [vmem:[%s6160_s27 + $0x40] sm:$0xff] %v990_v8  ;;  %v992_v9 = vld [vmem:[%s6152_s26 + $0x120] sm:$0xff] }
  0x19   : > { %v994_v10 = vld [vmem:[%s6152_s26 + $0x140] sm:$0xff]  ;;  %993 = vst [vmem:[%s6160_s27 + $0x48] sm:$0xff] %v992_v9 }
  0x1a   : > { %v996_v11 = vld [vmem:[%s6152_s26 + $0x160] sm:$0xff]  ;;  %995 = vst [vmem:[%s6160_s27 + $0x50] sm:$0xff] %v994_v10 }
  0x1b   : > { %997 = vst [vmem:[%s6160_s27 + $0x58] sm:$0xff] %v996_v11  ;;  %v998_v12 = vld [vmem:[%s6152_s26 + $0x180] sm:$0xff] }
  0x1c   : > { %v1000_v13 = vld [vmem:[%s6152_s26 + $0x1a0] sm:$0xff]  ;;  %999 = vst [vmem:[%s6160_s27 + $0x60] sm:$0xff] %v998_v12 }
  0x1d   : > { %v1002_v14 = vld [vmem:[%s6152_s26 + $0x1c0] sm:$0xff]  ;;  %1001 = vst [vmem:[%s6160_s27 + $0x68] sm:$0xff] %v1000_v13 }
  0x1e   : > { %1003 = vst [vmem:[%s6160_s27 + $0x70] sm:$0xff] %v1002_v14  ;;  %v1004_v15 = vld [vmem:[%s6152_s26 + $0x1e0] sm:$0xff] }
  0x1f   : > { %v1006_v16 = vld [vmem:[%s6152_s26 + $0x200] sm:$0xff]  ;;  %1005 = vst [vmem:[%s6160_s27 + $0x78] sm:$0xff] %v1004_v15 }
  0x20   : > { %v1008_v17 = vld [vmem:[%s6152_s26 + $0x220] sm:$0xff]  ;;  %1007 = vst [vmem:[%s6160_s27 + $0x80] sm:$0xff] %v1006_v16 }
  0x21   : > { %1009 = vst [vmem:[%s6160_s27 + $0x88] sm:$0xff] %v1008_v17  ;;  %v1010_v18 = vld [vmem:[%s6152_s26 + $0x240] sm:$0xff] }
  0x22   : > { %v1012_v19 = vld [vmem:[%s6152_s26 + $0x260] sm:$0xff]  ;;  %1011 = vst [vmem:[%s6160_s27 + $0x90] sm:$0xff] %v1010_v18 }
  0x23   : > { %v1014_v20 = vld [vmem:[%s6152_s26 + $0x280] sm:$0xff]  ;;  %1013 = vst [vmem:[%s6160_s27 + $0x98] sm:$0xff] %v1012_v19 }
  0x24   : > { %1015 = vst [vmem:[%s6160_s27 + $0xa0] sm:$0xff] %v1014_v20  ;;  %v1016_v21 = vld [vmem:[%s6152_s26 + $0x2a0] sm:$0xff] }
  0x25   : > { %v1018_v22 = vld [vmem:[%s6152_s26 + $0x2c0] sm:$0xff]  ;;  %1017 = vst [vmem:[%s6160_s27 + $0xa8] sm:$0xff] %v1016_v21 }
  0x26   : > { %v1020_v23 = vld [vmem:[%s6152_s26 + $0x2e0] sm:$0xff]  ;;  %1019 = vst [vmem:[%s6160_s27 + $0xb0] sm:$0xff] %v1018_v22 }
  0x27   : > { %1021 = vst [vmem:[%s6160_s27 + $0xb8] sm:$0xff] %v1020_v23  ;;  %v1022_v24 = vld [vmem:[%s6152_s26 + $0x300] sm:$0xff] }
  0x28   : > { %v1024_v25 = vld [vmem:[%s6152_s26 + $0x320] sm:$0xff]  ;;  %1023 = vst [vmem:[%s6160_s27 + $0xc0] sm:$0xff] %v1022_v24 }
  0x29   : > { %v1026_v26 = vld [vmem:[%s6152_s26 + $0x340] sm:$0xff]  ;;  %1025 = vst [vmem:[%s6160_s27 + $0xc8] sm:$0xff] %v1024_v25 }
  0x2a   : > { %1027 = vst [vmem:[%s6160_s27 + $0xd0] sm:$0xff] %v1026_v26  ;;  %v1028_v27 = vld [vmem:[%s6152_s26 + $0x360] sm:$0xff] }
  0x2b   : > { %v1030_v28 = vld [vmem:[%s6152_s26 + $0x380] sm:$0xff]  ;;  %1029 = vst [vmem:[%s6160_s27 + $0xd8] sm:$0xff] %v1028_v27 }
  0x2c   : > { %v1032_v29 = vld [vmem:[%s6152_s26 + $0x3a0] sm:$0xff]  ;;  %1031 = vst [vmem:[%s6160_s27 + $0xe0] sm:$0xff] %v1030_v28 }
  0x2d   : > { %1033 = vst [vmem:[%s6160_s27 + $0xe8] sm:$0xff] %v1032_v29  ;;  %v1034_v30 = vld [vmem:[%s6152_s26 + $0x3c0] sm:$0xff] }
  0x2e   : > { %v1036_v31 = vld [vmem:[%s6152_s26 + $0x3e0] sm:$0xff]  ;;  %1035 = vst [vmem:[%s6160_s27 + $0xf0] sm:$0xff] %v1034_v30 }
  0x2f   : > { %v1038_v32 = vld [vmem:[%s6152_s26 + $0x400] sm:$0xff]  ;;  %1037 = vst [vmem:[%s6160_s27 + $0xf8] sm:$0xff] %v1036_v31 }
  0x30   : > { %1039 = vst [vmem:[%s6160_s27 + $0x100] sm:$0xff] %v1038_v32  ;;  %v1040_v33 = vld [vmem:[%s6152_s26 + $0x420] sm:$0xff] }
  0x31   : > { %v1042_v34 = vld [vmem:[%s6152_s26 + $0x440] sm:$0xff]  ;;  %1041 = vst [vmem:[%s6160_s27 + $0x108] sm:$0xff] %v1040_v33 }
  0x32   : > { %v1044_v35 = vld [vmem:[%s6152_s26 + $0x460] sm:$0xff]  ;;  %1043 = vst [vmem:[%s6160_s27 + $0x110] sm:$0xff] %v1042_v34 }
  0x33   : > { %1045 = vst [vmem:[%s6160_s27 + $0x118] sm:$0xff] %v1044_v35  ;;  %v1046_v36 = vld [vmem:[%s6152_s26 + $0x480] sm:$0xff] }
  0x34   : > { %v1048_v37 = vld [vmem:[%s6152_s26 + $0x4a0] sm:$0xff]  ;;  %1047 = vst [vmem:[%s6160_s27 + $0x120] sm:$0xff] %v1046_v36 }
  0x35   : > { %v1050_v38 = vld [vmem:[%s6152_s26 + $0x4c0] sm:$0xff]  ;;  %1049 = vst [vmem:[%s6160_s27 + $0x128] sm:$0xff] %v1048_v37 }
  0x36   : > { %1051 = vst [vmem:[%s6160_s27 + $0x130] sm:$0xff] %v1050_v38  ;;  %v1052_v39 = vld [vmem:[%s6152_s26 + $0x4e0] sm:$0xff] }
  0x37   : > { %v1054_v40 = vld [vmem:[%s6152_s26 + $0x500] sm:$0xff]  ;;  %1053 = vst [vmem:[%s6160_s27 + $0x138] sm:$0xff] %v1052_v39 }
  0x38   : > { %v1056_v41 = vld [vmem:[%s6152_s26 + $0x520] sm:$0xff]  ;;  %1055 = vst [vmem:[%s6160_s27 + $0x140] sm:$0xff] %v1054_v40 }
  0x39   : > { %1057 = vst [vmem:[%s6160_s27 + $0x148] sm:$0xff] %v1056_v41  ;;  %v1058_v42 = vld [vmem:[%s6152_s26 + $0x540] sm:$0xff] }
  0x3a   : > { %v1060_v43 = vld [vmem:[%s6152_s26 + $0x560] sm:$0xff]  ;;  %1059 = vst [vmem:[%s6160_s27 + $0x150] sm:$0xff] %v1058_v42 }
  0x3b   : > { %v1062_v44 = vld [vmem:[%s6152_s26 + $0x580] sm:$0xff]  ;;  %1061 = vst [vmem:[%s6160_s27 + $0x158] sm:$0xff] %v1060_v43 }
  0x3c   : > { %1063 = vst [vmem:[%s6160_s27 + $0x160] sm:$0xff] %v1062_v44  ;;  %v1064_v45 = vld [vmem:[%s6152_s26 + $0x5a0] sm:$0xff] }
  0x3d   : > { %v1066_v46 = vld [vmem:[%s6152_s26 + $0x5c0] sm:$0xff]  ;;  %1065 = vst [vmem:[%s6160_s27 + $0x168] sm:$0xff] %v1064_v45 }
  0x3e   : > { %v1068_v47 = vld [vmem:[%s6152_s26 + $0x5e0] sm:$0xff]  ;;  %1067 = vst [vmem:[%s6160_s27 + $0x170] sm:$0xff] %v1066_v46 }
  0x3f   : > { %1069 = vst [vmem:[%s6160_s27 + $0x178] sm:$0xff] %v1068_v47  ;;  %v1070_v48 = vld [vmem:[%s6152_s26 + $0x600] sm:$0xff] }
  0x40   : > { %v1072_v49 = vld [vmem:[%s6152_s26 + $0x620] sm:$0xff]  ;;  %1071 = vst [vmem:[%s6160_s27 + $0x180] sm:$0xff] %v1070_v48 }
  0x41   : > { %v1074_v50 = vld [vmem:[%s6152_s26 + $0x640] sm:$0xff]  ;;  %1073 = vst [vmem:[%s6160_s27 + $0x188] sm:$0xff] %v1072_v49 }
  0x42   : > { %1075 = vst [vmem:[%s6160_s27 + $0x190] sm:$0xff] %v1074_v50  ;;  %v1076_v51 = vld [vmem:[%s6152_s26 + $0x660] sm:$0xff] }
  0x43   : > { %v1078_v52 = vld [vmem:[%s6152_s26 + $0x680] sm:$0xff]  ;;  %1077 = vst [vmem:[%s6160_s27 + $0x198] sm:$0xff] %v1076_v51 }
  0x44   : > { %v1080_v53 = vld [vmem:[%s6152_s26 + $0x6a0] sm:$0xff]  ;;  %1079 = vst [vmem:[%s6160_s27 + $0x1a0] sm:$0xff] %v1078_v52 }
  0x45   : > { %1081 = vst [vmem:[%s6160_s27 + $0x1a8] sm:$0xff] %v1080_v53  ;;  %v1082_v54 = vld [vmem:[%s6152_s26 + $0x6c0] sm:$0xff] }
  0x46   : > { %v1084_v55 = vld [vmem:[%s6152_s26 + $0x6e0] sm:$0xff]  ;;  %1083 = vst [vmem:[%s6160_s27 + $0x1b0] sm:$0xff] %v1082_v54 }
  0x47   : > { %v1086_v56 = vld [vmem:[%s6152_s26 + $0x700] sm:$0xff]  ;;  %1085 = vst [vmem:[%s6160_s27 + $0x1b8] sm:$0xff] %v1084_v55 }
  0x48   : > { %1087 = vst [vmem:[%s6160_s27 + $0x1c0] sm:$0xff] %v1086_v56  ;;  %v1088_v57 = vld [vmem:[%s6152_s26 + $0x720] sm:$0xff] }
  0x49   : > { %v1090_v58 = vld [vmem:[%s6152_s26 + $0x740] sm:$0xff]  ;;  %1089 = vst [vmem:[%s6160_s27 + $0x1c8] sm:$0xff] %v1088_v57 }
  0x4a   : > { %v1092_v59 = vld [vmem:[%s6152_s26 + $0x760] sm:$0xff]  ;;  %1091 = vst [vmem:[%s6160_s27 + $0x1d0] sm:$0xff] %v1090_v58 }
  0x4b   : > { %1093 = vst [vmem:[%s6160_s27 + $0x1d8] sm:$0xff] %v1092_v59  ;;  %v1094_v60 = vld [vmem:[%s6152_s26 + $0x780] sm:$0xff] }
  0x4c   : > { %v1096_v61 = vld [vmem:[%s6152_s26 + $0x7a0] sm:$0xff]  ;;  %1095 = vst [vmem:[%s6160_s27 + $0x1e0] sm:$0xff] %v1094_v60 }
  0x4d   : > { %v1098_v62 = vld [vmem:[%s6152_s26 + $0x7c0] sm:$0xff]  ;;  %1097 = vst [vmem:[%s6160_s27 + $0x1e8] sm:$0xff] %v1096_v61 }
  0x4e   : > { %1099 = vst [vmem:[%s6160_s27 + $0x1f0] sm:$0xff] %v1098_v62  ;;  %v1100_v63 = vld [vmem:[%s6152_s26 + $0x7e0] sm:$0xff] }
  0x4f   : > { %v1102_v0 = vld [vmem:[%s6152_s26 + $0x800] sm:$0xff]  ;;  %1101 = vst [vmem:[%s6160_s27 + $0x1f8] sm:$0xff] %v1100_v63 }
  0x50   : > { %v1104_v1 = vld [vmem:[%s6152_s26 + $0x820] sm:$0xff]  ;;  %1103 = vst [vmem:[%s6160_s27 + $0x200] sm:$0xff] %v1102_v0 }
  0x51   : > { %1105 = vst [vmem:[%s6160_s27 + $0x208] sm:$0xff] %v1104_v1  ;;  %v1106_v2 = vld [vmem:[%s6152_s26 + $0x840] sm:$0xff] }
  0x52   : > { %v1108_v3 = vld [vmem:[%s6152_s26 + $0x860] sm:$0xff]  ;;  %1107 = vst [vmem:[%s6160_s27 + $0x210] sm:$0xff] %v1106_v2 }
  0x53   : > { %v1110_v4 = vld [vmem:[%s6152_s26 + $0x880] sm:$0xff]  ;;  %1109 = vst [vmem:[%s6160_s27 + $0x218] sm:$0xff] %v1108_v3 }
  0x54   : > { %1111 = vst [vmem:[%s6160_s27 + $0x220] sm:$0xff] %v1110_v4  ;;  %v1112_v5 = vld [vmem:[%s6152_s26 + $0x8a0] sm:$0xff] }
  0x55   : > { %v1114_v6 = vld [vmem:[%s6152_s26 + $0x8c0] sm:$0xff]  ;;  %1113 = vst [vmem:[%s6160_s27 + $0x228] sm:$0xff] %v1112_v5 }
  0x56   : > { %v1116_v7 = vld [vmem:[%s6152_s26 + $0x8e0] sm:$0xff]  ;;  %1115 = vst [vmem:[%s6160_s27 + $0x230] sm:$0xff] %v1114_v6 }
  0x57   : > { %1117 = vst [vmem:[%s6160_s27 + $0x238] sm:$0xff] %v1116_v7  ;;  %v1118_v8 = vld [vmem:[%s6152_s26 + $0x900] sm:$0xff] }
  0x58   : > { %v1120_v9 = vld [vmem:[%s6152_s26 + $0x920] sm:$0xff]  ;;  %1119 = vst [vmem:[%s6160_s27 + $0x240] sm:$0xff] %v1118_v8 }
  0x59   : > { %v1122_v10 = vld [vmem:[%s6152_s26 + $0x940] sm:$0xff]  ;;  %1121 = vst [vmem:[%s6160_s27 + $0x248] sm:$0xff] %v1120_v9 }
  0x5a   : > { %1123 = vst [vmem:[%s6160_s27 + $0x250] sm:$0xff] %v1122_v10  ;;  %v1124_v11 = vld [vmem:[%s6152_s26 + $0x960] sm:$0xff] }
  0x5b   : > { %v1126_v12 = vld [vmem:[%s6152_s26 + $0x980] sm:$0xff]  ;;  %1125 = vst [vmem:[%s6160_s27 + $0x258] sm:$0xff] %v1124_v11 }
  0x5c   : > { %v1128_v13 = vld [vmem:[%s6152_s26 + $0x9a0] sm:$0xff]  ;;  %1127 = vst [vmem:[%s6160_s27 + $0x260] sm:$0xff] %v1126_v12 }
  0x5d   : > { %1129 = vst [vmem:[%s6160_s27 + $0x268] sm:$0xff] %v1128_v13  ;;  %v1130_v14 = vld [vmem:[%s6152_s26 + $0x9c0] sm:$0xff] }
  0x5e   : > { %v1132_v15 = vld [vmem:[%s6152_s26 + $0x9e0] sm:$0xff]  ;;  %1131 = vst [vmem:[%s6160_s27 + $0x270] sm:$0xff] %v1130_v14 }
  0x5f   : > { %v1134_v16 = vld [vmem:[%s6152_s26 + $0xa00] sm:$0xff]  ;;  %1133 = vst [vmem:[%s6160_s27 + $0x278] sm:$0xff] %v1132_v15 }
  0x60   : > { %1135 = vst [vmem:[%s6160_s27 + $0x280] sm:$0xff] %v1134_v16  ;;  %v1136_v17 = vld [vmem:[%s6152_s26 + $0xa20] sm:$0xff] }
  0x61   : > { %v1138_v18 = vld [vmem:[%s6152_s26 + $0xa40] sm:$0xff]  ;;  %1137 = vst [vmem:[%s6160_s27 + $0x288] sm:$0xff] %v1136_v17 }
  0x62   : > { %v1140_v19 = vld [vmem:[%s6152_s26 + $0xa60] sm:$0xff]  ;;  %1139 = vst [vmem:[%s6160_s27 + $0x290] sm:$0xff] %v1138_v18 }
  0x63   : > { %1141 = vst [vmem:[%s6160_s27 + $0x298] sm:$0xff] %v1140_v19  ;;  %v1142_v20 = vld [vmem:[%s6152_s26 + $0xa80] sm:$0xff] }
  0x64   : > { %v1144_v21 = vld [vmem:[%s6152_s26 + $0xaa0] sm:$0xff]  ;;  %1143 = vst [vmem:[%s6160_s27 + $0x2a0] sm:$0xff] %v1142_v20 }
  0x65   : > { %v1146_v22 = vld [vmem:[%s6152_s26 + $0xac0] sm:$0xff]  ;;  %1145 = vst [vmem:[%s6160_s27 + $0x2a8] sm:$0xff] %v1144_v21 }
  0x66   : > { %1147 = vst [vmem:[%s6160_s27 + $0x2b0] sm:$0xff] %v1146_v22  ;;  %v1148_v23 = vld [vmem:[%s6152_s26 + $0xae0] sm:$0xff] }
  0x67   : > { %v1150_v24 = vld [vmem:[%s6152_s26 + $0xb00] sm:$0xff]  ;;  %1149 = vst [vmem:[%s6160_s27 + $0x2b8] sm:$0xff] %v1148_v23 }
  0x68   : > { %v1152_v25 = vld [vmem:[%s6152_s26 + $0xb20] sm:$0xff]  ;;  %1151 = vst [vmem:[%s6160_s27 + $0x2c0] sm:$0xff] %v1150_v24 }
  0x69   : > { %1153 = vst [vmem:[%s6160_s27 + $0x2c8] sm:$0xff] %v1152_v25  ;;  %v1154_v26 = vld [vmem:[%s6152_s26 + $0xb40] sm:$0xff] }
  0x6a   : > { %v1156_v27 = vld [vmem:[%s6152_s26 + $0xb60] sm:$0xff]  ;;  %1155 = vst [vmem:[%s6160_s27 + $0x2d0] sm:$0xff] %v1154_v26 }
  0x6b   : > { %v1158_v28 = vld [vmem:[%s6152_s26 + $0xb80] sm:$0xff]  ;;  %1157 = vst [vmem:[%s6160_s27 + $0x2d8] sm:$0xff] %v1156_v27 }
  0x6c   : > { %1159 = vst [vmem:[%s6160_s27 + $0x2e0] sm:$0xff] %v1158_v28  ;;  %v1160_v29 = vld [vmem:[%s6152_s26 + $0xba0] sm:$0xff] }
  0x6d   : > { %v1162_v30 = vld [vmem:[%s6152_s26 + $0xbc0] sm:$0xff]  ;;  %1161 = vst [vmem:[%s6160_s27 + $0x2e8] sm:$0xff] %v1160_v29 }
  0x6e   : > { %v1164_v31 = vld [vmem:[%s6152_s26 + $0xbe0] sm:$0xff]  ;;  %1163 = vst [vmem:[%s6160_s27 + $0x2f0] sm:$0xff] %v1162_v30 }
  0x6f   : > { %1165 = vst [vmem:[%s6160_s27 + $0x2f8] sm:$0xff] %v1164_v31  ;;  %v1166_v32 = vld [vmem:[%s6152_s26 + $0xc00] sm:$0xff] }
  0x70   : > { %v1168_v33 = vld [vmem:[%s6152_s26 + $0xc20] sm:$0xff]  ;;  %1167 = vst [vmem:[%s6160_s27 + $0x300] sm:$0xff] %v1166_v32 }
  0x71   : > { %v1170_v34 = vld [vmem:[%s6152_s26 + $0xc40] sm:$0xff]  ;;  %1169 = vst [vmem:[%s6160_s27 + $0x308] sm:$0xff] %v1168_v33 }
  0x72   : > { %1171 = vst [vmem:[%s6160_s27 + $0x310] sm:$0xff] %v1170_v34  ;;  %v1172_v35 = vld [vmem:[%s6152_s26 + $0xc60] sm:$0xff] }
  0x73   : > { %v1174_v36 = vld [vmem:[%s6152_s26 + $0xc80] sm:$0xff]  ;;  %1173 = vst [vmem:[%s6160_s27 + $0x318] sm:$0xff] %v1172_v35 }
  0x74   : > { %v1176_v37 = vld [vmem:[%s6152_s26 + $0xca0] sm:$0xff]  ;;  %1175 = vst [vmem:[%s6160_s27 + $0x320] sm:$0xff] %v1174_v36 }
  0x75   : > { %1177 = vst [vmem:[%s6160_s27 + $0x328] sm:$0xff] %v1176_v37  ;;  %v1178_v38 = vld [vmem:[%s6152_s26 + $0xcc0] sm:$0xff] }
  0x76   : > { %v1180_v39 = vld [vmem:[%s6152_s26 + $0xce0] sm:$0xff]  ;;  %1179 = vst [vmem:[%s6160_s27 + $0x330] sm:$0xff] %v1178_v38 }
  0x77   : > { %v1182_v40 = vld [vmem:[%s6152_s26 + $0xd00] sm:$0xff]  ;;  %1181 = vst [vmem:[%s6160_s27 + $0x338] sm:$0xff] %v1180_v39 }
  0x78   : > { %1183 = vst [vmem:[%s6160_s27 + $0x340] sm:$0xff] %v1182_v40  ;;  %v1184_v41 = vld [vmem:[%s6152_s26 + $0xd20] sm:$0xff] }
  0x79   : > { %v1186_v42 = vld [vmem:[%s6152_s26 + $0xd40] sm:$0xff]  ;;  %1185 = vst [vmem:[%s6160_s27 + $0x348] sm:$0xff] %v1184_v41 }
  0x7a   : > { %v1188_v43 = vld [vmem:[%s6152_s26 + $0xd60] sm:$0xff]  ;;  %1187 = vst [vmem:[%s6160_s27 + $0x350] sm:$0xff] %v1186_v42 }
  0x7b   : > { %1189 = vst [vmem:[%s6160_s27 + $0x358] sm:$0xff] %v1188_v43  ;;  %v1190_v44 = vld [vmem:[%s6152_s26 + $0xd80] sm:$0xff] }
  0x7c   : > { %v1192_v45 = vld [vmem:[%s6152_s26 + $0xda0] sm:$0xff]  ;;  %1191 = vst [vmem:[%s6160_s27 + $0x360] sm:$0xff] %v1190_v44 }
  0x7d   : > { %v1194_v46 = vld [vmem:[%s6152_s26 + $0xdc0] sm:$0xff]  ;;  %1193 = vst [vmem:[%s6160_s27 + $0x368] sm:$0xff] %v1192_v45 }
  0x7e   : > { %1195 = vst [vmem:[%s6160_s27 + $0x370] sm:$0xff] %v1194_v46  ;;  %v1196_v47 = vld [vmem:[%s6152_s26 + $0xde0] sm:$0xff] }
  0x7f   : > { %v1198_v48 = vld [vmem:[%s6152_s26 + $0xe00] sm:$0xff]  ;;  %1197 = vst [vmem:[%s6160_s27 + $0x378] sm:$0xff] %v1196_v47 }
  0x80   : > { %v1200_v49 = vld [vmem:[%s6152_s26 + $0xe20] sm:$0xff]  ;;  %1199 = vst [vmem:[%s6160_s27 + $0x380] sm:$0xff] %v1198_v48 }
  0x81   : > { %1201 = vst [vmem:[%s6160_s27 + $0x388] sm:$0xff] %v1200_v49  ;;  %v1202_v50 = vld [vmem:[%s6152_s26 + $0xe40] sm:$0xff] }
  0x82   : > { %v1204_v51 = vld [vmem:[%s6152_s26 + $0xe60] sm:$0xff]  ;;  %1203 = vst [vmem:[%s6160_s27 + $0x390] sm:$0xff] %v1202_v50 }
  0x83   : > { %v1206_v52 = vld [vmem:[%s6152_s26 + $0xe80] sm:$0xff]  ;;  %1205 = vst [vmem:[%s6160_s27 + $0x398] sm:$0xff] %v1204_v51 }
  0x84   : > { %1207 = vst [vmem:[%s6160_s27 + $0x3a0] sm:$0xff] %v1206_v52  ;;  %v1208_v53 = vld [vmem:[%s6152_s26 + $0xea0] sm:$0xff] }
  0x85   : > { %v1210_v54 = vld [vmem:[%s6152_s26 + $0xec0] sm:$0xff]  ;;  %1209 = vst [vmem:[%s6160_s27 + $0x3a8] sm:$0xff] %v1208_v53 }
  0x86   : > { %v1212_v55 = vld [vmem:[%s6152_s26 + $0xee0] sm:$0xff]  ;;  %1211 = vst [vmem:[%s6160_s27 + $0x3b0] sm:$0xff] %v1210_v54 }
  0x87   : > { %1213 = vst [vmem:[%s6160_s27 + $0x3b8] sm:$0xff] %v1212_v55  ;;  %v1214_v56 = vld [vmem:[%s6152_s26 + $0xf00] sm:$0xff] }
  0x88   : > { %v1216_v57 = vld [vmem:[%s6152_s26 + $0xf20] sm:$0xff]  ;;  %1215 = vst [vmem:[%s6160_s27 + $0x3c0] sm:$0xff] %v1214_v56 }
  0x89   : > { %v1218_v58 = vld [vmem:[%s6152_s26 + $0xf40] sm:$0xff]  ;;  %1217 = vst [vmem:[%s6160_s27 + $0x3c8] sm:$0xff] %v1216_v57 }
  0x8a   : > { %1219 = vst [vmem:[%s6160_s27 + $0x3d0] sm:$0xff] %v1218_v58  ;;  %v1220_v59 = vld [vmem:[%s6152_s26 + $0xf60] sm:$0xff] }
  0x8b   : > { %v1222_v60 = vld [vmem:[%s6152_s26 + $0xf80] sm:$0xff]  ;;  %1221 = vst [vmem:[%s6160_s27 + $0x3d8] sm:$0xff] %v1220_v59 }
  0x8c   : > { %v1224_v61 = vld [vmem:[%s6152_s26 + $0xfa0] sm:$0xff]  ;;  %1223 = vst [vmem:[%s6160_s27 + $0x3e0] sm:$0xff] %v1222_v60 }
  0x8d   : > { %1225 = vst [vmem:[%s6160_s27 + $0x3e8] sm:$0xff] %v1224_v61  ;;  %v1226_v62 = vld [vmem:[%s6152_s26 + $0xfc0] sm:$0xff] }
  0x8e   : > { %v1228_v63 = vld [vmem:[%s6152_s26 + $0xfe0] sm:$0xff]  ;;  %1227 = vst [vmem:[%s6160_s27 + $0x3f0] sm:$0xff] %v1226_v62 }
  0x8f   : > { %v1230_v0 = vld [vmem:[%s6152_s26 + $0x1000] sm:$0xff]  ;;  %1229 = vst [vmem:[%s6160_s27 + $0x3f8] sm:$0xff] %v1228_v63 }
  0x90   : > { %1231 = vst [vmem:[%s6160_s27 + $0x400] sm:$0xff] %v1230_v0  ;;  %v1232_v1 = vld [vmem:[%s6152_s26 + $0x1020] sm:$0xff] }
  0x91   : > { %v1234_v2 = vld [vmem:[%s6152_s26 + $0x1040] sm:$0xff]  ;;  %1233 = vst [vmem:[%s6160_s27 + $0x408] sm:$0xff] %v1232_v1 }
  0x92   : > { %v1236_v3 = vld [vmem:[%s6152_s26 + $0x1060] sm:$0xff]  ;;  %1235 = vst [vmem:[%s6160_s27 + $0x410] sm:$0xff] %v1234_v2 }
  0x93   : > { %1237 = vst [vmem:[%s6160_s27 + $0x418] sm:$0xff] %v1236_v3  ;;  %v1238_v4 = vld [vmem:[%s6152_s26 + $0x1080] sm:$0xff] }
  0x94   : > { %v1240_v5 = vld [vmem:[%s6152_s26 + $0x10a0] sm:$0xff]  ;;  %1239 = vst [vmem:[%s6160_s27 + $0x420] sm:$0xff] %v1238_v4 }
  0x95   : > { %v1242_v6 = vld [vmem:[%s6152_s26 + $0x10c0] sm:$0xff]  ;;  %1241 = vst [vmem:[%s6160_s27 + $0x428] sm:$0xff] %v1240_v5 }
  0x96   : > { %1243 = vst [vmem:[%s6160_s27 + $0x430] sm:$0xff] %v1242_v6  ;;  %v1244_v7 = vld [vmem:[%s6152_s26 + $0x10e0] sm:$0xff] }
  0x97   : > { %v1246_v8 = vld [vmem:[%s6152_s26 + $0x1100] sm:$0xff]  ;;  %1245 = vst [vmem:[%s6160_s27 + $0x438] sm:$0xff] %v1244_v7 }
  0x98   : > { %v1248_v9 = vld [vmem:[%s6152_s26 + $0x1120] sm:$0xff]  ;;  %1247 = vst [vmem:[%s6160_s27 + $0x440] sm:$0xff] %v1246_v8 }
  0x99   : > { %1249 = vst [vmem:[%s6160_s27 + $0x448] sm:$0xff] %v1248_v9  ;;  %v1250_v10 = vld [vmem:[%s6152_s26 + $0x1140] sm:$0xff] }
  0x9a   : > { %v1252_v11 = vld [vmem:[%s6152_s26 + $0x1160] sm:$0xff]  ;;  %1251 = vst [vmem:[%s6160_s27 + $0x450] sm:$0xff] %v1250_v10 }
  0x9b   : > { %v1254_v12 = vld [vmem:[%s6152_s26 + $0x1180] sm:$0xff]  ;;  %1253 = vst [vmem:[%s6160_s27 + $0x458] sm:$0xff] %v1252_v11 }
  0x9c   : > { %1255 = vst [vmem:[%s6160_s27 + $0x460] sm:$0xff] %v1254_v12  ;;  %v1256_v13 = vld [vmem:[%s6152_s26 + $0x11a0] sm:$0xff] }
  0x9d   : > { %v1258_v14 = vld [vmem:[%s6152_s26 + $0x11c0] sm:$0xff]  ;;  %1257 = vst [vmem:[%s6160_s27 + $0x468] sm:$0xff] %v1256_v13 }
  0x9e   : > { %v1260_v15 = vld [vmem:[%s6152_s26 + $0x11e0] sm:$0xff]  ;;  %1259 = vst [vmem:[%s6160_s27 + $0x470] sm:$0xff] %v1258_v14 }
  0x9f   : > { %1261 = vst [vmem:[%s6160_s27 + $0x478] sm:$0xff] %v1260_v15  ;;  %v1262_v16 = vld [vmem:[%s6152_s26 + $0x1200] sm:$0xff] }
  0xa0   : > { %v1264_v17 = vld [vmem:[%s6152_s26 + $0x1220] sm:$0xff]  ;;  %1263 = vst [vmem:[%s6160_s27 + $0x480] sm:$0xff] %v1262_v16 }
  0xa1   : > { %v1266_v18 = vld [vmem:[%s6152_s26 + $0x1240] sm:$0xff]  ;;  %1265 = vst [vmem:[%s6160_s27 + $0x488] sm:$0xff] %v1264_v17 }
  0xa2   : > { %1267 = vst [vmem:[%s6160_s27 + $0x490] sm:$0xff] %v1266_v18  ;;  %v1268_v19 = vld [vmem:[%s6152_s26 + $0x1260] sm:$0xff] }
  0xa3   : > { %v1270_v20 = vld [vmem:[%s6152_s26 + $0x1280] sm:$0xff]  ;;  %1269 = vst [vmem:[%s6160_s27 + $0x498] sm:$0xff] %v1268_v19 }
  0xa4   : > { %v1272_v21 = vld [vmem:[%s6152_s26 + $0x12a0] sm:$0xff]  ;;  %1271 = vst [vmem:[%s6160_s27 + $0x4a0] sm:$0xff] %v1270_v20 }
  0xa5   : > { %1273 = vst [vmem:[%s6160_s27 + $0x4a8] sm:$0xff] %v1272_v21  ;;  %v1274_v22 = vld [vmem:[%s6152_s26 + $0x12c0] sm:$0xff] }
  0xa6   : > { %v1276_v23 = vld [vmem:[%s6152_s26 + $0x12e0] sm:$0xff]  ;;  %1275 = vst [vmem:[%s6160_s27 + $0x4b0] sm:$0xff] %v1274_v22 }
  0xa7   : > { %v1278_v24 = vld [vmem:[%s6152_s26 + $0x1300] sm:$0xff]  ;;  %1277 = vst [vmem:[%s6160_s27 + $0x4b8] sm:$0xff] %v1276_v23 }
  0xa8   : > { %1279 = vst [vmem:[%s6160_s27 + $0x4c0] sm:$0xff] %v1278_v24  ;;  %v1280_v25 = vld [vmem:[%s6152_s26 + $0x1320] sm:$0xff] }
  0xa9   : > { %v1282_v26 = vld [vmem:[%s6152_s26 + $0x1340] sm:$0xff]  ;;  %1281 = vst [vmem:[%s6160_s27 + $0x4c8] sm:$0xff] %v1280_v25 }
  0xaa   : > { %v1284_v27 = vld [vmem:[%s6152_s26 + $0x1360] sm:$0xff]  ;;  %1283 = vst [vmem:[%s6160_s27 + $0x4d0] sm:$0xff] %v1282_v26 }
  0xab   : > { %1285 = vst [vmem:[%s6160_s27 + $0x4d8] sm:$0xff] %v1284_v27  ;;  %v1286_v28 = vld [vmem:[%s6152_s26 + $0x1380] sm:$0xff] }
  0xac   : > { %v1288_v29 = vld [vmem:[%s6152_s26 + $0x13a0] sm:$0xff]  ;;  %1287 = vst [vmem:[%s6160_s27 + $0x4e0] sm:$0xff] %v1286_v28 }
  0xad   : > { %v1290_v30 = vld [vmem:[%s6152_s26 + $0x13c0] sm:$0xff]  ;;  %1289 = vst [vmem:[%s6160_s27 + $0x4e8] sm:$0xff] %v1288_v29 }
  0xae   : > { %1291 = vst [vmem:[%s6160_s27 + $0x4f0] sm:$0xff] %v1290_v30  ;;  %v1292_v31 = vld [vmem:[%s6152_s26 + $0x13e0] sm:$0xff] }
  0xaf   : > { %v1294_v32 = vld [vmem:[%s6152_s26 + $0x1400] sm:$0xff]  ;;  %1293 = vst [vmem:[%s6160_s27 + $0x4f8] sm:$0xff] %v1292_v31 }
  0xb0   : > { %v1296_v33 = vld [vmem:[%s6152_s26 + $0x1420] sm:$0xff]  ;;  %1295 = vst [vmem:[%s6160_s27 + $0x500] sm:$0xff] %v1294_v32 }
  0xb1   : > { %1297 = vst [vmem:[%s6160_s27 + $0x508] sm:$0xff] %v1296_v33  ;;  %v1298_v34 = vld [vmem:[%s6152_s26 + $0x1440] sm:$0xff] }
  0xb2   : > { %v1300_v35 = vld [vmem:[%s6152_s26 + $0x1460] sm:$0xff]  ;;  %1299 = vst [vmem:[%s6160_s27 + $0x510] sm:$0xff] %v1298_v34 }
  0xb3   : > { %v1302_v36 = vld [vmem:[%s6152_s26 + $0x1480] sm:$0xff]  ;;  %1301 = vst [vmem:[%s6160_s27 + $0x518] sm:$0xff] %v1300_v35 }
  0xb4   : > { %1303 = vst [vmem:[%s6160_s27 + $0x520] sm:$0xff] %v1302_v36  ;;  %v1304_v37 = vld [vmem:[%s6152_s26 + $0x14a0] sm:$0xff] }
  0xb5   : > { %v1306_v38 = vld [vmem:[%s6152_s26 + $0x14c0] sm:$0xff]  ;;  %1305 = vst [vmem:[%s6160_s27 + $0x528] sm:$0xff] %v1304_v37 }
  0xb6   : > { %v1308_v39 = vld [vmem:[%s6152_s26 + $0x14e0] sm:$0xff]  ;;  %1307 = vst [vmem:[%s6160_s27 + $0x530] sm:$0xff] %v1306_v38 }
  0xb7   : > { %1309 = vst [vmem:[%s6160_s27 + $0x538] sm:$0xff] %v1308_v39  ;;  %v1310_v40 = vld [vmem:[%s6152_s26 + $0x1500] sm:$0xff] }
  0xb8   : > { %v1312_v41 = vld [vmem:[%s6152_s26 + $0x1520] sm:$0xff]  ;;  %1311 = vst [vmem:[%s6160_s27 + $0x540] sm:$0xff] %v1310_v40 }
  0xb9   : > { %v1314_v42 = vld [vmem:[%s6152_s26 + $0x1540] sm:$0xff]  ;;  %1313 = vst [vmem:[%s6160_s27 + $0x548] sm:$0xff] %v1312_v41 }
  0xba   : > { %1315 = vst [vmem:[%s6160_s27 + $0x550] sm:$0xff] %v1314_v42  ;;  %v1316_v43 = vld [vmem:[%s6152_s26 + $0x1560] sm:$0xff] }
  0xbb   : > { %v1318_v44 = vld [vmem:[%s6152_s26 + $0x1580] sm:$0xff]  ;;  %1317 = vst [vmem:[%s6160_s27 + $0x558] sm:$0xff] %v1316_v43 }
  0xbc   : > { %v1320_v45 = vld [vmem:[%s6152_s26 + $0x15a0] sm:$0xff]  ;;  %1319 = vst [vmem:[%s6160_s27 + $0x560] sm:$0xff] %v1318_v44 }
  0xbd   : > { %1321 = vst [vmem:[%s6160_s27 + $0x568] sm:$0xff] %v1320_v45  ;;  %v1322_v46 = vld [vmem:[%s6152_s26 + $0x15c0] sm:$0xff] }
  0xbe   : > { %v1324_v47 = vld [vmem:[%s6152_s26 + $0x15e0] sm:$0xff]  ;;  %1323 = vst [vmem:[%s6160_s27 + $0x570] sm:$0xff] %v1322_v46 }
  0xbf   : > { %v1326_v48 = vld [vmem:[%s6152_s26 + $0x1600] sm:$0xff]  ;;  %1325 = vst [vmem:[%s6160_s27 + $0x578] sm:$0xff] %v1324_v47 }
  0xc0   : > { %1327 = vst [vmem:[%s6160_s27 + $0x580] sm:$0xff] %v1326_v48  ;;  %v1328_v49 = vld [vmem:[%s6152_s26 + $0x1620] sm:$0xff] }
  0xc1   : > { %v1330_v50 = vld [vmem:[%s6152_s26 + $0x1640] sm:$0xff]  ;;  %1329 = vst [vmem:[%s6160_s27 + $0x588] sm:$0xff] %v1328_v49 }
  0xc2   : > { %v1332_v51 = vld [vmem:[%s6152_s26 + $0x1660] sm:$0xff]  ;;  %1331 = vst [vmem:[%s6160_s27 + $0x590] sm:$0xff] %v1330_v50 }
  0xc3   : > { %1333 = vst [vmem:[%s6160_s27 + $0x598] sm:$0xff] %v1332_v51  ;;  %v1334_v52 = vld [vmem:[%s6152_s26 + $0x1680] sm:$0xff] }
  0xc4   : > { %v1336_v53 = vld [vmem:[%s6152_s26 + $0x16a0] sm:$0xff]  ;;  %1335 = vst [vmem:[%s6160_s27 + $0x5a0] sm:$0xff] %v1334_v52 }
  0xc5   : > { %v1338_v54 = vld [vmem:[%s6152_s26 + $0x16c0] sm:$0xff]  ;;  %1337 = vst [vmem:[%s6160_s27 + $0x5a8] sm:$0xff] %v1336_v53 }
  0xc6   : > { %1339 = vst [vmem:[%s6160_s27 + $0x5b0] sm:$0xff] %v1338_v54  ;;  %v1340_v55 = vld [vmem:[%s6152_s26 + $0x16e0] sm:$0xff] }
  0xc7   : > { %v1342_v56 = vld [vmem:[%s6152_s26 + $0x1700] sm:$0xff]  ;;  %1341 = vst [vmem:[%s6160_s27 + $0x5b8] sm:$0xff] %v1340_v55 }
  0xc8   : > { %v1344_v57 = vld [vmem:[%s6152_s26 + $0x1720] sm:$0xff]  ;;  %1343 = vst [vmem:[%s6160_s27 + $0x5c0] sm:$0xff] %v1342_v56 }
  0xc9   : > { %1345 = vst [vmem:[%s6160_s27 + $0x5c8] sm:$0xff] %v1344_v57  ;;  %v1346_v58 = vld [vmem:[%s6152_s26 + $0x1740] sm:$0xff] }
  0xca   : > { %v1348_v59 = vld [vmem:[%s6152_s26 + $0x1760] sm:$0xff]  ;;  %1347 = vst [vmem:[%s6160_s27 + $0x5d0] sm:$0xff] %v1346_v58 }
  0xcb   : > { %v1350_v60 = vld [vmem:[%s6152_s26 + $0x1780] sm:$0xff]  ;;  %1349 = vst [vmem:[%s6160_s27 + $0x5d8] sm:$0xff] %v1348_v59 }
  0xcc   : > { %1351 = vst [vmem:[%s6160_s27 + $0x5e0] sm:$0xff] %v1350_v60  ;;  %v1352_v61 = vld [vmem:[%s6152_s26 + $0x17a0] sm:$0xff] }
  0xcd   : > { %v1354_v62 = vld [vmem:[%s6152_s26 + $0x17c0] sm:$0xff]  ;;  %1353 = vst [vmem:[%s6160_s27 + $0x5e8] sm:$0xff] %v1352_v61 }
  0xce   : > { %v1356_v63 = vld [vmem:[%s6152_s26 + $0x17e0] sm:$0xff]  ;;  %1355 = vst [vmem:[%s6160_s27 + $0x5f0] sm:$0xff] %v1354_v62 }
  0xcf   : > { %1357 = vst [vmem:[%s6160_s27 + $0x5f8] sm:$0xff] %v1356_v63  ;;  %v1358_v0 = vld [vmem:[%s6152_s26 + $0x1800] sm:$0xff] }
  0xd0   : > { %v1360_v1 = vld [vmem:[%s6152_s26 + $0x1820] sm:$0xff]  ;;  %1359 = vst [vmem:[%s6160_s27 + $0x600] sm:$0xff] %v1358_v0 }
  0xd1   : > { %v1362_v2 = vld [vmem:[%s6152_s26 + $0x1840] sm:$0xff]  ;;  %1361 = vst [vmem:[%s6160_s27 + $0x608] sm:$0xff] %v1360_v1 }
  0xd2   : > { %1363 = vst [vmem:[%s6160_s27 + $0x610] sm:$0xff] %v1362_v2  ;;  %v1364_v3 = vld [vmem:[%s6152_s26 + $0x1860] sm:$0xff] }
  0xd3   : > { %v1366_v4 = vld [vmem:[%s6152_s26 + $0x1880] sm:$0xff]  ;;  %1365 = vst [vmem:[%s6160_s27 + $0x618] sm:$0xff] %v1364_v3 }
  0xd4   : > { %v1368_v5 = vld [vmem:[%s6152_s26 + $0x18a0] sm:$0xff]  ;;  %1367 = vst [vmem:[%s6160_s27 + $0x620] sm:$0xff] %v1366_v4 }
  0xd5   : > { %1369 = vst [vmem:[%s6160_s27 + $0x628] sm:$0xff] %v1368_v5  ;;  %v1370_v6 = vld [vmem:[%s6152_s26 + $0x18c0] sm:$0xff] }
  0xd6   : > { %v1372_v7 = vld [vmem:[%s6152_s26 + $0x18e0] sm:$0xff]  ;;  %1371 = vst [vmem:[%s6160_s27 + $0x630] sm:$0xff] %v1370_v6 }
  0xd7   : > { %v1374_v8 = vld [vmem:[%s6152_s26 + $0x1900] sm:$0xff]  ;;  %1373 = vst [vmem:[%s6160_s27 + $0x638] sm:$0xff] %v1372_v7 }
  0xd8   : > { %1375 = vst [vmem:[%s6160_s27 + $0x640] sm:$0xff] %v1374_v8  ;;  %v1376_v9 = vld [vmem:[%s6152_s26 + $0x1920] sm:$0xff] }
  0xd9   : > { %v1378_v10 = vld [vmem:[%s6152_s26 + $0x1940] sm:$0xff]  ;;  %1377 = vst [vmem:[%s6160_s27 + $0x648] sm:$0xff] %v1376_v9 }
  0xda   : > { %v1380_v11 = vld [vmem:[%s6152_s26 + $0x1960] sm:$0xff]  ;;  %1379 = vst [vmem:[%s6160_s27 + $0x650] sm:$0xff] %v1378_v10 }
  0xdb   : > { %1381 = vst [vmem:[%s6160_s27 + $0x658] sm:$0xff] %v1380_v11  ;;  %v1382_v12 = vld [vmem:[%s6152_s26 + $0x1980] sm:$0xff] }
  0xdc   : > { %v1384_v13 = vld [vmem:[%s6152_s26 + $0x19a0] sm:$0xff]  ;;  %1383 = vst [vmem:[%s6160_s27 + $0x660] sm:$0xff] %v1382_v12 }
  0xdd   : > { %v1386_v14 = vld [vmem:[%s6152_s26 + $0x19c0] sm:$0xff]  ;;  %1385 = vst [vmem:[%s6160_s27 + $0x668] sm:$0xff] %v1384_v13 }
  0xde   : > { %1387 = vst [vmem:[%s6160_s27 + $0x670] sm:$0xff] %v1386_v14  ;;  %v1388_v15 = vld [vmem:[%s6152_s26 + $0x19e0] sm:$0xff] }
  0xdf   : > { %v1390_v16 = vld [vmem:[%s6152_s26 + $0x1a00] sm:$0xff]  ;;  %1389 = vst [vmem:[%s6160_s27 + $0x678] sm:$0xff] %v1388_v15 }
  0xe0   : > { %v1392_v17 = vld [vmem:[%s6152_s26 + $0x1a20] sm:$0xff]  ;;  %1391 = vst [vmem:[%s6160_s27 + $0x680] sm:$0xff] %v1390_v16 }
  0xe1   : > { %1393 = vst [vmem:[%s6160_s27 + $0x688] sm:$0xff] %v1392_v17  ;;  %v1394_v18 = vld [vmem:[%s6152_s26 + $0x1a40] sm:$0xff] }
  0xe2   : > { %v1396_v19 = vld [vmem:[%s6152_s26 + $0x1a60] sm:$0xff]  ;;  %1395 = vst [vmem:[%s6160_s27 + $0x690] sm:$0xff] %v1394_v18 }
  0xe3   : > { %v1398_v20 = vld [vmem:[%s6152_s26 + $0x1a80] sm:$0xff]  ;;  %1397 = vst [vmem:[%s6160_s27 + $0x698] sm:$0xff] %v1396_v19 }
  0xe4   : > { %1399 = vst [vmem:[%s6160_s27 + $0x6a0] sm:$0xff] %v1398_v20  ;;  %v1400_v21 = vld [vmem:[%s6152_s26 + $0x1aa0] sm:$0xff] }
  0xe5   : > { %v1402_v22 = vld [vmem:[%s6152_s26 + $0x1ac0] sm:$0xff]  ;;  %1401 = vst [vmem:[%s6160_s27 + $0x6a8] sm:$0xff] %v1400_v21 }
  0xe6   : > { %v1404_v23 = vld [vmem:[%s6152_s26 + $0x1ae0] sm:$0xff]  ;;  %1403 = vst [vmem:[%s6160_s27 + $0x6b0] sm:$0xff] %v1402_v22 }
  0xe7   : > { %1405 = vst [vmem:[%s6160_s27 + $0x6b8] sm:$0xff] %v1404_v23  ;;  %v1406_v24 = vld [vmem:[%s6152_s26 + $0x1b00] sm:$0xff] }
  0xe8   : > { %v1408_v25 = vld [vmem:[%s6152_s26 + $0x1b20] sm:$0xff]  ;;  %1407 = vst [vmem:[%s6160_s27 + $0x6c0] sm:$0xff] %v1406_v24 }
  0xe9   : > { %v1410_v26 = vld [vmem:[%s6152_s26 + $0x1b40] sm:$0xff]  ;;  %1409 = vst [vmem:[%s6160_s27 + $0x6c8] sm:$0xff] %v1408_v25 }
  0xea   : > { %1411 = vst [vmem:[%s6160_s27 + $0x6d0] sm:$0xff] %v1410_v26  ;;  %v1412_v27 = vld [vmem:[%s6152_s26 + $0x1b60] sm:$0xff] }
  0xeb   : > { %v1414_v28 = vld [vmem:[%s6152_s26 + $0x1b80] sm:$0xff]  ;;  %1413 = vst [vmem:[%s6160_s27 + $0x6d8] sm:$0xff] %v1412_v27 }
  0xec   : > { %v1416_v29 = vld [vmem:[%s6152_s26 + $0x1ba0] sm:$0xff]  ;;  %1415 = vst [vmem:[%s6160_s27 + $0x6e0] sm:$0xff] %v1414_v28 }
  0xed   : > { %1417 = vst [vmem:[%s6160_s27 + $0x6e8] sm:$0xff] %v1416_v29  ;;  %v1418_v30 = vld [vmem:[%s6152_s26 + $0x1bc0] sm:$0xff] }
  0xee   : > { %v1420_v31 = vld [vmem:[%s6152_s26 + $0x1be0] sm:$0xff]  ;;  %1419 = vst [vmem:[%s6160_s27 + $0x6f0] sm:$0xff] %v1418_v30 }
  0xef   : > { %v1422_v32 = vld [vmem:[%s6152_s26 + $0x1c00] sm:$0xff]  ;;  %1421 = vst [vmem:[%s6160_s27 + $0x6f8] sm:$0xff] %v1420_v31 }
  0xf0   : > { %1423 = vst [vmem:[%s6160_s27 + $0x700] sm:$0xff] %v1422_v32  ;;  %v1424_v33 = vld [vmem:[%s6152_s26 + $0x1c20] sm:$0xff] }
  0xf1   : > { %v1426_v34 = vld [vmem:[%s6152_s26 + $0x1c40] sm:$0xff]  ;;  %1425 = vst [vmem:[%s6160_s27 + $0x708] sm:$0xff] %v1424_v33 }
  0xf2   : > { %v1428_v35 = vld [vmem:[%s6152_s26 + $0x1c60] sm:$0xff]  ;;  %1427 = vst [vmem:[%s6160_s27 + $0x710] sm:$0xff] %v1426_v34 }
  0xf3   : > { %1429 = vst [vmem:[%s6160_s27 + $0x718] sm:$0xff] %v1428_v35  ;;  %v1430_v36 = vld [vmem:[%s6152_s26 + $0x1c80] sm:$0xff] }
  0xf4   : > { %v1432_v37 = vld [vmem:[%s6152_s26 + $0x1ca0] sm:$0xff]  ;;  %1431 = vst [vmem:[%s6160_s27 + $0x720] sm:$0xff] %v1430_v36 }
  0xf5   : > { %v1434_v38 = vld [vmem:[%s6152_s26 + $0x1cc0] sm:$0xff]  ;;  %1433 = vst [vmem:[%s6160_s27 + $0x728] sm:$0xff] %v1432_v37 }
  0xf6   : > { %1435 = vst [vmem:[%s6160_s27 + $0x730] sm:$0xff] %v1434_v38  ;;  %v1436_v39 = vld [vmem:[%s6152_s26 + $0x1ce0] sm:$0xff] }
  0xf7   : > { %v1438_v40 = vld [vmem:[%s6152_s26 + $0x1d00] sm:$0xff]  ;;  %1437 = vst [vmem:[%s6160_s27 + $0x738] sm:$0xff] %v1436_v39 }
  0xf8   : > { %v1440_v41 = vld [vmem:[%s6152_s26 + $0x1d20] sm:$0xff]  ;;  %1439 = vst [vmem:[%s6160_s27 + $0x740] sm:$0xff] %v1438_v40 }
  0xf9   : > { %1441 = vst [vmem:[%s6160_s27 + $0x748] sm:$0xff] %v1440_v41  ;;  %v1442_v42 = vld [vmem:[%s6152_s26 + $0x1d40] sm:$0xff] }
  0xfa   : > { %v1444_v43 = vld [vmem:[%s6152_s26 + $0x1d60] sm:$0xff]  ;;  %1443 = vst [vmem:[%s6160_s27 + $0x750] sm:$0xff] %v1442_v42 }
  0xfb   : > { %v1446_v44 = vld [vmem:[%s6152_s26 + $0x1d80] sm:$0xff]  ;;  %1445 = vst [vmem:[%s6160_s27 + $0x758] sm:$0xff] %v1444_v43 }
  0xfc   : > { %1447 = vst [vmem:[%s6160_s27 + $0x760] sm:$0xff] %v1446_v44  ;;  %v1448_v45 = vld [vmem:[%s6152_s26 + $0x1da0] sm:$0xff] }
  0xfd   : > { %v1450_v46 = vld [vmem:[%s6152_s26 + $0x1dc0] sm:$0xff]  ;;  %1449 = vst [vmem:[%s6160_s27 + $0x768] sm:$0xff] %v1448_v45 }
  0xfe   : > { %v1452_v47 = vld [vmem:[%s6152_s26 + $0x1de0] sm:$0xff]  ;;  %1451 = vst [vmem:[%s6160_s27 + $0x770] sm:$0xff] %v1450_v46 }
  0xff   : > { %1453 = vst [vmem:[%s6160_s27 + $0x778] sm:$0xff] %v1452_v47  ;;  %v1454_v48 = vld [vmem:[%s6152_s26 + $0x1e00] sm:$0xff] }
 0x100   : > { %v1456_v49 = vld [vmem:[%s6152_s26 + $0x1e20] sm:$0xff]  ;;  %1455 = vst [vmem:[%s6160_s27 + $0x780] sm:$0xff] %v1454_v48 }
 0x101   : > { %v1458_v50 = vld [vmem:[%s6152_s26 + $0x1e40] sm:$0xff]  ;;  %1457 = vst [vmem:[%s6160_s27 + $0x788] sm:$0xff] %v1456_v49 }
 0x102   : > { %1459 = vst [vmem:[%s6160_s27 + $0x790] sm:$0xff] %v1458_v50  ;;  %v1460_v51 = vld [vmem:[%s6152_s26 + $0x1e60] sm:$0xff] }
 0x103   : > { %v1462_v52 = vld [vmem:[%s6152_s26 + $0x1e80] sm:$0xff]  ;;  %1461 = vst [vmem:[%s6160_s27 + $0x798] sm:$0xff] %v1460_v51 }
 0x104   : > { %v1464_v53 = vld [vmem:[%s6152_s26 + $0x1ea0] sm:$0xff]  ;;  %1463 = vst [vmem:[%s6160_s27 + $0x7a0] sm:$0xff] %v1462_v52 }
 0x105   : > { %1465 = vst [vmem:[%s6160_s27 + $0x7a8] sm:$0xff] %v1464_v53  ;;  %v1466_v54 = vld [vmem:[%s6152_s26 + $0x1ec0] sm:$0xff] }
 0x106   : > { %v1468_v55 = vld [vmem:[%s6152_s26 + $0x1ee0] sm:$0xff]  ;;  %1467 = vst [vmem:[%s6160_s27 + $0x7b0] sm:$0xff] %v1466_v54 }
 0x107   : > { %v1470_v56 = vld [vmem:[%s6152_s26 + $0x1f00] sm:$0xff]  ;;  %1469 = vst [vmem:[%s6160_s27 + $0x7b8] sm:$0xff] %v1468_v55 }
 0x108   : > { %1471 = vst [vmem:[%s6160_s27 + $0x7c0] sm:$0xff] %v1470_v56  ;;  %v1472_v57 = vld [vmem:[%s6152_s26 + $0x1f20] sm:$0xff] }
 0x109   : > { %v1474_v58 = vld [vmem:[%s6152_s26 + $0x1f40] sm:$0xff]  ;;  %1473 = vst [vmem:[%s6160_s27 + $0x7c8] sm:$0xff] %v1472_v57 }
 0x10a   : > { %v1476_v59 = vld [vmem:[%s6152_s26 + $0x1f60] sm:$0xff]  ;;  %1475 = vst [vmem:[%s6160_s27 + $0x7d0] sm:$0xff] %v1474_v58 }
 0x10b   : > { %1477 = vst [vmem:[%s6160_s27 + $0x7d8] sm:$0xff] %v1476_v59  ;;  %v1478_v60 = vld [vmem:[%s6152_s26 + $0x1f80] sm:$0xff] }
 0x10c   : > { %v1480_v61 = vld [vmem:[%s6152_s26 + $0x1fa0] sm:$0xff]  ;;  %1479 = vst [vmem:[%s6160_s27 + $0x7e0] sm:$0xff] %v1478_v60 }
 0x10d   : > { %v1482_v62 = vld [vmem:[%s6152_s26 + $0x1fc0] sm:$0xff]  ;;  %1481 = vst [vmem:[%s6160_s27 + $0x7e8] sm:$0xff] %v1480_v61 }
 0x10e   : > { %1483 = vst [vmem:[%s6160_s27 + $0x7f0] sm:$0xff] %v1482_v62  ;;  %v1484_v63 = vld [vmem:[%s6152_s26 + $0x1fe0] sm:$0xff] }
 0x10f   : > { %v1486_v0 = vld [vmem:[%s6152_s26 + $0x2000] sm:$0xff]  ;;  %1485 = vst [vmem:[%s6160_s27 + $0x7f8] sm:$0xff] %v1484_v63 }
 0x110   : > { %v1488_v1 = vld [vmem:[%s6152_s26 + $0x2020] sm:$0xff]  ;;  %1487 = vst [vmem:[%s6160_s27 + $0x800] sm:$0xff] %v1486_v0 }
 0x111   : > { %1489 = vst [vmem:[%s6160_s27 + $0x808] sm:$0xff] %v1488_v1  ;;  %v1490_v2 = vld [vmem:[%s6152_s26 + $0x2040] sm:$0xff] }
 0x112   : > { %v1492_v3 = vld [vmem:[%s6152_s26 + $0x2060] sm:$0xff]  ;;  %1491 = vst [vmem:[%s6160_s27 + $0x810] sm:$0xff] %v1490_v2 }
 0x113   : > { %v1494_v4 = vld [vmem:[%s6152_s26 + $0x2080] sm:$0xff]  ;;  %1493 = vst [vmem:[%s6160_s27 + $0x818] sm:$0xff] %v1492_v3 }
 0x114   : > { %1495 = vst [vmem:[%s6160_s27 + $0x820] sm:$0xff] %v1494_v4  ;;  %v1496_v5 = vld [vmem:[%s6152_s26 + $0x20a0] sm:$0xff] }
 0x115   : > { %v1498_v6 = vld [vmem:[%s6152_s26 + $0x20c0] sm:$0xff]  ;;  %1497 = vst [vmem:[%s6160_s27 + $0x828] sm:$0xff] %v1496_v5 }
 0x116   : > { %v1500_v7 = vld [vmem:[%s6152_s26 + $0x20e0] sm:$0xff]  ;;  %1499 = vst [vmem:[%s6160_s27 + $0x830] sm:$0xff] %v1498_v6 }
 0x117   : > { %1501 = vst [vmem:[%s6160_s27 + $0x838] sm:$0xff] %v1500_v7  ;;  %v1502_v8 = vld [vmem:[%s6152_s26 + $0x2100] sm:$0xff] }
 0x118   : > { %v1504_v9 = vld [vmem:[%s6152_s26 + $0x2120] sm:$0xff]  ;;  %1503 = vst [vmem:[%s6160_s27 + $0x840] sm:$0xff] %v1502_v8 }
 0x119   : > { %v1506_v10 = vld [vmem:[%s6152_s26 + $0x2140] sm:$0xff]  ;;  %1505 = vst [vmem:[%s6160_s27 + $0x848] sm:$0xff] %v1504_v9 }
 0x11a   : > { %1507 = vst [vmem:[%s6160_s27 + $0x850] sm:$0xff] %v1506_v10  ;;  %v1508_v11 = vld [vmem:[%s6152_s26 + $0x2160] sm:$0xff] }
 0x11b   : > { %v1510_v12 = vld [vmem:[%s6152_s26 + $0x2180] sm:$0xff]  ;;  %1509 = vst [vmem:[%s6160_s27 + $0x858] sm:$0xff] %v1508_v11 }
 0x11c   : > { %v1512_v13 = vld [vmem:[%s6152_s26 + $0x21a0] sm:$0xff]  ;;  %1511 = vst [vmem:[%s6160_s27 + $0x860] sm:$0xff] %v1510_v12 }
 0x11d   : > { %1513 = vst [vmem:[%s6160_s27 + $0x868] sm:$0xff] %v1512_v13  ;;  %v1514_v14 = vld [vmem:[%s6152_s26 + $0x21c0] sm:$0xff] }
 0x11e   : > { %v1516_v15 = vld [vmem:[%s6152_s26 + $0x21e0] sm:$0xff]  ;;  %1515 = vst [vmem:[%s6160_s27 + $0x870] sm:$0xff] %v1514_v14 }
 0x11f   : > { %v1518_v16 = vld [vmem:[%s6152_s26 + $0x2200] sm:$0xff]  ;;  %1517 = vst [vmem:[%s6160_s27 + $0x878] sm:$0xff] %v1516_v15 }
 0x120   : > { %1519 = vst [vmem:[%s6160_s27 + $0x880] sm:$0xff] %v1518_v16  ;;  %v1520_v17 = vld [vmem:[%s6152_s26 + $0x2220] sm:$0xff] }
 0x121   : > { %v1522_v18 = vld [vmem:[%s6152_s26 + $0x2240] sm:$0xff]  ;;  %1521 = vst [vmem:[%s6160_s27 + $0x888] sm:$0xff] %v1520_v17 }
 0x122   : > { %v1524_v19 = vld [vmem:[%s6152_s26 + $0x2260] sm:$0xff]  ;;  %1523 = vst [vmem:[%s6160_s27 + $0x890] sm:$0xff] %v1522_v18 }
 0x123   : > { %1525 = vst [vmem:[%s6160_s27 + $0x898] sm:$0xff] %v1524_v19  ;;  %v1526_v20 = vld [vmem:[%s6152_s26 + $0x2280] sm:$0xff] }
 0x124   : > { %v1528_v21 = vld [vmem:[%s6152_s26 + $0x22a0] sm:$0xff]  ;;  %1527 = vst [vmem:[%s6160_s27 + $0x8a0] sm:$0xff] %v1526_v20 }
 0x125   : > { %v1530_v22 = vld [vmem:[%s6152_s26 + $0x22c0] sm:$0xff]  ;;  %1529 = vst [vmem:[%s6160_s27 + $0x8a8] sm:$0xff] %v1528_v21 }
 0x126   : > { %1531 = vst [vmem:[%s6160_s27 + $0x8b0] sm:$0xff] %v1530_v22  ;;  %v1532_v23 = vld [vmem:[%s6152_s26 + $0x22e0] sm:$0xff] }
 0x127   : > { %v1534_v24 = vld [vmem:[%s6152_s26 + $0x2300] sm:$0xff]  ;;  %1533 = vst [vmem:[%s6160_s27 + $0x8b8] sm:$0xff] %v1532_v23 }
 0x128   : > { %v1536_v25 = vld [vmem:[%s6152_s26 + $0x2320] sm:$0xff]  ;;  %1535 = vst [vmem:[%s6160_s27 + $0x8c0] sm:$0xff] %v1534_v24 }
 0x129   : > { %1537 = vst [vmem:[%s6160_s27 + $0x8c8] sm:$0xff] %v1536_v25  ;;  %v1538_v26 = vld [vmem:[%s6152_s26 + $0x2340] sm:$0xff] }
 0x12a   : > { %v1540_v27 = vld [vmem:[%s6152_s26 + $0x2360] sm:$0xff]  ;;  %1539 = vst [vmem:[%s6160_s27 + $0x8d0] sm:$0xff] %v1538_v26 }
 0x12b   : > { %v1542_v28 = vld [vmem:[%s6152_s26 + $0x2380] sm:$0xff]  ;;  %1541 = vst [vmem:[%s6160_s27 + $0x8d8] sm:$0xff] %v1540_v27 }
 0x12c   : > { %1543 = vst [vmem:[%s6160_s27 + $0x8e0] sm:$0xff] %v1542_v28  ;;  %v1544_v29 = vld [vmem:[%s6152_s26 + $0x23a0] sm:$0xff] }
 0x12d   : > { %v1546_v30 = vld [vmem:[%s6152_s26 + $0x23c0] sm:$0xff]  ;;  %1545 = vst [vmem:[%s6160_s27 + $0x8e8] sm:$0xff] %v1544_v29 }
 0x12e   : > { %v1548_v31 = vld [vmem:[%s6152_s26 + $0x23e0] sm:$0xff]  ;;  %1547 = vst [vmem:[%s6160_s27 + $0x8f0] sm:$0xff] %v1546_v30 }
 0x12f   : > { %1549 = vst [vmem:[%s6160_s27 + $0x8f8] sm:$0xff] %v1548_v31  ;;  %v1550_v32 = vld [vmem:[%s6152_s26 + $0x2400] sm:$0xff] }
 0x130   : > { %v1552_v33 = vld [vmem:[%s6152_s26 + $0x2420] sm:$0xff]  ;;  %1551 = vst [vmem:[%s6160_s27 + $0x900] sm:$0xff] %v1550_v32 }
 0x131   : > { %v1554_v34 = vld [vmem:[%s6152_s26 + $0x2440] sm:$0xff]  ;;  %1553 = vst [vmem:[%s6160_s27 + $0x908] sm:$0xff] %v1552_v33 }
 0x132   : > { %1555 = vst [vmem:[%s6160_s27 + $0x910] sm:$0xff] %v1554_v34  ;;  %v1556_v35 = vld [vmem:[%s6152_s26 + $0x2460] sm:$0xff] }
 0x133   : > { %v1558_v36 = vld [vmem:[%s6152_s26 + $0x2480] sm:$0xff]  ;;  %1557 = vst [vmem:[%s6160_s27 + $0x918] sm:$0xff] %v1556_v35 }
 0x134   : > { %v1560_v37 = vld [vmem:[%s6152_s26 + $0x24a0] sm:$0xff]  ;;  %1559 = vst [vmem:[%s6160_s27 + $0x920] sm:$0xff] %v1558_v36 }
 0x135   : > { %1561 = vst [vmem:[%s6160_s27 + $0x928] sm:$0xff] %v1560_v37  ;;  %v1562_v38 = vld [vmem:[%s6152_s26 + $0x24c0] sm:$0xff] }
 0x136   : > { %v1564_v39 = vld [vmem:[%s6152_s26 + $0x24e0] sm:$0xff]  ;;  %1563 = vst [vmem:[%s6160_s27 + $0x930] sm:$0xff] %v1562_v38 }
 0x137   : > { %v1566_v40 = vld [vmem:[%s6152_s26 + $0x2500] sm:$0xff]  ;;  %1565 = vst [vmem:[%s6160_s27 + $0x938] sm:$0xff] %v1564_v39 }
 0x138   : > { %1567 = vst [vmem:[%s6160_s27 + $0x940] sm:$0xff] %v1566_v40  ;;  %v1568_v41 = vld [vmem:[%s6152_s26 + $0x2520] sm:$0xff] }
 0x139   : > { %v1570_v42 = vld [vmem:[%s6152_s26 + $0x2540] sm:$0xff]  ;;  %1569 = vst [vmem:[%s6160_s27 + $0x948] sm:$0xff] %v1568_v41 }
 0x13a   : > { %v1572_v43 = vld [vmem:[%s6152_s26 + $0x2560] sm:$0xff]  ;;  %1571 = vst [vmem:[%s6160_s27 + $0x950] sm:$0xff] %v1570_v42 }
 0x13b   : > { %1573 = vst [vmem:[%s6160_s27 + $0x958] sm:$0xff] %v1572_v43  ;;  %v1574_v44 = vld [vmem:[%s6152_s26 + $0x2580] sm:$0xff] }
 0x13c   : > { %v1576_v45 = vld [vmem:[%s6152_s26 + $0x25a0] sm:$0xff]  ;;  %1575 = vst [vmem:[%s6160_s27 + $0x960] sm:$0xff] %v1574_v44 }
 0x13d   : > { %v1578_v46 = vld [vmem:[%s6152_s26 + $0x25c0] sm:$0xff]  ;;  %1577 = vst [vmem:[%s6160_s27 + $0x968] sm:$0xff] %v1576_v45 }
 0x13e   : > { %1579 = vst [vmem:[%s6160_s27 + $0x970] sm:$0xff] %v1578_v46  ;;  %v1580_v47 = vld [vmem:[%s6152_s26 + $0x25e0] sm:$0xff] }
 0x13f   : > { %v1582_v48 = vld [vmem:[%s6152_s26 + $0x2600] sm:$0xff]  ;;  %1581 = vst [vmem:[%s6160_s27 + $0x978] sm:$0xff] %v1580_v47 }
 0x140   : > { %v1584_v49 = vld [vmem:[%s6152_s26 + $0x2620] sm:$0xff]  ;;  %1583 = vst [vmem:[%s6160_s27 + $0x980] sm:$0xff] %v1582_v48 }
 0x141   : > { %1585 = vst [vmem:[%s6160_s27 + $0x988] sm:$0xff] %v1584_v49  ;;  %v1586_v50 = vld [vmem:[%s6152_s26 + $0x2640] sm:$0xff] }
 0x142   : > { %v1588_v51 = vld [vmem:[%s6152_s26 + $0x2660] sm:$0xff]  ;;  %1587 = vst [vmem:[%s6160_s27 + $0x990] sm:$0xff] %v1586_v50 }
 0x143   : > { %v1590_v52 = vld [vmem:[%s6152_s26 + $0x2680] sm:$0xff]  ;;  %1589 = vst [vmem:[%s6160_s27 + $0x998] sm:$0xff] %v1588_v51 }
 0x144   : > { %1591 = vst [vmem:[%s6160_s27 + $0x9a0] sm:$0xff] %v1590_v52  ;;  %v1592_v53 = vld [vmem:[%s6152_s26 + $0x26a0] sm:$0xff] }
 0x145   : > { %v1594_v54 = vld [vmem:[%s6152_s26 + $0x26c0] sm:$0xff]  ;;  %1593 = vst [vmem:[%s6160_s27 + $0x9a8] sm:$0xff] %v1592_v53 }
 0x146   : > { %v1596_v55 = vld [vmem:[%s6152_s26 + $0x26e0] sm:$0xff]  ;;  %1595 = vst [vmem:[%s6160_s27 + $0x9b0] sm:$0xff] %v1594_v54 }
 0x147   : > { %1597 = vst [vmem:[%s6160_s27 + $0x9b8] sm:$0xff] %v1596_v55  ;;  %v1598_v56 = vld [vmem:[%s6152_s26 + $0x2700] sm:$0xff] }
 0x148   : > { %v1600_v57 = vld [vmem:[%s6152_s26 + $0x2720] sm:$0xff]  ;;  %1599 = vst [vmem:[%s6160_s27 + $0x9c0] sm:$0xff] %v1598_v56 }
 0x149   : > { %v1602_v58 = vld [vmem:[%s6152_s26 + $0x2740] sm:$0xff]  ;;  %1601 = vst [vmem:[%s6160_s27 + $0x9c8] sm:$0xff] %v1600_v57 }
 0x14a   : > { %1603 = vst [vmem:[%s6160_s27 + $0x9d0] sm:$0xff] %v1602_v58  ;;  %v1604_v59 = vld [vmem:[%s6152_s26 + $0x2760] sm:$0xff] }
 0x14b   : > { %v1606_v60 = vld [vmem:[%s6152_s26 + $0x2780] sm:$0xff]  ;;  %1605 = vst [vmem:[%s6160_s27 + $0x9d8] sm:$0xff] %v1604_v59 }
 0x14c   : > { %v1608_v61 = vld [vmem:[%s6152_s26 + $0x27a0] sm:$0xff]  ;;  %1607 = vst [vmem:[%s6160_s27 + $0x9e0] sm:$0xff] %v1606_v60 }
 0x14d   : > { %1609 = vst [vmem:[%s6160_s27 + $0x9e8] sm:$0xff] %v1608_v61  ;;  %v1610_v62 = vld [vmem:[%s6152_s26 + $0x27c0] sm:$0xff] }
 0x14e   : > { %v1612_v63 = vld [vmem:[%s6152_s26 + $0x27e0] sm:$0xff]  ;;  %1611 = vst [vmem:[%s6160_s27 + $0x9f0] sm:$0xff] %v1610_v62 }
 0x14f   : > { %v1614_v0 = vld [vmem:[%s6152_s26 + $0x2800] sm:$0xff]  ;;  %1613 = vst [vmem:[%s6160_s27 + $0x9f8] sm:$0xff] %v1612_v63 }
 0x150   : > { %1615 = vst [vmem:[%s6160_s27 + $0xa00] sm:$0xff] %v1614_v0  ;;  %v1616_v1 = vld [vmem:[%s6152_s26 + $0x2820] sm:$0xff] }
 0x151   : > { %v1618_v2 = vld [vmem:[%s6152_s26 + $0x2840] sm:$0xff]  ;;  %1617 = vst [vmem:[%s6160_s27 + $0xa08] sm:$0xff] %v1616_v1 }
 0x152   : > { %v1620_v3 = vld [vmem:[%s6152_s26 + $0x2860] sm:$0xff]  ;;  %1619 = vst [vmem:[%s6160_s27 + $0xa10] sm:$0xff] %v1618_v2 }
 0x153   : > { %1621 = vst [vmem:[%s6160_s27 + $0xa18] sm:$0xff] %v1620_v3  ;;  %v1622_v4 = vld [vmem:[%s6152_s26 + $0x2880] sm:$0xff] }
 0x154   : > { %v1624_v5 = vld [vmem:[%s6152_s26 + $0x28a0] sm:$0xff]  ;;  %1623 = vst [vmem:[%s6160_s27 + $0xa20] sm:$0xff] %v1622_v4 }
 0x155   : > { %v1626_v6 = vld [vmem:[%s6152_s26 + $0x28c0] sm:$0xff]  ;;  %1625 = vst [vmem:[%s6160_s27 + $0xa28] sm:$0xff] %v1624_v5 }
 0x156   : > { %1627 = vst [vmem:[%s6160_s27 + $0xa30] sm:$0xff] %v1626_v6  ;;  %v1628_v7 = vld [vmem:[%s6152_s26 + $0x28e0] sm:$0xff] }
 0x157   : > { %v1630_v8 = vld [vmem:[%s6152_s26 + $0x2900] sm:$0xff]  ;;  %1629 = vst [vmem:[%s6160_s27 + $0xa38] sm:$0xff] %v1628_v7 }
 0x158   : > { %v1632_v9 = vld [vmem:[%s6152_s26 + $0x2920] sm:$0xff]  ;;  %1631 = vst [vmem:[%s6160_s27 + $0xa40] sm:$0xff] %v1630_v8 }
 0x159   : > { %1633 = vst [vmem:[%s6160_s27 + $0xa48] sm:$0xff] %v1632_v9  ;;  %v1634_v10 = vld [vmem:[%s6152_s26 + $0x2940] sm:$0xff] }
 0x15a   : > { %v1636_v11 = vld [vmem:[%s6152_s26 + $0x2960] sm:$0xff]  ;;  %1635 = vst [vmem:[%s6160_s27 + $0xa50] sm:$0xff] %v1634_v10 }
 0x15b   : > { %v1638_v12 = vld [vmem:[%s6152_s26 + $0x2980] sm:$0xff]  ;;  %1637 = vst [vmem:[%s6160_s27 + $0xa58] sm:$0xff] %v1636_v11 }
 0x15c   : > { %1639 = vst [vmem:[%s6160_s27 + $0xa60] sm:$0xff] %v1638_v12  ;;  %v1640_v13 = vld [vmem:[%s6152_s26 + $0x29a0] sm:$0xff] }
 0x15d   : > { %v1642_v14 = vld [vmem:[%s6152_s26 + $0x29c0] sm:$0xff]  ;;  %1641 = vst [vmem:[%s6160_s27 + $0xa68] sm:$0xff] %v1640_v13 }
 0x15e   : > { %v1644_v15 = vld [vmem:[%s6152_s26 + $0x29e0] sm:$0xff]  ;;  %1643 = vst [vmem:[%s6160_s27 + $0xa70] sm:$0xff] %v1642_v14 }
 0x15f   : > { %1645 = vst [vmem:[%s6160_s27 + $0xa78] sm:$0xff] %v1644_v15  ;;  %v1646_v16 = vld [vmem:[%s6152_s26 + $0x2a00] sm:$0xff] }
 0x160   : > { %v1648_v17 = vld [vmem:[%s6152_s26 + $0x2a20] sm:$0xff]  ;;  %1647 = vst [vmem:[%s6160_s27 + $0xa80] sm:$0xff] %v1646_v16 }
 0x161   : > { %v1650_v18 = vld [vmem:[%s6152_s26 + $0x2a40] sm:$0xff]  ;;  %1649 = vst [vmem:[%s6160_s27 + $0xa88] sm:$0xff] %v1648_v17 }
 0x162   : > { %1651 = vst [vmem:[%s6160_s27 + $0xa90] sm:$0xff] %v1650_v18  ;;  %v1652_v19 = vld [vmem:[%s6152_s26 + $0x2a60] sm:$0xff] }
 0x163   : > { %v1654_v20 = vld [vmem:[%s6152_s26 + $0x2a80] sm:$0xff]  ;;  %1653 = vst [vmem:[%s6160_s27 + $0xa98] sm:$0xff] %v1652_v19 }
 0x164   : > { %v1656_v21 = vld [vmem:[%s6152_s26 + $0x2aa0] sm:$0xff]  ;;  %1655 = vst [vmem:[%s6160_s27 + $0xaa0] sm:$0xff] %v1654_v20 }
 0x165   : > { %1657 = vst [vmem:[%s6160_s27 + $0xaa8] sm:$0xff] %v1656_v21  ;;  %v1658_v22 = vld [vmem:[%s6152_s26 + $0x2ac0] sm:$0xff] }
 0x166   : > { %v1660_v23 = vld [vmem:[%s6152_s26 + $0x2ae0] sm:$0xff]  ;;  %1659 = vst [vmem:[%s6160_s27 + $0xab0] sm:$0xff] %v1658_v22 }
 0x167   : > { %v1662_v24 = vld [vmem:[%s6152_s26 + $0x2b00] sm:$0xff]  ;;  %1661 = vst [vmem:[%s6160_s27 + $0xab8] sm:$0xff] %v1660_v23 }
 0x168   : > { %1663 = vst [vmem:[%s6160_s27 + $0xac0] sm:$0xff] %v1662_v24  ;;  %v1664_v25 = vld [vmem:[%s6152_s26 + $0x2b20] sm:$0xff] }
 0x169   : > { %v1666_v26 = vld [vmem:[%s6152_s26 + $0x2b40] sm:$0xff]  ;;  %1665 = vst [vmem:[%s6160_s27 + $0xac8] sm:$0xff] %v1664_v25 }
 0x16a   : > { %v1668_v27 = vld [vmem:[%s6152_s26 + $0x2b60] sm:$0xff]  ;;  %1667 = vst [vmem:[%s6160_s27 + $0xad0] sm:$0xff] %v1666_v26 }
 0x16b   : > { %1669 = vst [vmem:[%s6160_s27 + $0xad8] sm:$0xff] %v1668_v27  ;;  %v1670_v28 = vld [vmem:[%s6152_s26 + $0x2b80] sm:$0xff] }
 0x16c   : > { %v1672_v29 = vld [vmem:[%s6152_s26 + $0x2ba0] sm:$0xff]  ;;  %1671 = vst [vmem:[%s6160_s27 + $0xae0] sm:$0xff] %v1670_v28 }
 0x16d   : > { %v1674_v30 = vld [vmem:[%s6152_s26 + $0x2bc0] sm:$0xff]  ;;  %1673 = vst [vmem:[%s6160_s27 + $0xae8] sm:$0xff] %v1672_v29 }
 0x16e   : > { %1675 = vst [vmem:[%s6160_s27 + $0xaf0] sm:$0xff] %v1674_v30  ;;  %v1676_v31 = vld [vmem:[%s6152_s26 + $0x2be0] sm:$0xff] }
 0x16f   : > { %v1678_v32 = vld [vmem:[%s6152_s26 + $0x2c00] sm:$0xff]  ;;  %1677 = vst [vmem:[%s6160_s27 + $0xaf8] sm:$0xff] %v1676_v31 }
 0x170   : > { %v1680_v33 = vld [vmem:[%s6152_s26 + $0x2c20] sm:$0xff]  ;;  %1679 = vst [vmem:[%s6160_s27 + $0xb00] sm:$0xff] %v1678_v32 }
 0x171   : > { %1681 = vst [vmem:[%s6160_s27 + $0xb08] sm:$0xff] %v1680_v33  ;;  %v1682_v34 = vld [vmem:[%s6152_s26 + $0x2c40] sm:$0xff] }
 0x172   : > { %v1684_v35 = vld [vmem:[%s6152_s26 + $0x2c60] sm:$0xff]  ;;  %1683 = vst [vmem:[%s6160_s27 + $0xb10] sm:$0xff] %v1682_v34 }
 0x173   : > { %v1686_v36 = vld [vmem:[%s6152_s26 + $0x2c80] sm:$0xff]  ;;  %1685 = vst [vmem:[%s6160_s27 + $0xb18] sm:$0xff] %v1684_v35 }
 0x174   : > { %1687 = vst [vmem:[%s6160_s27 + $0xb20] sm:$0xff] %v1686_v36  ;;  %v1688_v37 = vld [vmem:[%s6152_s26 + $0x2ca0] sm:$0xff] }
 0x175   : > { %v1690_v38 = vld [vmem:[%s6152_s26 + $0x2cc0] sm:$0xff]  ;;  %1689 = vst [vmem:[%s6160_s27 + $0xb28] sm:$0xff] %v1688_v37 }
 0x176   : > { %v1692_v39 = vld [vmem:[%s6152_s26 + $0x2ce0] sm:$0xff]  ;;  %1691 = vst [vmem:[%s6160_s27 + $0xb30] sm:$0xff] %v1690_v38 }
 0x177   : > { %1693 = vst [vmem:[%s6160_s27 + $0xb38] sm:$0xff] %v1692_v39  ;;  %v1694_v40 = vld [vmem:[%s6152_s26 + $0x2d00] sm:$0xff] }
 0x178   : > { %v1696_v41 = vld [vmem:[%s6152_s26 + $0x2d20] sm:$0xff]  ;;  %1695 = vst [vmem:[%s6160_s27 + $0xb40] sm:$0xff] %v1694_v40 }
 0x179   : > { %v1698_v42 = vld [vmem:[%s6152_s26 + $0x2d40] sm:$0xff]  ;;  %1697 = vst [vmem:[%s6160_s27 + $0xb48] sm:$0xff] %v1696_v41 }
 0x17a   : > { %1699 = vst [vmem:[%s6160_s27 + $0xb50] sm:$0xff] %v1698_v42  ;;  %v1700_v43 = vld [vmem:[%s6152_s26 + $0x2d60] sm:$0xff] }
 0x17b   : > { %v1702_v44 = vld [vmem:[%s6152_s26 + $0x2d80] sm:$0xff]  ;;  %1701 = vst [vmem:[%s6160_s27 + $0xb58] sm:$0xff] %v1700_v43 }
 0x17c   : > { %v1704_v45 = vld [vmem:[%s6152_s26 + $0x2da0] sm:$0xff]  ;;  %1703 = vst [vmem:[%s6160_s27 + $0xb60] sm:$0xff] %v1702_v44 }
 0x17d   : > { %1705 = vst [vmem:[%s6160_s27 + $0xb68] sm:$0xff] %v1704_v45  ;;  %v1706_v46 = vld [vmem:[%s6152_s26 + $0x2dc0] sm:$0xff] }
 0x17e   : > { %v1708_v47 = vld [vmem:[%s6152_s26 + $0x2de0] sm:$0xff]  ;;  %1707 = vst [vmem:[%s6160_s27 + $0xb70] sm:$0xff] %v1706_v46 }
 0x17f   : > { %v1710_v48 = vld [vmem:[%s6152_s26 + $0x2e00] sm:$0xff]  ;;  %1709 = vst [vmem:[%s6160_s27 + $0xb78] sm:$0xff] %v1708_v47 }
 0x180   : > { %1711 = vst [vmem:[%s6160_s27 + $0xb80] sm:$0xff] %v1710_v48  ;;  %v1712_v49 = vld [vmem:[%s6152_s26 + $0x2e20] sm:$0xff] }
 0x181   : > { %v1714_v50 = vld [vmem:[%s6152_s26 + $0x2e40] sm:$0xff]  ;;  %1713 = vst [vmem:[%s6160_s27 + $0xb88] sm:$0xff] %v1712_v49 }
 0x182   : > { %v1716_v51 = vld [vmem:[%s6152_s26 + $0x2e60] sm:$0xff]  ;;  %1715 = vst [vmem:[%s6160_s27 + $0xb90] sm:$0xff] %v1714_v50 }
 0x183   : > { %1717 = vst [vmem:[%s6160_s27 + $0xb98] sm:$0xff] %v1716_v51  ;;  %v1718_v52 = vld [vmem:[%s6152_s26 + $0x2e80] sm:$0xff] }
 0x184   : > { %v1720_v53 = vld [vmem:[%s6152_s26 + $0x2ea0] sm:$0xff]  ;;  %1719 = vst [vmem:[%s6160_s27 + $0xba0] sm:$0xff] %v1718_v52 }
 0x185   : > { %v1722_v54 = vld [vmem:[%s6152_s26 + $0x2ec0] sm:$0xff]  ;;  %1721 = vst [vmem:[%s6160_s27 + $0xba8] sm:$0xff] %v1720_v53 }
 0x186   : > { %1723 = vst [vmem:[%s6160_s27 + $0xbb0] sm:$0xff] %v1722_v54  ;;  %v1724_v55 = vld [vmem:[%s6152_s26 + $0x2ee0] sm:$0xff] }
 0x187   : > { %v1726_v56 = vld [vmem:[%s6152_s26 + $0x2f00] sm:$0xff]  ;;  %1725 = vst [vmem:[%s6160_s27 + $0xbb8] sm:$0xff] %v1724_v55 }
 0x188   : > { %v1728_v57 = vld [vmem:[%s6152_s26 + $0x2f20] sm:$0xff]  ;;  %1727 = vst [vmem:[%s6160_s27 + $0xbc0] sm:$0xff] %v1726_v56 }
 0x189   : > { %1729 = vst [vmem:[%s6160_s27 + $0xbc8] sm:$0xff] %v1728_v57  ;;  %v1730_v58 = vld [vmem:[%s6152_s26 + $0x2f40] sm:$0xff] }
 0x18a   : > { %v1732_v59 = vld [vmem:[%s6152_s26 + $0x2f60] sm:$0xff]  ;;  %1731 = vst [vmem:[%s6160_s27 + $0xbd0] sm:$0xff] %v1730_v58 }
 0x18b   : > { %v1734_v60 = vld [vmem:[%s6152_s26 + $0x2f80] sm:$0xff]  ;;  %1733 = vst [vmem:[%s6160_s27 + $0xbd8] sm:$0xff] %v1732_v59 }
 0x18c   : > { %1735 = vst [vmem:[%s6160_s27 + $0xbe0] sm:$0xff] %v1734_v60  ;;  %v1736_v61 = vld [vmem:[%s6152_s26 + $0x2fa0] sm:$0xff] }
 0x18d   : > { %v1738_v62 = vld [vmem:[%s6152_s26 + $0x2fc0] sm:$0xff]  ;;  %1737 = vst [vmem:[%s6160_s27 + $0xbe8] sm:$0xff] %v1736_v61 }
 0x18e   : > { %v1740_v63 = vld [vmem:[%s6152_s26 + $0x2fe0] sm:$0xff]  ;;  %1739 = vst [vmem:[%s6160_s27 + $0xbf0] sm:$0xff] %v1738_v62 }
 0x18f   : > { %1741 = vst [vmem:[%s6160_s27 + $0xbf8] sm:$0xff] %v1740_v63  ;;  %v1742_v0 = vld [vmem:[%s6152_s26 + $0x3000] sm:$0xff] }
 0x190   : > { %v1744_v1 = vld [vmem:[%s6152_s26 + $0x3020] sm:$0xff]  ;;  %1743 = vst [vmem:[%s6160_s27 + $0xc00] sm:$0xff] %v1742_v0 }
 0x191   : > { %v1746_v2 = vld [vmem:[%s6152_s26 + $0x3040] sm:$0xff]  ;;  %1745 = vst [vmem:[%s6160_s27 + $0xc08] sm:$0xff] %v1744_v1 }
 0x192   : > { %1747 = vst [vmem:[%s6160_s27 + $0xc10] sm:$0xff] %v1746_v2  ;;  %v1748_v3 = vld [vmem:[%s6152_s26 + $0x3060] sm:$0xff] }
 0x193   : > { %v1750_v4 = vld [vmem:[%s6152_s26 + $0x3080] sm:$0xff]  ;;  %1749 = vst [vmem:[%s6160_s27 + $0xc18] sm:$0xff] %v1748_v3 }
 0x194   : > { %v1752_v5 = vld [vmem:[%s6152_s26 + $0x30a0] sm:$0xff]  ;;  %1751 = vst [vmem:[%s6160_s27 + $0xc20] sm:$0xff] %v1750_v4 }
 0x195   : > { %1753 = vst [vmem:[%s6160_s27 + $0xc28] sm:$0xff] %v1752_v5  ;;  %v1754_v6 = vld [vmem:[%s6152_s26 + $0x30c0] sm:$0xff] }
 0x196   : > { %v1756_v7 = vld [vmem:[%s6152_s26 + $0x30e0] sm:$0xff]  ;;  %1755 = vst [vmem:[%s6160_s27 + $0xc30] sm:$0xff] %v1754_v6 }
 0x197   : > { %1757 = vst [vmem:[%s6160_s27 + $0xc38] sm:$0xff] %v1756_v7 }
 0x198 PF: > { %p4965_p6 = scmp.ge.s32.totalorder %s6086_s16, 1  ;;  %p1770_p7 = scmp.lt.s32.totalorder %s6086_s16, 5 }
 0x19a   : > { %p1771_p8 = pnand %p4965_p6, %p1770_p7 }
 0x19b   : > { %s1777_s28 = sand.u32 (!%p1771_p8), 1, %s6070_s12   ;;  %s4966_s26 = sshll.u32 (!%p1771_p8), %s6078_s14, 1 }
 0x19c   : > { %1774 = sbr.rel (%p1771_p8) target bundleno = 1020 (0x3fc), region = 66  ;;  %p1820_p9 = scmp.lt.s32.totalorder (!%p1771_p8), %s4966_s26, 7 }
 0x19d   : > { %s5393_s6 = smul.u32 (!%p1771_p8), 3136, %s1777_s28 }
 0x19f   : > { %s6957_s7 = scalar_lea.vmem (!%p1771_p8), [#allocation2], %s5393_s6 }
 0x1a1   : > { %v6946_v8 = vld [vmem:[%s7486_s0] sm:$0xff]  ;;  %v6951_v9 = vld [vmem:[%s7486_s0 + $0x8] sm:$0xff]  ;;  %v5435_v12 = vld [vmem:[%s6957_s7 + $0x74] ss:$8 sps:$4 sm:$0xff]   ;;  %s7497_s26 = smov (!%p1820_p9, %s4966_s26), 7  ;;  %vm4299_vm0 = vcmask 523264  }
 0x1a2   : > { %v4970_v10 = vcombine.high %v6946_v8, %v6946_v8  ;;  %v4972_v11 = vcombine.high %v6951_v9, %v6951_v9  ;;  %v5437_v13 = vld [vmem:[%s6957_s7 + $0x70] ss:$8 sps:$4 sm:$0xff]   ;;  %4303 = vmatprep.subr.bf16.mxu0 %v5435_v12  ;;  %v5438_v14 = vld [vmem:[%s6957_s7 + $0x174] ss:$8 sps:$4 sm:$0xff]   ;;  %v5441_v16 = vld [vmem:[%s6957_s7 + $0x64] ss:$8 sps:$4 sm:$0xff]   ;;  %s1822_s28 = scalar_lea.vmem %s7488_s2, %s7497_s26 }
 0x1a3   : > { %v5440_v15 = vld [vmem:[%s6957_s7 + $0x170] ss:$8 sps:$4 sm:$0xff]   ;;  %4304 = vmatpush1.bf16.msra.mxu0 %v5437_v13  ;;  %v5443_v17 = vld [vmem:[%s6957_s7 + $0x60] ss:$8 sps:$4 sm:$0xff]   ;;  %4344 = vmatprep.subr.bf16.mxu1 %v5438_v14  ;;  %v5444_v18 = vld [vmem:[%s6957_s7 + $0x164] ss:$8 sps:$4 sm:$0xff]  }
 0x1a4   : > { %4335 = vmatprep.mubr.bf16.mxu0 %v4970_v10  ;;  %4376 = vmatprep.mubr.bf16.mxu1 %v4972_v11  ;;  %v5446_v19 = vld [vmem:[%s6957_s7 + $0x160] ss:$8 sps:$4 sm:$0xff]   ;;  %v5447_v20 = vld [vmem:[%s6957_s7 + $0x54] ss:$8 sps:$4 sm:$0xff]   ;;  %v5449_v21 = vld [vmem:[%s6957_s7 + $0x50] ss:$8 sps:$4 sm:$0xff]  }
 0x1a5   : > { %4345 = vmatpush1.bf16.msra.mxu1 %v5440_v15  ;;  %4305 = vmatprep.subr.bf16.mxu0 %v5441_v16  ;;  %v5450_v22 = vld [vmem:[%s6957_s7 + $0x154] ss:$8 sps:$4 sm:$0xff]   ;;  %v5453_v23 = vld [vmem:[%s6957_s7 + $0x44] ss:$8 sps:$4 sm:$0xff]   ;;  %v5452_v24 = vld [vmem:[%s6957_s7 + $0x150] ss:$8 sps:$4 sm:$0xff]   ;;  %v4969_v16 = vcombine.low %v6946_v8, %v6946_v8 }
 0x1a6   : > { %4346 = vmatprep.subr.bf16.mxu1 %v5444_v18  ;;  %v5456_v25 = vld [vmem:[%s6957_s7 + $0x144] ss:$8 sps:$4 sm:$0xff]   ;;  %v5455_v26 = vld [vmem:[%s6957_s7 + $0x40] ss:$8 sps:$4 sm:$0xff]   ;;  %v5459_v27 = vld [vmem:[%s6957_s7 + $0x34] ss:$8 sps:$4 sm:$0xff]  }
 0x1a7   : > { %4306 = vmatpush1.bf16.msra.mxu0 %v5443_v17  ;;  %v5458_v28 = vld [vmem:[%s6957_s7 + $0x140] ss:$8 sps:$4 sm:$0xff]   ;;  %v5462_v29 = vld [vmem:[%s6957_s7 + $0x134] ss:$8 sps:$4 sm:$0xff]   ;;  %v5461_v30 = vld [vmem:[%s6957_s7 + $0x30] ss:$8 sps:$4 sm:$0xff]  }
 0x1a8   : > { %4307 = vmatprep.subr.bf16.mxu0 %v5447_v20  ;;  %v5465_v31 = vld [vmem:[%s6957_s7 + $0x24] ss:$8 sps:$4 sm:$0xff]   ;;  %v5464_v32 = vld [vmem:[%s6957_s7 + $0x130] ss:$8 sps:$4 sm:$0xff]   ;;  %v5467_v34 = vld [vmem:[%s6957_s7 + $0x20] ss:$8 sps:$4 sm:$0xff]   ;;  %v4971_v20 = vcombine.low %v6951_v9, %v6951_v9 }
 0x1a9   : > { %4347 = vmatpush1.bf16.msra.mxu1 %v5446_v19  ;;  %v5468_v33 = vld [vmem:[%s6957_s7 + $0x124] ss:$8 sps:$4 sm:$0xff]   ;;  %v5471_v35 = vld [vmem:[%s6957_s7 + $0x14] ss:$8 sps:$4 sm:$0xff]   ;;  %v5470_v36 = vld [vmem:[%s6957_s7 + $0x120] ss:$8 sps:$4 sm:$0xff]  }
 0x1aa   : > { %4348 = vmatprep.subr.bf16.mxu1 %v5450_v22  ;;  %v5474_v37 = vld [vmem:[%s6957_s7 + $0x114] ss:$8 sps:$4 sm:$0xff]   ;;  %v5473_v38 = vld [vmem:[%s6957_s7 + $0x10] ss:$8 sps:$4 sm:$0xff]   ;;  %v5477_v39 = vld [vmem:[%s6957_s7 + $0x4] ss:$8 sps:$4 sm:$0xff]  }
 0x1ab   : > { %4308 = vmatpush1.bf16.msra.mxu0 %v5449_v21  ;;  %v5476_v40 = vld [vmem:[%s6957_s7 + $0x110] ss:$8 sps:$4 sm:$0xff]   ;;  %v5480_v41 = vld [vmem:[%s6957_s7 + $0x104] ss:$8 sps:$4 sm:$0xff]   ;;  %v5479_v42 = vld [vmem:[%s6957_s7] ss:$8 sps:$4 sm:$0xff]  }
 0x1ac   : > { %4309 = vmatprep.subr.bf16.mxu0 %v5453_v23  ;;  %v5483_v43 = vld [vmem:[%s6957_s7 + $0xf4] ss:$8 sps:$4 sm:$0xff]   ;;  %v5482_v44 = vld [vmem:[%s6957_s7 + $0x100] ss:$8 sps:$4 sm:$0xff]   ;;  %v5485_v46 = vld [vmem:[%s6957_s7 + $0xf0] ss:$8 sps:$4 sm:$0xff]  }
 0x1ad   : > { %4349 = vmatpush1.bf16.msra.mxu1 %v5452_v24  ;;  %v5486_v45 = vld [vmem:[%s6957_s7 + $0x1f4] ss:$8 sps:$4 sm:$0xff]   ;;  %v5489_v47 = vld [vmem:[%s6957_s7 + $0xe4] ss:$8 sps:$4 sm:$0xff]   ;;  %v5488_v48 = vld [vmem:[%s6957_s7 + $0x1f0] ss:$8 sps:$4 sm:$0xff]  }
 0x1ae   : > { %4350 = vmatprep.subr.bf16.mxu1 %v5456_v25  ;;  %v5492_v49 = vld [vmem:[%s6957_s7 + $0x1e4] ss:$8 sps:$4 sm:$0xff]   ;;  %v5491_v50 = vld [vmem:[%s6957_s7 + $0xe0] ss:$8 sps:$4 sm:$0xff]   ;;  %v5495_v51 = vld [vmem:[%s6957_s7 + $0xd4] ss:$8 sps:$4 sm:$0xff]  }
 0x1af   : > { %4310 = vmatpush1.bf16.msra.mxu0 %v5455_v26  ;;  %v5494_v52 = vld [vmem:[%s6957_s7 + $0x1e0] ss:$8 sps:$4 sm:$0xff]   ;;  %v5498_v53 = vld [vmem:[%s6957_s7 + $0x1d4] ss:$8 sps:$4 sm:$0xff]   ;;  %v5497_v54 = vld [vmem:[%s6957_s7 + $0xd0] ss:$8 sps:$4 sm:$0xff]  }
 0x1b0   : > { %4311 = vmatprep.subr.bf16.mxu0 %v5459_v27  ;;  %v5501_v55 = vld [vmem:[%s6957_s7 + $0xc4] ss:$8 sps:$4 sm:$0xff]   ;;  %v5500_v56 = vld [vmem:[%s6957_s7 + $0x1d0] ss:$8 sps:$4 sm:$0xff]   ;;  %v5503_v58 = vld [vmem:[%s6957_s7 + $0xc0] ss:$8 sps:$4 sm:$0xff]  }
 0x1b1   : > { %4351 = vmatpush1.bf16.msra.mxu1 %v5458_v28  ;;  %v5504_v57 = vld [vmem:[%s6957_s7 + $0x1c4] ss:$8 sps:$4 sm:$0xff]   ;;  %v5507_v59 = vld [vmem:[%s6957_s7 + $0xb4] ss:$8 sps:$4 sm:$0xff]   ;;  %v5506_v60 = vld [vmem:[%s6957_s7 + $0x1c0] ss:$8 sps:$4 sm:$0xff]  }
 0x1b2   : > { %4352 = vmatprep.subr.bf16.mxu1 %v5462_v29  ;;  %v5510_v61 = vld [vmem:[%s6957_s7 + $0x1b4] ss:$8 sps:$4 sm:$0xff]   ;;  %v5509_v62 = vld [vmem:[%s6957_s7 + $0xb0] ss:$8 sps:$4 sm:$0xff]   ;;  %v5513_v63 = vld [vmem:[%s6957_s7 + $0xa4] ss:$8 sps:$4 sm:$0xff]  }
 0x1b3   : > { %4312 = vmatpush1.bf16.msra.mxu0 %v5461_v30  ;;  %v5512_v0 = vld [vmem:[%s6957_s7 + $0x1b0] ss:$8 sps:$4 sm:$0xff]   ;;  %v5516_v1 = vld [vmem:[%s6957_s7 + $0x1a4] ss:$8 sps:$4 sm:$0xff]   ;;  %v5515_v2 = vld [vmem:[%s6957_s7 + $0xa0] ss:$8 sps:$4 sm:$0xff]  }
 0x1b4   : > { %4313 = vmatprep.subr.bf16.mxu0 %v5465_v31  ;;  %v5519_v3 = vld [vmem:[%s6957_s7 + $0x94] ss:$8 sps:$4 sm:$0xff]   ;;  %v5518_v4 = vld [vmem:[%s6957_s7 + $0x1a0] ss:$8 sps:$4 sm:$0xff]   ;;  %v5521_v6 = vld [vmem:[%s6957_s7 + $0x90] ss:$8 sps:$4 sm:$0xff]  }
 0x1b5   : > { %4353 = vmatpush1.bf16.msra.mxu1 %v5464_v32  ;;  %v5522_v5 = vld [vmem:[%s6957_s7 + $0x194] ss:$8 sps:$4 sm:$0xff]   ;;  %v5525_v7 = vld [vmem:[%s6957_s7 + $0x84] ss:$8 sps:$4 sm:$0xff]   ;;  %v5524_v10 = vld [vmem:[%s6957_s7 + $0x190] ss:$8 sps:$4 sm:$0xff]  }
 0x1b6   : > { %4354 = vmatprep.subr.bf16.mxu1 %v5468_v33  ;;  %v5528_v11 = vld [vmem:[%s6957_s7 + $0x184] ss:$8 sps:$4 sm:$0xff]   ;;  %v5527_v12 = vld [vmem:[%s6957_s7 + $0x80] ss:$8 sps:$4 sm:$0xff]   ;;  %v7025_v13 = vld [vmem:[%s7486_s0 + $0x10] sm:$0xff] }
 0x1b7   : > { %4314 = vmatpush1.bf16.msra.mxu0 %v5467_v34  ;;  %v5535_v14 = vld [vmem:[%s6957_s7 + $0x274] ss:$8 sps:$4 sm:$0xff]   ;;  %v5532_v15 = vld [vmem:[%s6957_s7 + $0x180] ss:$8 sps:$4 sm:$0xff]   ;;  %v5533_v18 = vld [vmem:[%s6957_s7 + $0x270] ss:$8 sps:$4 sm:$0xff]   ;;  %v4974_v19 = vcombine.high %v7025_v13, %v7025_v13 }
 0x1b8   : > { %4315 = vmatprep.subr.bf16.mxu0 %v5471_v35  ;;  %v5540_v17 = vld [vmem:[%s6957_s7 + $0x374] ss:$8 sps:$4 sm:$0xff]   ;;  %v5543_v21 = vld [vmem:[%s6957_s7 + $0x264] ss:$8 sps:$4 sm:$0xff]   ;;  %v5538_v22 = vld [vmem:[%s6957_s7 + $0x370] ss:$8 sps:$4 sm:$0xff]  }
 0x1b9   : > { %4355 = vmatpush1.bf16.msra.mxu1 %v5470_v36  ;;  %v5546_v8 = vld [vmem:[%s6957_s7 + $0x364] ss:$8 sps:$4 sm:$0xff]   ;;  %v5541_v23 = vld [vmem:[%s6957_s7 + $0x260] ss:$8 sps:$4 sm:$0xff]   ;;  %v5549_v24 = vld [vmem:[%s6957_s7 + $0x254] ss:$8 sps:$4 sm:$0xff]  }
 0x1ba   : > { %4356 = vmatprep.subr.bf16.mxu1 %v5474_v37  ;;  %v5544_v9 = vld [vmem:[%s6957_s7 + $0x360] ss:$8 sps:$4 sm:$0xff]   ;;  %v5552_v25 = vld [vmem:[%s6957_s7 + $0x354] ss:$8 sps:$4 sm:$0xff]   ;;  %v5547_v26 = vld [vmem:[%s6957_s7 + $0x250] ss:$8 sps:$4 sm:$0xff]  }
 0x1bb   : > { %4316 = vmatpush1.bf16.msra.mxu0 %v5473_v38  ;;  %v5555_v27 = vld [vmem:[%s6957_s7 + $0x244] ss:$8 sps:$4 sm:$0xff]   ;;  %v5550_v28 = vld [vmem:[%s6957_s7 + $0x350] ss:$8 sps:$4 sm:$0xff]   ;;  %v5553_v30 = vld [vmem:[%s6957_s7 + $0x240] ss:$8 sps:$4 sm:$0xff]  }
 0x1bc   : > { %4317 = vmatprep.subr.bf16.mxu0 %v5477_v39  ;;  %v5558_v29 = vld [vmem:[%s6957_s7 + $0x344] ss:$8 sps:$4 sm:$0xff]   ;;  %v5561_v31 = vld [vmem:[%s6957_s7 + $0x234] ss:$8 sps:$4 sm:$0xff]   ;;  %v5556_v32 = vld [vmem:[%s6957_s7 + $0x340] ss:$8 sps:$4 sm:$0xff]  }
 0x1bd   : > { %4357 = vmatpush1.bf16.msra.mxu1 %v5476_v40  ;;  %v5564_v33 = vld [vmem:[%s6957_s7 + $0x334] ss:$8 sps:$4 sm:$0xff]   ;;  %v5559_v34 = vld [vmem:[%s6957_s7 + $0x230] ss:$8 sps:$4 sm:$0xff]   ;;  %v5567_v35 = vld [vmem:[%s6957_s7 + $0x224] ss:$8 sps:$4 sm:$0xff]  }
 0x1be   : > { %4358 = vmatprep.subr.bf16.mxu1 %v5480_v41  ;;  %v5562_v36 = vld [vmem:[%s6957_s7 + $0x330] ss:$8 sps:$4 sm:$0xff]   ;;  %v5570_v37 = vld [vmem:[%s6957_s7 + $0x324] ss:$8 sps:$4 sm:$0xff]   ;;  %v5565_v38 = vld [vmem:[%s6957_s7 + $0x220] ss:$8 sps:$4 sm:$0xff]  }
 0x1bf   : > { %4318 = vmatpush1.bf16.msra.mxu0 %v5479_v42  ;;  %v5573_v39 = vld [vmem:[%s6957_s7 + $0x214] ss:$8 sps:$4 sm:$0xff]   ;;  %v5568_v40 = vld [vmem:[%s6957_s7 + $0x320] ss:$8 sps:$4 sm:$0xff]  }
 0x1c0   : > { %4319 = vmatprep.subr.bf16.mxu0 %v5483_v43  ;;  %v5576_v41 = vld [vmem:[%s6957_s7 + $0x314] ss:$8 sps:$4 sm:$0xff]   ;;  %v5571_v43 = vld [vmem:[%s6957_s7 + $0x210] ss:$8 sps:$4 sm:$0xff]  }
 0x1c1   : > { %4359 = vmatpush1.bf16.msra.mxu1 %v5482_v44  ;;  %v7063_v42 = vld [vmem:[%s7486_s0 + $0x18] sm:$0xff] }
 0x1c2   : > { %4360 = vmatprep.subr.bf16.mxu1 %v5486_v45  ;;  %v4976_v44 = vcombine.high %v7063_v42, %v7063_v42  ;;  %v5579_v45 = vld [vmem:[%s6957_s7 + $0x204] ss:$8 sps:$4 sm:$0xff]  }
 0x1c3   : > { %4320 = vmatpush2.bf16.msra.mxu0 %v5485_v46  ;;  %v5574_v46 = vld [vmem:[%s6957_s7 + $0x310] ss:$8 sps:$4 sm:$0xff]  }
 0x1c4   : > { %4321 = vmatprep.subr.bf16.mxu0 %v5489_v47  ;;  %v5582_v47 = vld [vmem:[%s6957_s7 + $0x304] ss:$8 sps:$4 sm:$0xff]  }
 0x1c5   : > { %4361 = vmatpush2.bf16.msra.mxu1 %v5488_v48  ;;  %v5577_v48 = vld [vmem:[%s6957_s7 + $0x200] ss:$8 sps:$4 sm:$0xff]  }
 0x1c6   : > { %4362 = vmatprep.subr.bf16.mxu1 %v5492_v49  ;;  %v5585_v49 = vld [vmem:[%s6957_s7 + $0x2f4] ss:$8 sps:$4 sm:$0xff]  }
 0x1c7   : > { %4322 = vmatpush2.bf16.msra.mxu0 %v5491_v50  ;;  %v5580_v50 = vld [vmem:[%s6957_s7 + $0x300] ss:$8 sps:$4 sm:$0xff]  }
 0x1c8   : > { %4323 = vmatprep.subr.bf16.mxu0 %v5495_v51  ;;  %v5588_v51 = vld [vmem:[%s6957_s7 + $0x3f4] ss:$8 sps:$4 sm:$0xff]  }
 0x1c9   : > { %4363 = vmatpush2.bf16.msra.mxu1 %v5494_v52  ;;  %v5583_v52 = vld [vmem:[%s6957_s7 + $0x2f0] ss:$8 sps:$4 sm:$0xff]  }
 0x1ca   : > { %4364 = vmatprep.subr.bf16.mxu1 %v5498_v53  ;;  %v5591_v53 = vld [vmem:[%s6957_s7 + $0x2e4] ss:$8 sps:$4 sm:$0xff]  }
 0x1cb   : > { %4324 = vmatpush2.bf16.msra.mxu0 %v5497_v54  ;;  %v5586_v54 = vld [vmem:[%s6957_s7 + $0x3f0] ss:$8 sps:$4 sm:$0xff]  }
 0x1cc   : > { %4325 = vmatprep.subr.bf16.mxu0 %v5501_v55  ;;  %v5594_v55 = vld [vmem:[%s6957_s7 + $0x3e4] ss:$8 sps:$4 sm:$0xff]  }
 0x1cd   : > { %4365 = vmatpush2.bf16.msra.mxu1 %v5500_v56  ;;  %v5589_v56 = vld [vmem:[%s6957_s7 + $0x2e0] ss:$8 sps:$4 sm:$0xff]  }
 0x1ce   : > { %4366 = vmatprep.subr.bf16.mxu1 %v5504_v57  ;;  %v5597_v57 = vld [vmem:[%s6957_s7 + $0x2d4] ss:$8 sps:$4 sm:$0xff]  }
 0x1cf   : > { %4326 = vmatpush2.bf16.msra.mxu0 %v5503_v58  ;;  %v5592_v58 = vld [vmem:[%s6957_s7 + $0x3e0] ss:$8 sps:$4 sm:$0xff]  }
 0x1d0   : > { %4327 = vmatprep.subr.bf16.mxu0 %v5507_v59  ;;  %v5600_v59 = vld [vmem:[%s6957_s7 + $0x3d4] ss:$8 sps:$4 sm:$0xff]  }
 0x1d1   : > { %4367 = vmatpush2.bf16.msra.mxu1 %v5506_v60  ;;  %v5595_v60 = vld [vmem:[%s6957_s7 + $0x2d0] ss:$8 sps:$4 sm:$0xff]  }
 0x1d2   : > { %4368 = vmatprep.subr.bf16.mxu1 %v5510_v61  ;;  %v5603_v61 = vld [vmem:[%s6957_s7 + $0x2c4] ss:$8 sps:$4 sm:$0xff]  }
 0x1d3   : > { %4328 = vmatpush2.bf16.msra.mxu0 %v5509_v62  ;;  %v5598_v62 = vld [vmem:[%s6957_s7 + $0x3d0] ss:$8 sps:$4 sm:$0xff]  }
 0x1d4   : > { %4329 = vmatprep.subr.bf16.mxu0 %v5513_v63  ;;  %v5606_v63 = vld [vmem:[%s6957_s7 + $0x3c4] ss:$8 sps:$4 sm:$0xff]  }
 0x1d5   : > { %4369 = vmatpush2.bf16.msra.mxu1 %v5512_v0  ;;  %v5601_v0 = vld [vmem:[%s6957_s7 + $0x2c0] ss:$8 sps:$4 sm:$0xff]  }
 0x1d6   : > { %4370 = vmatprep.subr.bf16.mxu1 %v5516_v1  ;;  %v5609_v1 = vld [vmem:[%s6957_s7 + $0x2b4] ss:$8 sps:$4 sm:$0xff]  }
 0x1d7   : > { %4330 = vmatpush2.bf16.msra.mxu0 %v5515_v2  ;;  %v5604_v2 = vld [vmem:[%s6957_s7 + $0x3c0] ss:$8 sps:$4 sm:$0xff]  }
 0x1d8   : > { %4331 = vmatprep.subr.bf16.mxu0 %v5519_v3  ;;  %v5612_v3 = vld [vmem:[%s6957_s7 + $0x3b4] ss:$8 sps:$4 sm:$0xff]  }
 0x1d9   : > { %4371 = vmatpush2.bf16.msra.mxu1 %v5518_v4  ;;  %v5607_v4 = vld [vmem:[%s6957_s7 + $0x2b0] ss:$8 sps:$4 sm:$0xff]  }
 0x1da   : > { %4372 = vmatprep.subr.bf16.mxu1 %v5522_v5  ;;  %v5615_v5 = vld [vmem:[%s6957_s7 + $0x2a4] ss:$8 sps:$4 sm:$0xff]  }
 0x1db   : > { %4332 = vmatpush2.bf16.msra.mxu0 %v5521_v6  ;;  %v5610_v6 = vld [vmem:[%s6957_s7 + $0x3b0] ss:$8 sps:$4 sm:$0xff]  }
 0x1dc   : > { %4333 = vmatprep.subr.bf16.mxu0 %v5525_v7  ;;  %v5618_v7 = vld [vmem:[%s6957_s7 + $0x3a4] ss:$8 sps:$4 sm:$0xff]  }
 0x1dd   : > { %4373 = vmatpush2.bf16.msra.mxu1 %v5524_v10  ;;  %v5613_v10 = vld [vmem:[%s6957_s7 + $0x2a0] ss:$8 sps:$4 sm:$0xff]  }
 0x1de   : > { %4374 = vmatprep.subr.bf16.mxu1 %v5528_v11  ;;  %v5621_v11 = vld [vmem:[%s6957_s7 + $0x294] ss:$8 sps:$4 sm:$0xff]  }
 0x1df   : > { %4334 = vmatpush2.bf16.msra.mxu0 %v5527_v12  ;;  %v5616_v12 = vld [vmem:[%s6957_s7 + $0x3a0] ss:$8 sps:$4 sm:$0xff]  }
 0x1e0   : > { %4385 = vmatprep.subr.bf16.mxu0 %v5535_v14  ;;  %v5624_v14 = vld [vmem:[%s6957_s7 + $0x394] ss:$8 sps:$4 sm:$0xff]  }
 0x1e1   : > { %4375 = vmatpush2.bf16.msra.mxu1 %v5532_v15  ;;  %v5619_v15 = vld [vmem:[%s6957_s7 + $0x290] ss:$8 sps:$4 sm:$0xff]  }
 0x1e2   : > { %4336 = vmatmul.mubr.bf16.vlgmr.msra.gmra.mxu0 %v4969_v16  ;;  %4426 = vmatprep.subr.bf16.mxu1 %v5540_v17  ;;  %v5627_v16 = vld [vmem:[%s6957_s7 + $0x284] ss:$8 sps:$4 sm:$0xff]   ;;  %v5622_v17 = vld [vmem:[%s6957_s7 + $0x390] ss:$8 sps:$4 sm:$0xff]  }
 0x1e3   : > { %4386 = vmatpush1.bf16.msra.mxu0 %v5533_v18  ;;  %4417 = vmatprep.mubr.bf16.mxu0 %v4974_v19  ;;  %v5630_v18 = vld [vmem:[%s6957_s7 + $0x384] ss:$8 sps:$4 sm:$0xff]   ;;  %v5625_v19 = vld [vmem:[%s6957_s7 + $0x280] ss:$8 sps:$4 sm:$0xff]  }
 0x1e4   : > { %4377 = vmatmul.mubr.bf16.vlgmr.msra.gmra.mxu1 %v4971_v20  ;;  %4387 = vmatprep.subr.bf16.mxu0 %v5543_v21  ;;  %v5635_v20 = vld [vmem:[%s6957_s7 + $0x474] ss:$8 sps:$4 sm:$0xff]   ;;  %v5628_v21 = vld [vmem:[%s6957_s7 + $0x380] ss:$8 sps:$4 sm:$0xff]  }
 0x1e5   : > { %4427 = vmatpush1.bf16.msra.mxu1 %v5538_v22  ;;  %4458 = vmatprep.mubr.bf16.mxu1 %v4976_v44  ;;  %v4973_v22 = vcombine.low %v7025_v13, %v7025_v13  ;;  %v5662_v44 = vld [vmem:[%s6957_s7 + $0x530] ss:$8 sps:$4 sm:$0xff]  }
 0x1e6   : > { %4428 = vmatprep.subr.bf16.mxu1 %v5546_v8  ;;  %v5640_v8 = vld [vmem:[%s6957_s7 + $0x574] ss:$8 sps:$4 sm:$0xff]  }
 0x1e7   : > { %4388 = vmatpush1.bf16.msra.mxu0 %v5541_v23  ;;  %v5633_v23 = vld [vmem:[%s6957_s7 + $0x470] ss:$8 sps:$4 sm:$0xff]  }
 0x1e8   : > { %4389 = vmatprep.subr.bf16.mxu0 %v5549_v24  ;;  %v4975_v24 = vcombine.low %v7063_v42, %v7063_v42  ;;  %v5659_v42 = vld [vmem:[%s6957_s7 + $0x430] ss:$8 sps:$4 sm:$0xff]  }
 0x1e9   : > { %4429 = vmatpush1.bf16.msra.mxu1 %v5544_v9  ;;  %v5643_v9 = vld [vmem:[%s6957_s7 + $0x464] ss:$8 sps:$4 sm:$0xff]  }
 0x1ea   : > { %4430 = vmatprep.subr.bf16.mxu1 %v5552_v25  ;;  %v7116_v25 = vld [vmem:[%s7486_s0 + $0x20] sm:$0xff] }
 0x1eb   : > { %4390 = vmatpush1.bf16.msra.mxu0 %v5547_v26  ;;  %v5638_v26 = vld [vmem:[%s6957_s7 + $0x570] ss:$8 sps:$4 sm:$0xff]   ;;  %v4978_v13 = vcombine.high %v7116_v25, %v7116_v25 }
 0x1ec   : > { %4391 = vmatprep.subr.bf16.mxu0 %v5555_v27  ;;  %v5646_v27 = vld [vmem:[%s6957_s7 + $0x564] ss:$8 sps:$4 sm:$0xff]  }
 0x1ed   : > { %4431 = vmatpush1.bf16.msra.mxu1 %v5550_v28  ;;  %v7125_v28 = vld [vmem:[%s7486_s0 + $0x28] sm:$0xff] }
 0x1ee   : > { %4432 = vmatprep.subr.bf16.mxu1 %v5558_v29  ;;  %v5641_v29 = vld [vmem:[%s6957_s7 + $0x460] ss:$8 sps:$4 sm:$0xff]  }
 0x1ef   : > { %4392 = vmatpush1.bf16.msra.mxu0 %v5553_v30  ;;  %v4980_v30 = vcombine.high %v7125_v28, %v7125_v28 }
 0x1f0   : > { %4393 = vmatprep.subr.bf16.mxu0 %v5561_v31  ;;  %v5649_v31 = vld [vmem:[%s6957_s7 + $0x454] ss:$8 sps:$4 sm:$0xff]  }
 0x1f1   : > { %4433 = vmatpush1.bf16.msra.mxu1 %v5556_v32  ;;  %v5644_v32 = vld [vmem:[%s6957_s7 + $0x560] ss:$8 sps:$4 sm:$0xff]  }
 0x1f2   : > { %4434 = vmatprep.subr.bf16.mxu1 %v5564_v33  ;;  %v5652_v33 = vld [vmem:[%s6957_s7 + $0x554] ss:$8 sps:$4 sm:$0xff]  }
 0x1f3   : > { %4394 = vmatpush1.bf16.msra.mxu0 %v5559_v34  ;;  %v5647_v34 = vld [vmem:[%s6957_s7 + $0x450] ss:$8 sps:$4 sm:$0xff]  }
 0x1f4   : > { %4395 = vmatprep.subr.bf16.mxu0 %v5567_v35  ;;  %v5655_v35 = vld [vmem:[%s6957_s7 + $0x444] ss:$8 sps:$4 sm:$0xff]  }
 0x1f5   : > { %4435 = vmatpush1.bf16.msra.mxu1 %v5562_v36  ;;  %v5650_v36 = vld [vmem:[%s6957_s7 + $0x550] ss:$8 sps:$4 sm:$0xff]  }
 0x1f6   : > { %4436 = vmatprep.subr.bf16.mxu1 %v5570_v37  ;;  %v5658_v37 = vld [vmem:[%s6957_s7 + $0x544] ss:$8 sps:$4 sm:$0xff]  }
 0x1f7   : > { %4396 = vmatpush1.bf16.msra.mxu0 %v5565_v38  ;;  %v5653_v38 = vld [vmem:[%s6957_s7 + $0x440] ss:$8 sps:$4 sm:$0xff]  }
 0x1f8   : > { %4397 = vmatprep.subr.bf16.mxu0 %v5573_v39  ;;  %v5661_v39 = vld [vmem:[%s6957_s7 + $0x434] ss:$8 sps:$4 sm:$0xff]  }
 0x1f9   : > { %4437 = vmatpush1.bf16.msra.mxu1 %v5568_v40  ;;  %v5656_v40 = vld [vmem:[%s6957_s7 + $0x540] ss:$8 sps:$4 sm:$0xff]  }
 0x1fa   : > { %4438 = vmatprep.subr.bf16.mxu1 %v5576_v41  ;;  %v5664_v41 = vld [vmem:[%s6957_s7 + $0x534] ss:$8 sps:$4 sm:$0xff]  }
 0x1fb   : > { %4398 = vmatpush1.bf16.msra.mxu0 %v5571_v43  ;;  %v5667_v43 = vld [vmem:[%s6957_s7 + $0x424] ss:$8 sps:$4 sm:$0xff]  }
 0x1fc   : > { %4399 = vmatprep.subr.bf16.mxu0 %v5579_v45  ;;  %v5670_v45 = vld [vmem:[%s6957_s7 + $0x524] ss:$8 sps:$4 sm:$0xff]  }
 0x1fd   : > { %4439 = vmatpush1.bf16.msra.mxu1 %v5574_v46  ;;  %v5665_v46 = vld [vmem:[%s6957_s7 + $0x420] ss:$8 sps:$4 sm:$0xff]  }
 0x1fe   : > { %4440 = vmatprep.subr.bf16.mxu1 %v5582_v47  ;;  %v5673_v47 = vld [vmem:[%s6957_s7 + $0x414] ss:$8 sps:$4 sm:$0xff]  }
 0x1ff   : > { %4400 = vmatpush1.bf16.msra.mxu0 %v5577_v48  ;;  %v5668_v48 = vld [vmem:[%s6957_s7 + $0x520] ss:$8 sps:$4 sm:$0xff]  }
 0x200   : > { %4401 = vmatprep.subr.bf16.mxu0 %v5585_v49  ;;  %v5676_v49 = vld [vmem:[%s6957_s7 + $0x514] ss:$8 sps:$4 sm:$0xff]  }
 0x201   : > { %4441 = vmatpush1.bf16.msra.mxu1 %v5580_v50  ;;  %v5671_v50 = vld [vmem:[%s6957_s7 + $0x410] ss:$8 sps:$4 sm:$0xff]  }
 0x202   : > { %4442 = vmatprep.subr.bf16.mxu1 %v5588_v51  ;;  %v5679_v51 = vld [vmem:[%s6957_s7 + $0x404] ss:$8 sps:$4 sm:$0xff]  }
 0x203   : > { %4402 = vmatpush2.bf16.msra.mxu0 %v5583_v52  ;;  %v5674_v52 = vld [vmem:[%s6957_s7 + $0x510] ss:$8 sps:$4 sm:$0xff]  }
 0x204   : > { %4403 = vmatprep.subr.bf16.mxu0 %v5591_v53  ;;  %v5682_v53 = vld [vmem:[%s6957_s7 + $0x504] ss:$8 sps:$4 sm:$0xff]  }
 0x205   : > { %4443 = vmatpush2.bf16.msra.mxu1 %v5586_v54  ;;  %v5677_v54 = vld [vmem:[%s6957_s7 + $0x400] ss:$8 sps:$4 sm:$0xff]  }
 0x206   : > { %4444 = vmatprep.subr.bf16.mxu1 %v5594_v55  ;;  %v5685_v55 = vld [vmem:[%s6957_s7 + $0x4f4] ss:$8 sps:$4 sm:$0xff]  }
 0x207   : > { %4404 = vmatpush2.bf16.msra.mxu0 %v5589_v56  ;;  %v5680_v56 = vld [vmem:[%s6957_s7 + $0x500] ss:$8 sps:$4 sm:$0xff]  }
 0x208   : > { %4405 = vmatprep.subr.bf16.mxu0 %v5597_v57  ;;  %v5688_v57 = vld [vmem:[%s6957_s7 + $0x5f4] ss:$8 sps:$4 sm:$0xff]  }
 0x209   : > { %4445 = vmatpush2.bf16.msra.mxu1 %v5592_v58  ;;  %v5683_v58 = vld [vmem:[%s6957_s7 + $0x4f0] ss:$8 sps:$4 sm:$0xff]  }
 0x20a   : > { %4446 = vmatprep.subr.bf16.mxu1 %v5600_v59  ;;  %v5691_v59 = vld [vmem:[%s6957_s7 + $0x4e4] ss:$8 sps:$4 sm:$0xff]  }
 0x20b   : > { %4406 = vmatpush2.bf16.msra.mxu0 %v5595_v60  ;;  %v5686_v60 = vld [vmem:[%s6957_s7 + $0x5f0] ss:$8 sps:$4 sm:$0xff]  }
 0x20c   : > { %4407 = vmatprep.subr.bf16.mxu0 %v5603_v61  ;;  %v5694_v61 = vld [vmem:[%s6957_s7 + $0x5e4] ss:$8 sps:$4 sm:$0xff]  }
 0x20d   : > { %4447 = vmatpush2.bf16.msra.mxu1 %v5598_v62  ;;  %v5689_v62 = vld [vmem:[%s6957_s7 + $0x4e0] ss:$8 sps:$4 sm:$0xff]  }
 0x20e   : > { %4448 = vmatprep.subr.bf16.mxu1 %v5606_v63  ;;  %v5697_v63 = vld [vmem:[%s6957_s7 + $0x4d4] ss:$8 sps:$4 sm:$0xff]  }
 0x20f   : > { %4408 = vmatpush2.bf16.msra.mxu0 %v5601_v0  ;;  %v5692_v0 = vld [vmem:[%s6957_s7 + $0x5e0] ss:$8 sps:$4 sm:$0xff]  }
 0x210   : > { %4409 = vmatprep.subr.bf16.mxu0 %v5609_v1  ;;  %v5700_v1 = vld [vmem:[%s6957_s7 + $0x5d4] ss:$8 sps:$4 sm:$0xff]  }
 0x211   : > { %4449 = vmatpush2.bf16.msra.mxu1 %v5604_v2  ;;  %v5695_v2 = vld [vmem:[%s6957_s7 + $0x4d0] ss:$8 sps:$4 sm:$0xff]  }
 0x212   : > { %4450 = vmatprep.subr.bf16.mxu1 %v5612_v3  ;;  %v5703_v3 = vld [vmem:[%s6957_s7 + $0x4c4] ss:$8 sps:$4 sm:$0xff]  }
 0x213   : > { %4410 = vmatpush2.bf16.msra.mxu0 %v5607_v4  ;;  %v5698_v4 = vld [vmem:[%s6957_s7 + $0x5d0] ss:$8 sps:$4 sm:$0xff]  }
 0x214   : > { %4411 = vmatprep.subr.bf16.mxu0 %v5615_v5  ;;  %v5706_v5 = vld [vmem:[%s6957_s7 + $0x5c4] ss:$8 sps:$4 sm:$0xff]  }
 0x215   : > { %4451 = vmatpush2.bf16.msra.mxu1 %v5610_v6  ;;  %v5701_v6 = vld [vmem:[%s6957_s7 + $0x4c0] ss:$8 sps:$4 sm:$0xff]  }
 0x216   : > { %4452 = vmatprep.subr.bf16.mxu1 %v5618_v7  ;;  %v5709_v7 = vld [vmem:[%s6957_s7 + $0x4b4] ss:$8 sps:$4 sm:$0xff]  }
 0x217   : > { %4412 = vmatpush2.bf16.msra.mxu0 %v5613_v10  ;;  %v5704_v10 = vld [vmem:[%s6957_s7 + $0x5c0] ss:$8 sps:$4 sm:$0xff]  }
 0x218   : > { %4413 = vmatprep.subr.bf16.mxu0 %v5621_v11  ;;  %v5712_v11 = vld [vmem:[%s6957_s7 + $0x5b4] ss:$8 sps:$4 sm:$0xff]  }
 0x219   : > { %4453 = vmatpush2.bf16.msra.mxu1 %v5616_v12  ;;  %v5707_v12 = vld [vmem:[%s6957_s7 + $0x4b0] ss:$8 sps:$4 sm:$0xff]  }
 0x21a   : > { %4454 = vmatprep.subr.bf16.mxu1 %v5624_v14  ;;  %v5715_v14 = vld [vmem:[%s6957_s7 + $0x4a4] ss:$8 sps:$4 sm:$0xff]  }
 0x21b   : > { %4414 = vmatpush2.bf16.msra.mxu0 %v5619_v15  ;;  %v5710_v15 = vld [vmem:[%s6957_s7 + $0x5b0] ss:$8 sps:$4 sm:$0xff]  }
 0x21c   : > { %4415 = vmatprep.subr.bf16.mxu0 %v5627_v16  ;;  %v5718_v16 = vld [vmem:[%s6957_s7 + $0x5a4] ss:$8 sps:$4 sm:$0xff]  }
 0x21d   : > { %4455 = vmatpush2.bf16.msra.mxu1 %v5622_v17  ;;  %v5713_v17 = vld [vmem:[%s6957_s7 + $0x4a0] ss:$8 sps:$4 sm:$0xff]  }
 0x21e   : > { %4456 = vmatprep.subr.bf16.mxu1 %v5630_v18  ;;  %v5721_v18 = vld [vmem:[%s6957_s7 + $0x494] ss:$8 sps:$4 sm:$0xff]  }
 0x21f   : > { %4416 = vmatpush2.bf16.msra.mxu0 %v5625_v19  ;;  %v5716_v19 = vld [vmem:[%s6957_s7 + $0x5a0] ss:$8 sps:$4 sm:$0xff]  }
 0x220   : > { %4467 = vmatprep.subr.bf16.mxu0 %v5635_v20  ;;  %v5724_v20 = vld [vmem:[%s6957_s7 + $0x594] ss:$8 sps:$4 sm:$0xff]  }
 0x221   : > { %4457 = vmatpush2.bf16.msra.mxu1 %v5628_v21  ;;  %v5719_v21 = vld [vmem:[%s6957_s7 + $0x490] ss:$8 sps:$4 sm:$0xff]  }
 0x222   : > { %4418 = vmatmul.mubr.bf16.vlgmr.msra.gmra.mxu0 %v4973_v22  ;;  %4508 = vmatprep.subr.bf16.mxu1 %v5640_v8  ;;  %v5727_v22 = vld [vmem:[%s6957_s7 + $0x484] ss:$8 sps:$4 sm:$0xff]   ;;  %v5722_v8 = vld [vmem:[%s6957_s7 + $0x590] ss:$8 sps:$4 sm:$0xff]  }
 0x223   : > { %4468 = vmatpush1.bf16.msra.mxu0 %v5633_v23  ;;  %4499 = vmatprep.mubr.bf16.mxu0 %v4978_v13  ;;  %v5730_v23 = vld [vmem:[%s6957_s7 + $0x584] ss:$8 sps:$4 sm:$0xff]   ;;  %v5740_v13 = vld [vmem:[%s6957_s7 + $0x774] ss:$8 sps:$4 sm:$0xff]  }
 0x224   : > { %4459 = vmatmul.mubr.bf16.vlgmr.msra.gmra.mxu1 %v4975_v24  ;;  %4469 = vmatprep.subr.bf16.mxu0 %v5643_v9  ;;  %v5725_v24 = vld [vmem:[%s6957_s7 + $0x480] ss:$8 sps:$4 sm:$0xff]   ;;  %v5735_v9 = vld [vmem:[%s6957_s7 + $0x674] ss:$8 sps:$4 sm:$0xff]  }
 0x225   : > { %4509 = vmatpush1.bf16.msra.mxu1 %v5638_v26  ;;  %4540 = vmatprep.mubr.bf16.mxu1 %v4980_v30  ;;  %v7190_v26 = vld [vmem:[%s7486_s0 + $0x30] sm:$0xff]  ;;  %v7199_v30 = vld [vmem:[%s7486_s0 + $0x38] sm:$0xff] }
 0x226   : > { %4510 = vmatprep.subr.bf16.mxu1 %v5646_v27  ;;  %v5728_v27 = vld [vmem:[%s6957_s7 + $0x580] ss:$8 sps:$4 sm:$0xff]  }
 0x227   : > { %4470 = vmatpush1.bf16.msra.mxu0 %v5641_v29  ;;  %v4977_v29 = vcombine.low %v7116_v25, %v7116_v25  ;;  %v5738_v25 = vld [vmem:[%s6957_s7 + $0x770] ss:$8 sps:$4 sm:$0xff]  }
 0x228   : > { %4471 = vmatprep.subr.bf16.mxu0 %v5649_v31  ;;  %v5733_v31 = vld [vmem:[%s6957_s7 + $0x670] ss:$8 sps:$4 sm:$0xff]  }
 0x229   : > { %4511 = vmatpush1.bf16.msra.mxu1 %v5644_v32  ;;  %v4982_v32 = vcombine.high %v7190_v26, %v7190_v26 }
 0x22a   : > { %4512 = vmatprep.subr.bf16.mxu1 %v5652_v33  ;;  %v4979_v33 = vcombine.low %v7125_v28, %v7125_v28  ;;  %v5749_v28 = vld [vmem:[%s6957_s7 + $0x654] ss:$8 sps:$4 sm:$0xff]  }
 0x22b   : > { %4472 = vmatpush1.bf16.msra.mxu0 %v5647_v34  ;;  %v5743_v34 = vld [vmem:[%s6957_s7 + $0x664] ss:$8 sps:$4 sm:$0xff]  }
 0x22c   : > { %4473 = vmatprep.subr.bf16.mxu0 %v5655_v35  ;;  %v4984_v35 = vcombine.high %v7199_v30, %v7199_v30 }
 0x22d   : > { %4513 = vmatpush1.bf16.msra.mxu1 %v5650_v36  ;;  %v5746_v36 = vld [vmem:[%s6957_s7 + $0x764] ss:$8 sps:$4 sm:$0xff]  }
 0x22e   : > { %4514 = vmatprep.subr.bf16.mxu1 %v5658_v37  ;;  %v5741_v37 = vld [vmem:[%s6957_s7 + $0x660] ss:$8 sps:$4 sm:$0xff]  }
 0x22f   : > { %4474 = vmatpush1.bf16.msra.mxu0 %v5653_v38  ;;  %v5744_v38 = vld [vmem:[%s6957_s7 + $0x760] ss:$8 sps:$4 sm:$0xff]  }
 0x230   : > { %4475 = vmatprep.subr.bf16.mxu0 %v5661_v39  ;;  %v5752_v39 = vld [vmem:[%s6957_s7 + $0x754] ss:$8 sps:$4 sm:$0xff]  }
 0x231   : > { %4515 = vmatpush1.bf16.msra.mxu1 %v5656_v40  ;;  %v5747_v40 = vld [vmem:[%s6957_s7 + $0x650] ss:$8 sps:$4 sm:$0xff]  }
 0x232   : > { %4516 = vmatprep.subr.bf16.mxu1 %v5664_v41  ;;  %v5755_v41 = vld [vmem:[%s6957_s7 + $0x644] ss:$8 sps:$4 sm:$0xff]  }
 0x233   : > { %4476 = vmatpush1.bf16.msra.mxu0 %v5659_v42  ;;  %v5750_v42 = vld [vmem:[%s6957_s7 + $0x750] ss:$8 sps:$4 sm:$0xff]  }
 0x234   : > { %4477 = vmatprep.subr.bf16.mxu0 %v5667_v43  ;;  %v5758_v43 = vld [vmem:[%s6957_s7 + $0x744] ss:$8 sps:$4 sm:$0xff]  }
 0x235   : > { %4517 = vmatpush1.bf16.msra.mxu1 %v5662_v44  ;;  %v5753_v44 = vld [vmem:[%s6957_s7 + $0x640] ss:$8 sps:$4 sm:$0xff]  }
 0x236   : > { %4518 = vmatprep.subr.bf16.mxu1 %v5670_v45  ;;  %v5761_v45 = vld [vmem:[%s6957_s7 + $0x634] ss:$8 sps:$4 sm:$0xff]  }
 0x237   : > { %4478 = vmatpush1.bf16.msra.mxu0 %v5665_v46  ;;  %v5756_v46 = vld [vmem:[%s6957_s7 + $0x740] ss:$8 sps:$4 sm:$0xff]  }
 0x238   : > { %4479 = vmatprep.subr.bf16.mxu0 %v5673_v47  ;;  %v5764_v47 = vld [vmem:[%s6957_s7 + $0x734] ss:$8 sps:$4 sm:$0xff]  }
 0x239   : > { %4519 = vmatpush1.bf16.msra.mxu1 %v5668_v48  ;;  %v5759_v48 = vld [vmem:[%s6957_s7 + $0x630] ss:$8 sps:$4 sm:$0xff]  }
 0x23a   : > { %4520 = vmatprep.subr.bf16.mxu1 %v5676_v49  ;;  %v5767_v49 = vld [vmem:[%s6957_s7 + $0x624] ss:$8 sps:$4 sm:$0xff]  }
 0x23b   : > { %4480 = vmatpush1.bf16.msra.mxu0 %v5671_v50  ;;  %v5762_v50 = vld [vmem:[%s6957_s7 + $0x730] ss:$8 sps:$4 sm:$0xff]  }
 0x23c   : > { %4481 = vmatprep.subr.bf16.mxu0 %v5679_v51  ;;  %v5770_v51 = vld [vmem:[%s6957_s7 + $0x724] ss:$8 sps:$4 sm:$0xff]  }
 0x23d   : > { %4521 = vmatpush1.bf16.msra.mxu1 %v5674_v52  ;;  %v5765_v52 = vld [vmem:[%s6957_s7 + $0x620] ss:$8 sps:$4 sm:$0xff]  }
 0x23e   : > { %4522 = vmatprep.subr.bf16.mxu1 %v5682_v53  ;;  %v5773_v53 = vld [vmem:[%s6957_s7 + $0x614] ss:$8 sps:$4 sm:$0xff]  }
 0x23f   : > { %4482 = vmatpush1.bf16.msra.mxu0 %v5677_v54  ;;  %v5768_v54 = vld [vmem:[%s6957_s7 + $0x720] ss:$8 sps:$4 sm:$0xff]  }
 0x240   : > { %4483 = vmatprep.subr.bf16.mxu0 %v5685_v55  ;;  %v5776_v55 = vld [vmem:[%s6957_s7 + $0x714] ss:$8 sps:$4 sm:$0xff]  }
 0x241   : > { %4523 = vmatpush1.bf16.msra.mxu1 %v5680_v56  ;;  %v5771_v56 = vld [vmem:[%s6957_s7 + $0x610] ss:$8 sps:$4 sm:$0xff]  }
 0x242   : > { %4524 = vmatprep.subr.bf16.mxu1 %v5688_v57  ;;  %v5779_v57 = vld [vmem:[%s6957_s7 + $0x604] ss:$8 sps:$4 sm:$0xff]  }
 0x243   : > { %4484 = vmatpush2.bf16.msra.mxu0 %v5683_v58  ;;  %v5774_v58 = vld [vmem:[%s6957_s7 + $0x710] ss:$8 sps:$4 sm:$0xff]  }
 0x244   : > { %4485 = vmatprep.subr.bf16.mxu0 %v5691_v59  ;;  %v5782_v59 = vld [vmem:[%s6957_s7 + $0x704] ss:$8 sps:$4 sm:$0xff]  }
 0x245   : > { %4525 = vmatpush2.bf16.msra.mxu1 %v5686_v60  ;;  %v5777_v60 = vld [vmem:[%s6957_s7 + $0x600] ss:$8 sps:$4 sm:$0xff]  }
 0x246   : > { %4526 = vmatprep.subr.bf16.mxu1 %v5694_v61  ;;  %v5785_v61 = vld [vmem:[%s6957_s7 + $0x6f4] ss:$8 sps:$4 sm:$0xff]  }
 0x247   : > { %4486 = vmatpush2.bf16.msra.mxu0 %v5689_v62  ;;  %v5780_v62 = vld [vmem:[%s6957_s7 + $0x700] ss:$8 sps:$4 sm:$0xff]  }
 0x248   : > { %4487 = vmatprep.subr.bf16.mxu0 %v5697_v63  ;;  %v5788_v63 = vld [vmem:[%s6957_s7 + $0x7f4] ss:$8 sps:$4 sm:$0xff]  }
 0x249   : > { %4527 = vmatpush2.bf16.msra.mxu1 %v5692_v0  ;;  %v5783_v0 = vld [vmem:[%s6957_s7 + $0x6f0] ss:$8 sps:$4 sm:$0xff]  }
 0x24a   : > { %4528 = vmatprep.subr.bf16.mxu1 %v5700_v1  ;;  %v5791_v1 = vld [vmem:[%s6957_s7 + $0x6e4] ss:$8 sps:$4 sm:$0xff]  }
 0x24b   : > { %4488 = vmatpush2.bf16.msra.mxu0 %v5695_v2  ;;  %v5786_v2 = vld [vmem:[%s6957_s7 + $0x7f0] ss:$8 sps:$4 sm:$0xff]  }
 0x24c   : > { %4489 = vmatprep.subr.bf16.mxu0 %v5703_v3  ;;  %v5794_v3 = vld [vmem:[%s6957_s7 + $0x7e4] ss:$8 sps:$4 sm:$0xff]  }
 0x24d   : > { %4529 = vmatpush2.bf16.msra.mxu1 %v5698_v4  ;;  %v5789_v4 = vld [vmem:[%s6957_s7 + $0x6e0] ss:$8 sps:$4 sm:$0xff]  }
 0x24e   : > { %4530 = vmatprep.subr.bf16.mxu1 %v5706_v5  ;;  %v5797_v5 = vld [vmem:[%s6957_s7 + $0x6d4] ss:$8 sps:$4 sm:$0xff]  }
 0x24f   : > { %4490 = vmatpush2.bf16.msra.mxu0 %v5701_v6  ;;  %v5792_v6 = vld [vmem:[%s6957_s7 + $0x7e0] ss:$8 sps:$4 sm:$0xff]  }
 0x250   : > { %4491 = vmatprep.subr.bf16.mxu0 %v5709_v7  ;;  %v5800_v7 = vld [vmem:[%s6957_s7 + $0x7d4] ss:$8 sps:$4 sm:$0xff]  }
 0x251   : > { %4531 = vmatpush2.bf16.msra.mxu1 %v5704_v10  ;;  %v5795_v10 = vld [vmem:[%s6957_s7 + $0x6d0] ss:$8 sps:$4 sm:$0xff]  }
 0x252   : > { %4532 = vmatprep.subr.bf16.mxu1 %v5712_v11  ;;  %v5803_v11 = vld [vmem:[%s6957_s7 + $0x6c4] ss:$8 sps:$4 sm:$0xff]  }
 0x253   : > { %4492 = vmatpush2.bf16.msra.mxu0 %v5707_v12  ;;  %v5798_v12 = vld [vmem:[%s6957_s7 + $0x7d0] ss:$8 sps:$4 sm:$0xff]  }
 0x254   : > { %4493 = vmatprep.subr.bf16.mxu0 %v5715_v14  ;;  %v5806_v14 = vld [vmem:[%s6957_s7 + $0x7c4] ss:$8 sps:$4 sm:$0xff]  }
 0x255   : > { %4533 = vmatpush2.bf16.msra.mxu1 %v5710_v15  ;;  %v5801_v15 = vld [vmem:[%s6957_s7 + $0x6c0] ss:$8 sps:$4 sm:$0xff]  }
 0x256   : > { %4534 = vmatprep.subr.bf16.mxu1 %v5718_v16  ;;  %v5809_v16 = vld [vmem:[%s6957_s7 + $0x6b4] ss:$8 sps:$4 sm:$0xff]  }
 0x257   : > { %4494 = vmatpush2.bf16.msra.mxu0 %v5713_v17  ;;  %v5804_v17 = vld [vmem:[%s6957_s7 + $0x7c0] ss:$8 sps:$4 sm:$0xff]  }
 0x258   : > { %4495 = vmatprep.subr.bf16.mxu0 %v5721_v18  ;;  %v5812_v18 = vld [vmem:[%s6957_s7 + $0x7b4] ss:$8 sps:$4 sm:$0xff]  }
 0x259   : > { %4535 = vmatpush2.bf16.msra.mxu1 %v5716_v19  ;;  %v5807_v19 = vld [vmem:[%s6957_s7 + $0x6b0] ss:$8 sps:$4 sm:$0xff]  }
 0x25a   : > { %4536 = vmatprep.subr.bf16.mxu1 %v5724_v20  ;;  %v5815_v20 = vld [vmem:[%s6957_s7 + $0x6a4] ss:$8 sps:$4 sm:$0xff]  }
 0x25b   : > { %4496 = vmatpush2.bf16.msra.mxu0 %v5719_v21  ;;  %v5810_v21 = vld [vmem:[%s6957_s7 + $0x7b0] ss:$8 sps:$4 sm:$0xff]  }
 0x25c   : > { %4497 = vmatprep.subr.bf16.mxu0 %v5727_v22  ;;  %v5818_v22 = vld [vmem:[%s6957_s7 + $0x7a4] ss:$8 sps:$4 sm:$0xff]  }
 0x25d   : > { %4537 = vmatpush2.bf16.msra.mxu1 %v5722_v8  ;;  %v5813_v8 = vld [vmem:[%s6957_s7 + $0x6a0] ss:$8 sps:$4 sm:$0xff]  }
 0x25e   : > { %4538 = vmatprep.subr.bf16.mxu1 %v5730_v23  ;;  %v2242_v23 = vlaneseq }
 0x25f   : > { %4498 = vmatpush2.bf16.msra.mxu0 %v5725_v24  ;;  %v5821_v24 = vld [vmem:[%s6957_s7 + $0x694] ss:$8 sps:$4 sm:$0xff]  }
 0x260   : > { %4549 = vmatprep.subr.bf16.mxu0 %v5735_v9  ;;  %v5816_v9 = vld [vmem:[%s6957_s7 + $0x7a0] ss:$8 sps:$4 sm:$0xff]  }
 0x261   : > { %4539 = vmatpush2.bf16.msra.mxu1 %v5728_v27  ;;  %v5824_v27 = vld [vmem:[%s6957_s7 + $0x794] ss:$8 sps:$4 sm:$0xff]  }
 0x262   : > { %4500 = vmatmul.mubr.bf16.vlgmr.msra.gmra.mxu0 %v4977_v29  ;;  %4590 = vmatprep.subr.bf16.mxu1 %v5740_v13  ;;  %v5819_v13 = vld [vmem:[%s6957_s7 + $0x690] ss:$8 sps:$4 sm:$0xff]   ;;  %v2243_v29 = vshrl.u32 %v2242_v23, 7  ;;  %v5877_v23 = vld [vmem:[%s6957_s7 + $0x800] ss:$8 sps:$4 sm:$0xff]  }
 0x263   : > { %4550 = vmatpush1.bf16.msra.mxu0 %v5733_v31  ;;  %4581 = vmatprep.mubr.bf16.mxu0 %v4982_v32  ;;  %v5827_v31 = vld [vmem:[%s6957_s7 + $0x684] ss:$8 sps:$4 sm:$0xff]   ;;  %v5822_v32 = vld [vmem:[%s6957_s7 + $0x790] ss:$8 sps:$4 sm:$0xff]  }
 0x264   : > { %4541 = vmatmul.mubr.bf16.vlgmr.msra.gmra.mxu1 %v4979_v33  ;;  %4551 = vmatprep.subr.bf16.mxu0 %v5743_v34  ;;  %v5825_v33 = vld [vmem:[%s6957_s7 + $0x680] ss:$8 sps:$4 sm:$0xff]   ;;  %v5830_v34 = vld [vmem:[%s6957_s7 + $0x784] ss:$8 sps:$4 sm:$0xff]  }
 0x265   : > { %4591 = vmatpush1.bf16.msra.mxu1 %v5738_v25  ;;  %4622 = vmatprep.mubr.bf16.mxu1 %v4984_v35  ;;  %v2240_v25 = vld [vmem:[%s1822_s28] sm:$0x3]  ;;  %v2244_v35 = vsub.s32 0, %v2243_v29 }
 0x266   : > { %4592 = vmatprep.subr.bf16.mxu1 %v5746_v36  ;;  %v5835_v36 = vld [vmem:[%s6957_s7 + $0x874] ss:$8 sps:$4 sm:$0xff]  }
 0x267   : > { %4552 = vmatpush1.bf16.msra.mxu0 %v5741_v37  ;;  %v7279_v37 = vld [vmem:[%s7486_s0 + $0x40] sm:$0xff] }
 0x268   : > { %4553 = vmatprep.subr.bf16.mxu0 %v5749_v28  ;;  %v5828_v28 = vld [vmem:[%s6957_s7 + $0x780] ss:$8 sps:$4 sm:$0xff]  }
 0x269   : > { %4593 = vmatpush1.bf16.msra.mxu1 %v5744_v38  ;;  %v2248_v38 = vsub.s32 1, %v2243_v29  ;;  %v5891_v29 = vld [vmem:[%s6957_s7 + $0x8e4] ss:$8 sps:$4 sm:$0xff]  }
 0x26a   : > { %4594 = vmatprep.subr.bf16.mxu1 %v5752_v39  ;;  %v4981_v39 = vcombine.low %v7190_v26, %v7190_v26 }
 0x26b   : > { %4554 = vmatpush1.bf16.msra.mxu0 %v5747_v40  ;;  %v5840_v40 = vld [vmem:[%s6957_s7 + $0x974] ss:$8 sps:$4 sm:$0xff]   ;;  %v2249_v26 = vrot.slane %v2240_v25, %v2248_v38  ;;  %v5898_v38 = vld [vmem:[%s6957_s7 + $0x9d0] ss:$8 sps:$4 sm:$0xff]  }
 0x26c   : > { %4555 = vmatprep.subr.bf16.mxu0 %v5755_v41  ;;  %v7288_v41 = vld [vmem:[%s7486_s0 + $0x48] sm:$0xff] }
 0x26d   : > { %4595 = vmatpush1.bf16.msra.mxu1 %v5750_v42  ;;  %v2245_v42 = vrot.slane %v2240_v25, %v2244_v35  ;;  %v5892_v25 = vld [vmem:[%s6957_s7 + $0x9e0] ss:$8 sps:$4 sm:$0xff]   ;;  %v5900_v35 = vld [vmem:[%s6957_s7 + $0x9d4] ss:$8 sps:$4 sm:$0xff]  }
 0x26e   : > { %4596 = vmatprep.subr.bf16.mxu1 %v5758_v43  ;;  %v5833_v43 = vld [vmem:[%s6957_s7 + $0x870] ss:$8 sps:$4 sm:$0xff]  }
 0x26f   : > { %4556 = vmatpush1.bf16.msra.mxu0 %v5753_v44  ;;  %v4986_v44 = vcombine.high %v7279_v37, %v7279_v37 }
 0x270   : > { %4557 = vmatprep.subr.bf16.mxu0 %v5761_v45  ;;  %v4983_v45 = vcombine.low %v7199_v30, %v7199_v30 }
 0x271   : > { %4597 = vmatpush1.bf16.msra.mxu1 %v5756_v46  ;;  %v5843_v46 = vld [vmem:[%s6957_s7 + $0x864] ss:$8 sps:$4 sm:$0xff]  }
 0x272   : > { %4598 = vmatprep.subr.bf16.mxu1 %v5764_v47  ;;  %v5838_v47 = vld [vmem:[%s6957_s7 + $0x970] ss:$8 sps:$4 sm:$0xff]  }
 0x273   : > { %4558 = vmatpush1.bf16.msra.mxu0 %v5759_v48  ;;  %v4988_v48 = vcombine.high %v7288_v41, %v7288_v41 }
 0x274   : > { %4559 = vmatprep.subr.bf16.mxu0 %v5767_v49 }
 0x275   : > { %4599 = vmatpush1.bf16.msra.mxu1 %v5762_v50  ;;  %v5846_v50 = vld [vmem:[%s6957_s7 + $0x964] ss:$8 sps:$4 sm:$0xff]  }
 0x276   : > { %4600 = vmatprep.subr.bf16.mxu1 %v5770_v51 }
 0x277   : > { %4560 = vmatpush1.bf16.msra.mxu0 %v5765_v52  ;;  %v5841_v52 = vld [vmem:[%s6957_s7 + $0x860] ss:$8 sps:$4 sm:$0xff]  }
 0x278   : > { %4561 = vmatprep.subr.bf16.mxu0 %v5773_v53 }
 0x279   : > { %4601 = vmatpush1.bf16.msra.mxu1 %v5768_v54  ;;  %v5849_v54 = vld [vmem:[%s6957_s7 + $0x854] ss:$8 sps:$4 sm:$0xff]  }
 0x27a   : > { %4602 = vmatprep.subr.bf16.mxu1 %v5776_v55 }
 0x27b   : > { %4562 = vmatpush1.bf16.msra.mxu0 %v5771_v56 }
 0x27c   : > { %4563 = vmatprep.subr.bf16.mxu0 %v5779_v57  ;;  %v5844_v57 = vld [vmem:[%s6957_s7 + $0x960] ss:$8 sps:$4 sm:$0xff]  }
 0x27d   : > { %4603 = vmatpush1.bf16.msra.mxu1 %v5774_v58  ;;  %v5852_v58 = vld [vmem:[%s6957_s7 + $0x954] ss:$8 sps:$4 sm:$0xff]  }
 0x27e   : > { %4604 = vmatprep.subr.bf16.mxu1 %v5782_v59 }
 0x27f   : > { %4564 = vmatpush1.bf16.msra.mxu0 %v5777_v60 }
 0x280   : > { %4565 = vmatprep.subr.bf16.mxu0 %v5785_v61 }
 0x281   : > { %4605 = vmatpush1.bf16.msra.mxu1 %v5780_v62  ;;  %v5847_v62 = vld [vmem:[%s6957_s7 + $0x850] ss:$8 sps:$4 sm:$0xff]  }
 0x282   : > { %4606 = vmatprep.subr.bf16.mxu1 %v5788_v63 }
 0x283   : > { %4566 = vmatpush2.bf16.msra.mxu0 %v5783_v0  ;;  %v5855_v0 = vld [vmem:[%s6957_s7 + $0x844] ss:$8 sps:$4 sm:$0xff]  }
 0x284   : > { %4567 = vmatprep.subr.bf16.mxu0 %v5791_v1 }
 0x285   : > { %4607 = vmatpush2.bf16.msra.mxu1 %v5786_v2  ;;  %v5850_v2 = vld [vmem:[%s6957_s7 + $0x950] ss:$8 sps:$4 sm:$0xff]  }
 0x286   : > { %4608 = vmatprep.subr.bf16.mxu1 %v5794_v3  ;;  %v5858_v3 = vld [vmem:[%s6957_s7 + $0x944] ss:$8 sps:$4 sm:$0xff]  }
 0x287   : > { %4568 = vmatpush2.bf16.msra.mxu0 %v5789_v4 }
 0x288   : > { %4569 = vmatprep.subr.bf16.mxu0 %v5797_v5  ;;  %v5853_v5 = vld [vmem:[%s6957_s7 + $0x840] ss:$8 sps:$4 sm:$0xff]  }
 0x289   : > { %4609 = vmatpush2.bf16.msra.mxu1 %v5792_v6  ;;  %v5861_v6 = vld [vmem:[%s6957_s7 + $0x834] ss:$8 sps:$4 sm:$0xff]  }
 0x28a   : > { %4610 = vmatprep.subr.bf16.mxu1 %v5800_v7  ;;  %v5856_v7 = vld [vmem:[%s6957_s7 + $0x940] ss:$8 sps:$4 sm:$0xff]  }
 0x28b   : > { %4570 = vmatpush2.bf16.msra.mxu0 %v5795_v10  ;;  %v5864_v10 = vld [vmem:[%s6957_s7 + $0x934] ss:$8 sps:$4 sm:$0xff]  }
 0x28c   : > { %4571 = vmatprep.subr.bf16.mxu0 %v5803_v11  ;;  %v5859_v11 = vld [vmem:[%s6957_s7 + $0x830] ss:$8 sps:$4 sm:$0xff]  }
 0x28d   : > { %4611 = vmatpush2.bf16.msra.mxu1 %v5798_v12  ;;  %v5867_v12 = vld [vmem:[%s6957_s7 + $0x824] ss:$8 sps:$4 sm:$0xff]  }
 0x28e   : > { %4612 = vmatprep.subr.bf16.mxu1 %v5806_v14  ;;  %v5862_v14 = vld [vmem:[%s6957_s7 + $0x930] ss:$8 sps:$4 sm:$0xff]  }
 0x28f   : > { %4572 = vmatpush2.bf16.msra.mxu0 %v5801_v15  ;;  %v5870_v15 = vld [vmem:[%s6957_s7 + $0x924] ss:$8 sps:$4 sm:$0xff]  }
 0x290   : > { %4573 = vmatprep.subr.bf16.mxu0 %v5809_v16  ;;  %v5865_v16 = vld [vmem:[%s6957_s7 + $0x820] ss:$8 sps:$4 sm:$0xff]  }
 0x291   : > { %4613 = vmatpush2.bf16.msra.mxu1 %v5804_v17  ;;  %v5873_v17 = vld [vmem:[%s6957_s7 + $0x814] ss:$8 sps:$4 sm:$0xff]  }
 0x292   : > { %4614 = vmatprep.subr.bf16.mxu1 %v5812_v18  ;;  %v5868_v18 = vld [vmem:[%s6957_s7 + $0x920] ss:$8 sps:$4 sm:$0xff]  }
 0x293   : > { %4574 = vmatpush2.bf16.msra.mxu0 %v5807_v19  ;;  %v5876_v19 = vld [vmem:[%s6957_s7 + $0x914] ss:$8 sps:$4 sm:$0xff]  }
 0x294   : > { %4575 = vmatprep.subr.bf16.mxu0 %v5815_v20  ;;  %v5871_v20 = vld [vmem:[%s6957_s7 + $0x810] ss:$8 sps:$4 sm:$0xff]  }
 0x295   : > { %4615 = vmatpush2.bf16.msra.mxu1 %v5810_v21  ;;  %v5879_v21 = vld [vmem:[%s6957_s7 + $0x804] ss:$8 sps:$4 sm:$0xff]  }
 0x296   : > { %4616 = vmatprep.subr.bf16.mxu1 %v5818_v22  ;;  %v5874_v22 = vld [vmem:[%s6957_s7 + $0x910] ss:$8 sps:$4 sm:$0xff]  }
 0x297   : > { %4576 = vmatpush2.bf16.msra.mxu0 %v5813_v8  ;;  %v5882_v8 = vld [vmem:[%s6957_s7 + $0x904] ss:$8 sps:$4 sm:$0xff]  }
 0x298   : > { %4577 = vmatprep.subr.bf16.mxu0 %v5821_v24  ;;  %v5885_v24 = vld [vmem:[%s6957_s7 + $0x8f4] ss:$8 sps:$4 sm:$0xff]  }
 0x299   : > { %4617 = vmatpush2.bf16.msra.mxu1 %v5816_v9  ;;  %v5880_v9 = vld [vmem:[%s6957_s7 + $0x900] ss:$8 sps:$4 sm:$0xff]  }
 0x29a   : > { %4618 = vmatprep.subr.bf16.mxu1 %v5824_v27  ;;  %v5888_v27 = vld [vmem:[%s6957_s7 + $0x9f4] ss:$8 sps:$4 sm:$0xff]  }
 0x29b   : > { %4578 = vmatpush2.bf16.msra.mxu0 %v5819_v13  ;;  %v5883_v13 = vld [vmem:[%s6957_s7 + $0x8f0] ss:$8 sps:$4 sm:$0xff]  }
 0x29c   : > { %4579 = vmatprep.subr.bf16.mxu0 %v5827_v31  ;;  %v5886_v31 = vld [vmem:[%s6957_s7 + $0x9f0] ss:$8 sps:$4 sm:$0xff]  }
 0x29d   : > { %4619 = vmatpush2.bf16.msra.mxu1 %v5822_v32  ;;  %v5894_v32 = vld [vmem:[%s6957_s7 + $0x9e4] ss:$8 sps:$4 sm:$0xff]  }
 0x29e   : > { %4620 = vmatprep.subr.bf16.mxu1 %v5830_v34  ;;  %v5897_v34 = vld [vmem:[%s6957_s7 + $0x8d4] ss:$8 sps:$4 sm:$0xff]  }
 0x29f   : > { %4580 = vmatpush2.bf16.msra.mxu0 %v5825_v33  ;;  %v5889_v33 = vld [vmem:[%s6957_s7 + $0x8e0] ss:$8 sps:$4 sm:$0xff]  }
 0x2a0   : > { %4631 = vmatprep.subr.bf16.mxu0 %v5835_v36  ;;  %v5895_v36 = vld [vmem:[%s6957_s7 + $0x8d0] ss:$8 sps:$4 sm:$0xff]  }
 0x2a1   : > { %4621 = vmatpush2.bf16.msra.mxu1 %v5828_v28  ;;  %v5903_v28 = vld [vmem:[%s6957_s7 + $0x8c4] ss:$8 sps:$4 sm:$0xff]  }
 0x2a2   : > { %v4337_v49 = vpop.f32.mrf.mxu0  ;;  %4582 = vmatmul.mubr.bf16.vlgmr.msra.gmra.mxu0 %v4981_v39  ;;  %4672 = vmatprep.subr.bf16.mxu1 %v5840_v40  ;;  %v5906_v39 = vld [vmem:[%s6957_s7 + $0x9c4] ss:$8 sps:$4 sm:$0xff]   ;;  %v5901_v40 = vld [vmem:[%s6957_s7 + $0x8c0] ss:$8 sps:$4 sm:$0xff]  }
 0x2a3   : > { %v4338_v51 = vadd.f32 %v4337_v49, %v2245_v42  ;;  %4632 = vmatpush1.bf16.msra.mxu0 %v5833_v43  ;;  %4663 = vmatprep.mubr.bf16.mxu0 %v4986_v44  ;;  %v5909_v42 = vld [vmem:[%s6957_s7 + $0x8b4] ss:$8 sps:$4 sm:$0xff]   ;;  %v5904_v43 = vld [vmem:[%s6957_s7 + $0x9c0] ss:$8 sps:$4 sm:$0xff]  }
 0x2a4   : > { %v4339_v53 = vpop.f32.mrf.mxu0  ;;  %v4378_v30 = vpop.f32.mrf.mxu1  ;;  %4623 = vmatmul.mubr.bf16.vlgmr.msra.gmra.mxu1 %v4983_v45  ;;  %4633 = vmatprep.subr.bf16.mxu0 %v5843_v46  ;;  %v5912_v44 = vld [vmem:[%s6957_s7 + $0x9b4] ss:$8 sps:$4 sm:$0xff]   ;;  %v5907_v45 = vld [vmem:[%s6957_s7 + $0x8b0] ss:$8 sps:$4 sm:$0xff]   ;;  %v5915_v46 = vld [vmem:[%s6957_s7 + $0x8a4] ss:$8 sps:$4 sm:$0xff]  }
 0x2a5   : > { %v4340_v55 = vadd.f32 %v4339_v53, %v2249_v26  ;;  %v7302_v56 = vadd.f32 %v4378_v30, %v4338_v51  ;;  %4673 = vmatpush1.bf16.msra.mxu1 %v5838_v47  ;;  %4704 = vmatprep.mubr.bf16.mxu1 %v4988_v48  ;;  %v5910_v26 = vld [vmem:[%s6957_s7 + $0x9b0] ss:$8 sps:$4 sm:$0xff]   ;;  %v5918_v47 = vld [vmem:[%s6957_s7 + $0x9a4] ss:$8 sps:$4 sm:$0xff]   ;;  %v5913_v48 = vld [vmem:[%s6957_s7 + $0x8a0] ss:$8 sps:$4 sm:$0xff]  }
 0x2a6   : > { %v4341_v59 = vpop.f32.mrf.mxu0  ;;  %v4380_v60 = vpop.f32.mrf.mxu1  ;;  %4674 = vmatprep.subr.bf16.mxu1 %v5846_v50  ;;  %v5921_v49 = vld [vmem:[%s6957_s7 + $0x894] ss:$8 sps:$4 sm:$0xff]   ;;  %v5916_v50 = vld [vmem:[%s6957_s7 + $0x9a0] ss:$8 sps:$4 sm:$0xff]   ;;  %v5927_v53 = vld [vmem:[%s6957_s7 + $0x884] ss:$8 sps:$4 sm:$0xff]  }
 0x2a7   : > { %v7306_v61 = vadd.f32 %v4380_v60, %v4340_v55  ;;  %4634 = vmatpush1.bf16.msra.mxu0 %v5841_v52  ;;  %v5924_v51 = vld [vmem:[%s6957_s7 + $0x994] ss:$8 sps:$4 sm:$0xff]   ;;  %v5919_v52 = vld [vmem:[%s6957_s7 + $0x890] ss:$8 sps:$4 sm:$0xff]   ;;  %v5925_v55 = vld [vmem:[%s6957_s7 + $0x880] ss:$8 sps:$4 sm:$0xff]   ;;  %v4985_v60 = vcombine.low %v7279_v37, %v7279_v37 }
 0x2a8   : > { %v4342_v63 = vpop.f32.mrf.mxu0  ;;  %4635 = vmatprep.subr.bf16.mxu0 %v5849_v54  ;;  %v4382_v1 = vpop.f32.mrf.mxu1  ;;  %v5922_v30 = vld [vmem:[%s6957_s7 + $0x990] ss:$8 sps:$4 sm:$0xff]   ;;  %v5930_v54 = vld [vmem:[%s6957_s7 + $0x984] ss:$8 sps:$4 sm:$0xff]   ;;  %v5928_v59 = vld [vmem:[%s6957_s7 + $0x980] ss:$8 sps:$4 sm:$0xff]  }
 0x2a9   : > { %4675 = vmatpush1.bf16.msra.mxu1 %v5844_v57  ;;  %v5935_v57 = vld [vmem:[%s6957_s7 + $0xa74] ss:$8 sps:$4 sm:$0xff]   ;;  %v5938_v37 = vld [vmem:[%s6957_s7 + $0xb70] ss:$8 sps:$4 sm:$0xff]  }
 0x2aa   : > { %4676 = vmatprep.subr.bf16.mxu1 %v5852_v58  ;;  %v4383_v4 = vpop.f32.mrf.mxu1  ;;  %v7365_v58 = vld [vmem:[%s7486_s0 + $0x50] sm:$0xff]  ;;  %v7374_v63 = vld [vmem:[%s7486_s0 + $0x58] sm:$0xff] }
 0x2ab   : > { %4636 = vmatpush1.bf16.msra.mxu0 %v5847_v62  ;;  %v5940_v62 = vld [vmem:[%s6957_s7 + $0xb74] ss:$8 sps:$4 sm:$0xff]   ;;  %v4990_v1 = vcombine.high %v7365_v58, %v7365_v58  ;;  %v4992_v4 = vcombine.high %v7374_v63, %v7374_v63 }
 0x2ac   : > { %4637 = vmatprep.subr.bf16.mxu0 %v5855_v0  ;;  %v5933_v0 = vld [vmem:[%s6957_s7 + $0xa70] ss:$8 sps:$4 sm:$0xff]  }
 0x2ad   : > { %4677 = vmatpush1.bf16.msra.mxu1 %v5850_v2  ;;  %v4987_v2 = vcombine.low %v7288_v41, %v7288_v41 }
 0x2ae   : > { %4678 = vmatprep.subr.bf16.mxu1 %v5858_v3  ;;  %v5943_v3 = vld [vmem:[%s6957_s7 + $0xa64] ss:$8 sps:$4 sm:$0xff]  }
 0x2af   : > { %4638 = vmatpush1.bf16.msra.mxu0 %v5853_v5 }
 0x2b0   : > { %4639 = vmatprep.subr.bf16.mxu0 %v5861_v6  ;;  %v5946_v6 = vld [vmem:[%s6957_s7 + $0xb64] ss:$8 sps:$4 sm:$0xff]  }
 0x2b1   : > { %4679 = vmatpush1.bf16.msra.mxu1 %v5856_v7 }
 0x2b2   : > { %4680 = vmatprep.subr.bf16.mxu1 %v5864_v10  ;;  %v5941_v10 = vld [vmem:[%s6957_s7 + $0xa60] ss:$8 sps:$4 sm:$0xff]  }
 0x2b3   : > { %4640 = vmatpush1.bf16.msra.mxu0 %v5859_v11 }
 0x2b4   : > { %4641 = vmatprep.subr.bf16.mxu0 %v5867_v12  ;;  %v5949_v12 = vld [vmem:[%s6957_s7 + $0xa54] ss:$8 sps:$4 sm:$0xff]  }
 0x2b5   : > { %4681 = vmatpush1.bf16.msra.mxu1 %v5862_v14 }
 0x2b6   : > { %4682 = vmatprep.subr.bf16.mxu1 %v5870_v15 }
 0x2b7   : > { %4642 = vmatpush1.bf16.msra.mxu0 %v5865_v16  ;;  %v5944_v16 = vld [vmem:[%s6957_s7 + $0xb60] ss:$8 sps:$4 sm:$0xff]  }
 0x2b8   : > { %4643 = vmatprep.subr.bf16.mxu0 %v5873_v17 }
 0x2b9   : > { %4683 = vmatpush1.bf16.msra.mxu1 %v5868_v18  ;;  %v5952_v18 = vld [vmem:[%s6957_s7 + $0xb54] ss:$8 sps:$4 sm:$0xff]  }
 0x2ba   : > { %4684 = vmatprep.subr.bf16.mxu1 %v5876_v19 }
 0x2bb   : > { %4644 = vmatpush1.bf16.msra.mxu0 %v5871_v20  ;;  %v5947_v20 = vld [vmem:[%s6957_s7 + $0xa50] ss:$8 sps:$4 sm:$0xff]  }
 0x2bc   : > { %4645 = vmatprep.subr.bf16.mxu0 %v5879_v21 }
 0x2bd   : > { %4685 = vmatpush1.bf16.msra.mxu1 %v5874_v22 }
 0x2be   : > { %4686 = vmatprep.subr.bf16.mxu1 %v5882_v8  ;;  %v5950_v8 = vld [vmem:[%s6957_s7 + $0xb50] ss:$8 sps:$4 sm:$0xff]  }
 0x2bf   : > { %4646 = vmatpush1.bf16.msra.mxu0 %v5877_v23  ;;  %v5958_v23 = vld [vmem:[%s6957_s7 + $0xb44] ss:$8 sps:$4 sm:$0xff]  }
 0x2c0   : > { %4647 = vmatprep.subr.bf16.mxu0 %v5885_v24 }
 0x2c1   : > { %4687 = vmatpush1.bf16.msra.mxu1 %v5880_v9  ;;  %v5953_v9 = vld [vmem:[%s6957_s7 + $0xa40] ss:$8 sps:$4 sm:$0xff]  }
 0x2c2   : > { %4688 = vmatprep.subr.bf16.mxu1 %v5888_v27  ;;  %v5961_v27 = vld [vmem:[%s6957_s7 + $0xa34] ss:$8 sps:$4 sm:$0xff]  }
 0x2c3   : > { %4648 = vmatpush2.bf16.msra.mxu0 %v5883_v13  ;;  %v5956_v13 = vld [vmem:[%s6957_s7 + $0xb40] ss:$8 sps:$4 sm:$0xff]  }
 0x2c4   : > { %4649 = vmatprep.subr.bf16.mxu0 %v5891_v29  ;;  %v5964_v29 = vld [vmem:[%s6957_s7 + $0xb34] ss:$8 sps:$4 sm:$0xff]  }
 0x2c5   : > { %4689 = vmatpush2.bf16.msra.mxu1 %v5886_v31  ;;  %v5959_v31 = vld [vmem:[%s6957_s7 + $0xa30] ss:$8 sps:$4 sm:$0xff]  }
 0x2c6   : > { %4690 = vmatprep.subr.bf16.mxu1 %v5894_v32  ;;  %v5967_v32 = vld [vmem:[%s6957_s7 + $0xa24] ss:$8 sps:$4 sm:$0xff]  }
 0x2c7   : > { %4650 = vmatpush2.bf16.msra.mxu0 %v5889_v33  ;;  %v5962_v33 = vld [vmem:[%s6957_s7 + $0xb30] ss:$8 sps:$4 sm:$0xff]  }
 0x2c8   : > { %4651 = vmatprep.subr.bf16.mxu0 %v5897_v34  ;;  %v5970_v34 = vld [vmem:[%s6957_s7 + $0xb24] ss:$8 sps:$4 sm:$0xff]  }
 0x2c9   : > { %4691 = vmatpush2.bf16.msra.mxu1 %v5892_v25  ;;  %v5965_v25 = vld [vmem:[%s6957_s7 + $0xa20] ss:$8 sps:$4 sm:$0xff]  }
 0x2ca   : > { %4692 = vmatprep.subr.bf16.mxu1 %v5900_v35  ;;  %v5973_v35 = vld [vmem:[%s6957_s7 + $0xa14] ss:$8 sps:$4 sm:$0xff]  }
 0x2cb   : > { %4652 = vmatpush2.bf16.msra.mxu0 %v5895_v36  ;;  %v5968_v36 = vld [vmem:[%s6957_s7 + $0xb20] ss:$8 sps:$4 sm:$0xff]  }
 0x2cc   : > { %4653 = vmatprep.subr.bf16.mxu0 %v5903_v28  ;;  %v5976_v28 = vld [vmem:[%s6957_s7 + $0xb14] ss:$8 sps:$4 sm:$0xff]  }
 0x2cd   : > { %4693 = vmatpush2.bf16.msra.mxu1 %v5898_v38  ;;  %v5971_v38 = vld [vmem:[%s6957_s7 + $0xa10] ss:$8 sps:$4 sm:$0xff]  }
 0x2ce   : > { %4694 = vmatprep.subr.bf16.mxu1 %v5906_v39  ;;  %v5979_v39 = vld [vmem:[%s6957_s7 + $0xa04] ss:$8 sps:$4 sm:$0xff]  }
 0x2cf   : > { %4654 = vmatpush2.bf16.msra.mxu0 %v5901_v40  ;;  %v5974_v40 = vld [vmem:[%s6957_s7 + $0xb10] ss:$8 sps:$4 sm:$0xff]  }
 0x2d0   : > { %4655 = vmatprep.subr.bf16.mxu0 %v5909_v42  ;;  %v5982_v42 = vld [vmem:[%s6957_s7 + $0xb04] ss:$8 sps:$4 sm:$0xff]  }
 0x2d1   : > { %4695 = vmatpush2.bf16.msra.mxu1 %v5904_v43  ;;  %v5977_v43 = vld [vmem:[%s6957_s7 + $0xa00] ss:$8 sps:$4 sm:$0xff]  }
 0x2d2   : > { %4696 = vmatprep.subr.bf16.mxu1 %v5912_v44  ;;  %v5985_v44 = vld [vmem:[%s6957_s7 + $0xaf4] ss:$8 sps:$4 sm:$0xff]  }
 0x2d3   : > { %4656 = vmatpush2.bf16.msra.mxu0 %v5907_v45  ;;  %v5980_v45 = vld [vmem:[%s6957_s7 + $0xb00] ss:$8 sps:$4 sm:$0xff]  }
 0x2d4   : > { %4657 = vmatprep.subr.bf16.mxu0 %v5915_v46  ;;  %v5988_v46 = vld [vmem:[%s6957_s7 + $0xbf4] ss:$8 sps:$4 sm:$0xff]  }
 0x2d5   : > { %4697 = vmatpush2.bf16.msra.mxu1 %v5910_v26  ;;  %v5983_v26 = vld [vmem:[%s6957_s7 + $0xaf0] ss:$8 sps:$4 sm:$0xff]  }
 0x2d6   : > { %4698 = vmatprep.subr.bf16.mxu1 %v5918_v47  ;;  %v5991_v47 = vld [vmem:[%s6957_s7 + $0xae4] ss:$8 sps:$4 sm:$0xff]  }
 0x2d7   : > { %4658 = vmatpush2.bf16.msra.mxu0 %v5913_v48  ;;  %v5986_v48 = vld [vmem:[%s6957_s7 + $0xbf0] ss:$8 sps:$4 sm:$0xff]  }
 0x2d8   : > { %4659 = vmatprep.subr.bf16.mxu0 %v5921_v49  ;;  %v5994_v49 = vld [vmem:[%s6957_s7 + $0xbe4] ss:$8 sps:$4 sm:$0xff]  }
 0x2d9   : > { %4699 = vmatpush2.bf16.msra.mxu1 %v5916_v50  ;;  %v5989_v50 = vld [vmem:[%s6957_s7 + $0xae0] ss:$8 sps:$4 sm:$0xff]  }
 0x2da   : > { %4700 = vmatprep.subr.bf16.mxu1 %v5924_v51  ;;  %v5997_v51 = vld [vmem:[%s6957_s7 + $0xad4] ss:$8 sps:$4 sm:$0xff]  }
 0x2db   : > { %4660 = vmatpush2.bf16.msra.mxu0 %v5919_v52  ;;  %v5992_v52 = vld [vmem:[%s6957_s7 + $0xbe0] ss:$8 sps:$4 sm:$0xff]  }
 0x2dc   : > { %4661 = vmatprep.subr.bf16.mxu0 %v5927_v53  ;;  %v6000_v53 = vld [vmem:[%s6957_s7 + $0xbd4] ss:$8 sps:$4 sm:$0xff]  }
 0x2dd   : > { %4701 = vmatpush2.bf16.msra.mxu1 %v5922_v30  ;;  %v5995_v30 = vld [vmem:[%s6957_s7 + $0xad0] ss:$8 sps:$4 sm:$0xff]  }
 0x2de   : > { %4702 = vmatprep.subr.bf16.mxu1 %v5930_v54  ;;  %v6003_v54 = vld [vmem:[%s6957_s7 + $0xac4] ss:$8 sps:$4 sm:$0xff]  }
 0x2df   : > { %4662 = vmatpush2.bf16.msra.mxu0 %v5925_v55  ;;  %v5998_v55 = vld [vmem:[%s6957_s7 + $0xbd0] ss:$8 sps:$4 sm:$0xff]  }
 0x2e0   : > { %4713 = vmatprep.subr.bf16.mxu0 %v5935_v57  ;;  %v6006_v57 = vld [vmem:[%s6957_s7 + $0xbc4] ss:$8 sps:$4 sm:$0xff]  }
 0x2e1   : > { %4703 = vmatpush2.bf16.msra.mxu1 %v5928_v59  ;;  %v6001_v59 = vld [vmem:[%s6957_s7 + $0xac0] ss:$8 sps:$4 sm:$0xff]  }
 0x2e2   : > { %v4419_v5 = vpop.f32.mrf.mxu0  ;;  %4664 = vmatmul.mubr.bf16.vlgmr.msra.gmra.mxu0 %v4985_v60  ;;  %4754 = vmatprep.subr.bf16.mxu1 %v5940_v62  ;;  %v6009_v60 = vld [vmem:[%s6957_s7 + $0xab4] ss:$8 sps:$4 sm:$0xff]   ;;  %v6004_v62 = vld [vmem:[%s6957_s7 + $0xbc0] ss:$8 sps:$4 sm:$0xff]  }
 0x2e3   : > { %v4420_v7 = vadd.f32 %v4419_v5, %v7302_v56  ;;  %4714 = vmatpush1.bf16.msra.mxu0 %v5933_v0  ;;  %4745 = vmatprep.mubr.bf16.mxu0 %v4990_v1  ;;  %v6012_v0 = vld [vmem:[%s6957_s7 + $0xbb4] ss:$8 sps:$4 sm:$0xff]   ;;  %v6007_v1 = vld [vmem:[%s6957_s7 + $0xab0] ss:$8 sps:$4 sm:$0xff]  }
 0x2e4   : > { %v4421_v11 = vpop.f32.mrf.mxu0  ;;  %v4460_v41 = vpop.f32.mrf.mxu1  ;;  %4705 = vmatmul.mubr.bf16.vlgmr.msra.gmra.mxu1 %v4987_v2  ;;  %4715 = vmatprep.subr.bf16.mxu0 %v5943_v3  ;;  %v6015_v2 = vld [vmem:[%s6957_s7 + $0xaa4] ss:$8 sps:$4 sm:$0xff]   ;;  %v6010_v3 = vld [vmem:[%s6957_s7 + $0xbb0] ss:$8 sps:$4 sm:$0xff]   ;;  %v6021_v5 = vld [vmem:[%s6957_s7 + $0xa94] ss:$8 sps:$4 sm:$0xff]  }
 0x2e5   : > { %v4422_v14 = vadd.f32 %v4421_v11, %v7306_v61  ;;  %v7390_v15 = vadd.f32 %v4460_v41, %v4420_v7  ;;  %4755 = vmatpush1.bf16.msra.mxu1 %v5938_v37  ;;  %4786 = vmatprep.mubr.bf16.mxu1 %v4992_v4  ;;  %v5955_v61 = vld [vmem:[%s6957_s7 + $0xa44] ss:$8 sps:$4 sm:$0xff]   ;;  %v6013_v4 = vld [vmem:[%s6957_s7 + $0xaa0] ss:$8 sps:$4 sm:$0xff]   ;;  %v6024_v7 = vld [vmem:[%s6957_s7 + $0xb94] ss:$8 sps:$4 sm:$0xff]  }
 0x2e6   : > { %v4423_v56 = vpop.f32.mrf.mxu0  ;;  %v4462_v17 = vpop.f32.mrf.mxu1  ;;  %4756 = vmatprep.subr.bf16.mxu1 %v5946_v6  ;;  %v6018_v37 = vld [vmem:[%s6957_s7 + $0xba4] ss:$8 sps:$4 sm:$0xff]   ;;  %v6016_v6 = vld [vmem:[%s6957_s7 + $0xba0] ss:$8 sps:$4 sm:$0xff]   ;;  %v6022_v41 = vld [vmem:[%s6957_s7 + $0xb90] ss:$8 sps:$4 sm:$0xff]  }
 0x2e7   : > { %v7394_v19 = vadd.f32 %v4462_v17, %v4422_v14  ;;  %4716 = vmatpush1.bf16.msra.mxu0 %v5941_v10  ;;  %v6019_v10 = vld [vmem:[%s6957_s7 + $0xa90] ss:$8 sps:$4 sm:$0xff]   ;;  %v6027_v11 = vld [vmem:[%s6957_s7 + $0xa84] ss:$8 sps:$4 sm:$0xff]   ;;  %v6025_v14 = vld [vmem:[%s6957_s7 + $0xa80] ss:$8 sps:$4 sm:$0xff]   ;;  %v4989_v17 = vcombine.low %v7365_v58, %v7365_v58 }
 0x2e8   : > { %v4424_v21 = vpop.f32.mrf.mxu0  ;;  %4717 = vmatprep.subr.bf16.mxu0 %v5949_v12  ;;  %v4464_v22 = vpop.f32.mrf.mxu1  ;;  %v6030_v12 = vld [vmem:[%s6957_s7 + $0xb84] ss:$8 sps:$4 sm:$0xff]   ;;  %v6028_v56 = vld [vmem:[%s6957_s7 + $0xb80] ss:$8 sps:$4 sm:$0xff]  }
 0x2e9   : > { %4757 = vmatpush1.bf16.msra.mxu1 %v5944_v16  ;;  %v6035_v16 = vld [vmem:[%s6957_s7 + $0xc34] ss:$8 sps:$4 sm:$0xff]   ;;  %v6040_v21 = vld [vmem:[%s6957_s7 + $0xc24] ss:$8 sps:$4 sm:$0xff]  }
 0x2ea   : > { %4758 = vmatprep.subr.bf16.mxu1 %v5952_v18  ;;  %v4465_v24 = vpop.f32.mrf.mxu1  ;;  %v6033_v18 = vld [vmem:[%s6957_s7 + $0xc30] ss:$8 sps:$4 sm:$0xff]  }
 0x2eb   : > { %4718 = vmatpush1.bf16.msra.mxu0 %v5947_v20  ;;  %v4991_v20 = vcombine.low %v7374_v63, %v7374_v63 }
 0x2ec   : > { %4719 = vmatprep.subr.bf16.mxu0 %v5955_v61 }
 0x2ed   : > { %4759 = vmatpush1.bf16.msra.mxu1 %v5950_v8  ;;  %v6038_v8 = vld [vmem:[%s6957_s7 + $0xc20] ss:$8 sps:$4 sm:$0xff]  }
 0x2ee   : > { %4760 = vmatprep.subr.bf16.mxu1 %v5958_v23  ;;  %v6088_v23 = vmov 0  }
 0x2ef   : > { %4720 = vmatpush1.bf16.msra.mxu0 %v5953_v9  ;;  %v6043_v9 = vld [vmem:[%s6957_s7 + $0xc14] ss:$8 sps:$4 sm:$0xff]  }
 0x2f0   : > { %4721 = vmatprep.subr.bf16.mxu0 %v5961_v27 }
 0x2f1   : > { %4761 = vmatpush1.bf16.msra.mxu1 %v5956_v13 }
 0x2f2   : > { %4762 = vmatprep.subr.bf16.mxu1 %v5964_v29 }
 0x2f3   : > { %4722 = vmatpush1.bf16.msra.mxu0 %v5959_v31 }
 0x2f4   : > { %4723 = vmatprep.subr.bf16.mxu0 %v5967_v32 }
 0x2f5   : > { %4763 = vmatpush1.bf16.msra.mxu1 %v5962_v33  ;;  %v6046_v33 = vld [vmem:[%s6957_s7 + $0xc04] ss:$8 sps:$4 sm:$0xff]  }
 0x2f6   : > { %4764 = vmatprep.subr.bf16.mxu1 %v5970_v34 }
 0x2f7   : > { %4724 = vmatpush1.bf16.msra.mxu0 %v5965_v25 }
 0x2f8   : > { %4725 = vmatprep.subr.bf16.mxu0 %v5973_v35  ;;  %v6044_v35 = vld [vmem:[%s6957_s7 + $0xc00] ss:$8 sps:$4 sm:$0xff]  }
 0x2f9   : > { %4765 = vmatpush1.bf16.msra.mxu1 %v5968_v36  ;;  %v6047_v36 = vld [vmem:[%s7486_s0 + $0x60] ss:$0 sps:$4 sm:$0xff]  }
 0x2fa   : > { %4766 = vmatprep.subr.bf16.mxu1 %v5976_v28 }
 0x2fb   : > { %4726 = vmatpush1.bf16.msra.mxu0 %v5971_v38 }
 0x2fc   : > { %4727 = vmatprep.subr.bf16.mxu0 %v5979_v39 }
 0x2fd   : > { %4767 = vmatpush1.bf16.msra.mxu1 %v5974_v40 }
 0x2fe   : > { %4768 = vmatprep.subr.bf16.mxu1 %v5982_v42 }
 0x2ff   : > { %4728 = vmatpush1.bf16.msra.mxu0 %v5977_v43 }
 0x300   : > { %4729 = vmatprep.subr.bf16.mxu0 %v5985_v44 }
 0x301   : > { %4769 = vmatpush1.bf16.msra.mxu1 %v5980_v45 }
 0x302   : > { %4770 = vmatprep.subr.bf16.mxu1 %v5988_v46 }
 0x303   : > { %4730 = vmatpush2.bf16.msra.mxu0 %v5983_v26 }
 0x304   : > { %4731 = vmatprep.subr.bf16.mxu0 %v5991_v47 }
 0x305   : > { %4771 = vmatpush2.bf16.msra.mxu1 %v5986_v48 }
 0x306   : > { %4772 = vmatprep.subr.bf16.mxu1 %v5994_v49 }
 0x307   : > { %4732 = vmatpush2.bf16.msra.mxu0 %v5989_v50 }
 0x308   : > { %4733 = vmatprep.subr.bf16.mxu0 %v5997_v51 }
 0x309   : > { %4773 = vmatpush2.bf16.msra.mxu1 %v5992_v52 }
 0x30a   : > { %4774 = vmatprep.subr.bf16.mxu1 %v6000_v53 }
 0x30b   : > { %4734 = vmatpush2.bf16.msra.mxu0 %v5995_v30 }
 0x30c   : > { %4735 = vmatprep.subr.bf16.mxu0 %v6003_v54 }
 0x30d   : > { %4775 = vmatpush2.bf16.msra.mxu1 %v5998_v55 }
 0x30e   : > { %4776 = vmatprep.subr.bf16.mxu1 %v6006_v57 }
 0x30f   : > { %4736 = vmatpush2.bf16.msra.mxu0 %v6001_v59 }
 0x310   : > { %4737 = vmatprep.subr.bf16.mxu0 %v6009_v60 }
 0x311   : > { %4777 = vmatpush2.bf16.msra.mxu1 %v6004_v62 }
 0x312   : > { %4778 = vmatprep.subr.bf16.mxu1 %v6012_v0 }
 0x313   : > { %4738 = vmatpush2.bf16.msra.mxu0 %v6007_v1 }
 0x314   : > { %4739 = vmatprep.subr.bf16.mxu0 %v6015_v2 }
 0x315   : > { %4779 = vmatpush2.bf16.msra.mxu1 %v6010_v3 }
 0x316   : > { %4780 = vmatprep.subr.bf16.mxu1 %v6018_v37 }
 0x317   : > { %4740 = vmatpush2.bf16.msra.mxu0 %v6013_v4 }
 0x318   : > { %4741 = vmatprep.subr.bf16.mxu0 %v6021_v5 }
 0x319   : > { %4781 = vmatpush2.bf16.msra.mxu1 %v6016_v6 }
 0x31a   : > { %4782 = vmatprep.subr.bf16.mxu1 %v6024_v7 }
 0x31b   : > { %4742 = vmatpush2.bf16.msra.mxu0 %v6019_v10 }
 0x31c   : > { %4743 = vmatprep.subr.bf16.mxu0 %v6027_v11 }
 0x31d   : > { %4783 = vmatpush2.bf16.msra.mxu1 %v6022_v41 }
 0x31e   : > { %4784 = vmatprep.subr.bf16.mxu1 %v6030_v12 }
 0x31f   : > { %4744 = vmatpush2.bf16.msra.mxu0 %v6025_v14 }
 0x320   : > { %4803 = vmatprep.subr.bf16.mxu0 %v6035_v16 }
 0x321   : > { %4785 = vmatpush2.bf16.msra.mxu1 %v6028_v56 }
 0x322   : > { %v4501_v61 = vpop.f32.mrf.mxu0  ;;  %4746 = vmatmul.mubr.bf16.vlgmr.msra.gmra.mxu0 %v4989_v17 }
 0x323   : > { %v4502_v22 = vadd.f32 %v4501_v61, %v7390_v15  ;;  %4804 = vmatpush1.bf16.msra.mxu0 %v6033_v18  ;;  %4827 = vmatprep.mubr.bf16.mxu0 %v6088_v23  ;;  %v6041_v15 = vld [vmem:[%s6957_s7 + $0xc10] ss:$8 sps:$4 sm:$0xff]   ;;  %s4968_s7 = sshll.u32 %s7497_s26, 2 }
 0x324   : > { %v4503_v58 = vpop.f32.mrf.mxu0  ;;  %v4542_v24 = vpop.f32.mrf.mxu1  ;;  %4787 = vmatmul.mubr.bf16.vlgmr.msra.gmra.mxu1 %v4991_v20  ;;  %4805 = vmatprep.subr.bf16.mxu0 %v6040_v21  ;;  %s1832_s21 = scalar_lea.vmem %s7489_s3, %s4968_s7 }
 0x325   : > { %v4504_v63 = vadd.f32 %v4503_v58, %v7394_v19  ;;  %v4543_v27 = vadd.f32 %v4542_v24, %v4502_v22 }
 0x326   : > { %v4505_v13 = vpop.f32.mrf.mxu0  ;;  %v4544_v29 = vpop.f32.mrf.mxu1 }
 0x327   : > { %v4545_v31 = vadd.f32 %v4544_v29, %v4504_v63  ;;  %4806 = vmatpush1.bf16.msra.mxu0 %v6038_v8 }
 0x328   : > { %v4506_v32 = vpop.f32.mrf.mxu0  ;;  %4807 = vmatprep.subr.bf16.mxu0 %v6043_v9  ;;  %v4546_v34 = vpop.f32.mrf.mxu1 }
 0x32a   : > { %v4547_v25 = vpop.f32.mrf.mxu1 }
 0x32b   : > { %4808 = vmatpush1.bf16.msra.mxu0 %v6041_v15 }
 0x32c   : > { %4809 = vmatprep.subr.bf16.mxu0 %v6046_v33 }
 0x32f   : > { %4810 = vmatpush1.bf16.msra.mxu0 %v6044_v35 }
 0x332   : > { %5386 = vmatmul.mubr.msk.bf16.vlgmr.msra.gmra.mxu0 %vm4299_vm0, %v6047_v36 }
 0x362   : > { %v4583_v19 = vpop.f32.mrf.mxu0 }
 0x363   : > { %v4584_v28 = vadd.f32 %v4583_v19, %v4543_v27 }
 0x364   : > { %v4585_v38 = vpop.f32.mrf.mxu0  ;;  %v4624_v39 = vpop.f32.mrf.mxu1 }
 0x365   : > { %v4586_v40 = vadd.f32 %v4585_v38, %v4545_v31  ;;  %v4625_v42 = vadd.f32 %v4624_v39, %v4584_v28 }
 0x366   : > { %v4587_v43 = vpop.f32.mrf.mxu0  ;;  %v4626_v44 = vpop.f32.mrf.mxu1 }
 0x367   : > { %v4627_v45 = vadd.f32 %v4626_v44, %v4586_v40 }
 0x368   : > { %v4588_v46 = vpop.f32.mrf.mxu0  ;;  %v4628_v26 = vpop.f32.mrf.mxu1 }
 0x36a   : > { %v4629_v47 = vpop.f32.mrf.mxu1 }
 0x3a2   : > { %v4665_v48 = vpop.f32.mrf.mxu0 }
 0x3a3   : > { %v4666_v49 = vadd.f32 %v4665_v48, %v4625_v42 }
 0x3a4   : > { %v4667_v50 = vpop.f32.mrf.mxu0  ;;  %v4706_v51 = vpop.f32.mrf.mxu1 }
 0x3a5   : > { %v4668_v52 = vadd.f32 %v4667_v50, %v4627_v45  ;;  %v4707_v53 = vadd.f32 %v4706_v51, %v4666_v49 }
 0x3a6   : > { %v4669_v30 = vpop.f32.mrf.mxu0  ;;  %v4708_v54 = vpop.f32.mrf.mxu1 }
 0x3a7   : > { %v4709_v55 = vadd.f32 %v4708_v54, %v4668_v52 }
 0x3a8   : > { %v4670_v57 = vpop.f32.mrf.mxu0  ;;  %v4710_v59 = vpop.f32.mrf.mxu1 }
 0x3aa   : > { %v4711_v60 = vpop.f32.mrf.mxu1 }
 0x3e2   : > { %v4747_v62 = vpop.f32.mrf.mxu0 }
 0x3e3   : > { %v4748_v6 = vadd.f32 %v4747_v62, %v4707_v53 }
 0x3e4   : > { %v4749_v0 = vpop.f32.mrf.mxu0  ;;  %v4788_v1 = vpop.f32.mrf.mxu1 }
 0x3e5   : > { %v4750_v7 = vadd.f32 %v4749_v0, %v4709_v55  ;;  %v4789_v10 = vadd.f32 %v4788_v1, %v4748_v6 }
 0x3e6   : > { %v4751_v2 = vpop.f32.mrf.mxu0  ;;  %v4790_v3 = vpop.f32.mrf.mxu1 }
 0x3e7   : > { %v4791_v41 = vadd.f32 %v4790_v3, %v4750_v7 }
 0x3e8   : > { %v4752_v37 = vpop.f32.mrf.mxu0  ;;  %v4792_v4 = vpop.f32.mrf.mxu1 }
 0x3ea   : > { %v4793_v5 = vpop.f32.mrf.mxu1 }
 0x3f2   : > { %v4829_v11 = vpop.f32.mrf.mxu0 }
 0x3f3   : > { %v4830_v12 = vadd.f32 %v4829_v11, %v4789_v10 }
 0x3f4   : > { %v4831_v14 = vpop.f32.mrf.mxu0 }
 0x3f5   : > { %v4832_v16 = vadd.f32 %v4831_v14, %v4791_v41  ;;  %v4836_v17 = vmax.f32 %v4830_v12, 0.0 }
 0x3f6   : > { %v4833_v56 = vpop.f32.mrf.mxu0 }
 0x3f7   : > { %v4837_v18 = vmax.f32 %v4832_v16, 0.0 }
 0x3f8   : > { %v4834_v20 = vpop.f32.mrf.mxu0 }
 0x3f9   : > { %v5391_v21 = vpack.c.bf16 %v4837_v18, %v4836_v17 }
 0x3fb   : > { %4846 = vst [vmem:[%s1832_s21] sm:$0xff] %v5391_v21 }
 0x3fc PF: > { %s13_s16 = sadd.s32 1, %s6086_s16   ;;  %s7490_s12 = smov %s6074_s13 }
 0x3fd   : > { %p10_p10 = scmp.ge.s32.totalorder %s13_s16, 6   ;;  %s7491_s13 = smov %s6144_s20 }
 0x3fe   : > { %s7492_s14 = smov %s6082_s15  ;;  %s7493_s15 = smov %s7495_s17 }
 0x3ff   :  { %12 = sbr.rel (!%p10_p10) target bundleno = 3 (0x3), region = 111 }

// kernel: forward.11
= control target key start
LH: loop header
LB: loop body
LE: loop exit
PB: predicated region body
PF: predicated region fallthrough
CT: control target
= control target key end

     0   :  { %s1194_s1 = inlined_call_operand.vmem [shape: bf16[1024,128], index: 1, kind: input, shape index: {}]   ;;  %s1195_s0 = inlined_call_operand.vmem [shape: bf16[8,1024], index: 0, kind: input, shape index: {}]   ;;  %s1196_s2 = inlined_call_operand.vmem [shape: f32[1,128], index: 2, kind: input, shape index: {}]   ;;  %s1197_s3 = inlined_call_operand.vmem [shape: f32[8,128], index: 3, kind: output, shape index: {}]  }
   0x1   :  { %v892_v0 = vld [vmem:[%s1194_s1 + $0x78] sm:$0xff]   ;;  %v896_v4 = vld [vmem:[%s1194_s1 + $0x70] sm:$0xff]   ;;  %v900_v8 = vld [vmem:[%s1194_s1 + $0x68] sm:$0xff]  }
   0x2   :  { %v893_v1 = vld [vmem:[%s1194_s1 + $0xf8] sm:$0xff]   ;;  %804 = vmatprep.subr.bf16.mxu0 %v892_v0  ;;  %v897_v5 = vld [vmem:[%s1194_s1 + $0xf0] sm:$0xff]   ;;  %v901_v9 = vld [vmem:[%s1194_s1 + $0xe8] sm:$0xff]  }
   0x3   :  { %v894_v2 = vld [vmem:[%s1194_s1 + $0x38] sm:$0xff]   ;;  %826 = vmatprep.subr.bf16.mxu1 %v893_v1  ;;  %v898_v6 = vld [vmem:[%s1194_s1 + $0x30] sm:$0xff]   ;;  %v902_v10 = vld [vmem:[%s1194_s1 + $0x28] sm:$0xff]  }
   0x4   :  { %v895_v3 = vld [vmem:[%s1194_s1 + $0xb8] sm:$0xff]   ;;  %805 = vmatpush3.bf16.msra.mxu0 %v894_v2  ;;  %v899_v7 = vld [vmem:[%s1194_s1 + $0xb0] sm:$0xff]   ;;  %v903_v11 = vld [vmem:[%s1194_s1 + $0xa8] sm:$0xff]  }
   0x5   :  { %827 = vmatpush3.bf16.msra.mxu1 %v895_v3  ;;  %806 = vmatprep.subr.bf16.mxu0 %v896_v4  ;;  %v904_v12 = vld [vmem:[%s1194_s1 + $0x60] sm:$0xff]   ;;  %v908_v16 = vld [vmem:[%s1194_s1 + $0x58] sm:$0xff]   ;;  %v912_v20 = vld [vmem:[%s1194_s1 + $0x50] sm:$0xff]  }
   0x6   :  { %828 = vmatprep.subr.bf16.mxu1 %v897_v5  ;;  %v905_v13 = vld [vmem:[%s1194_s1 + $0xe0] sm:$0xff]   ;;  %v909_v17 = vld [vmem:[%s1194_s1 + $0xd8] sm:$0xff]   ;;  %v913_v21 = vld [vmem:[%s1194_s1 + $0xd0] sm:$0xff]  }
   0x7   :  { %v906_v14 = vld [vmem:[%s1194_s1 + $0x20] sm:$0xff]   ;;  %v910_v18 = vld [vmem:[%s1194_s1 + $0x18] sm:$0xff]   ;;  %v914_v22 = vld [vmem:[%s1194_s1 + $0x10] sm:$0xff]  }
   0x8   :  { %807 = vmatpush3.bf16.msra.mxu0 %v898_v6  ;;  %v907_v15 = vld [vmem:[%s1194_s1 + $0xa0] sm:$0xff]   ;;  %v911_v19 = vld [vmem:[%s1194_s1 + $0x98] sm:$0xff]   ;;  %v915_v23 = vld [vmem:[%s1194_s1 + $0x90] sm:$0xff]  }
   0x9   :  { %829 = vmatpush3.bf16.msra.mxu1 %v899_v7  ;;  %808 = vmatprep.subr.bf16.mxu0 %v900_v8  ;;  %v916_v24 = vld [vmem:[%s1194_s1 + $0x48] sm:$0xff]   ;;  %v920_v28 = vld [vmem:[%s1194_s1 + $0x40] sm:$0xff]   ;;  %v928_v38 = vld [vmem:[%s1194_s1 + $0x178] sm:$0xff]  }
   0xa   :  { %830 = vmatprep.subr.bf16.mxu1 %v901_v9  ;;  %v917_v25 = vld [vmem:[%s1194_s1 + $0xc8] sm:$0xff]   ;;  %v921_v29 = vld [vmem:[%s1194_s1 + $0xc0] sm:$0xff]   ;;  %v929_v39 = vld [vmem:[%s1194_s1 + $0x1f8] sm:$0xff]  }
   0xb   :  { %v918_v26 = vld [vmem:[%s1194_s1 + $0x8] sm:$0xff]   ;;  %v922_v30 = vld [vmem:[%s1194_s1] sm:$0xff]   ;;  %v930_v40 = vld [vmem:[%s1194_s1 + $0x138] sm:$0xff]  }
   0xc   :  { %809 = vmatpush3.bf16.msra.mxu0 %v902_v10  ;;  %v919_v27 = vld [vmem:[%s1194_s1 + $0x88] sm:$0xff]   ;;  %v923_v31 = vld [vmem:[%s1194_s1 + $0x80] sm:$0xff]   ;;  %v931_v41 = vld [vmem:[%s1194_s1 + $0x1b8] sm:$0xff]  }
   0xd   :  { %831 = vmatpush3.bf16.msra.mxu1 %v903_v11  ;;  %810 = vmatprep.subr.bf16.mxu0 %v904_v12  ;;  %v15_v32 = vld [vmem:[%s1195_s0] sm:$0xff]  ;;  %v16_v33 = vld [vmem:[%s1195_s0 + $0x8] sm:$0xff]  ;;  %v932_v42 = vld [vmem:[%s1194_s1 + $0x170] sm:$0xff]  }
   0xe   :  { %832 = vmatprep.subr.bf16.mxu1 %v905_v13  ;;  %v732_v34 = vcombine.low %v15_v32, %v15_v32  ;;  %v733_v35 = vcombine.high %v15_v32, %v15_v32  ;;  %v734_v36 = vcombine.low %v16_v33, %v16_v33  ;;  %v735_v37 = vcombine.high %v16_v33, %v16_v33  ;;  %v933_v43 = vld [vmem:[%s1194_s1 + $0x1f0] sm:$0xff]   ;;  %v936_v46 = vld [vmem:[%s1194_s1 + $0x168] sm:$0xff]   ;;  %v940_v50 = vld [vmem:[%s1194_s1 + $0x160] sm:$0xff]  }
   0xf   :  { %v934_v44 = vld [vmem:[%s1194_s1 + $0x130] sm:$0xff]   ;;  %v937_v47 = vld [vmem:[%s1194_s1 + $0x1e8] sm:$0xff]   ;;  %v941_v51 = vld [vmem:[%s1194_s1 + $0x1e0] sm:$0xff]  }
  0x10   :  { %811 = vmatpush3.bf16.msra.mxu0 %v906_v14  ;;  %598 = vmatprep.mubr.bf16.mxu0 %v733_v35  ;;  %v935_v45 = vld [vmem:[%s1194_s1 + $0x1b0] sm:$0xff]   ;;  %v938_v48 = vld [vmem:[%s1194_s1 + $0x128] sm:$0xff]   ;;  %v942_v52 = vld [vmem:[%s1194_s1 + $0x120] sm:$0xff]  }
  0x11   :  { %833 = vmatpush3.bf16.msra.mxu1 %v907_v15  ;;  %812 = vmatprep.subr.bf16.mxu0 %v908_v16  ;;  %v939_v49 = vld [vmem:[%s1194_s1 + $0x1a8] sm:$0xff]   ;;  %v943_v53 = vld [vmem:[%s1194_s1 + $0x1a0] sm:$0xff]   ;;  %v944_v54 = vld [vmem:[%s1194_s1 + $0x158] sm:$0xff]  }
  0x12   :  { %834 = vmatprep.subr.bf16.mxu1 %v909_v17  ;;  %638 = vmatprep.mubr.bf16.mxu1 %v735_v37  ;;  %v945_v55 = vld [vmem:[%s1194_s1 + $0x1d8] sm:$0xff]   ;;  %v948_v58 = vld [vmem:[%s1194_s1 + $0x150] sm:$0xff]   ;;  %v952_v62 = vld [vmem:[%s1194_s1 + $0x148] sm:$0xff]  }
  0x13   :  { %v946_v56 = vld [vmem:[%s1194_s1 + $0x118] sm:$0xff]   ;;  %v949_v59 = vld [vmem:[%s1194_s1 + $0x1d0] sm:$0xff]   ;;  %v953_v63 = vld [vmem:[%s1194_s1 + $0x1c8] sm:$0xff]  }
  0x14   :  { %813 = vmatpush3.bf16.msra.mxu0 %v910_v18  ;;  %v947_v57 = vld [vmem:[%s1194_s1 + $0x198] sm:$0xff]   ;;  %v950_v60 = vld [vmem:[%s1194_s1 + $0x110] sm:$0xff]   ;;  %v954_v0 = vld [vmem:[%s1194_s1 + $0x108] sm:$0xff]  }
  0x15   :  { %835 = vmatpush3.bf16.msra.mxu1 %v911_v19  ;;  %814 = vmatprep.subr.bf16.mxu0 %v912_v20  ;;  %v951_v61 = vld [vmem:[%s1194_s1 + $0x190] sm:$0xff]   ;;  %v955_v1 = vld [vmem:[%s1194_s1 + $0x188] sm:$0xff]   ;;  %v956_v2 = vld [vmem:[%s1194_s1 + $0x140] sm:$0xff]  }
  0x16   :  { %836 = vmatprep.subr.bf16.mxu1 %v913_v21  ;;  %v957_v3 = vld [vmem:[%s1194_s1 + $0x1c0] sm:$0xff]   ;;  %v17_v6 = vld [vmem:[%s1195_s0 + $0x10] sm:$0xff]  ;;  %v18_v9 = vld [vmem:[%s1195_s0 + $0x18] sm:$0xff] }
  0x17   :  { %v958_v4 = vld [vmem:[%s1194_s1 + $0x100] sm:$0xff]   ;;  %v736_v7 = vcombine.low %v17_v6, %v17_v6  ;;  %v737_v8 = vcombine.high %v17_v6, %v17_v6  ;;  %v738_v10 = vcombine.low %v18_v9, %v18_v9  ;;  %v739_v11 = vcombine.high %v18_v9, %v18_v9 }
  0x18   :  { %815 = vmatpush3.bf16.msra.mxu0 %v914_v22  ;;  %v959_v5 = vld [vmem:[%s1194_s1 + $0x180] sm:$0xff]  }
  0x19   :  { %837 = vmatpush3.bf16.msra.mxu1 %v915_v23  ;;  %816 = vmatprep.subr.bf16.mxu0 %v916_v24  ;;  %v731_v21 = vld [vmem:[%s1196_s2] ss:$0 sm:$0xff] }
  0x1a   :  { %838 = vmatprep.subr.bf16.mxu1 %v917_v25 }
  0x1c   :  { %817 = vmatpush3.bf16.msra.mxu0 %v918_v26 }
  0x1d   :  { %839 = vmatpush3.bf16.msra.mxu1 %v919_v27  ;;  %818 = vmatprep.subr.bf16.mxu0 %v920_v28 }
  0x1e   :  { %840 = vmatprep.subr.bf16.mxu1 %v921_v29 }
  0x20   :  { %819 = vmatpush3.bf16.msra.mxu0 %v922_v30 }
  0x21   :  { %841 = vmatpush3.bf16.msra.mxu1 %v923_v31  ;;  %848 = vmatprep.subr.bf16.mxu0 %v928_v38 }
  0x22   :  { %870 = vmatprep.subr.bf16.mxu1 %v929_v39 }
  0x23   :  { %599 = vmatmul.mubr.bf16.vlgmr.msra.gmra.mxu0 %v732_v34 }
  0x24   :  { %639 = vmatmul.mubr.bf16.vlgmr.msra.gmra.mxu1 %v734_v36  ;;  %849 = vmatpush3.bf16.msra.mxu0 %v930_v40 }
  0x25   :  { %871 = vmatpush3.bf16.msra.mxu1 %v931_v41  ;;  %850 = vmatprep.subr.bf16.mxu0 %v932_v42 }
  0x26   :  { %872 = vmatprep.subr.bf16.mxu1 %v933_v43  ;;  %678 = vmatprep.mubr.bf16.mxu0 %v737_v8 }
  0x27   :  { %718 = vmatprep.mubr.bf16.mxu1 %v739_v11 }
  0x28   :  { %851 = vmatpush3.bf16.msra.mxu0 %v934_v44 }
  0x29   :  { %873 = vmatpush3.bf16.msra.mxu1 %v935_v45  ;;  %852 = vmatprep.subr.bf16.mxu0 %v936_v46 }
  0x2a   :  { %874 = vmatprep.subr.bf16.mxu1 %v937_v47 }
  0x2c   :  { %853 = vmatpush3.bf16.msra.mxu0 %v938_v48 }
  0x2d   :  { %875 = vmatpush3.bf16.msra.mxu1 %v939_v49  ;;  %854 = vmatprep.subr.bf16.mxu0 %v940_v50 }
  0x2e   :  { %876 = vmatprep.subr.bf16.mxu1 %v941_v51 }
  0x30   :  { %855 = vmatpush3.bf16.msra.mxu0 %v942_v52 }
  0x31   :  { %877 = vmatpush3.bf16.msra.mxu1 %v943_v53  ;;  %856 = vmatprep.subr.bf16.mxu0 %v944_v54 }
  0x32   :  { %878 = vmatprep.subr.bf16.mxu1 %v945_v55 }
  0x34   :  { %857 = vmatpush3.bf16.msra.mxu0 %v946_v56 }
  0x35   :  { %879 = vmatpush3.bf16.msra.mxu1 %v947_v57  ;;  %858 = vmatprep.subr.bf16.mxu0 %v948_v58 }
  0x36   :  { %880 = vmatprep.subr.bf16.mxu1 %v949_v59 }
  0x38   :  { %859 = vmatpush3.bf16.msra.mxu0 %v950_v60 }
  0x39   :  { %881 = vmatpush3.bf16.msra.mxu1 %v951_v61  ;;  %860 = vmatprep.subr.bf16.mxu0 %v952_v62 }
  0x3a   :  { %882 = vmatprep.subr.bf16.mxu1 %v953_v63 }
  0x3c   :  { %861 = vmatpush3.bf16.msra.mxu0 %v954_v0 }
  0x3d   :  { %883 = vmatpush3.bf16.msra.mxu1 %v955_v1  ;;  %862 = vmatprep.subr.bf16.mxu0 %v956_v2 }
  0x3e   :  { %884 = vmatprep.subr.bf16.mxu1 %v957_v3 }
  0x40   :  { %863 = vmatpush3.bf16.msra.mxu0 %v958_v4 }
  0x41   :  { %885 = vmatpush3.bf16.msra.mxu1 %v959_v5 }
  0x43   :  { %679 = vmatmul.mubr.bf16.vlgmr.msra.gmra.mxu0 %v736_v7 }
  0x44   :  { %719 = vmatmul.mubr.bf16.vlgmr.msra.gmra.mxu1 %v738_v10 }
  0xe3   :  { %v820_v12 = vpop.f32.mrf.mxu0 }
  0xe4   :  { %v842_v13 = vpop.f32.mrf.mxu1 }
  0xe5   :  { %v821_v14 = vpop.f32.mrf.mxu0 }
  0xe6   :  { %v843_v15 = vpop.f32.mrf.mxu1  ;;  %v822_v20 = vadd.f32 %v821_v14, %v820_v12 }
  0xe7   :  { %v823_v16 = vpop.f32.mrf.mxu0  ;;  %v844_v23 = vadd.f32 %v843_v15, %v842_v13 }
  0xe8   :  { %v845_v17 = vpop.f32.mrf.mxu1  ;;  %v601_v22 = vadd.f32 %v822_v20, %v731_v21 }
  0xe9   :  { %v824_v18 = vpop.f32.mrf.mxu0 }
  0xea   :  { %v846_v19 = vpop.f32.mrf.mxu1  ;;  %v641_v28 = vadd.f32 %v844_v23, %v601_v22 }
 0x103   :  { %v864_v24 = vpop.f32.mrf.mxu0 }
 0x104   :  { %v886_v25 = vpop.f32.mrf.mxu1 }
 0x105   :  { %v865_v26 = vpop.f32.mrf.mxu0 }
 0x106   :  { %v887_v27 = vpop.f32.mrf.mxu1  ;;  %v866_v29 = vadd.f32 %v865_v26, %v864_v24 }
 0x107   :  { %v867_v30 = vpop.f32.mrf.mxu0  ;;  %v888_v33 = vadd.f32 %v887_v27, %v886_v25 }
 0x108   :  { %v889_v31 = vpop.f32.mrf.mxu1  ;;  %v681_v32 = vadd.f32 %v866_v29, %v641_v28 }
 0x109   :  { %v868_v34 = vpop.f32.mrf.mxu0 }
 0x10a   :  { %v890_v35 = vpop.f32.mrf.mxu1  ;;  %v721_v36 = vadd.f32 %v888_v33, %v681_v32 }
 0x10c   :  { %726 = vst [vmem:[%s1197_s3] sm:$0xff] %v721_v36 }

</bundles_post_ra>
